<compile_context>
chip_gen: v7x
topology: tpu7x:2x2x1
jax: 0.10.0
libtpu: 0.0.40
codegen_flags: <defaults>
</compile_context>

<pallas_src>
import itertools

import numpy as np
import jax
import jax.numpy as jnp
from jax.experimental import pallas as pl
from jax.experimental.pallas import tpu as pltpu

EPS = 1e-5  # BatchNorm3d default eps


def _make_resnet_block_kernel(C, NM, tap_offsets, center_idx):
    """Fused conv->BN->ReLU x2 + residual kernel for fixed (static) problem dimensions."""
    inv_nm = 1.0 / NM

    def kernel(x_ref, mask_ref, wt1_ref, g1_ref, be1_ref,
               wt2_ref, g2_ref, be2_ref, o_ref):
        # x_ref      : (C, N*M)      activation, channels on sublanes, flat spatial on lanes
        # mask_ref   : (K^3, N*M)    host-precomputed {0,1} boundary masks, one row per tap
        # wt*_ref    : (K^3*C, C)    per-conv weights, tap-major row blocks (W_t = rows t*C:(t+1)*C)
        # g*/be*_ref : (C, 1)        BN gamma / beta
        # o_ref      : (C, N*M)      block output

        x0 = x_ref[...]
        # Ones column so BN sums / sum-of-squares ride the (otherwise idle) MXU.
        ones_col = jnp.ones((NM, 1), jnp.float32)

        def conv_bn_relu(h, wt_ref, g_ref, be_ref):
            # Center tap (0,0,0): always valid -> no roll, no mask.
            conv = jnp.dot(wt_ref[center_idx * C:(center_idx + 1) * C, :], h,
                           preferred_element_type=jnp.float32)
            for t, off in enumerate(tap_offsets):
                if t == center_idx:
                    continue
                # Circular shift along the flat spatial axis; wrapped lanes are exactly the
                # positions the boundary mask zeroes, so semantics match 'same' padding.
                shifted = pltpu.roll(h, shift=(-off) % NM, axis=1)
                masked = shifted * mask_ref[t:t + 1, :]              # (C,NM) * (1,NM)
                conv = conv + jnp.dot(wt_ref[t * C:(t + 1) * C, :], masked,
                                      preferred_element_type=jnp.float32)
            # Conv bias intentionally omitted: it cancels exactly under training-mode BatchNorm.

            # BatchNorm (training-mode batch stats, biased variance); reductions on the MXU.
            s1 = jnp.dot(conv, ones_col, preferred_element_type=jnp.float32)         # (C,1)
            s2 = jnp.dot(conv * conv, ones_col, preferred_element_type=jnp.float32)  # (C,1)
            mean = s1 * inv_nm
            var = s2 * inv_nm - mean * mean
            xhat = (conv - mean) * jax.lax.rsqrt(var + EPS)
            return jnp.maximum(xhat * g_ref[...] + be_ref[...], 0.0)

        h1 = conv_bn_relu(x0, wt1_ref, g1_ref, be1_ref)
        h2 = conv_bn_relu(h1, wt2_ref, g2_ref, be2_ref)
        o_ref[...] = h2 + x0                                         # residual add

    return kernel


def resnet_block_forward(x_ncdhw, params):
    """Forward pass of resnet_block (stride=1, 'same' padding) via one fused Pallas call."""
    N, C, D, H, W = x_ncdhw.shape
    K = params["w1"].shape[-1]
    r = K // 2
    M = D * H * W
    NM = N * M

    taps = list(itertools.product(range(-r, r + 1), repeat=3))
    center_idx = taps.index((0, 0, 0))
    tap_offsets = [(dz * H + dy) * W + dx for (dz, dy, dx) in taps]

    # Host-precomputed boundary masks (trace-time constants): mask[t, i] == 1 iff flat position i
    # shifted by tap t stays inside the same sample's spatial volume.
    m = np.arange(NM, dtype=np.int64) % M
    zc, yc, xc = m // (H * W), (m // W) % H, m % W
    masks = np.empty((len(taps), NM), np.float32)
    for t, (dz, dy, dx) in enumerate(taps):
        masks[t] = ((zc + dz >= 0) & (zc + dz < D) &
                    (yc + dy >= 0) & (yc + dy < H) &
                    (xc + dx >= 0) & (xc + dx < W)).astype(np.float32)

    # Internal layout: channels on sublanes, flattened (N*D*H*W) on lanes (lane-dense).
    xt = jnp.transpose(x_ncdhw, (1, 0, 2, 3, 4)).reshape(C, NM).astype(jnp.float32)

    def prep_w(w):  # (Co, Ci, Kd, Kh, Kw) -> (K^3*Co, Ci), tap-major row blocks
        co, ci = w.shape[0], w.shape[1]
        return jnp.transpose(w, (2, 3, 4, 0, 1)).reshape(K * K * K * co, ci).astype(jnp.float32)

    def prep_v(v):
        return v.reshape(C, 1).astype(jnp.float32)

    kernel = _make_resnet_block_kernel(C, NM, tap_offsets, center_idx)

    # Single grid step: the whole working set (~1 MiB) lives in VMEM on one TensorCore.
    # TODO(synk): if scaled to realistic C / spatial sizes (esp. v7x's 64 MiB VMEM), add a grid
    # over the flat spatial axis with partial-sum (two-pass) BatchNorm instead of this design.
    vmem = pltpu.MemorySpace.VMEM
    out = pl.pallas_call(
        kernel,
        out_shape=jax.ShapeDtypeStruct((C, NM), jnp.float32),
        in_specs=[pl.BlockSpec(memory_space=vmem)] * 8,
        out_specs=pl.BlockSpec(memory_space=vmem),
    )(xt, jnp.asarray(masks),
      prep_w(params["w1"]), prep_v(params["g1"]), prep_v(params["be1"]),
      prep_w(params["w2"]), prep_v(params["g2"]), prep_v(params["be2"]))

    return jnp.transpose(out.reshape(C, N, D, H, W), (1, 0, 2, 3, 4))   # back to NCDHW


# --------------------------------------------------------------------------------------
# Pure-JAX reference for numerical verification (same training-mode BN semantics,
# faithful to PyTorch: conv biases included — they cancel inside BatchNorm).
# --------------------------------------------------------------------------------------
def reference_forward(x, params):
    r = params["w1"].shape[-1] // 2

    def block(h, w, b, g, be):
        y = jax.lax.conv_general_dilated(
            h, w, window_strides=(1, 1, 1),
            padding=((r, r), (r, r), (r, r)),
            dimension_numbers=("NCDHW", "OIDHW", "NCDHW"))
        y = y + b.reshape(1, -1, 1, 1, 1)
        mean = jnp.mean(y, axis=(0, 2, 3, 4), keepdims=True)
        var = jnp.mean((y - mean) ** 2, axis=(0, 2, 3, 4), keepdims=True)
        yhat = (y - mean) * jax.lax.rsqrt(var + EPS)
        return jnp.maximum(yhat * g.reshape(1, -1, 1, 1, 1) + be.reshape(1, -1, 1, 1, 1), 0.0)

    h = block(x, params["w1"], params["b1"], params["g1"], params["be1"])
    h = block(h, params["w2"], params["b2"], params["g2"], params["be2"])
    return h + x


if __name__ == "__main__":
    # resnet_block(channels=8, kernel_size=3, stride=1, padding=1) on x: (2, 8, 8, 8, 8) NCDHW
    N, C, D, H, W = 2, 8, 8, 8, 8
    K = 3
    key = jax.random.PRNGKey(0)
    k_x, k_w1, k_b1, k_w2, k_b2 = jax.random.split(key, 5)

    x = jax.random.normal(k_x, (N, C, D, H, W), jnp.float32)

    # Deterministic parameter init (PyTorch Conv3d weight layout: (Cout, Cin, K, K, K)).
    fan_in = C * K * K * K
    bound = 1.0 / (fan_in ** 0.5)
    params = {
        "w1": jax.random.uniform(k_w1, (C, C, K, K, K), jnp.float32, -bound, bound),
        "b1": jax.random.uniform(k_b1, (C,), jnp.float32, -bound, bound),
        "g1": jnp.ones((C,), jnp.float32),    # BatchNorm3d default init
        "be1": jnp.zeros((C,), jnp.float32),
        "w2": jax.random.uniform(k_w2, (C, C, K, K, K), jnp.float32, -bound, bound),
        "b2": jax.random.uniform(k_b2, (C,), jnp.float32, -bound, bound),
        "g2": jnp.ones((C,), jnp.float32),
        "be2": jnp.zeros((C,), jnp.float32),
    }
    # TODO(synk): BatchNorm running_mean/running_var tracking (stateful buffers) is not reproduced;
    # forward math uses batch statistics, matching a freshly constructed nn.Module in .train().

    out = jax.block_until_ready(jax.jit(resnet_block_forward)(x, params))
    ref = reference_forward(x, params)

    assert out.shape == (N, C, D, H, W)
    if not jnp.allclose(out, ref, atol=2e-3, rtol=2e-3):
        raise AssertionError(
            f"mismatch vs reference, max abs err = {float(jnp.max(jnp.abs(out - ref)))}")
    print("KERNEL_OK")
</pallas_src>

<mosaic_0001>
module attributes {stable_mosaic.version = 11 : i64} {
  func.func @kernel(%arg0: memref<8x1024xf32, #tpu.memory_space<vmem>>, %arg1: memref<27x1024xf32, #tpu.memory_space<vmem>>, %arg2: memref<216x8xf32, #tpu.memory_space<vmem>>, %arg3: memref<8x1xf32, #tpu.memory_space<vmem>>, %arg4: memref<8x1xf32, #tpu.memory_space<vmem>>, %arg5: memref<216x8xf32, #tpu.memory_space<vmem>>, %arg6: memref<8x1xf32, #tpu.memory_space<vmem>>, %arg7: memref<8x1xf32, #tpu.memory_space<vmem>>, %arg8: memref<8x1024xf32, #tpu.memory_space<vmem>>) attributes {dimension_semantics = [], scalar_prefetch = 0 : i64, scratch_operands = 0 : i64, tpu.core_type = #tpu.core_type<tc>} {
    %c0 = arith.constant 0 : index
    %c0_0 = arith.constant 0 : index
    %0 = vector.load %arg0[%c0, %c0_0] : memref<8x1024xf32, #tpu.memory_space<vmem>>, vector<8x1024xf32>
    %cst = arith.constant 1.000000e+00 : f32
    %1 = vector.broadcast %cst : f32 to vector<1024x1xf32>
    %c104 = arith.constant 104 : index
    %c0_1 = arith.constant 0 : index
    %2 = vector.load %arg2[%c104, %c0_1] : memref<216x8xf32, #tpu.memory_space<vmem>>, vector<8x8xf32>
    %cst_2 = arith.constant dense<0.000000e+00> : vector<8x1024xf32>
    %3 = tpu.matmul %2, %0, %cst_2 {dimension_numbers = #tpu.dot_dimension_numbers<[1], [0], [0], [1], [0, 0, 1, 1], [], []>} : vector<8x8xf32>, vector<8x1024xf32>, vector<8x1024xf32> -> vector<8x1024xf32>
    %c73_i32 = arith.constant 73 : i32
    %4 = tpu.dynamic_rotate %0 by %c73_i32 dim 1 : vector<8x1024xf32>, i32 -> vector<8x1024xf32>
    %c0_3 = arith.constant 0 : index
    %c0_4 = arith.constant 0 : index
    %5 = vector.load %arg1[%c0_3, %c0_4] : memref<27x1024xf32, #tpu.memory_space<vmem>>, vector<1x1024xf32>
    %6 = vector.broadcast %5 : vector<1x1024xf32> to vector<8x1024xf32>
    %7 = arith.mulf %4, %6 : vector<8x1024xf32>
    %c0_5 = arith.constant 0 : index
    %c0_6 = arith.constant 0 : index
    %8 = vector.load %arg2[%c0_5, %c0_6] : memref<216x8xf32, #tpu.memory_space<vmem>>, vector<8x8xf32>
    %cst_7 = arith.constant dense<0.000000e+00> : vector<8x1024xf32>
    %9 = tpu.matmul %8, %7, %cst_7 {dimension_numbers = #tpu.dot_dimension_numbers<[1], [0], [0], [1], [0, 0, 1, 1], [], []>} : vector<8x8xf32>, vector<8x1024xf32>, vector<8x1024xf32> -> vector<8x1024xf32>
    %10 = arith.addf %3, %9 : vector<8x1024xf32>
    %c72_i32 = arith.constant 72 : i32
    %11 = tpu.dynamic_rotate %0 by %c72_i32 dim 1 : vector<8x1024xf32>, i32 -> vector<8x1024xf32>
    %c1 = arith.constant 1 : index
    %c0_8 = arith.constant 0 : index
    %12 = vector.load %arg1[%c1, %c0_8] : memref<27x1024xf32, #tpu.memory_space<vmem>>, vector<1x1024xf32>
    %13 = vector.broadcast %12 : vector<1x1024xf32> to vector<8x1024xf32>
    %14 = arith.mulf %11, %13 : vector<8x1024xf32>
    %c8 = arith.constant 8 : index
    %c0_9 = arith.constant 0 : index
    %15 = vector.load %arg2[%c8, %c0_9] : memref<216x8xf32, #tpu.memory_space<vmem>>, vector<8x8xf32>
    %cst_10 = arith.constant dense<0.000000e+00> : vector<8x1024xf32>
    %16 = tpu.matmul %15, %14, %cst_10 {dimension_numbers = #tpu.dot_dimension_numbers<[1], [0], [0], [1], [0, 0, 1, 1], [], []>} : vector<8x8xf32>, vector<8x1024xf32>, vector<8x1024xf32> -> vector<8x1024xf32>
    %17 = arith.addf %10, %16 : vector<8x1024xf32>
    %c71_i32 = arith.constant 71 : i32
    %18 = tpu.dynamic_rotate %0 by %c71_i32 dim 1 : vector<8x1024xf32>, i32 -> vector<8x1024xf32>
    %c2 = arith.constant 2 : index
    %c0_11 = arith.constant 0 : index
    %19 = vector.load %arg1[%c2, %c0_11] : memref<27x1024xf32, #tpu.memory_space<vmem>>, vector<1x1024xf32>
    %20 = vector.broadcast %19 : vector<1x1024xf32> to vector<8x1024xf32>
    %21 = arith.mulf %18, %20 : vector<8x1024xf32>
    %c16 = arith.constant 16 : index
    %c0_12 = arith.constant 0 : index
    %22 = vector.load %arg2[%c16, %c0_12] : memref<216x8xf32, #tpu.memory_space<vmem>>, vector<8x8xf32>
    %cst_13 = arith.constant dense<0.000000e+00> : vector<8x1024xf32>
    %23 = tpu.matmul %22, %21, %cst_13 {dimension_numbers = #tpu.dot_dimension_numbers<[1], [0], [0], [1], [0, 0, 1, 1], [], []>} : vector<8x8xf32>, vector<8x1024xf32>, vector<8x1024xf32> -> vector<8x1024xf32>
    %24 = arith.addf %17, %23 : vector<8x1024xf32>
    %c65_i32 = arith.constant 65 : i32
    %25 = tpu.dynamic_rotate %0 by %c65_i32 dim 1 : vector<8x1024xf32>, i32 -> vector<8x1024xf32>
    %c3 = arith.constant 3 : index
    %c0_14 = arith.constant 0 : index
    %26 = vector.load %arg1[%c3, %c0_14] : memref<27x1024xf32, #tpu.memory_space<vmem>>, vector<1x1024xf32>
    %27 = vector.broadcast %26 : vector<1x1024xf32> to vector<8x1024xf32>
    %28 = arith.mulf %25, %27 : vector<8x1024xf32>
    %c24 = arith.constant 24 : index
    %c0_15 = arith.constant 0 : index
    %29 = vector.load %arg2[%c24, %c0_15] : memref<216x8xf32, #tpu.memory_space<vmem>>, vector<8x8xf32>
    %cst_16 = arith.constant dense<0.000000e+00> : vector<8x1024xf32>
    %30 = tpu.matmul %29, %28, %cst_16 {dimension_numbers = #tpu.dot_dimension_numbers<[1], [0], [0], [1], [0, 0, 1, 1], [], []>} : vector<8x8xf32>, vector<8x1024xf32>, vector<8x1024xf32> -> vector<8x1024xf32>
    %31 = arith.addf %24, %30 : vector<8x1024xf32>
    %c64_i32 = arith.constant 64 : i32
    %32 = tpu.dynamic_rotate %0 by %c64_i32 dim 1 : vector<8x1024xf32>, i32 -> vector<8x1024xf32>
    %c4 = arith.constant 4 : index
    %c0_17 = arith.constant 0 : index
    %33 = vector.load %arg1[%c4, %c0_17] : memref<27x1024xf32, #tpu.memory_space<vmem>>, vector<1x1024xf32>
    %34 = vector.broadcast %33 : vector<1x1024xf32> to vector<8x1024xf32>
    %35 = arith.mulf %32, %34 : vector<8x1024xf32>
    %c32 = arith.constant 32 : index
    %c0_18 = arith.constant 0 : index
    %36 = vector.load %arg2[%c32, %c0_18] : memref<216x8xf32, #tpu.memory_space<vmem>>, vector<8x8xf32>
    %cst_19 = arith.constant dense<0.000000e+00> : vector<8x1024xf32>
    %37 = tpu.matmul %36, %35, %cst_19 {dimension_numbers = #tpu.dot_dimension_numbers<[1], [0], [0], [1], [0, 0, 1, 1], [], []>} : vector<8x8xf32>, vector<8x1024xf32>, vector<8x1024xf32> -> vector<8x1024xf32>
    %38 = arith.addf %31, %37 : vector<8x1024xf32>
    %c63_i32 = arith.constant 63 : i32
    %39 = tpu.dynamic_rotate %0 by %c63_i32 dim 1 : vector<8x1024xf32>, i32 -> vector<8x1024xf32>
    %c5 = arith.constant 5 : index
    %c0_20 = arith.constant 0 : index
    %40 = vector.load %arg1[%c5, %c0_20] : memref<27x1024xf32, #tpu.memory_space<vmem>>, vector<1x1024xf32>
    %41 = vector.broadcast %40 : vector<1x1024xf32> to vector<8x1024xf32>
    %42 = arith.mulf %39, %41 : vector<8x1024xf32>
    %c40 = arith.constant 40 : index
    %c0_21 = arith.constant 0 : index
    %43 = vector.load %arg2[%c40, %c0_21] : memref<216x8xf32, #tpu.memory_space<vmem>>, vector<8x8xf32>
    %cst_22 = arith.constant dense<0.000000e+00> : vector<8x1024xf32>
    %44 = tpu.matmul %43, %42, %cst_22 {dimension_numbers = #tpu.dot_dimension_numbers<[1], [0], [0], [1], [0, 0, 1, 1], [], []>} : vector<8x8xf32>, vector<8x1024xf32>, vector<8x1024xf32> -> vector<8x1024xf32>
    %45 = arith.addf %38, %44 : vector<8x1024xf32>
    %c57_i32 = arith.constant 57 : i32
    %46 = tpu.dynamic_rotate %0 by %c57_i32 dim 1 : vector<8x1024xf32>, i32 -> vector<8x1024xf32>
    %c6 = arith.constant 6 : index
    %c0_23 = arith.constant 0 : index
    %47 = vector.load %arg1[%c6, %c0_23] : memref<27x1024xf32, #tpu.memory_space<vmem>>, vector<1x1024xf32>
    %48 = vector.broadcast %47 : vector<1x1024xf32> to vector<8x1024xf32>
    %49 = arith.mulf %46, %48 : vector<8x1024xf32>
    %c48 = arith.constant 48 : index
    %c0_24 = arith.constant 0 : index
    %50 = vector.load %arg2[%c48, %c0_24] : memref<216x8xf32, #tpu.memory_space<vmem>>, vector<8x8xf32>
    %cst_25 = arith.constant dense<0.000000e+00> : vector<8x1024xf32>
    %51 = tpu.matmul %50, %49, %cst_25 {dimension_numbers = #tpu.dot_dimension_numbers<[1], [0], [0], [1], [0, 0, 1, 1], [], []>} : vector<8x8xf32>, vector<8x1024xf32>, vector<8x1024xf32> -> vector<8x1024xf32>
    %52 = arith.addf %45, %51 : vector<8x1024xf32>
    %c56_i32 = arith.constant 56 : i32
    %53 = tpu.dynamic_rotate %0 by %c56_i32 dim 1 : vector<8x1024xf32>, i32 -> vector<8x1024xf32>
    %c7 = arith.constant 7 : index
    %c0_26 = arith.constant 0 : index
    %54 = vector.load %arg1[%c7, %c0_26] : memref<27x1024xf32, #tpu.memory_space<vmem>>, vector<1x1024xf32>
    %55 = vector.broadcast %54 : vector<1x1024xf32> to vector<8x1024xf32>
    %56 = arith.mulf %53, %55 : vector<8x1024xf32>
    %c56 = arith.constant 56 : index
    %c0_27 = arith.constant 0 : index
    %57 = vector.load %arg2[%c56, %c0_27] : memref<216x8xf32, #tpu.memory_space<vmem>>, vector<8x8xf32>
    %cst_28 = arith.constant dense<0.000000e+00> : vector<8x1024xf32>
    %58 = tpu.matmul %57, %56, %cst_28 {dimension_numbers = #tpu.dot_dimension_numbers<[1], [0], [0], [1], [0, 0, 1, 1], [], []>} : vector<8x8xf32>, vector<8x1024xf32>, vector<8x1024xf32> -> vector<8x1024xf32>
    %59 = arith.addf %52, %58 : vector<8x1024xf32>
    %c55_i32 = arith.constant 55 : i32
    %60 = tpu.dynamic_rotate %0 by %c55_i32 dim 1 : vector<8x1024xf32>, i32 -> vector<8x1024xf32>
    %c8_29 = arith.constant 8 : index
    %c0_30 = arith.constant 0 : index
    %61 = vector.load %arg1[%c8_29, %c0_30] : memref<27x1024xf32, #tpu.memory_space<vmem>>, vector<1x1024xf32>
    %62 = vector.broadcast %61 : vector<1x1024xf32> to vector<8x1024xf32>
    %63 = arith.mulf %60, %62 : vector<8x1024xf32>
    %c64 = arith.constant 64 : index
    %c0_31 = arith.constant 0 : index
    %64 = vector.load %arg2[%c64, %c0_31] : memref<216x8xf32, #tpu.memory_space<vmem>>, vector<8x8xf32>
    %cst_32 = arith.constant dense<0.000000e+00> : vector<8x1024xf32>
    %65 = tpu.matmul %64, %63, %cst_32 {dimension_numbers = #tpu.dot_dimension_numbers<[1], [0], [0], [1], [0, 0, 1, 1], [], []>} : vector<8x8xf32>, vector<8x1024xf32>, vector<8x1024xf32> -> vector<8x1024xf32>
    %66 = arith.addf %59, %65 : vector<8x1024xf32>
    %c9_i32 = arith.constant 9 : i32
    %67 = tpu.dynamic_rotate %0 by %c9_i32 dim 1 : vector<8x1024xf32>, i32 -> vector<8x1024xf32>
    %c9 = arith.constant 9 : index
    %c0_33 = arith.constant 0 : index
    %68 = vector.load %arg1[%c9, %c0_33] : memref<27x1024xf32, #tpu.memory_space<vmem>>, vector<1x1024xf32>
    %69 = vector.broadcast %68 : vector<1x1024xf32> to vector<8x1024xf32>
    %70 = arith.mulf %67, %69 : vector<8x1024xf32>
    %c72 = arith.constant 72 : index
    %c0_34 = arith.constant 0 : index
    %71 = vector.load %arg2[%c72, %c0_34] : memref<216x8xf32, #tpu.memory_space<vmem>>, vector<8x8xf32>
    %cst_35 = arith.constant dense<0.000000e+00> : vector<8x1024xf32>
    %72 = tpu.matmul %71, %70, %cst_35 {dimension_numbers = #tpu.dot_dimension_numbers<[1], [0], [0], [1], [0, 0, 1, 1], [], []>} : vector<8x8xf32>, vector<8x1024xf32>, vector<8x1024xf32> -> vector<8x1024xf32>
    %73 = arith.addf %66, %72 : vector<8x1024xf32>
    %c8_i32 = arith.constant 8 : i32
    %74 = tpu.dynamic_rotate %0 by %c8_i32 dim 1 : vector<8x1024xf32>, i32 -> vector<8x1024xf32>
    %c10 = arith.constant 10 : index
    %c0_36 = arith.constant 0 : index
    %75 = vector.load %arg1[%c10, %c0_36] : memref<27x1024xf32, #tpu.memory_space<vmem>>, vector<1x1024xf32>
    %76 = vector.broadcast %75 : vector<1x1024xf32> to vector<8x1024xf32>
    %77 = arith.mulf %74, %76 : vector<8x1024xf32>
    %c80 = arith.constant 80 : index
    %c0_37 = arith.constant 0 : index
    %78 = vector.load %arg2[%c80, %c0_37] : memref<216x8xf32, #tpu.memory_space<vmem>>, vector<8x8xf32>
    %cst_38 = arith.constant dense<0.000000e+00> : vector<8x1024xf32>
    %79 = tpu.matmul %78, %77, %cst_38 {dimension_numbers = #tpu.dot_dimension_numbers<[1], [0], [0], [1], [0, 0, 1, 1], [], []>} : vector<8x8xf32>, vector<8x1024xf32>, vector<8x1024xf32> -> vector<8x1024xf32>
    %80 = arith.addf %73, %79 : vector<8x1024xf32>
    %c7_i32 = arith.constant 7 : i32
    %81 = tpu.dynamic_rotate %0 by %c7_i32 dim 1 : vector<8x1024xf32>, i32 -> vector<8x1024xf32>
    %c11 = arith.constant 11 : index
    %c0_39 = arith.constant 0 : index
    %82 = vector.load %arg1[%c11, %c0_39] : memref<27x1024xf32, #tpu.memory_space<vmem>>, vector<1x1024xf32>
    %83 = vector.broadcast %82 : vector<1x1024xf32> to vector<8x1024xf32>
    %84 = arith.mulf %81, %83 : vector<8x1024xf32>
    %c88 = arith.constant 88 : index
    %c0_40 = arith.constant 0 : index
    %85 = vector.load %arg2[%c88, %c0_40] : memref<216x8xf32, #tpu.memory_space<vmem>>, vector<8x8xf32>
    %cst_41 = arith.constant dense<0.000000e+00> : vector<8x1024xf32>
    %86 = tpu.matmul %85, %84, %cst_41 {dimension_numbers = #tpu.dot_dimension_numbers<[1], [0], [0], [1], [0, 0, 1, 1], [], []>} : vector<8x8xf32>, vector<8x1024xf32>, vector<8x1024xf32> -> vector<8x1024xf32>
    %87 = arith.addf %80, %86 : vector<8x1024xf32>
    %c1_i32 = arith.constant 1 : i32
    %88 = tpu.dynamic_rotate %0 by %c1_i32 dim 1 : vector<8x1024xf32>, i32 -> vector<8x1024xf32>
    %c12 = arith.constant 12 : index
    %c0_42 = arith.constant 0 : index
    %89 = vector.load %arg1[%c12, %c0_42] : memref<27x1024xf32, #tpu.memory_space<vmem>>, vector<1x1024xf32>
    %90 = vector.broadcast %89 : vector<1x1024xf32> to vector<8x1024xf32>
    %91 = arith.mulf %88, %90 : vector<8x1024xf32>
    %c96 = arith.constant 96 : index
    %c0_43 = arith.constant 0 : index
    %92 = vector.load %arg2[%c96, %c0_43] : memref<216x8xf32, #tpu.memory_space<vmem>>, vector<8x8xf32>
    %cst_44 = arith.constant dense<0.000000e+00> : vector<8x1024xf32>
    %93 = tpu.matmul %92, %91, %cst_44 {dimension_numbers = #tpu.dot_dimension_numbers<[1], [0], [0], [1], [0, 0, 1, 1], [], []>} : vector<8x8xf32>, vector<8x1024xf32>, vector<8x1024xf32> -> vector<8x1024xf32>
    %94 = arith.addf %87, %93 : vector<8x1024xf32>
    %c1023_i32 = arith.constant 1023 : i32
    %95 = tpu.dynamic_rotate %0 by %c1023_i32 dim 1 : vector<8x1024xf32>, i32 -> vector<8x1024xf32>
    %c14 = arith.constant 14 : index
    %c0_45 = arith.constant 0 : index
    %96 = vector.load %arg1[%c14, %c0_45] : memref<27x1024xf32, #tpu.memory_space<vmem>>, vector<1x1024xf32>
    %97 = vector.broadcast %96 : vector<1x1024xf32> to vector<8x1024xf32>
    %98 = arith.mulf %95, %97 : vector<8x1024xf32>
    %c112 = arith.constant 112 : index
    %c0_46 = arith.constant 0 : index
    %99 = vector.load %arg2[%c112, %c0_46] : memref<216x8xf32, #tpu.memory_space<vmem>>, vector<8x8xf32>
    %cst_47 = arith.constant dense<0.000000e+00> : vector<8x1024xf32>
    %100 = tpu.matmul %99, %98, %cst_47 {dimension_numbers = #tpu.dot_dimension_numbers<[1], [0], [0], [1], [0, 0, 1, 1], [], []>} : vector<8x8xf32>, vector<8x1024xf32>, vector<8x1024xf32> -> vector<8x1024xf32>
    %101 = arith.addf %94, %100 : vector<8x1024xf32>
    %c1017_i32 = arith.constant 1017 : i32
    %102 = tpu.dynamic_rotate %0 by %c1017_i32 dim 1 : vector<8x1024xf32>, i32 -> vector<8x1024xf32>
    %c15 = arith.constant 15 : index
    %c0_48 = arith.constant 0 : index
    %103 = vector.load %arg1[%c15, %c0_48] : memref<27x1024xf32, #tpu.memory_space<vmem>>, vector<1x1024xf32>
    %104 = vector.broadcast %103 : vector<1x1024xf32> to vector<8x1024xf32>
    %105 = arith.mulf %102, %104 : vector<8x1024xf32>
    %c120 = arith.constant 120 : index
    %c0_49 = arith.constant 0 : index
    %106 = vector.load %arg2[%c120, %c0_49] : memref<216x8xf32, #tpu.memory_space<vmem>>, vector<8x8xf32>
    %cst_50 = arith.constant dense<0.000000e+00> : vector<8x1024xf32>
    %107 = tpu.matmul %106, %105, %cst_50 {dimension_numbers = #tpu.dot_dimension_numbers<[1], [0], [0], [1], [0, 0, 1, 1], [], []>} : vector<8x8xf32>, vector<8x1024xf32>, vector<8x1024xf32> -> vector<8x1024xf32>
    %108 = arith.addf %101, %107 : vector<8x1024xf32>
    %c1016_i32 = arith.constant 1016 : i32
    %109 = tpu.dynamic_rotate %0 by %c1016_i32 dim 1 : vector<8x1024xf32>, i32 -> vector<8x1024xf32>
    %c16_51 = arith.constant 16 : index
    %c0_52 = arith.constant 0 : index
    %110 = vector.load %arg1[%c16_51, %c0_52] : memref<27x1024xf32, #tpu.memory_space<vmem>>, vector<1x1024xf32>
    %111 = vector.broadcast %110 : vector<1x1024xf32> to vector<8x1024xf32>
    %112 = arith.mulf %109, %111 : vector<8x1024xf32>
    %c128 = arith.constant 128 : index
    %c0_53 = arith.constant 0 : index
    %113 = vector.load %arg2[%c128, %c0_53] : memref<216x8xf32, #tpu.memory_space<vmem>>, vector<8x8xf32>
    %cst_54 = arith.constant dense<0.000000e+00> : vector<8x1024xf32>
    %114 = tpu.matmul %113, %112, %cst_54 {dimension_numbers = #tpu.dot_dimension_numbers<[1], [0], [0], [1], [0, 0, 1, 1], [], []>} : vector<8x8xf32>, vector<8x1024xf32>, vector<8x1024xf32> -> vector<8x1024xf32>
    %115 = arith.addf %108, %114 : vector<8x1024xf32>
    %c1015_i32 = arith.constant 1015 : i32
    %116 = tpu.dynamic_rotate %0 by %c1015_i32 dim 1 : vector<8x1024xf32>, i32 -> vector<8x1024xf32>
    %c17 = arith.constant 17 : index
    %c0_55 = arith.constant 0 : index
    %117 = vector.load %arg1[%c17, %c0_55] : memref<27x1024xf32, #tpu.memory_space<vmem>>, vector<1x1024xf32>
    %118 = vector.broadcast %117 : vector<1x1024xf32> to vector<8x1024xf32>
    %119 = arith.mulf %116, %118 : vector<8x1024xf32>
    %c136 = arith.constant 136 : index
    %c0_56 = arith.constant 0 : index
    %120 = vector.load %arg2[%c136, %c0_56] : memref<216x8xf32, #tpu.memory_space<vmem>>, vector<8x8xf32>
    %cst_57 = arith.constant dense<0.000000e+00> : vector<8x1024xf32>
    %121 = tpu.matmul %120, %119, %cst_57 {dimension_numbers = #tpu.dot_dimension_numbers<[1], [0], [0], [1], [0, 0, 1, 1], [], []>} : vector<8x8xf32>, vector<8x1024xf32>, vector<8x1024xf32> -> vector<8x1024xf32>
    %122 = arith.addf %115, %121 : vector<8x1024xf32>
    %c969_i32 = arith.constant 969 : i32
    %123 = tpu.dynamic_rotate %0 by %c969_i32 dim 1 : vector<8x1024xf32>, i32 -> vector<8x1024xf32>
    %c18 = arith.constant 18 : index
    %c0_58 = arith.constant 0 : index
    %124 = vector.load %arg1[%c18, %c0_58] : memref<27x1024xf32, #tpu.memory_space<vmem>>, vector<1x1024xf32>
    %125 = vector.broadcast %124 : vector<1x1024xf32> to vector<8x1024xf32>
    %126 = arith.mulf %123, %125 : vector<8x1024xf32>
    %c144 = arith.constant 144 : index
    %c0_59 = arith.constant 0 : index
    %127 = vector.load %arg2[%c144, %c0_59] : memref<216x8xf32, #tpu.memory_space<vmem>>, vector<8x8xf32>
    %cst_60 = arith.constant dense<0.000000e+00> : vector<8x1024xf32>
    %128 = tpu.matmul %127, %126, %cst_60 {dimension_numbers = #tpu.dot_dimension_numbers<[1], [0], [0], [1], [0, 0, 1, 1], [], []>} : vector<8x8xf32>, vector<8x1024xf32>, vector<8x1024xf32> -> vector<8x1024xf32>
    %129 = arith.addf %122, %128 : vector<8x1024xf32>
    %c968_i32 = arith.constant 968 : i32
    %130 = tpu.dynamic_rotate %0 by %c968_i32 dim 1 : vector<8x1024xf32>, i32 -> vector<8x1024xf32>
    %c19 = arith.constant 19 : index
    %c0_61 = arith.constant 0 : index
    %131 = vector.load %arg1[%c19, %c0_61] : memref<27x1024xf32, #tpu.memory_space<vmem>>, vector<1x1024xf32>
    %132 = vector.broadcast %131 : vector<1x1024xf32> to vector<8x1024xf32>
    %133 = arith.mulf %130, %132 : vector<8x1024xf32>
    %c152 = arith.constant 152 : index
    %c0_62 = arith.constant 0 : index
    %134 = vector.load %arg2[%c152, %c0_62] : memref<216x8xf32, #tpu.memory_space<vmem>>, vector<8x8xf32>
    %cst_63 = arith.constant dense<0.000000e+00> : vector<8x1024xf32>
    %135 = tpu.matmul %134, %133, %cst_63 {dimension_numbers = #tpu.dot_dimension_numbers<[1], [0], [0], [1], [0, 0, 1, 1], [], []>} : vector<8x8xf32>, vector<8x1024xf32>, vector<8x1024xf32> -> vector<8x1024xf32>
    %136 = arith.addf %129, %135 : vector<8x1024xf32>
    %c967_i32 = arith.constant 967 : i32
    %137 = tpu.dynamic_rotate %0 by %c967_i32 dim 1 : vector<8x1024xf32>, i32 -> vector<8x1024xf32>
    %c20 = arith.constant 20 : index
    %c0_64 = arith.constant 0 : index
    %138 = vector.load %arg1[%c20, %c0_64] : memref<27x1024xf32, #tpu.memory_space<vmem>>, vector<1x1024xf32>
    %139 = vector.broadcast %138 : vector<1x1024xf32> to vector<8x1024xf32>
    %140 = arith.mulf %137, %139 : vector<8x1024xf32>
    %c160 = arith.constant 160 : index
    %c0_65 = arith.constant 0 : index
    %141 = vector.load %arg2[%c160, %c0_65] : memref<216x8xf32, #tpu.memory_space<vmem>>, vector<8x8xf32>
    %cst_66 = arith.constant dense<0.000000e+00> : vector<8x1024xf32>
    %142 = tpu.matmul %141, %140, %cst_66 {dimension_numbers = #tpu.dot_dimension_numbers<[1], [0], [0], [1], [0, 0, 1, 1], [], []>} : vector<8x8xf32>, vector<8x1024xf32>, vector<8x1024xf32> -> vector<8x1024xf32>
    %143 = arith.addf %136, %142 : vector<8x1024xf32>
    %c961_i32 = arith.constant 961 : i32
    %144 = tpu.dynamic_rotate %0 by %c961_i32 dim 1 : vector<8x1024xf32>, i32 -> vector<8x1024xf32>
    %c21 = arith.constant 21 : index
    %c0_67 = arith.constant 0 : index
    %145 = vector.load %arg1[%c21, %c0_67] : memref<27x1024xf32, #tpu.memory_space<vmem>>, vector<1x1024xf32>
    %146 = vector.broadcast %145 : vector<1x1024xf32> to vector<8x1024xf32>
    %147 = arith.mulf %144, %146 : vector<8x1024xf32>
    %c168 = arith.constant 168 : index
    %c0_68 = arith.constant 0 : index
    %148 = vector.load %arg2[%c168, %c0_68] : memref<216x8xf32, #tpu.memory_space<vmem>>, vector<8x8xf32>
    %cst_69 = arith.constant dense<0.000000e+00> : vector<8x1024xf32>
    %149 = tpu.matmul %148, %147, %cst_69 {dimension_numbers = #tpu.dot_dimension_numbers<[1], [0], [0], [1], [0, 0, 1, 1], [], []>} : vector<8x8xf32>, vector<8x1024xf32>, vector<8x1024xf32> -> vector<8x1024xf32>
    %150 = arith.addf %143, %149 : vector<8x1024xf32>
    %c960_i32 = arith.constant 960 : i32
    %151 = tpu.dynamic_rotate %0 by %c960_i32 dim 1 : vector<8x1024xf32>, i32 -> vector<8x1024xf32>
    %c22 = arith.constant 22 : index
    %c0_70 = arith.constant 0 : index
    %152 = vector.load %arg1[%c22, %c0_70] : memref<27x1024xf32, #tpu.memory_space<vmem>>, vector<1x1024xf32>
    %153 = vector.broadcast %152 : vector<1x1024xf32> to vector<8x1024xf32>
    %154 = arith.mulf %151, %153 : vector<8x1024xf32>
    %c176 = arith.constant 176 : index
    %c0_71 = arith.constant 0 : index
    %155 = vector.load %arg2[%c176, %c0_71] : memref<216x8xf32, #tpu.memory_space<vmem>>, vector<8x8xf32>
    %cst_72 = arith.constant dense<0.000000e+00> : vector<8x1024xf32>
    %156 = tpu.matmul %155, %154, %cst_72 {dimension_numbers = #tpu.dot_dimension_numbers<[1], [0], [0], [1], [0, 0, 1, 1], [], []>} : vector<8x8xf32>, vector<8x1024xf32>, vector<8x1024xf32> -> vector<8x1024xf32>
    %157 = arith.addf %150, %156 : vector<8x1024xf32>
    %c959_i32 = arith.constant 959 : i32
    %158 = tpu.dynamic_rotate %0 by %c959_i32 dim 1 : vector<8x1024xf32>, i32 -> vector<8x1024xf32>
    %c23 = arith.constant 23 : index
    %c0_73 = arith.constant 0 : index
    %159 = vector.load %arg1[%c23, %c0_73] : memref<27x1024xf32, #tpu.memory_space<vmem>>, vector<1x1024xf32>
    %160 = vector.broadcast %159 : vector<1x1024xf32> to vector<8x1024xf32>
    %161 = arith.mulf %158, %160 : vector<8x1024xf32>
    %c184 = arith.constant 184 : index
    %c0_74 = arith.constant 0 : index
    %162 = vector.load %arg2[%c184, %c0_74] : memref<216x8xf32, #tpu.memory_space<vmem>>, vector<8x8xf32>
    %cst_75 = arith.constant dense<0.000000e+00> : vector<8x1024xf32>
    %163 = tpu.matmul %162, %161, %cst_75 {dimension_numbers = #tpu.dot_dimension_numbers<[1], [0], [0], [1], [0, 0, 1, 1], [], []>} : vector<8x8xf32>, vector<8x1024xf32>, vector<8x1024xf32> -> vector<8x1024xf32>
    %164 = arith.addf %157, %163 : vector<8x1024xf32>
    %c953_i32 = arith.constant 953 : i32
    %165 = tpu.dynamic_rotate %0 by %c953_i32 dim 1 : vector<8x1024xf32>, i32 -> vector<8x1024xf32>
    %c24_76 = arith.constant 24 : index
    %c0_77 = arith.constant 0 : index
    %166 = vector.load %arg1[%c24_76, %c0_77] : memref<27x1024xf32, #tpu.memory_space<vmem>>, vector<1x1024xf32>
    %167 = vector.broadcast %166 : vector<1x1024xf32> to vector<8x1024xf32>
    %168 = arith.mulf %165, %167 : vector<8x1024xf32>
    %c192 = arith.constant 192 : index
    %c0_78 = arith.constant 0 : index
    %169 = vector.load %arg2[%c192, %c0_78] : memref<216x8xf32, #tpu.memory_space<vmem>>, vector<8x8xf32>
    %cst_79 = arith.constant dense<0.000000e+00> : vector<8x1024xf32>
    %170 = tpu.matmul %169, %168, %cst_79 {dimension_numbers = #tpu.dot_dimension_numbers<[1], [0], [0], [1], [0, 0, 1, 1], [], []>} : vector<8x8xf32>, vector<8x1024xf32>, vector<8x1024xf32> -> vector<8x1024xf32>
    %171 = arith.addf %164, %170 : vector<8x1024xf32>
    %c952_i32 = arith.constant 952 : i32
    %172 = tpu.dynamic_rotate %0 by %c952_i32 dim 1 : vector<8x1024xf32>, i32 -> vector<8x1024xf32>
    %c25 = arith.constant 25 : index
    %c0_80 = arith.constant 0 : index
    %173 = vector.load %arg1[%c25, %c0_80] : memref<27x1024xf32, #tpu.memory_space<vmem>>, vector<1x1024xf32>
    %174 = vector.broadcast %173 : vector<1x1024xf32> to vector<8x1024xf32>
    %175 = arith.mulf %172, %174 : vector<8x1024xf32>
    %c200 = arith.constant 200 : index
    %c0_81 = arith.constant 0 : index
    %176 = vector.load %arg2[%c200, %c0_81] : memref<216x8xf32, #tpu.memory_space<vmem>>, vector<8x8xf32>
    %cst_82 = arith.constant dense<0.000000e+00> : vector<8x1024xf32>
    %177 = tpu.matmul %176, %175, %cst_82 {dimension_numbers = #tpu.dot_dimension_numbers<[1], [0], [0], [1], [0, 0, 1, 1], [], []>} : vector<8x8xf32>, vector<8x1024xf32>, vector<8x1024xf32> -> vector<8x1024xf32>
    %178 = arith.addf %171, %177 : vector<8x1024xf32>
    %c951_i32 = arith.constant 951 : i32
    %179 = tpu.dynamic_rotate %0 by %c951_i32 dim 1 : vector<8x1024xf32>, i32 -> vector<8x1024xf32>
    %c26 = arith.constant 26 : index
    %c0_83 = arith.constant 0 : index
    %180 = vector.load %arg1[%c26, %c0_83] : memref<27x1024xf32, #tpu.memory_space<vmem>>, vector<1x1024xf32>
    %181 = vector.broadcast %180 : vector<1x1024xf32> to vector<8x1024xf32>
    %182 = arith.mulf %179, %181 : vector<8x1024xf32>
    %c208 = arith.constant 208 : index
    %c0_84 = arith.constant 0 : index
    %183 = vector.load %arg2[%c208, %c0_84] : memref<216x8xf32, #tpu.memory_space<vmem>>, vector<8x8xf32>
    %cst_85 = arith.constant dense<0.000000e+00> : vector<8x1024xf32>
    %184 = tpu.matmul %183, %182, %cst_85 {dimension_numbers = #tpu.dot_dimension_numbers<[1], [0], [0], [1], [0, 0, 1, 1], [], []>} : vector<8x8xf32>, vector<8x1024xf32>, vector<8x1024xf32> -> vector<8x1024xf32>
    %185 = arith.addf %178, %184 : vector<8x1024xf32>
    %cst_86 = arith.constant dense<0.000000e+00> : vector<8x1xf32>
    %186 = tpu.matmul %185, %1, %cst_86 {dimension_numbers = #tpu.dot_dimension_numbers<[1], [0], [0], [1], [0, 0, 1, 1], [], []>} : vector<8x1024xf32>, vector<1024x1xf32>, vector<8x1xf32> -> vector<8x1xf32>
    %187 = arith.mulf %185, %185 : vector<8x1024xf32>
    %cst_87 = arith.constant dense<0.000000e+00> : vector<8x1xf32>
    %188 = tpu.matmul %187, %1, %cst_87 {dimension_numbers = #tpu.dot_dimension_numbers<[1], [0], [0], [1], [0, 0, 1, 1], [], []>} : vector<8x1024xf32>, vector<1024x1xf32>, vector<8x1xf32> -> vector<8x1xf32>
    %cst_88 = arith.constant 9.765625E-4 : f32
    %189 = vector.broadcast %cst_88 : f32 to vector<8x1xf32>
    %190 = arith.mulf %186, %189 : vector<8x1xf32>
    %cst_89 = arith.constant 9.765625E-4 : f32
    %191 = vector.broadcast %cst_89 : f32 to vector<8x1xf32>
    %192 = arith.mulf %188, %191 : vector<8x1xf32>
    %193 = arith.mulf %190, %190 : vector<8x1xf32>
    %194 = arith.subf %192, %193 : vector<8x1xf32>
    %195 = vector.broadcast %190 : vector<8x1xf32> to vector<8x1024xf32>
    %196 = arith.subf %185, %195 : vector<8x1024xf32>
    %cst_90 = arith.constant 9.99999974E-6 : f32
    %197 = vector.broadcast %cst_90 : f32 to vector<8x1xf32>
    %198 = arith.addf %194, %197 : vector<8x1xf32>
    %199 = math.rsqrt %198 : vector<8x1xf32>
    %200 = vector.broadcast %199 : vector<8x1xf32> to vector<8x1024xf32>
    %201 = arith.mulf %196, %200 : vector<8x1024xf32>
    %c0_91 = arith.constant 0 : index
    %c0_92 = arith.constant 0 : index
    %202 = vector.load %arg3[%c0_91, %c0_92] : memref<8x1xf32, #tpu.memory_space<vmem>>, vector<8x1xf32>
    %203 = vector.broadcast %202 : vector<8x1xf32> to vector<8x1024xf32>
    %204 = arith.mulf %201, %203 : vector<8x1024xf32>
    %c0_93 = arith.constant 0 : index
    %c0_94 = arith.constant 0 : index
    %205 = vector.load %arg4[%c0_93, %c0_94] : memref<8x1xf32, #tpu.memory_space<vmem>>, vector<8x1xf32>
    %206 = vector.broadcast %205 : vector<8x1xf32> to vector<8x1024xf32>
    %207 = arith.addf %204, %206 : vector<8x1024xf32>
    %cst_95 = arith.constant 0.000000e+00 : f32
    %208 = vector.broadcast %cst_95 : f32 to vector<8x1024xf32>
    %209 = arith.maximumf %207, %208 : vector<8x1024xf32>
    %c104_96 = arith.constant 104 : index
    %c0_97 = arith.constant 0 : index
    %210 = vector.load %arg5[%c104_96, %c0_97] : memref<216x8xf32, #tpu.memory_space<vmem>>, vector<8x8xf32>
    %cst_98 = arith.constant dense<0.000000e+00> : vector<8x1024xf32>
    %211 = tpu.matmul %210, %209, %cst_98 {dimension_numbers = #tpu.dot_dimension_numbers<[1], [0], [0], [1], [0, 0, 1, 1], [], []>} : vector<8x8xf32>, vector<8x1024xf32>, vector<8x1024xf32> -> vector<8x1024xf32>
    %c73_i32_99 = arith.constant 73 : i32
    %212 = tpu.dynamic_rotate %209 by %c73_i32_99 dim 1 : vector<8x1024xf32>, i32 -> vector<8x1024xf32>
    %c0_100 = arith.constant 0 : index
    %c0_101 = arith.constant 0 : index
    %213 = vector.load %arg1[%c0_100, %c0_101] : memref<27x1024xf32, #tpu.memory_space<vmem>>, vector<1x1024xf32>
    %214 = vector.broadcast %213 : vector<1x1024xf32> to vector<8x1024xf32>
    %215 = arith.mulf %212, %214 : vector<8x1024xf32>
    %c0_102 = arith.constant 0 : index
    %c0_103 = arith.constant 0 : index
    %216 = vector.load %arg5[%c0_102, %c0_103] : memref<216x8xf32, #tpu.memory_space<vmem>>, vector<8x8xf32>
    %cst_104 = arith.constant dense<0.000000e+00> : vector<8x1024xf32>
    %217 = tpu.matmul %216, %215, %cst_104 {dimension_numbers = #tpu.dot_dimension_numbers<[1], [0], [0], [1], [0, 0, 1, 1], [], []>} : vector<8x8xf32>, vector<8x1024xf32>, vector<8x1024xf32> -> vector<8x1024xf32>
    %218 = arith.addf %211, %217 : vector<8x1024xf32>
    %c72_i32_105 = arith.constant 72 : i32
    %219 = tpu.dynamic_rotate %209 by %c72_i32_105 dim 1 : vector<8x1024xf32>, i32 -> vector<8x1024xf32>
    %c1_106 = arith.constant 1 : index
    %c0_107 = arith.constant 0 : index
    %220 = vector.load %arg1[%c1_106, %c0_107] : memref<27x1024xf32, #tpu.memory_space<vmem>>, vector<1x1024xf32>
    %221 = vector.broadcast %220 : vector<1x1024xf32> to vector<8x1024xf32>
    %222 = arith.mulf %219, %221 : vector<8x1024xf32>
    %c8_108 = arith.constant 8 : index
    %c0_109 = arith.constant 0 : index
    %223 = vector.load %arg5[%c8_108, %c0_109] : memref<216x8xf32, #tpu.memory_space<vmem>>, vector<8x8xf32>
    %cst_110 = arith.constant dense<0.000000e+00> : vector<8x1024xf32>
    %224 = tpu.matmul %223, %222, %cst_110 {dimension_numbers = #tpu.dot_dimension_numbers<[1], [0], [0], [1], [0, 0, 1, 1], [], []>} : vector<8x8xf32>, vector<8x1024xf32>, vector<8x1024xf32> -> vector<8x1024xf32>
    %225 = arith.addf %218, %224 : vector<8x1024xf32>
    %c71_i32_111 = arith.constant 71 : i32
    %226 = tpu.dynamic_rotate %209 by %c71_i32_111 dim 1 : vector<8x1024xf32>, i32 -> vector<8x1024xf32>
    %c2_112 = arith.constant 2 : index
    %c0_113 = arith.constant 0 : index
    %227 = vector.load %arg1[%c2_112, %c0_113] : memref<27x1024xf32, #tpu.memory_space<vmem>>, vector<1x1024xf32>
    %228 = vector.broadcast %227 : vector<1x1024xf32> to vector<8x1024xf32>
    %229 = arith.mulf %226, %228 : vector<8x1024xf32>
    %c16_114 = arith.constant 16 : index
    %c0_115 = arith.constant 0 : index
    %230 = vector.load %arg5[%c16_114, %c0_115] : memref<216x8xf32, #tpu.memory_space<vmem>>, vector<8x8xf32>
    %cst_116 = arith.constant dense<0.000000e+00> : vector<8x1024xf32>
    %231 = tpu.matmul %230, %229, %cst_116 {dimension_numbers = #tpu.dot_dimension_numbers<[1], [0], [0], [1], [0, 0, 1, 1], [], []>} : vector<8x8xf32>, vector<8x1024xf32>, vector<8x1024xf32> -> vector<8x1024xf32>
    %232 = arith.addf %225, %231 : vector<8x1024xf32>
    %c65_i32_117 = arith.constant 65 : i32
    %233 = tpu.dynamic_rotate %209 by %c65_i32_117 dim 1 : vector<8x1024xf32>, i32 -> vector<8x1024xf32>
    %c3_118 = arith.constant 3 : index
    %c0_119 = arith.constant 0 : index
    %234 = vector.load %arg1[%c3_118, %c0_119] : memref<27x1024xf32, #tpu.memory_space<vmem>>, vector<1x1024xf32>
    %235 = vector.broadcast %234 : vector<1x1024xf32> to vector<8x1024xf32>
    %236 = arith.mulf %233, %235 : vector<8x1024xf32>
    %c24_120 = arith.constant 24 : index
    %c0_121 = arith.constant 0 : index
    %237 = vector.load %arg5[%c24_120, %c0_121] : memref<216x8xf32, #tpu.memory_space<vmem>>, vector<8x8xf32>
    %cst_122 = arith.constant dense<0.000000e+00> : vector<8x1024xf32>
    %238 = tpu.matmul %237, %236, %cst_122 {dimension_numbers = #tpu.dot_dimension_numbers<[1], [0], [0], [1], [0, 0, 1, 1], [], []>} : vector<8x8xf32>, vector<8x1024xf32>, vector<8x1024xf32> -> vector<8x1024xf32>
    %239 = arith.addf %232, %238 : vector<8x1024xf32>
    %c64_i32_123 = arith.constant 64 : i32
    %240 = tpu.dynamic_rotate %209 by %c64_i32_123 dim 1 : vector<8x1024xf32>, i32 -> vector<8x1024xf32>
    %c4_124 = arith.constant 4 : index
    %c0_125 = arith.constant 0 : index
    %241 = vector.load %arg1[%c4_124, %c0_125] : memref<27x1024xf32, #tpu.memory_space<vmem>>, vector<1x1024xf32>
    %242 = vector.broadcast %241 : vector<1x1024xf32> to vector<8x1024xf32>
    %243 = arith.mulf %240, %242 : vector<8x1024xf32>
    %c32_126 = arith.constant 32 : index
    %c0_127 = arith.constant 0 : index
    %244 = vector.load %arg5[%c32_126, %c0_127] : memref<216x8xf32, #tpu.memory_space<vmem>>, vector<8x8xf32>
    %cst_128 = arith.constant dense<0.000000e+00> : vector<8x1024xf32>
    %245 = tpu.matmul %244, %243, %cst_128 {dimension_numbers = #tpu.dot_dimension_numbers<[1], [0], [0], [1], [0, 0, 1, 1], [], []>} : vector<8x8xf32>, vector<8x1024xf32>, vector<8x1024xf32> -> vector<8x1024xf32>
    %246 = arith.addf %239, %245 : vector<8x1024xf32>
    %c63_i32_129 = arith.constant 63 : i32
    %247 = tpu.dynamic_rotate %209 by %c63_i32_129 dim 1 : vector<8x1024xf32>, i32 -> vector<8x1024xf32>
    %c5_130 = arith.constant 5 : index
    %c0_131 = arith.constant 0 : index
    %248 = vector.load %arg1[%c5_130, %c0_131] : memref<27x1024xf32, #tpu.memory_space<vmem>>, vector<1x1024xf32>
    %249 = vector.broadcast %248 : vector<1x1024xf32> to vector<8x1024xf32>
    %250 = arith.mulf %247, %249 : vector<8x1024xf32>
    %c40_132 = arith.constant 40 : index
    %c0_133 = arith.constant 0 : index
    %251 = vector.load %arg5[%c40_132, %c0_133] : memref<216x8xf32, #tpu.memory_space<vmem>>, vector<8x8xf32>
    %cst_134 = arith.constant dense<0.000000e+00> : vector<8x1024xf32>
    %252 = tpu.matmul %251, %250, %cst_134 {dimension_numbers = #tpu.dot_dimension_numbers<[1], [0], [0], [1], [0, 0, 1, 1], [], []>} : vector<8x8xf32>, vector<8x1024xf32>, vector<8x1024xf32> -> vector<8x1024xf32>
    %253 = arith.addf %246, %252 : vector<8x1024xf32>
    %c57_i32_135 = arith.constant 57 : i32
    %254 = tpu.dynamic_rotate %209 by %c57_i32_135 dim 1 : vector<8x1024xf32>, i32 -> vector<8x1024xf32>
    %c6_136 = arith.constant 6 : index
    %c0_137 = arith.constant 0 : index
    %255 = vector.load %arg1[%c6_136, %c0_137] : memref<27x1024xf32, #tpu.memory_space<vmem>>, vector<1x1024xf32>
    %256 = vector.broadcast %255 : vector<1x1024xf32> to vector<8x1024xf32>
    %257 = arith.mulf %254, %256 : vector<8x1024xf32>
    %c48_138 = arith.constant 48 : index
    %c0_139 = arith.constant 0 : index
    %258 = vector.load %arg5[%c48_138, %c0_139] : memref<216x8xf32, #tpu.memory_space<vmem>>, vector<8x8xf32>
    %cst_140 = arith.constant dense<0.000000e+00> : vector<8x1024xf32>
    %259 = tpu.matmul %258, %257, %cst_140 {dimension_numbers = #tpu.dot_dimension_numbers<[1], [0], [0], [1], [0, 0, 1, 1], [], []>} : vector<8x8xf32>, vector<8x1024xf32>, vector<8x1024xf32> -> vector<8x1024xf32>
    %260 = arith.addf %253, %259 : vector<8x1024xf32>
    %c56_i32_141 = arith.constant 56 : i32
    %261 = tpu.dynamic_rotate %209 by %c56_i32_141 dim 1 : vector<8x1024xf32>, i32 -> vector<8x1024xf32>
    %c7_142 = arith.constant 7 : index
    %c0_143 = arith.constant 0 : index
    %262 = vector.load %arg1[%c7_142, %c0_143] : memref<27x1024xf32, #tpu.memory_space<vmem>>, vector<1x1024xf32>
    %263 = vector.broadcast %262 : vector<1x1024xf32> to vector<8x1024xf32>
    %264 = arith.mulf %261, %263 : vector<8x1024xf32>
    %c56_144 = arith.constant 56 : index
    %c0_145 = arith.constant 0 : index
    %265 = vector.load %arg5[%c56_144, %c0_145] : memref<216x8xf32, #tpu.memory_space<vmem>>, vector<8x8xf32>
    %cst_146 = arith.constant dense<0.000000e+00> : vector<8x1024xf32>
    %266 = tpu.matmul %265, %264, %cst_146 {dimension_numbers = #tpu.dot_dimension_numbers<[1], [0], [0], [1], [0, 0, 1, 1], [], []>} : vector<8x8xf32>, vector<8x1024xf32>, vector<8x1024xf32> -> vector<8x1024xf32>
    %267 = arith.addf %260, %266 : vector<8x1024xf32>
    %c55_i32_147 = arith.constant 55 : i32
    %268 = tpu.dynamic_rotate %209 by %c55_i32_147 dim 1 : vector<8x1024xf32>, i32 -> vector<8x1024xf32>
    %c8_148 = arith.constant 8 : index
    %c0_149 = arith.constant 0 : index
    %269 = vector.load %arg1[%c8_148, %c0_149] : memref<27x1024xf32, #tpu.memory_space<vmem>>, vector<1x1024xf32>
    %270 = vector.broadcast %269 : vector<1x1024xf32> to vector<8x1024xf32>
    %271 = arith.mulf %268, %270 : vector<8x1024xf32>
    %c64_150 = arith.constant 64 : index
    %c0_151 = arith.constant 0 : index
    %272 = vector.load %arg5[%c64_150, %c0_151] : memref<216x8xf32, #tpu.memory_space<vmem>>, vector<8x8xf32>
    %cst_152 = arith.constant dense<0.000000e+00> : vector<8x1024xf32>
    %273 = tpu.matmul %272, %271, %cst_152 {dimension_numbers = #tpu.dot_dimension_numbers<[1], [0], [0], [1], [0, 0, 1, 1], [], []>} : vector<8x8xf32>, vector<8x1024xf32>, vector<8x1024xf32> -> vector<8x1024xf32>
    %274 = arith.addf %267, %273 : vector<8x1024xf32>
    %c9_i32_153 = arith.constant 9 : i32
    %275 = tpu.dynamic_rotate %209 by %c9_i32_153 dim 1 : vector<8x1024xf32>, i32 -> vector<8x1024xf32>
    %c9_154 = arith.constant 9 : index
    %c0_155 = arith.constant 0 : index
    %276 = vector.load %arg1[%c9_154, %c0_155] : memref<27x1024xf32, #tpu.memory_space<vmem>>, vector<1x1024xf32>
    %277 = vector.broadcast %276 : vector<1x1024xf32> to vector<8x1024xf32>
    %278 = arith.mulf %275, %277 : vector<8x1024xf32>
    %c72_156 = arith.constant 72 : index
    %c0_157 = arith.constant 0 : index
    %279 = vector.load %arg5[%c72_156, %c0_157] : memref<216x8xf32, #tpu.memory_space<vmem>>, vector<8x8xf32>
    %cst_158 = arith.constant dense<0.000000e+00> : vector<8x1024xf32>
    %280 = tpu.matmul %279, %278, %cst_158 {dimension_numbers = #tpu.dot_dimension_numbers<[1], [0], [0], [1], [0, 0, 1, 1], [], []>} : vector<8x8xf32>, vector<8x1024xf32>, vector<8x1024xf32> -> vector<8x1024xf32>
    %281 = arith.addf %274, %280 : vector<8x1024xf32>
    %c8_i32_159 = arith.constant 8 : i32
    %282 = tpu.dynamic_rotate %209 by %c8_i32_159 dim 1 : vector<8x1024xf32>, i32 -> vector<8x1024xf32>
    %c10_160 = arith.constant 10 : index
    %c0_161 = arith.constant 0 : index
    %283 = vector.load %arg1[%c10_160, %c0_161] : memref<27x1024xf32, #tpu.memory_space<vmem>>, vector<1x1024xf32>
    %284 = vector.broadcast %283 : vector<1x1024xf32> to vector<8x1024xf32>
    %285 = arith.mulf %282, %284 : vector<8x1024xf32>
    %c80_162 = arith.constant 80 : index
    %c0_163 = arith.constant 0 : index
    %286 = vector.load %arg5[%c80_162, %c0_163] : memref<216x8xf32, #tpu.memory_space<vmem>>, vector<8x8xf32>
    %cst_164 = arith.constant dense<0.000000e+00> : vector<8x1024xf32>
    %287 = tpu.matmul %286, %285, %cst_164 {dimension_numbers = #tpu.dot_dimension_numbers<[1], [0], [0], [1], [0, 0, 1, 1], [], []>} : vector<8x8xf32>, vector<8x1024xf32>, vector<8x1024xf32> -> vector<8x1024xf32>
    %288 = arith.addf %281, %287 : vector<8x1024xf32>
    %c7_i32_165 = arith.constant 7 : i32
    %289 = tpu.dynamic_rotate %209 by %c7_i32_165 dim 1 : vector<8x1024xf32>, i32 -> vector<8x1024xf32>
    %c11_166 = arith.constant 11 : index
    %c0_167 = arith.constant 0 : index
    %290 = vector.load %arg1[%c11_166, %c0_167] : memref<27x1024xf32, #tpu.memory_space<vmem>>, vector<1x1024xf32>
    %291 = vector.broadcast %290 : vector<1x1024xf32> to vector<8x1024xf32>
    %292 = arith.mulf %289, %291 : vector<8x1024xf32>
    %c88_168 = arith.constant 88 : index
    %c0_169 = arith.constant 0 : index
    %293 = vector.load %arg5[%c88_168, %c0_169] : memref<216x8xf32, #tpu.memory_space<vmem>>, vector<8x8xf32>
    %cst_170 = arith.constant dense<0.000000e+00> : vector<8x1024xf32>
    %294 = tpu.matmul %293, %292, %cst_170 {dimension_numbers = #tpu.dot_dimension_numbers<[1], [0], [0], [1], [0, 0, 1, 1], [], []>} : vector<8x8xf32>, vector<8x1024xf32>, vector<8x1024xf32> -> vector<8x1024xf32>
    %295 = arith.addf %288, %294 : vector<8x1024xf32>
    %c1_i32_171 = arith.constant 1 : i32
    %296 = tpu.dynamic_rotate %209 by %c1_i32_171 dim 1 : vector<8x1024xf32>, i32 -> vector<8x1024xf32>
    %c12_172 = arith.constant 12 : index
    %c0_173 = arith.constant 0 : index
    %297 = vector.load %arg1[%c12_172, %c0_173] : memref<27x1024xf32, #tpu.memory_space<vmem>>, vector<1x1024xf32>
    %298 = vector.broadcast %297 : vector<1x1024xf32> to vector<8x1024xf32>
    %299 = arith.mulf %296, %298 : vector<8x1024xf32>
    %c96_174 = arith.constant 96 : index
    %c0_175 = arith.constant 0 : index
    %300 = vector.load %arg5[%c96_174, %c0_175] : memref<216x8xf32, #tpu.memory_space<vmem>>, vector<8x8xf32>
    %cst_176 = arith.constant dense<0.000000e+00> : vector<8x1024xf32>
    %301 = tpu.matmul %300, %299, %cst_176 {dimension_numbers = #tpu.dot_dimension_numbers<[1], [0], [0], [1], [0, 0, 1, 1], [], []>} : vector<8x8xf32>, vector<8x1024xf32>, vector<8x1024xf32> -> vector<8x1024xf32>
    %302 = arith.addf %295, %301 : vector<8x1024xf32>
    %c1023_i32_177 = arith.constant 1023 : i32
    %303 = tpu.dynamic_rotate %209 by %c1023_i32_177 dim 1 : vector<8x1024xf32>, i32 -> vector<8x1024xf32>
    %c14_178 = arith.constant 14 : index
    %c0_179 = arith.constant 0 : index
    %304 = vector.load %arg1[%c14_178, %c0_179] : memref<27x1024xf32, #tpu.memory_space<vmem>>, vector<1x1024xf32>
    %305 = vector.broadcast %304 : vector<1x1024xf32> to vector<8x1024xf32>
    %306 = arith.mulf %303, %305 : vector<8x1024xf32>
    %c112_180 = arith.constant 112 : index
    %c0_181 = arith.constant 0 : index
    %307 = vector.load %arg5[%c112_180, %c0_181] : memref<216x8xf32, #tpu.memory_space<vmem>>, vector<8x8xf32>
    %cst_182 = arith.constant dense<0.000000e+00> : vector<8x1024xf32>
    %308 = tpu.matmul %307, %306, %cst_182 {dimension_numbers = #tpu.dot_dimension_numbers<[1], [0], [0], [1], [0, 0, 1, 1], [], []>} : vector<8x8xf32>, vector<8x1024xf32>, vector<8x1024xf32> -> vector<8x1024xf32>
    %309 = arith.addf %302, %308 : vector<8x1024xf32>
    %c1017_i32_183 = arith.constant 1017 : i32
    %310 = tpu.dynamic_rotate %209 by %c1017_i32_183 dim 1 : vector<8x1024xf32>, i32 -> vector<8x1024xf32>
    %c15_184 = arith.constant 15 : index
    %c0_185 = arith.constant 0 : index
    %311 = vector.load %arg1[%c15_184, %c0_185] : memref<27x1024xf32, #tpu.memory_space<vmem>>, vector<1x1024xf32>
    %312 = vector.broadcast %311 : vector<1x1024xf32> to vector<8x1024xf32>
    %313 = arith.mulf %310, %312 : vector<8x1024xf32>
    %c120_186 = arith.constant 120 : index
    %c0_187 = arith.constant 0 : index
    %314 = vector.load %arg5[%c120_186, %c0_187] : memref<216x8xf32, #tpu.memory_space<vmem>>, vector<8x8xf32>
    %cst_188 = arith.constant dense<0.000000e+00> : vector<8x1024xf32>
    %315 = tpu.matmul %314, %313, %cst_188 {dimension_numbers = #tpu.dot_dimension_numbers<[1], [0], [0], [1], [0, 0, 1, 1], [], []>} : vector<8x8xf32>, vector<8x1024xf32>, vector<8x1024xf32> -> vector<8x1024xf32>
    %316 = arith.addf %309, %315 : vector<8x1024xf32>
    %c1016_i32_189 = arith.constant 1016 : i32
    %317 = tpu.dynamic_rotate %209 by %c1016_i32_189 dim 1 : vector<8x1024xf32>, i32 -> vector<8x1024xf32>
    %c16_190 = arith.constant 16 : index
    %c0_191 = arith.constant 0 : index
    %318 = vector.load %arg1[%c16_190, %c0_191] : memref<27x1024xf32, #tpu.memory_space<vmem>>, vector<1x1024xf32>
    %319 = vector.broadcast %318 : vector<1x1024xf32> to vector<8x1024xf32>
    %320 = arith.mulf %317, %319 : vector<8x1024xf32>
    %c128_192 = arith.constant 128 : index
    %c0_193 = arith.constant 0 : index
    %321 = vector.load %arg5[%c128_192, %c0_193] : memref<216x8xf32, #tpu.memory_space<vmem>>, vector<8x8xf32>
    %cst_194 = arith.constant dense<0.000000e+00> : vector<8x1024xf32>
    %322 = tpu.matmul %321, %320, %cst_194 {dimension_numbers = #tpu.dot_dimension_numbers<[1], [0], [0], [1], [0, 0, 1, 1], [], []>} : vector<8x8xf32>, vector<8x1024xf32>, vector<8x1024xf32> -> vector<8x1024xf32>
    %323 = arith.addf %316, %322 : vector<8x1024xf32>
    %c1015_i32_195 = arith.constant 1015 : i32
    %324 = tpu.dynamic_rotate %209 by %c1015_i32_195 dim 1 : vector<8x1024xf32>, i32 -> vector<8x1024xf32>
    %c17_196 = arith.constant 17 : index
    %c0_197 = arith.constant 0 : index
    %325 = vector.load %arg1[%c17_196, %c0_197] : memref<27x1024xf32, #tpu.memory_space<vmem>>, vector<1x1024xf32>
    %326 = vector.broadcast %325 : vector<1x1024xf32> to vector<8x1024xf32>
    %327 = arith.mulf %324, %326 : vector<8x1024xf32>
    %c136_198 = arith.constant 136 : index
    %c0_199 = arith.constant 0 : index
    %328 = vector.load %arg5[%c136_198, %c0_199] : memref<216x8xf32, #tpu.memory_space<vmem>>, vector<8x8xf32>
    %cst_200 = arith.constant dense<0.000000e+00> : vector<8x1024xf32>
    %329 = tpu.matmul %328, %327, %cst_200 {dimension_numbers = #tpu.dot_dimension_numbers<[1], [0], [0], [1], [0, 0, 1, 1], [], []>} : vector<8x8xf32>, vector<8x1024xf32>, vector<8x1024xf32> -> vector<8x1024xf32>
    %330 = arith.addf %323, %329 : vector<8x1024xf32>
    %c969_i32_201 = arith.constant 969 : i32
    %331 = tpu.dynamic_rotate %209 by %c969_i32_201 dim 1 : vector<8x1024xf32>, i32 -> vector<8x1024xf32>
    %c18_202 = arith.constant 18 : index
    %c0_203 = arith.constant 0 : index
    %332 = vector.load %arg1[%c18_202, %c0_203] : memref<27x1024xf32, #tpu.memory_space<vmem>>, vector<1x1024xf32>
    %333 = vector.broadcast %332 : vector<1x1024xf32> to vector<8x1024xf32>
    %334 = arith.mulf %331, %333 : vector<8x1024xf32>
    %c144_204 = arith.constant 144 : index
    %c0_205 = arith.constant 0 : index
    %335 = vector.load %arg5[%c144_204, %c0_205] : memref<216x8xf32, #tpu.memory_space<vmem>>, vector<8x8xf32>
    %cst_206 = arith.constant dense<0.000000e+00> : vector<8x1024xf32>
    %336 = tpu.matmul %335, %334, %cst_206 {dimension_numbers = #tpu.dot_dimension_numbers<[1], [0], [0], [1], [0, 0, 1, 1], [], []>} : vector<8x8xf32>, vector<8x1024xf32>, vector<8x1024xf32> -> vector<8x1024xf32>
    %337 = arith.addf %330, %336 : vector<8x1024xf32>
    %c968_i32_207 = arith.constant 968 : i32
    %338 = tpu.dynamic_rotate %209 by %c968_i32_207 dim 1 : vector<8x1024xf32>, i32 -> vector<8x1024xf32>
    %c19_208 = arith.constant 19 : index
    %c0_209 = arith.constant 0 : index
    %339 = vector.load %arg1[%c19_208, %c0_209] : memref<27x1024xf32, #tpu.memory_space<vmem>>, vector<1x1024xf32>
    %340 = vector.broadcast %339 : vector<1x1024xf32> to vector<8x1024xf32>
    %341 = arith.mulf %338, %340 : vector<8x1024xf32>
    %c152_210 = arith.constant 152 : index
    %c0_211 = arith.constant 0 : index
    %342 = vector.load %arg5[%c152_210, %c0_211] : memref<216x8xf32, #tpu.memory_space<vmem>>, vector<8x8xf32>
    %cst_212 = arith.constant dense<0.000000e+00> : vector<8x1024xf32>
    %343 = tpu.matmul %342, %341, %cst_212 {dimension_numbers = #tpu.dot_dimension_numbers<[1], [0], [0], [1], [0, 0, 1, 1], [], []>} : vector<8x8xf32>, vector<8x1024xf32>, vector<8x1024xf32> -> vector<8x1024xf32>
    %344 = arith.addf %337, %343 : vector<8x1024xf32>
    %c967_i32_213 = arith.constant 967 : i32
    %345 = tpu.dynamic_rotate %209 by %c967_i32_213 dim 1 : vector<8x1024xf32>, i32 -> vector<8x1024xf32>
    %c20_214 = arith.constant 20 : index
    %c0_215 = arith.constant 0 : index
    %346 = vector.load %arg1[%c20_214, %c0_215] : memref<27x1024xf32, #tpu.memory_space<vmem>>, vector<1x1024xf32>
    %347 = vector.broadcast %346 : vector<1x1024xf32> to vector<8x1024xf32>
    %348 = arith.mulf %345, %347 : vector<8x1024xf32>
    %c160_216 = arith.constant 160 : index
    %c0_217 = arith.constant 0 : index
    %349 = vector.load %arg5[%c160_216, %c0_217] : memref<216x8xf32, #tpu.memory_space<vmem>>, vector<8x8xf32>
    %cst_218 = arith.constant dense<0.000000e+00> : vector<8x1024xf32>
    %350 = tpu.matmul %349, %348, %cst_218 {dimension_numbers = #tpu.dot_dimension_numbers<[1], [0], [0], [1], [0, 0, 1, 1], [], []>} : vector<8x8xf32>, vector<8x1024xf32>, vector<8x1024xf32> -> vector<8x1024xf32>
    %351 = arith.addf %344, %350 : vector<8x1024xf32>
    %c961_i32_219 = arith.constant 961 : i32
    %352 = tpu.dynamic_rotate %209 by %c961_i32_219 dim 1 : vector<8x1024xf32>, i32 -> vector<8x1024xf32>
    %c21_220 = arith.constant 21 : index
    %c0_221 = arith.constant 0 : index
    %353 = vector.load %arg1[%c21_220, %c0_221] : memref<27x1024xf32, #tpu.memory_space<vmem>>, vector<1x1024xf32>
    %354 = vector.broadcast %353 : vector<1x1024xf32> to vector<8x1024xf32>
    %355 = arith.mulf %352, %354 : vector<8x1024xf32>
    %c168_222 = arith.constant 168 : index
    %c0_223 = arith.constant 0 : index
    %356 = vector.load %arg5[%c168_222, %c0_223] : memref<216x8xf32, #tpu.memory_space<vmem>>, vector<8x8xf32>
    %cst_224 = arith.constant dense<0.000000e+00> : vector<8x1024xf32>
    %357 = tpu.matmul %356, %355, %cst_224 {dimension_numbers = #tpu.dot_dimension_numbers<[1], [0], [0], [1], [0, 0, 1, 1], [], []>} : vector<8x8xf32>, vector<8x1024xf32>, vector<8x1024xf32> -> vector<8x1024xf32>
    %358 = arith.addf %351, %357 : vector<8x1024xf32>
    %c960_i32_225 = arith.constant 960 : i32
    %359 = tpu.dynamic_rotate %209 by %c960_i32_225 dim 1 : vector<8x1024xf32>, i32 -> vector<8x1024xf32>
    %c22_226 = arith.constant 22 : index
    %c0_227 = arith.constant 0 : index
    %360 = vector.load %arg1[%c22_226, %c0_227] : memref<27x1024xf32, #tpu.memory_space<vmem>>, vector<1x1024xf32>
    %361 = vector.broadcast %360 : vector<1x1024xf32> to vector<8x1024xf32>
    %362 = arith.mulf %359, %361 : vector<8x1024xf32>
    %c176_228 = arith.constant 176 : index
    %c0_229 = arith.constant 0 : index
    %363 = vector.load %arg5[%c176_228, %c0_229] : memref<216x8xf32, #tpu.memory_space<vmem>>, vector<8x8xf32>
    %cst_230 = arith.constant dense<0.000000e+00> : vector<8x1024xf32>
    %364 = tpu.matmul %363, %362, %cst_230 {dimension_numbers = #tpu.dot_dimension_numbers<[1], [0], [0], [1], [0, 0, 1, 1], [], []>} : vector<8x8xf32>, vector<8x1024xf32>, vector<8x1024xf32> -> vector<8x1024xf32>
    %365 = arith.addf %358, %364 : vector<8x1024xf32>
    %c959_i32_231 = arith.constant 959 : i32
    %366 = tpu.dynamic_rotate %209 by %c959_i32_231 dim 1 : vector<8x1024xf32>, i32 -> vector<8x1024xf32>
    %c23_232 = arith.constant 23 : index
    %c0_233 = arith.constant 0 : index
    %367 = vector.load %arg1[%c23_232, %c0_233] : memref<27x1024xf32, #tpu.memory_space<vmem>>, vector<1x1024xf32>
    %368 = vector.broadcast %367 : vector<1x1024xf32> to vector<8x1024xf32>
    %369 = arith.mulf %366, %368 : vector<8x1024xf32>
    %c184_234 = arith.constant 184 : index
    %c0_235 = arith.constant 0 : index
    %370 = vector.load %arg5[%c184_234, %c0_235] : memref<216x8xf32, #tpu.memory_space<vmem>>, vector<8x8xf32>
    %cst_236 = arith.constant dense<0.000000e+00> : vector<8x1024xf32>
    %371 = tpu.matmul %370, %369, %cst_236 {dimension_numbers = #tpu.dot_dimension_numbers<[1], [0], [0], [1], [0, 0, 1, 1], [], []>} : vector<8x8xf32>, vector<8x1024xf32>, vector<8x1024xf32> -> vector<8x1024xf32>
    %372 = arith.addf %365, %371 : vector<8x1024xf32>
    %c953_i32_237 = arith.constant 953 : i32
    %373 = tpu.dynamic_rotate %209 by %c953_i32_237 dim 1 : vector<8x1024xf32>, i32 -> vector<8x1024xf32>
    %c24_238 = arith.constant 24 : index
    %c0_239 = arith.constant 0 : index
    %374 = vector.load %arg1[%c24_238, %c0_239] : memref<27x1024xf32, #tpu.memory_space<vmem>>, vector<1x1024xf32>
    %375 = vector.broadcast %374 : vector<1x1024xf32> to vector<8x1024xf32>
    %376 = arith.mulf %373, %375 : vector<8x1024xf32>
    %c192_240 = arith.constant 192 : index
    %c0_241 = arith.constant 0 : index
    %377 = vector.load %arg5[%c192_240, %c0_241] : memref<216x8xf32, #tpu.memory_space<vmem>>, vector<8x8xf32>
    %cst_242 = arith.constant dense<0.000000e+00> : vector<8x1024xf32>
    %378 = tpu.matmul %377, %376, %cst_242 {dimension_numbers = #tpu.dot_dimension_numbers<[1], [0], [0], [1], [0, 0, 1, 1], [], []>} : vector<8x8xf32>, vector<8x1024xf32>, vector<8x1024xf32> -> vector<8x1024xf32>
    %379 = arith.addf %372, %378 : vector<8x1024xf32>
    %c952_i32_243 = arith.constant 952 : i32
    %380 = tpu.dynamic_rotate %209 by %c952_i32_243 dim 1 : vector<8x1024xf32>, i32 -> vector<8x1024xf32>
    %c25_244 = arith.constant 25 : index
    %c0_245 = arith.constant 0 : index
    %381 = vector.load %arg1[%c25_244, %c0_245] : memref<27x1024xf32, #tpu.memory_space<vmem>>, vector<1x1024xf32>
    %382 = vector.broadcast %381 : vector<1x1024xf32> to vector<8x1024xf32>
    %383 = arith.mulf %380, %382 : vector<8x1024xf32>
    %c200_246 = arith.constant 200 : index
    %c0_247 = arith.constant 0 : index
    %384 = vector.load %arg5[%c200_246, %c0_247] : memref<216x8xf32, #tpu.memory_space<vmem>>, vector<8x8xf32>
    %cst_248 = arith.constant dense<0.000000e+00> : vector<8x1024xf32>
    %385 = tpu.matmul %384, %383, %cst_248 {dimension_numbers = #tpu.dot_dimension_numbers<[1], [0], [0], [1], [0, 0, 1, 1], [], []>} : vector<8x8xf32>, vector<8x1024xf32>, vector<8x1024xf32> -> vector<8x1024xf32>
    %386 = arith.addf %379, %385 : vector<8x1024xf32>
    %c951_i32_249 = arith.constant 951 : i32
    %387 = tpu.dynamic_rotate %209 by %c951_i32_249 dim 1 : vector<8x1024xf32>, i32 -> vector<8x1024xf32>
    %c26_250 = arith.constant 26 : index
    %c0_251 = arith.constant 0 : index
    %388 = vector.load %arg1[%c26_250, %c0_251] : memref<27x1024xf32, #tpu.memory_space<vmem>>, vector<1x1024xf32>
    %389 = vector.broadcast %388 : vector<1x1024xf32> to vector<8x1024xf32>
    %390 = arith.mulf %387, %389 : vector<8x1024xf32>
    %c208_252 = arith.constant 208 : index
    %c0_253 = arith.constant 0 : index
    %391 = vector.load %arg5[%c208_252, %c0_253] : memref<216x8xf32, #tpu.memory_space<vmem>>, vector<8x8xf32>
    %cst_254 = arith.constant dense<0.000000e+00> : vector<8x1024xf32>
    %392 = tpu.matmul %391, %390, %cst_254 {dimension_numbers = #tpu.dot_dimension_numbers<[1], [0], [0], [1], [0, 0, 1, 1], [], []>} : vector<8x8xf32>, vector<8x1024xf32>, vector<8x1024xf32> -> vector<8x1024xf32>
    %393 = arith.addf %386, %392 : vector<8x1024xf32>
    %cst_255 = arith.constant dense<0.000000e+00> : vector<8x1xf32>
    %394 = tpu.matmul %393, %1, %cst_255 {dimension_numbers = #tpu.dot_dimension_numbers<[1], [0], [0], [1], [0, 0, 1, 1], [], []>} : vector<8x1024xf32>, vector<1024x1xf32>, vector<8x1xf32> -> vector<8x1xf32>
    %395 = arith.mulf %393, %393 : vector<8x1024xf32>
    %cst_256 = arith.constant dense<0.000000e+00> : vector<8x1xf32>
    %396 = tpu.matmul %395, %1, %cst_256 {dimension_numbers = #tpu.dot_dimension_numbers<[1], [0], [0], [1], [0, 0, 1, 1], [], []>} : vector<8x1024xf32>, vector<1024x1xf32>, vector<8x1xf32> -> vector<8x1xf32>
    %cst_257 = arith.constant 9.765625E-4 : f32
    %397 = vector.broadcast %cst_257 : f32 to vector<8x1xf32>
    %398 = arith.mulf %394, %397 : vector<8x1xf32>
    %cst_258 = arith.constant 9.765625E-4 : f32
    %399 = vector.broadcast %cst_258 : f32 to vector<8x1xf32>
    %400 = arith.mulf %396, %399 : vector<8x1xf32>
    %401 = arith.mulf %398, %398 : vector<8x1xf32>
    %402 = arith.subf %400, %401 : vector<8x1xf32>
    %403 = vector.broadcast %398 : vector<8x1xf32> to vector<8x1024xf32>
    %404 = arith.subf %393, %403 : vector<8x1024xf32>
    %cst_259 = arith.constant 9.99999974E-6 : f32
    %405 = vector.broadcast %cst_259 : f32 to vector<8x1xf32>
    %406 = arith.addf %402, %405 : vector<8x1xf32>
    %407 = math.rsqrt %406 : vector<8x1xf32>
    %408 = vector.broadcast %407 : vector<8x1xf32> to vector<8x1024xf32>
    %409 = arith.mulf %404, %408 : vector<8x1024xf32>
    %c0_260 = arith.constant 0 : index
    %c0_261 = arith.constant 0 : index
    %410 = vector.load %arg6[%c0_260, %c0_261] : memref<8x1xf32, #tpu.memory_space<vmem>>, vector<8x1xf32>
    %411 = vector.broadcast %410 : vector<8x1xf32> to vector<8x1024xf32>
    %412 = arith.mulf %409, %411 : vector<8x1024xf32>
    %c0_262 = arith.constant 0 : index
    %c0_263 = arith.constant 0 : index
    %413 = vector.load %arg7[%c0_262, %c0_263] : memref<8x1xf32, #tpu.memory_space<vmem>>, vector<8x1xf32>
    %414 = vector.broadcast %413 : vector<8x1xf32> to vector<8x1024xf32>
    %415 = arith.addf %412, %414 : vector<8x1024xf32>
    %cst_264 = arith.constant 0.000000e+00 : f32
    %416 = vector.broadcast %cst_264 : f32 to vector<8x1024xf32>
    %417 = arith.maximumf %415, %416 : vector<8x1024xf32>
    %418 = arith.addf %417, %0 : vector<8x1024xf32>
    %c0_265 = arith.constant 0 : index
    %c0_266 = arith.constant 0 : index
    %419 = vector.load %arg8[%c0_265, %c0_266] : memref<8x1024xf32, #tpu.memory_space<vmem>>, vector<8x1024xf32>
    tpu.vector_store %arg8[%c0_265, %c0_266], %418 {strides = array<i32>} : memref<8x1024xf32, #tpu.memory_space<vmem>>, vector<8x1024xf32>,
    return
  }
}

</mosaic_0001>

<bundles_post_ra>
// kernel: resnet_block_forward.1
= control target key start
LH: loop header
LB: loop body
LE: loop exit
PB: predicated region body
PF: predicated region fallthrough
CT: control target
= control target key end

     0   :  { %v25409_v2 = vmov 0.0   ;;  %s21243_s9 = smov 73   ;;  %s21244_s22 = smov 72   ;;  %v54_v9 = vlaneseq  ;;  %vm118_vm1 = vcmask 64512   ;;  %s25400_s0 = inlined_call_operand.vmem [shape: f32[8,1024], index: 0, kind: input, shape index: {}]   ;;  %s25401_s1 = inlined_call_operand.vmem [shape: f32[27,1024], index: 1, kind: input, shape index: {}]   ;;  %s25402_s2 = inlined_call_operand.vmem [shape: f32[216,8], index: 2, kind: input, shape index: {}]   ;;  %s25403_s4 = inlined_call_operand.vmem [shape: f32[8,1], index: 4, kind: input, shape index: {}]   ;;  %s25404_s3 = inlined_call_operand.vmem [shape: f32[8,1], index: 3, kind: input, shape index: {}]   ;;  %s25405_s5 = inlined_call_operand.vmem [shape: f32[216,8], index: 5, kind: input, shape index: {}]   ;;  %s25406_s6 = inlined_call_operand.vmem [shape: f32[8,1], index: 6, kind: input, shape index: {}]   ;;  %s25407_s7 = inlined_call_operand.vmem [shape: f32[8,1], index: 7, kind: input, shape index: {}]   ;;  %s25408_s8 = inlined_call_operand.vmem [shape: f32[8,1024], index: 8, kind: output, shape index: {}]  }
   0x1   :  { %v21310_v0 = vld [vmem:[%s25400_s0 + $0x38] sm:$0xff]  ;;  %v21315_v1 = vld [vmem:[%s25400_s0] sm:$0xff]  ;;  %186 = vmatprep.mubr.f32.mxu0 %v25409_v2  ;;  %257 = vmatprep.mubr.f32.mxu1 %v25409_v2  ;;  %v21326_v3 = vld [vmem:[%s25400_s0 + $0x10] sm:$0xff]  ;;  %s21245_s23 = smov 71   ;;  %s21246_s24 = smov 65  }
   0x2   :  { %52 = vrot.lane.b32.xlu1 %v21310_v0, %s21243_s9  ;;  %38 = vrot.lane.b32.xlu0 %v21315_v1, %s21243_s9  ;;  %v21331_v4 = vld [vmem:[%s25400_s0 + $0x8] sm:$0xff]  ;;  %v21340_v5 = vld [vmem:[%s25400_s0 + $0x20] sm:$0xff]  ;;  %s21247_s25 = smov 64   ;;  %s21248_s26 = smov 63   ;;  %v70_v10 = vshrl.u32 %v54_v9, 7  ;;  %v21467_v13 = vand.u32 127, %v54_v9 }
   0x3   :  { %v21345_v6 = vld [vmem:[%s25400_s0 + $0x18] sm:$0xff]  ;;  %v21354_v7 = vld [vmem:[%s25400_s0 + $0x30] sm:$0xff]  ;;  %v21359_v8 = vld [vmem:[%s25400_s0 + $0x28] sm:$0xff]  ;;  %s21249_s27 = smov 57   ;;  %s21250_s11 = smov 56  }
   0x4   :  { %v65_v11 = vld [vmem:[%s25401_s1] ss:$8 sm:$0xf]  ;;  %v21473_v14 = vsub.s32 1, %v70_v10  ;;  %v21475_v16 = vsub.s32 0, %v70_v10  ;;  %vm56_vm0 = vcmp.lt.s32.totalorder %v21467_v13, 73 }
   0x5   :  { %v66_v12 = vld [vmem:[%s25401_s1] ss:$8 sm:$0xf0]  ;;  %v21485_v20 = vsub.s32 3, %v70_v10  ;;  %v21487_v21 = vsub.s32 2, %v70_v10  ;;  %v21504_v27 = vsub.s32 6, %v70_v10 }
   0x6   :  { %42 = vrot.lane.b32.xlu1 %v21326_v3, %s21243_s9  ;;  %40 = vrot.lane.b32.xlu0 %v21331_v4, %s21243_s9  ;;  %v67_v15 = vor.u32 %v66_v12, %v65_v11  ;;  %v21511_v30 = vsub.s32 5, %v70_v10  ;;  %v21518_v34 = vsub.s32 4, %v70_v10  ;;  %v117_v37 = vld [vmem:[%s25402_s2] sm:$0xff]  ;;  %v21527_v38 = vsub.s32 7, %v70_v10  ;;  %s21251_s18 = smov 55   ;;  %v37_v10 = vld [vmem:[%s25402_s2 + $0x68] sm:$0xff] }
   0x7   :  { %v19710_v52 = vld [vmem:[%s25401_s1 + $0x1] ss:$8 sm:$0xf]  ;;  %vm709_vm2 = vcmp.lt.s32.totalorder %v21467_v13, 72  ;;  %vm1083_vm3 = vcmp.lt.s32.totalorder %v21467_v13, 71  ;;  %s21252_s10 = smov 9  }
   0x8   :  { %v21483_v19 = vrot.slane %v67_v15, %v21473_v14  ;;  %v21490_v22 = vrot.slane %v67_v15, %v21475_v16  ;;  %v21509_v29 = vrot.slane %v67_v15, %v21485_v20  ;;  %v21516_v32 = vrot.slane %v67_v15, %v21487_v21  ;;  %v19711_v53 = vld [vmem:[%s25401_s1 + $0x1] ss:$8 sm:$0xf0]  ;;  %v19716_v12 = vld [vmem:[%s25401_s1 + $0x2] ss:$8 sm:$0xf] }
   0x9   :  { %v21540_v41 = vrot.slane %v67_v15, %v21504_v27  ;;  %v21546_v43 = vrot.slane %v67_v15, %v21511_v30  ;;  %v21549_v44 = vrot.slane %v67_v15, %v21527_v38  ;;  %v21552_v45 = vrot.slane %v67_v15, %v21518_v34  ;;  %v19717_v15 = vld [vmem:[%s25401_s1 + $0x2] ss:$8 sm:$0xf0]  ;;  %s21253_s21 = smov 8   ;;  %s21254_s15 = smov 7  }
   0xa   :  { %46 = vrot.lane.b32.xlu1 %v21340_v5, %s21243_s9  ;;  %44 = vrot.lane.b32.xlu0 %v21345_v6, %s21243_s9  ;;  %25696 = vst [vmem:[#allocation2_spill] sm:$0xff] %v21483_v19  ;;  %25697 = vst [vmem:[#allocation3_spill] sm:$0xff] %v21490_v22  ;;  %v721_v60 = vor.u32 %v19711_v53, %v19710_v52  ;;  %vm1457_vm4 = vcmp.lt.s32.totalorder %v21467_v13, 65  ;;  %vm1831_vm5 = vcmp.lt.s32.totalorder %v21467_v13, 64  ;;  %vm2205_vm6 = vcmp.lt.s32.totalorder %v21467_v13, 63  ;;  %s21255_s30 = smov 1  }
   0xb   :  { %25698 = vst [vmem:[#allocation4_spill] sm:$0xff] %v21509_v29  ;;  %25699 = vst [vmem:[#allocation5_spill] sm:$0xff] %v21516_v32  ;;  %vm2579_vm7 = vcmp.lt.s32.totalorder %v21467_v13, 57  ;;  %s21256_s20 = smov 127   ;;  %vm2953_vm8 = vcmp.lt.s32.totalorder %v21467_v13, 56  ;;  %s21257_s12 = smov 121  }
   0xc   :  { %25700 = vst [vmem:[#allocation6_spill] sm:$0xff] %v21540_v41  ;;  %25701 = vst [vmem:[#allocation7_spill] sm:$0xff] %v21546_v43  ;;  %v21599_v63 = vrot.slane %v721_v60, %v21473_v14  ;;  %v21617_v11 = vrot.slane %v721_v60, %v21485_v20  ;;  %vm3327_vm9 = vcmp.lt.s32.totalorder %v21467_v13, 55  ;;  %s25520_s19 = smov 120   ;;  %vm3701_vm10 = vcmp.lt.s32.totalorder %v21467_v13, 9  ;;  %s21259_s28 = smov 119  }
   0xd   :  { %25702 = vst [vmem:[#allocation8_spill] sm:$0xff] %v21549_v44  ;;  %25703 = vst [vmem:[#allocation9_spill] sm:$0xff] %v21552_v45  ;;  %vm4075_vm11 = vcmp.lt.s32.totalorder %v21467_v13, 8  ;;  %vm4449_vm12 = vcmp.lt.s32.totalorder %v21467_v13, 7  ;;  %vm4823_vm13 = vcmp.lt.s32.totalorder %v21467_v13, 1  ;;  %vm25567_vm14 = vcmp.lt.s32.totalorder %v21467_v13, 127 }
   0xe   :  { %50 = vrot.lane.b32.xlu1 %v21354_v7, %s21243_s9  ;;  %48 = vrot.lane.b32.xlu0 %v21359_v8, %s21243_s9  ;;  %25704 = vst [vmem:[#allocation10_spill] sm:$0xff] %v21599_v63  ;;  %25705 = vst [vmem:[#allocation11_spill] sm:$0xff] %v21617_v11  ;;  %vm25576_vm15 = vcmp.lt.s32.totalorder %v21467_v13, 121 }
  0x12   :  { %695 = vrot.lane.b32.xlu1 %v21331_v4, %s21244_s22  ;;  %693 = vrot.lane.b32.xlu0 %v21315_v1, %s21244_s22 }
  0x16   :  { %697 = vrot.lane.b32.xlu1 %v21326_v3, %s21244_s22  ;;  %707 = vrot.lane.b32.xlu0 %v21310_v0, %s21244_s22 }
  0x1a   :  { %701 = vrot.lane.b32.xlu1 %v21340_v5, %s21244_s22  ;;  %699 = vrot.lane.b32.xlu0 %v21345_v6, %s21244_s22 }
  0x1e   :  { %705 = vrot.lane.b32.xlu1 %v21354_v7, %s21244_s22  ;;  %703 = vrot.lane.b32.xlu0 %v21359_v8, %s21244_s22 }
  0x22   :  { %1069 = vrot.lane.b32.xlu1 %v21331_v4, %s21245_s23  ;;  %1067 = vrot.lane.b32.xlu0 %v21315_v1, %s21245_s23 }
  0x26   :  { %1071 = vrot.lane.b32.xlu1 %v21326_v3, %s21245_s23  ;;  %1081 = vrot.lane.b32.xlu0 %v21310_v0, %s21245_s23 }
  0x2a   :  { %1075 = vrot.lane.b32.xlu1 %v21340_v5, %s21245_s23  ;;  %1073 = vrot.lane.b32.xlu0 %v21345_v6, %s21245_s23 }
  0x2e   :  { %1079 = vrot.lane.b32.xlu1 %v21354_v7, %s21245_s23  ;;  %1077 = vrot.lane.b32.xlu0 %v21359_v8, %s21245_s23 }
  0x32   :  { %1443 = vrot.lane.b32.xlu1 %v21331_v4, %s21246_s24  ;;  %1441 = vrot.lane.b32.xlu0 %v21315_v1, %s21246_s24 }
  0x36   :  { %1445 = vrot.lane.b32.xlu1 %v21326_v3, %s21246_s24  ;;  %1455 = vrot.lane.b32.xlu0 %v21310_v0, %s21246_s24 }
  0x3a   :  { %1449 = vrot.lane.b32.xlu1 %v21340_v5, %s21246_s24  ;;  %1447 = vrot.lane.b32.xlu0 %v21345_v6, %s21246_s24 }
  0x3e   :  { %1453 = vrot.lane.b32.xlu1 %v21354_v7, %s21246_s24  ;;  %1451 = vrot.lane.b32.xlu0 %v21359_v8, %s21246_s24 }
  0x42   :  { %1817 = vrot.lane.b32.xlu1 %v21331_v4, %s21247_s25  ;;  %1815 = vrot.lane.b32.xlu0 %v21315_v1, %s21247_s25 }
  0x46   :  { %1819 = vrot.lane.b32.xlu1 %v21326_v3, %s21247_s25  ;;  %1829 = vrot.lane.b32.xlu0 %v21310_v0, %s21247_s25 }
  0x4a   :  { %1823 = vrot.lane.b32.xlu1 %v21340_v5, %s21247_s25  ;;  %1821 = vrot.lane.b32.xlu0 %v21345_v6, %s21247_s25 }
  0x4e   :  { %1827 = vrot.lane.b32.xlu1 %v21354_v7, %s21247_s25  ;;  %1825 = vrot.lane.b32.xlu0 %v21359_v8, %s21247_s25 }
  0x52   :  { %2191 = vrot.lane.b32.xlu1 %v21331_v4, %s21248_s26  ;;  %2189 = vrot.lane.b32.xlu0 %v21315_v1, %s21248_s26 }
  0x56   :  { %2193 = vrot.lane.b32.xlu1 %v21326_v3, %s21248_s26  ;;  %2203 = vrot.lane.b32.xlu0 %v21310_v0, %s21248_s26 }
  0x5a   :  { %2197 = vrot.lane.b32.xlu1 %v21340_v5, %s21248_s26  ;;  %2195 = vrot.lane.b32.xlu0 %v21345_v6, %s21248_s26 }
  0x5e   :  { %2201 = vrot.lane.b32.xlu1 %v21354_v7, %s21248_s26  ;;  %2199 = vrot.lane.b32.xlu0 %v21359_v8, %s21248_s26 }
  0x62   :  { %2565 = vrot.lane.b32.xlu1 %v21331_v4, %s21249_s27  ;;  %2563 = vrot.lane.b32.xlu0 %v21315_v1, %s21249_s27 }
  0x66   :  { %2567 = vrot.lane.b32.xlu1 %v21326_v3, %s21249_s27  ;;  %2577 = vrot.lane.b32.xlu0 %v21310_v0, %s21249_s27 }
  0x6a   :  { %2571 = vrot.lane.b32.xlu1 %v21340_v5, %s21249_s27  ;;  %2569 = vrot.lane.b32.xlu0 %v21345_v6, %s21249_s27 }
  0x6e   :  { %2575 = vrot.lane.b32.xlu1 %v21354_v7, %s21249_s27  ;;  %2573 = vrot.lane.b32.xlu0 %v21359_v8, %s21249_s27 }
  0x72   :  { %2939 = vrot.lane.b32.xlu1 %v21331_v4, %s21250_s11  ;;  %2937 = vrot.lane.b32.xlu0 %v21315_v1, %s21250_s11 }
  0x74   :  { %v53_v17 = vpop.permute.xlu1 %52  ;;  %v39_v18 = vpop.permute.xlu0 %38 }
  0x75   :  { %v21494_v25 = vsel %vm56_vm0, %v53_v17, %v39_v18 }
  0x76   :  { %2941 = vrot.lane.b32.xlu1 %v21326_v3, %s21250_s11  ;;  %2951 = vrot.lane.b32.xlu0 %v21310_v0, %s21250_s11  ;;  %v109_v31 = vmul.f32 %v21490_v22, %v21494_v25 }
  0x78   :  { %v43_v23 = vpop.permute.xlu1 %42  ;;  %v41_v24 = vpop.permute.xlu0 %40 }
  0x79   :  { %v21498_v26 = vsel %vm56_vm0, %v39_v18, %v41_v24  ;;  %v21522_v36 = vsel %vm56_vm0, %v41_v24, %v43_v23 }
  0x7a   :  { %2945 = vrot.lane.b32.xlu1 %v21340_v5, %s21250_s11  ;;  %2943 = vrot.lane.b32.xlu0 %v21345_v6, %s21250_s11  ;;  %v110_v28 = vmul.f32 %v21483_v19, %v21498_v26  ;;  %v111_v42 = vmul.f32 %v21516_v32, %v21522_v36 }
  0x7c   :  { %v47_v33 = vpop.permute.xlu1 %46  ;;  %122 = vmatprep.subr.mxu0 %v110_v28  ;;  %v45_v35 = vpop.permute.xlu0 %44 }
  0x7d   :  { %123 = vmatpush1.msra.mxu0 %v109_v31  ;;  %v21531_v39 = vsel %vm56_vm0, %v43_v23, %v45_v35  ;;  %v21557_v48 = vsel %vm56_vm0, %v45_v35, %v47_v33  ;;  %v21646_v35 = vor.u32 %v19717_v15, %v19716_v12 }
  0x7e   :  { %2949 = vrot.lane.b32.xlu1 %v21354_v7, %s21250_s11  ;;  %2947 = vrot.lane.b32.xlu0 %v21359_v8, %s21250_s11  ;;  %v112_v40 = vmul.f32 %v21509_v29, %v21531_v39  ;;  %v113_v57 = vmul.f32 %v21552_v45, %v21557_v48 }
  0x7f   :  { %19702 = vmatmul.mubr.msk.f32.vlgmr.msra.gmra.mrb[0].mxu0 %vm118_vm1, %v117_v37 }
  0x80   :  { %v51_v46 = vpop.permute.xlu1 %50  ;;  %193 = vmatprep.subr.mxu1 %v112_v40  ;;  %v49_v47 = vpop.permute.xlu0 %48  ;;  %328 = vmatprep.mubr.f32.mxu0 %v25409_v2  ;;  %v21653_v40 = vrot.slane %v721_v60, %v21511_v30 }
  0x81   :  { %v21561_v49 = vsel %vm56_vm0, %v51_v46, %v53_v17  ;;  %v21565_v50 = vsel %vm56_vm0, %v49_v47, %v51_v46  ;;  %v21569_v51 = vsel %vm56_vm0, %v47_v33, %v49_v47  ;;  %194 = vmatpush1.msra.mxu1 %v111_v42  ;;  %v21626_v17 = vrot.slane %v721_v60, %v21475_v16 }
  0x82   :  { %v115_v54 = vmul.f32 %v21540_v41, %v21565_v50  ;;  %3313 = vrot.lane.b32.xlu1 %v21331_v4, %s21251_s18  ;;  %3311 = vrot.lane.b32.xlu0 %v21315_v1, %s21251_s18  ;;  %v114_v55 = vmul.f32 %v21546_v43, %v21569_v51  ;;  %v116_v56 = vmul.f32 %v21549_v44, %v21561_v49 }
  0x83   :  { %19703 = vmatmul.mubr.msk.f32.vlgmr.msra.gmra.mrb[0].mxu1 %vm118_vm1, %v117_v37  ;;  %25706 = vst [vmem:[#allocation12_spill] sm:$0xff] %v21626_v17  ;;  %v21643_v33 = vrot.slane %v721_v60, %v21487_v21  ;;  %25708 = vst [vmem:[#allocation14_spill] sm:$0xff] %v21653_v40  ;;  %v21656_v42 = vrot.slane %v721_v60, %v21527_v38 }
  0x84   :  { %v696_v58 = vpop.permute.xlu1 %695  ;;  %v694_v59 = vpop.permute.xlu0 %693  ;;  %399 = vmatprep.mubr.f32.mxu1 %v25409_v2  ;;  %264 = vmatprep.subr.mxu0 %v114_v55  ;;  %v21675_v55 = vrot.slane %v721_v60, %v21504_v27 }
  0x85   :  { %335 = vmatprep.subr.mxu1 %v116_v56  ;;  %265 = vmatpush1.msra.mxu0 %v113_v57  ;;  %v21603_v9 = vsel %vm709_vm2, %v694_v59, %v696_v58  ;;  %25707 = vst [vmem:[#allocation13_spill] sm:$0xff] %v21643_v33  ;;  %25709 = vst [vmem:[#allocation15_spill] sm:$0xff] %v21656_v42  ;;  %v21682_v57 = vrot.slane %v721_v60, %v21518_v34 }
  0x86   :  { %336 = vmatpush1.msra.mxu1 %v115_v54  ;;  %3315 = vrot.lane.b32.xlu1 %v21326_v3, %s21251_s18  ;;  %v764_v18 = vmul.f32 %v21599_v63, %v21603_v9  ;;  %25710 = vst [vmem:[#allocation16_spill] sm:$0xff] %v21675_v55 }
  0x87   :  { %3325 = vrot.lane.b32.xlu0 %v21310_v0, %s21251_s18  ;;  %19704 = vmatmul.mubr.msk.f32.vlgmr.msra.gmra.mrb[2].mxu0 %vm118_vm1, %v117_v37  ;;  %25711 = vst [vmem:[#allocation17_spill] sm:$0xff] %v21682_v57 }
  0x88   :  { %409 = vmatprep.subr.mxu0 %v21331_v4  ;;  %v698_v61 = vpop.permute.xlu1 %697  ;;  %v708_v62 = vpop.permute.xlu0 %707  ;;  %19705 = vmatmul.mubr.msk.f32.vlgmr.msra.gmra.mrb[2].mxu1 %vm118_vm1, %v117_v37 }
  0x89   :  { %410 = vmatpush1.msra.mxu0 %v21315_v1  ;;  %473 = vmatprep.mubr.f32.mxu0 %v25409_v2  ;;  %v21634_v28 = vsel %vm709_vm2, %v708_v62, %v694_v59  ;;  %v21660_v46 = vsel %vm709_vm2, %v696_v58, %v698_v61  ;;  %v21692_v59 = vrot.slane %v21646_v35, %v21473_v14 }
  0x8a   :  { %551 = vmatprep.subr.mxu0 %v21359_v8  ;;  %3319 = vrot.lane.b32.xlu1 %v21340_v5, %s21251_s18  ;;  %v763_v47 = vmul.f32 %v21626_v17, %v21634_v28 }
  0x8b   :  { %3317 = vrot.lane.b32.xlu0 %v21345_v6, %s21251_s18  ;;  %19706 = vmatmul.mubr.msk.f32.vlgmr.msra.gmra.mrb[0].mxu0 %vm118_vm1, %v37_v10  ;;  %25712 = vst [vmem:[#allocation18_spill] sm:$0xff] %v21692_v59 }
  0x8c   :  { %480 = vmatprep.subr.mxu1 %v21345_v6  ;;  %v702_v23 = vpop.permute.xlu1 %701  ;;  %v700_v24 = vpop.permute.xlu0 %699  ;;  %552 = vmatpush1.msra.mxu0 %v21340_v5 }
  0x8d   :  { %481 = vmatpush1.msra.mxu1 %v21326_v3  ;;  %v21640_v31 = vsel %vm709_vm2, %v698_v61, %v700_v24  ;;  %775 = vmatprep.subr.mxu0 %v764_v18  ;;  %v765_v61 = vmul.f32 %v21643_v33, %v21660_v46  ;;  %v21703_v12 = vsel %vm709_vm2, %v700_v24, %v702_v23 }
  0x8e   :  { %544 = vmatprep.mubr.f32.mxu1 %v25409_v2  ;;  %615 = vmatprep.mubr.f32.mxu0 %v25409_v2  ;;  %v766_v37 = vmul.f32 %v21617_v11, %v21640_v31  ;;  %v767_v24 = vmul.f32 %v21682_v57, %v21703_v12  ;;  %v21796_v33 = vrot.slane %v21646_v35, %v21518_v34 }
  0x8f   :  { %19707 = vmatmul.mubr.msk.f32.vlgmr.msra.gmra.mrb[0].mxu1 %vm118_vm1, %v37_v10  ;;  %3323 = vrot.lane.b32.xlu1 %v21354_v7, %s21251_s18 }
  0x90   :  { %3321 = vrot.lane.b32.xlu0 %v21359_v8, %s21251_s18  ;;  %v706_v52 = vpop.permute.xlu1 %705  ;;  %v704_v53 = vpop.permute.xlu0 %703  ;;  %19708 = vmatmul.mubr.msk.f32.vlgmr.msra.gmra.mrb[2].mxu0 %vm118_vm1, %v37_v10  ;;  %25720 = vst [vmem:[#allocation25_spill] sm:$0xff] %v21796_v33 }
  0x91   :  { %622 = vmatprep.subr.mxu1 %v21310_v0  ;;  %v21672_v54 = vsel %vm709_vm2, %v706_v52, %v708_v62  ;;  %v21679_v56 = vsel %vm709_vm2, %v702_v23, %v704_v53  ;;  %776 = vmatpush1.msra.mxu0 %v763_v47  ;;  %v21687_v58 = vsel %vm709_vm2, %v704_v53, %v706_v52 }
  0x92   :  { %623 = vmatpush1.msra.mxu1 %v21354_v7  ;;  %686 = vmatprep.mubr.f32.mxu1 %v25409_v2  ;;  %v768_v60 = vmul.f32 %v21653_v40, %v21679_v56  ;;  %v770_v62 = vmul.f32 %v21656_v42, %v21672_v54  ;;  %v21723_v23 = vrot.slane %v21646_v35, %v21475_v16  ;;  %v1145_v42 = vld [vmem:[%s25402_s2 + $0x10] sm:$0xff] }
  0x93   :  { %846 = vmatprep.subr.mxu1 %v766_v37  ;;  %19709 = vmatmul.mubr.msk.f32.vlgmr.msra.gmra.mrb[2].mxu1 %vm118_vm1, %v37_v10  ;;  %v769_v37 = vmul.f32 %v21675_v55, %v21687_v58  ;;  %v771_v10 = vld [vmem:[%s25402_s2 + $0x8] sm:$0xff]  ;;  %v21788_v40 = vrot.slane %v21646_v35, %v21511_v30 }
  0x94   :  { %3687 = vrot.lane.b32.xlu1 %v21331_v4, %s21252_s10  ;;  %v1070_v15 = vpop.permute.xlu1 %1069  ;;  %v1068_v18 = vpop.permute.xlu0 %1067  ;;  %847 = vmatpush1.msra.mxu1 %v765_v61  ;;  %25713 = vst [vmem:[#allocation19_spill] sm:$0xff] %v21723_v23 }
  0x95   :  { %3685 = vrot.lane.b32.xlu0 %v21315_v1, %s21252_s10  ;;  %v21714_v47 = vsel %vm1083_vm3, %v1068_v18, %v1070_v15  ;;  %839 = vmatprep.mubr.f32.mxu0 %v25409_v2  ;;  %25718 = vst [vmem:[#allocation23_spill] sm:$0xff] %v21788_v40 }
  0x96   :  { %910 = vmatprep.mubr.f32.mxu1 %v25409_v2  ;;  %917 = vmatprep.subr.mxu0 %v768_v60  ;;  %v1138_v52 = vmul.f32 %v21692_v59, %v21714_v47  ;;  %v19723_v59 = vld [vmem:[%s25401_s1 + $0x3] ss:$8 sm:$0xf0] }
  0x97   :  { %988 = vmatprep.subr.mxu1 %v770_v62  ;;  %19712 = vmatmul.mubr.msk.f32.vlgmr.msra.gmra.mrb[0].mxu0 %vm118_vm1, %v771_v10  ;;  %v21743_v62 = vrot.slane %v21646_v35, %v21485_v20 }
  0x98   :  { %19713 = vmatmul.mubr.msk.f32.vlgmr.msra.gmra.mrb[0].mxu1 %vm118_vm1, %v771_v10  ;;  %v1072_v53 = vpop.permute.xlu1 %1071  ;;  %v1082_v61 = vpop.permute.xlu0 %1081  ;;  %918 = vmatpush1.msra.mxu0 %v767_v24  ;;  %v19722_v24 = vld [vmem:[%s25401_s1 + $0x3] ss:$8 sm:$0xf] }
  0x99   :  { %989 = vmatpush1.msra.mxu1 %v769_v37  ;;  %v21733_v2 = vsel %vm1083_vm3, %v1082_v61, %v1068_v18  ;;  %3689 = vrot.lane.b32.xlu1 %v21326_v3, %s21252_s10  ;;  %25714 = vst [vmem:[#allocation20_spill] sm:$0xff] %v21743_v62  ;;  %v21747_v37 = vrot.slane %v21646_v35, %v21487_v21  ;;  %v25716_v18 = vmov 0.0  }
  0x9a   :  { %3699 = vrot.lane.b32.xlu0 %v21310_v0, %s21252_s10  ;;  %v1137_v60 = vmul.f32 %v21723_v23, %v21733_v2  ;;  %1149 = vmatprep.subr.mxu0 %v1138_v52  ;;  %v21758_v23 = vsel %vm1083_vm3, %v1070_v15, %v1072_v53 }
  0x9b   :  { %25715 = vst [vmem:[#allocation21_spill] sm:$0xff] %v21747_v37  ;;  %981 = vmatprep.mubr.f32.mxu0 %v25716_v18  ;;  %1052 = vmatprep.mubr.f32.mxu1 %v25716_v18 }
  0x9c   :  { %v1076_v57 = vpop.permute.xlu1 %1075  ;;  %19714 = vmatmul.mubr.msk.f32.vlgmr.msra.gmra.mrb[2].mxu0 %vm118_vm1, %v771_v10  ;;  %v1074_v55 = vpop.permute.xlu0 %1073  ;;  %19715 = vmatmul.mubr.msk.f32.vlgmr.msra.gmra.mrb[2].mxu1 %vm118_vm1, %v771_v10  ;;  %v1139_v10 = vmul.f32 %v21747_v37, %v21758_v23 }
  0x9d   :  { %1150 = vmatpush1.msra.mxu0 %v1137_v60  ;;  %v21764_v52 = vsel %vm1083_vm3, %v1072_v53, %v1074_v55  ;;  %3693 = vrot.lane.b32.xlu1 %v21340_v5, %s21252_s10  ;;  %v21778_v60 = vrot.slane %v21646_v35, %v21504_v27  ;;  %v21780_v53 = vor.u32 %v19723_v59, %v19722_v24 }
  0x9e   :  { %3691 = vrot.lane.b32.xlu0 %v21345_v6, %s21252_s10  ;;  %v1140_v15 = vmul.f32 %v21743_v62, %v21764_v52  ;;  %1213 = vmatprep.mubr.f32.mxu0 %v25716_v18  ;;  %v21792_v62 = vrot.slane %v21646_v35, %v21527_v38  ;;  %v21814_v35 = vsel %vm1083_vm3, %v1074_v55, %v1076_v57 }
  0x9f   :  { %25717 = vst [vmem:[#allocation22_spill] sm:$0xff] %v21778_v60  ;;  %1284 = vmatprep.mubr.f32.mxu1 %v25716_v18  ;;  %v21905_v41 = vrot.slane %v21780_v53, %v21511_v30  ;;  %v21909_v32 = vrot.slane %v21780_v53, %v21527_v38 }
  0xa0   :  { %25719 = vst [vmem:[#allocation24_spill] sm:$0xff] %v21792_v62  ;;  %v1080_v59 = vpop.permute.xlu1 %1079  ;;  %1220 = vmatprep.subr.mxu1 %v1140_v15  ;;  %v1078_v24 = vpop.permute.xlu0 %1077  ;;  %19718 = vmatmul.mubr.msk.f32.vlgmr.msra.gmra.mrb[0].mxu0 %vm118_vm1, %v1145_v42 }
  0xa1   :  { %v21801_v37 = vsel %vm1083_vm3, %v1080_v59, %v1082_v61  ;;  %v21805_v17 = vsel %vm1083_vm3, %v1078_v24, %v1080_v59  ;;  %v21809_v11 = vsel %vm1083_vm3, %v1076_v57, %v1078_v24  ;;  %1221 = vmatpush1.msra.mxu1 %v1139_v10  ;;  %1355 = vmatprep.mubr.f32.mxu0 %v25716_v18 }
  0xa2   :  { %3697 = vrot.lane.b32.xlu1 %v21354_v7, %s21252_s10  ;;  %3695 = vrot.lane.b32.xlu0 %v21359_v8, %s21252_s10  ;;  %v21823_v61 = vrot.slane %v21780_v53, %v21473_v14  ;;  %v1143_v15 = vmul.f32 %v21778_v60, %v21805_v17  ;;  %v1142_v10 = vmul.f32 %v21788_v40, %v21809_v11 }
  0xa3   :  { %v1144_v55 = vmul.f32 %v21792_v62, %v21801_v37  ;;  %19719 = vmatmul.mubr.msk.f32.vlgmr.msra.gmra.mrb[0].mxu1 %vm118_vm1, %v1145_v42  ;;  %v1141_v24 = vmul.f32 %v21796_v33, %v21814_v35  ;;  %v21847_v40 = vrot.slane %v21780_v53, %v21475_v16  ;;  %25727 = vst [vmem:[#allocation32_spill] sm:$0xff] %v21905_v41  ;;  %25728 = vst [vmem:[#allocation33_spill] sm:$0xff] %v21909_v32 }
  0xa4   :  { %25721 = vst [vmem:[#allocation26_spill] sm:$0xff] %v21823_v61  ;;  %v1444_v57 = vpop.permute.xlu1 %1443  ;;  %v1442_v59 = vpop.permute.xlu0 %1441  ;;  %1426 = vmatprep.mubr.f32.mxu1 %v25716_v18  ;;  %1291 = vmatprep.subr.mxu0 %v1142_v10 }
  0xa5   :  { %1362 = vmatprep.subr.mxu1 %v1144_v55  ;;  %v21837_v60 = vsel %vm1457_vm4, %v1442_v59, %v1444_v57  ;;  %25722 = vst [vmem:[#allocation27_spill] sm:$0xff] %v21847_v40  ;;  %1292 = vmatpush1.msra.mxu0 %v1141_v24  ;;  %v19728_v24 = vld [vmem:[%s25401_s1 + $0x4] ss:$8 sm:$0xf] }
  0xa6   :  { %4061 = vrot.lane.b32.xlu1 %v21331_v4, %s21253_s21  ;;  %4059 = vrot.lane.b32.xlu0 %v21315_v1, %s21253_s21  ;;  %v1512_v62 = vmul.f32 %v21823_v61, %v21837_v60 }
  0xa7   :  { %1363 = vmatpush1.msra.mxu1 %v1143_v15  ;;  %19720 = vmatmul.mubr.msk.f32.vlgmr.msra.gmra.mrb[2].mxu0 %vm118_vm1, %v1145_v42  ;;  %v21864_v15 = vrot.slane %v21780_v53, %v21485_v20 }
  0xa8   :  { %v1446_v10 = vpop.permute.xlu1 %1445  ;;  %1523 = vmatprep.subr.mxu0 %v1512_v62  ;;  %v1456_v55 = vpop.permute.xlu0 %1455  ;;  %19721 = vmatmul.mubr.msk.f32.vlgmr.msra.gmra.mrb[2].mxu1 %vm118_vm1, %v1145_v42  ;;  %v21871_v42 = vrot.slane %v21780_v53, %v21487_v21 }
  0xa9   :  { %v21852_v33 = vsel %vm1457_vm4, %v1456_v55, %v1442_v59  ;;  %1587 = vmatprep.mubr.f32.mxu0 %v25716_v18  ;;  %25724 = vst [vmem:[#allocation29_spill] sm:$0xff] %v21864_v15  ;;  %v1519_v59 = vld [vmem:[%s25402_s2 + $0x18] sm:$0xff]  ;;  %1658 = vmatprep.mubr.f32.mxu1 %v25716_v18  ;;  %v21882_v61 = vsel %vm1457_vm4, %v1444_v57, %v1446_v10 }
  0xaa   :  { %25723 = vst [vmem:[#allocation28_spill] sm:$0xff] %v21852_v33  ;;  %4063 = vrot.lane.b32.xlu1 %v21326_v3, %s21253_s21  ;;  %4073 = vrot.lane.b32.xlu0 %v21310_v0, %s21253_s21  ;;  %v1511_v62 = vmul.f32 %v21847_v40, %v21852_v33  ;;  %25725 = vst [vmem:[#allocation30_spill] sm:$0xff] %v21871_v42  ;;  %v19729_v40 = vld [vmem:[%s25401_s1 + $0x4] ss:$8 sm:$0xf0] }
  0xab   :  { %v21895_v57 = vor.u32 %v19729_v40, %v19728_v24  ;;  %v21914_v24 = vrot.slane %v21780_v53, %v21518_v34 }
  0xac   :  { %v1450_v63 = vpop.permute.xlu1 %1449  ;;  %1524 = vmatpush1.msra.mxu0 %v1511_v62  ;;  %v1448_v45 = vpop.permute.xlu0 %1447  ;;  %v1513_v62 = vmul.f32 %v21871_v42, %v21882_v61 }
  0xad   :  { %v21886_v44 = vsel %vm1457_vm4, %v1446_v10, %v1448_v45  ;;  %19724 = vmatmul.mubr.msk.f32.vlgmr.msra.gmra.mrb[0].mxu0 %vm118_vm1, %v1519_v59  ;;  %v21901_v10 = vrot.slane %v21780_v53, %v21504_v27  ;;  %25729 = vst [vmem:[#allocation34_spill] sm:$0xff] %v21914_v24  ;;  %v21939_v53 = vrot.slane %v21895_v57, %v21473_v14 }
  0xae   :  { %4067 = vrot.lane.b32.xlu1 %v21340_v5, %s21253_s21  ;;  %4065 = vrot.lane.b32.xlu0 %v21345_v6, %s21253_s21  ;;  %v1514_v43 = vmul.f32 %v21864_v15, %v21886_v44  ;;  %v22025_v33 = vrot.slane %v21895_v57, %v21527_v38 }
  0xaf   :  { %25726 = vst [vmem:[#allocation31_spill] sm:$0xff] %v21901_v10  ;;  %1729 = vmatprep.mubr.f32.mxu0 %v25716_v18  ;;  %25733 = vst [vmem:[#allocation38_spill] sm:$0xff] %v21939_v53 }
  0xb0   :  { %v1454_v15 = vpop.permute.xlu1 %1453  ;;  %1594 = vmatprep.subr.mxu1 %v1514_v43  ;;  %v1452_v40 = vpop.permute.xlu0 %1451  ;;  %v21930_v43 = vsel %vm1457_vm4, %v1448_v45, %v1450_v63  ;;  %25743 = vst [vmem:[#allocation48_spill] sm:$0xff] %v22025_v33 }
  0xb1   :  { %v21918_v42 = vsel %vm1457_vm4, %v1454_v15, %v1456_v55  ;;  %v21922_v29 = vsel %vm1457_vm4, %v1452_v40, %v1454_v15  ;;  %v21926_v22 = vsel %vm1457_vm4, %v1450_v63, %v1452_v40  ;;  %1595 = vmatpush1.msra.mxu1 %v1513_v62  ;;  %v1515_v40 = vmul.f32 %v21914_v24, %v21930_v43 }
  0xb2   :  { %25730 = vst [vmem:[#allocation35_spill] sm:$0xff] %v21918_v42  ;;  %25731 = vst [vmem:[#allocation36_spill] sm:$0xff] %v21922_v29  ;;  %4071 = vrot.lane.b32.xlu1 %v21354_v7, %s21253_s21  ;;  %4069 = vrot.lane.b32.xlu0 %v21359_v8, %s21253_s21  ;;  %v1517_v55 = vmul.f32 %v21901_v10, %v21922_v29  ;;  %v1516_v15 = vmul.f32 %v21905_v41, %v21926_v22 }
  0xb3   :  { %25732 = vst [vmem:[#allocation37_spill] sm:$0xff] %v21926_v22  ;;  %v1518_v45 = vmul.f32 %v21909_v32, %v21918_v42  ;;  %19725 = vmatmul.mubr.msk.f32.vlgmr.msra.gmra.mrb[0].mxu1 %vm118_vm1, %v1519_v59  ;;  %v21963_v41 = vrot.slane %v21895_v57, %v21475_v16  ;;  %v22021_v42 = vrot.slane %v21895_v57, %v21511_v30 }
  0xb4   :  { %v1818_v63 = vpop.permute.xlu1 %1817  ;;  %v1816_v62 = vpop.permute.xlu0 %1815  ;;  %1800 = vmatprep.mubr.f32.mxu1 %v25716_v18  ;;  %1665 = vmatprep.subr.mxu0 %v1516_v15 }
  0xb5   :  { %1736 = vmatprep.subr.mxu1 %v1518_v45  ;;  %v21953_v10 = vsel %vm1831_vm5, %v1816_v62, %v1818_v63  ;;  %25735 = vst [vmem:[#allocation40_spill] sm:$0xff] %v21963_v41  ;;  %1666 = vmatpush1.msra.mxu0 %v1515_v40  ;;  %v19734_v40 = vld [vmem:[%s25401_s1 + $0x5] ss:$8 sm:$0xf]  ;;  %25742 = vst [vmem:[#allocation47_spill] sm:$0xff] %v22021_v42 }
  0xb6   :  { %25734 = vst [vmem:[#allocation39_spill] sm:$0xff] %v21953_v10  ;;  %4435 = vrot.lane.b32.xlu1 %v21331_v4, %s21254_s15  ;;  %4433 = vrot.lane.b32.xlu0 %v21315_v1, %s21254_s15  ;;  %v1886_v32 = vmul.f32 %v21939_v53, %v21953_v10 }
  0xb7   :  { %1737 = vmatpush1.msra.mxu1 %v1517_v55  ;;  %19726 = vmatmul.mubr.msk.f32.vlgmr.msra.gmra.mrb[2].mxu0 %vm118_vm1, %v1519_v59  ;;  %v21980_v55 = vrot.slane %v21895_v57, %v21485_v20 }
  0xb8   :  { %v1820_v15 = vpop.permute.xlu1 %1819  ;;  %1897 = vmatprep.subr.mxu0 %v1886_v32  ;;  %v1830_v45 = vpop.permute.xlu0 %1829  ;;  %19727 = vmatmul.mubr.msk.f32.vlgmr.msra.gmra.mrb[2].mxu1 %vm118_vm1, %v1519_v59  ;;  %v21987_v59 = vrot.slane %v21895_v57, %v21487_v21 }
  0xb9   :  { %v21968_v24 = vsel %vm1831_vm5, %v1830_v45, %v1816_v62  ;;  %1961 = vmatprep.mubr.f32.mxu0 %v25716_v18  ;;  %25737 = vst [vmem:[#allocation42_spill] sm:$0xff] %v21980_v55  ;;  %v1893_v62 = vld [vmem:[%s25402_s2 + $0x20] sm:$0xff]  ;;  %2032 = vmatprep.mubr.f32.mxu1 %v25716_v18  ;;  %v21998_v53 = vsel %vm1831_vm5, %v1818_v63, %v1820_v15 }
  0xba   :  { %25736 = vst [vmem:[#allocation41_spill] sm:$0xff] %v21968_v24  ;;  %4437 = vrot.lane.b32.xlu1 %v21326_v3, %s21254_s15  ;;  %4447 = vrot.lane.b32.xlu0 %v21310_v0, %s21254_s15  ;;  %v1885_v32 = vmul.f32 %v21963_v41, %v21968_v24  ;;  %25738 = vst [vmem:[#allocation43_spill] sm:$0xff] %v21987_v59  ;;  %v19735_v41 = vld [vmem:[%s25401_s1 + $0x5] ss:$8 sm:$0xf0] }
  0xbb   :  { %25739 = vst [vmem:[#allocation44_spill] sm:$0xff] %v21998_v53  ;;  %v22011_v63 = vor.u32 %v19735_v41, %v19734_v40  ;;  %v22030_v40 = vrot.slane %v21895_v57, %v21518_v34 }
  0xbc   :  { %v1824_v19 = vpop.permute.xlu1 %1823  ;;  %1898 = vmatpush1.msra.mxu0 %v1885_v32  ;;  %v1822_v24 = vpop.permute.xlu0 %1821  ;;  %v1887_v32 = vmul.f32 %v21987_v59, %v21998_v53 }
  0xbd   :  { %v22002_v10 = vsel %vm1831_vm5, %v1820_v15, %v1822_v24  ;;  %19730 = vmatmul.mubr.msk.f32.vlgmr.msra.gmra.mrb[0].mxu0 %vm118_vm1, %v1893_v62  ;;  %v22017_v15 = vrot.slane %v21895_v57, %v21504_v27  ;;  %25744 = vst [vmem:[#allocation49_spill] sm:$0xff] %v22030_v40  ;;  %v22055_v57 = vrot.slane %v22011_v63, %v21473_v14 }
  0xbe   :  { %25740 = vst [vmem:[#allocation45_spill] sm:$0xff] %v22002_v10  ;;  %4441 = vrot.lane.b32.xlu1 %v21340_v5, %s21254_s15  ;;  %4439 = vrot.lane.b32.xlu0 %v21345_v6, %s21254_s15  ;;  %v1888_v22 = vmul.f32 %v21980_v55, %v22002_v10 }
  0xbf   :  { %25741 = vst [vmem:[#allocation46_spill] sm:$0xff] %v22017_v15  ;;  %2103 = vmatprep.mubr.f32.mxu0 %v25716_v18  ;;  %25749 = vst [vmem:[#allocation54_spill] sm:$0xff] %v22055_v57 }
  0xc0   :  { %v1828_v55 = vpop.permute.xlu1 %1827  ;;  %1968 = vmatprep.subr.mxu1 %v1888_v22  ;;  %v1826_v41 = vpop.permute.xlu0 %1825  ;;  %v22046_v22 = vsel %vm1831_vm5, %v1822_v24, %v1824_v19 }
  0xc1   :  { %v22034_v59 = vsel %vm1831_vm5, %v1828_v55, %v1830_v45  ;;  %v22038_v10 = vsel %vm1831_vm5, %v1826_v41, %v1828_v55  ;;  %v22042_v53 = vsel %vm1831_vm5, %v1824_v19, %v1826_v41  ;;  %1969 = vmatpush1.msra.mxu1 %v1887_v32  ;;  %25748 = vst [vmem:[#allocation53_spill] sm:$0xff] %v22046_v22 }
  0xc2   :  { %25745 = vst [vmem:[#allocation50_spill] sm:$0xff] %v22034_v59  ;;  %25746 = vst [vmem:[#allocation51_spill] sm:$0xff] %v22038_v10  ;;  %4445 = vrot.lane.b32.xlu1 %v21354_v7, %s21254_s15  ;;  %4443 = vrot.lane.b32.xlu0 %v21359_v8, %s21254_s15  ;;  %v1891_v45 = vmul.f32 %v22017_v15, %v22038_v10  ;;  %v1890_v55 = vmul.f32 %v22021_v42, %v22042_v53 }
  0xc3   :  { %25747 = vst [vmem:[#allocation52_spill] sm:$0xff] %v22042_v53  ;;  %v1892_v19 = vmul.f32 %v22025_v33, %v22034_v59  ;;  %19731 = vmatmul.mubr.msk.f32.vlgmr.msra.gmra.mrb[0].mxu1 %vm118_vm1, %v1893_v62  ;;  %v1889_v41 = vmul.f32 %v22030_v40, %v22046_v22  ;;  %v22079_v42 = vrot.slane %v22011_v63, %v21475_v16 }
  0xc4   :  { %v2192_v24 = vpop.permute.xlu1 %2191  ;;  %v2190_v32 = vpop.permute.xlu0 %2189  ;;  %2174 = vmatprep.mubr.f32.mxu1 %v25716_v18  ;;  %2039 = vmatprep.subr.mxu0 %v1890_v55  ;;  %v22137_v59 = vrot.slane %v22011_v63, %v21511_v30  ;;  %v22141_v10 = vrot.slane %v22011_v63, %v21527_v38 }
  0xc5   :  { %2110 = vmatprep.subr.mxu1 %v1892_v19  ;;  %v22069_v15 = vsel %vm2205_vm6, %v2190_v32, %v2192_v24  ;;  %25751 = vst [vmem:[#allocation56_spill] sm:$0xff] %v22079_v42  ;;  %2040 = vmatpush1.msra.mxu0 %v1889_v41  ;;  %v19741_v41 = vld [vmem:[%s25401_s1 + $0x6] ss:$8 sm:$0xf0] }
  0xc6   :  { %25750 = vst [vmem:[#allocation55_spill] sm:$0xff] %v22069_v15  ;;  %4809 = vrot.lane.b32.xlu1 %v21331_v4, %s21255_s30  ;;  %4807 = vrot.lane.b32.xlu0 %v21315_v1, %s21255_s30  ;;  %v2260_v33 = vmul.f32 %v22055_v57, %v22069_v15  ;;  %25758 = vst [vmem:[#allocation63_spill] sm:$0xff] %v22137_v59 }
  0xc7   :  { %2111 = vmatpush1.msra.mxu1 %v1891_v45  ;;  %19732 = vmatmul.mubr.msk.f32.vlgmr.msra.gmra.mrb[2].mxu0 %vm118_vm1, %v1893_v62  ;;  %v22096_v45 = vrot.slane %v22011_v63, %v21485_v20  ;;  %25759 = vst [vmem:[#allocation64_spill] sm:$0xff] %v22141_v10 }
  0xc8   :  { %v2194_v55 = vpop.permute.xlu1 %2193  ;;  %2271 = vmatprep.subr.mxu0 %v2260_v33  ;;  %v2204_v19 = vpop.permute.xlu0 %2203  ;;  %19733 = vmatmul.mubr.msk.f32.vlgmr.msra.gmra.mrb[2].mxu1 %vm118_vm1, %v1893_v62  ;;  %v22103_v62 = vrot.slane %v22011_v63, %v21487_v21 }
  0xc9   :  { %v22084_v40 = vsel %vm2205_vm6, %v2204_v19, %v2190_v32  ;;  %2335 = vmatprep.mubr.f32.mxu0 %v25716_v18  ;;  %25753 = vst [vmem:[#allocation58_spill] sm:$0xff] %v22096_v45  ;;  %v2267_v32 = vld [vmem:[%s25402_s2 + $0x28] sm:$0xff]  ;;  %2406 = vmatprep.mubr.f32.mxu1 %v25716_v18 }
  0xca   :  { %25752 = vst [vmem:[#allocation57_spill] sm:$0xff] %v22084_v40  ;;  %4811 = vrot.lane.b32.xlu1 %v21326_v3, %s21255_s30  ;;  %4821 = vrot.lane.b32.xlu0 %v21310_v0, %s21255_s30  ;;  %v2259_v33 = vmul.f32 %v22079_v42, %v22084_v40  ;;  %25754 = vst [vmem:[#allocation59_spill] sm:$0xff] %v22103_v62  ;;  %v19740_v0 = vld [vmem:[%s25401_s1 + $0x6] ss:$8 sm:$0xf]  ;;  %v22114_v42 = vsel %vm2205_vm6, %v2192_v24, %v2194_v55 }
  0xcb   :  { %25755 = vst [vmem:[#allocation60_spill] sm:$0xff] %v22114_v42  ;;  %v22127_v24 = vor.u32 %v19741_v41, %v19740_v0  ;;  %v22146_v41 = vrot.slane %v22011_v63, %v21518_v34 }
  0xcc   :  { %v2198_v57 = vpop.permute.xlu1 %2197  ;;  %2272 = vmatpush1.msra.mxu0 %v2259_v33  ;;  %v2196_v40 = vpop.permute.xlu0 %2195  ;;  %v2261_v33 = vmul.f32 %v22103_v62, %v22114_v42 }
  0xcd   :  { %v22118_v15 = vsel %vm2205_vm6, %v2194_v55, %v2196_v40  ;;  %19736 = vmatmul.mubr.msk.f32.vlgmr.msra.gmra.mrb[0].mxu0 %vm118_vm1, %v2267_v32  ;;  %v22133_v55 = vrot.slane %v22011_v63, %v21504_v27  ;;  %25760 = vst [vmem:[#allocation65_spill] sm:$0xff] %v22146_v41  ;;  %v22171_v63 = vrot.slane %v22127_v24, %v21473_v14 }
  0xce   :  { %25756 = vst [vmem:[#allocation61_spill] sm:$0xff] %v22118_v15  ;;  %4815 = vrot.lane.b32.xlu1 %v21340_v5, %s21255_s30  ;;  %4813 = vrot.lane.b32.xlu0 %v21345_v6, %s21255_s30  ;;  %v2262_v53 = vmul.f32 %v22096_v45, %v22118_v15 }
  0xcf   :  { %25757 = vst [vmem:[#allocation62_spill] sm:$0xff] %v22133_v55  ;;  %2477 = vmatprep.mubr.f32.mxu0 %v25716_v18  ;;  %25765 = vst [vmem:[#allocation70_spill] sm:$0xff] %v22171_v63 }
  0xd0   :  { %v2202_v45 = vpop.permute.xlu1 %2201  ;;  %2342 = vmatprep.subr.mxu1 %v2262_v53  ;;  %v2200_v0 = vpop.permute.xlu0 %2199  ;;  %v22162_v53 = vsel %vm2205_vm6, %v2196_v40, %v2198_v57 }
  0xd1   :  { %v22150_v62 = vsel %vm2205_vm6, %v2202_v45, %v2204_v19  ;;  %v22154_v15 = vsel %vm2205_vm6, %v2200_v0, %v2202_v45  ;;  %v22158_v42 = vsel %vm2205_vm6, %v2198_v57, %v2200_v0  ;;  %2343 = vmatpush1.msra.mxu1 %v2261_v33  ;;  %25764 = vst [vmem:[#allocation69_spill] sm:$0xff] %v22162_v53 }
  0xd2   :  { %25761 = vst [vmem:[#allocation66_spill] sm:$0xff] %v22150_v62  ;;  %25762 = vst [vmem:[#allocation67_spill] sm:$0xff] %v22154_v15  ;;  %4819 = vrot.lane.b32.xlu1 %v21354_v7, %s21255_s30  ;;  %4817 = vrot.lane.b32.xlu0 %v21359_v8, %s21255_s30  ;;  %v2265_v19 = vmul.f32 %v22133_v55, %v22154_v15  ;;  %v2264_v45 = vmul.f32 %v22137_v59, %v22158_v42 }
  0xd3   :  { %25763 = vst [vmem:[#allocation68_spill] sm:$0xff] %v22158_v42  ;;  %v2266_v40 = vmul.f32 %v22141_v10, %v22150_v62  ;;  %19737 = vmatmul.mubr.msk.f32.vlgmr.msra.gmra.mrb[0].mxu1 %vm118_vm1, %v2267_v32  ;;  %v2263_v0 = vmul.f32 %v22146_v41, %v22162_v53  ;;  %v22195_v10 = vrot.slane %v22127_v24, %v21475_v16 }
  0xd4   :  { %v2566_v57 = vpop.permute.xlu1 %2565  ;;  %v2564_v33 = vpop.permute.xlu0 %2563  ;;  %2548 = vmatprep.mubr.f32.mxu1 %v25716_v18  ;;  %2413 = vmatprep.subr.mxu0 %v2264_v45 }
  0xd5   :  { %2484 = vmatprep.subr.mxu1 %v2266_v40  ;;  %v22185_v55 = vsel %vm2579_vm7, %v2564_v33, %v2566_v57  ;;  %25767 = vst [vmem:[#allocation72_spill] sm:$0xff] %v22195_v10  ;;  %2414 = vmatpush1.msra.mxu0 %v2263_v0 }
  0xd6   :  { %25766 = vst [vmem:[#allocation71_spill] sm:$0xff] %v22185_v55  ;;  %5185 = vrot.lane.b32.xlu1 %v21326_v3, %s21256_s20  ;;  %5183 = vrot.lane.b32.xlu0 %v21331_v4, %s21256_s20  ;;  %v2634_v59 = vmul.f32 %v22171_v63, %v22185_v55 }
  0xd7   :  { %2485 = vmatpush1.msra.mxu1 %v2265_v19  ;;  %19738 = vmatmul.mubr.msk.f32.vlgmr.msra.gmra.mrb[2].mxu0 %vm118_vm1, %v2267_v32  ;;  %v2641_v19 = vld [vmem:[%s25402_s2 + $0x30] sm:$0xff] }
  0xd8   :  { %v2568_v45 = vpop.permute.xlu1 %2567  ;;  %2645 = vmatprep.subr.mxu0 %v2634_v59  ;;  %v2578_v40 = vpop.permute.xlu0 %2577  ;;  %19739 = vmatmul.mubr.msk.f32.vlgmr.msra.gmra.mrb[2].mxu1 %vm118_vm1, %v2267_v32  ;;  %v22212_v59 = vrot.slane %v22127_v24, %v21485_v20  ;;  %v22219_v32 = vrot.slane %v22127_v24, %v21487_v21 }
  0xd9   :  { %v22200_v3 = vsel %vm2579_vm7, %v2578_v40, %v2564_v33  ;;  %2709 = vmatprep.mubr.f32.mxu0 %v25716_v18  ;;  %2780 = vmatprep.mubr.f32.mxu1 %v25716_v18  ;;  %v22230_v33 = vsel %vm2579_vm7, %v2566_v57, %v2568_v45 }
  0xda   :  { %25768 = vst [vmem:[#allocation73_spill] sm:$0xff] %v22200_v3  ;;  %5187 = vrot.lane.b32.xlu1 %v21345_v6, %s21256_s20  ;;  %5181 = vrot.lane.b32.xlu0 %v21315_v1, %s21256_s20  ;;  %v2633_v4 = vmul.f32 %v22195_v10, %v22200_v3  ;;  %25769 = vst [vmem:[#allocation74_spill] sm:$0xff] %v22212_v59  ;;  %v19746_v1 = vld [vmem:[%s25401_s1 + $0x7] ss:$8 sm:$0xf]  ;;  %v22253_v3 = vrot.slane %v22127_v24, %v21511_v30 }
  0xdb   :  { %25770 = vst [vmem:[#allocation75_spill] sm:$0xff] %v22219_v32  ;;  %v19747_v6 = vld [vmem:[%s25401_s1 + $0x7] ss:$8 sm:$0xf0]  ;;  %25771 = vst [vmem:[#allocation76_spill] sm:$0xff] %v22230_v33 }
  0xdc   :  { %v2572_v0 = vpop.permute.xlu1 %2571  ;;  %2646 = vmatpush1.msra.mxu0 %v2633_v4  ;;  %v2570_v10 = vpop.permute.xlu0 %2569  ;;  %v22243_v57 = vor.u32 %v19747_v6, %v19746_v1  ;;  %v2635_v4 = vmul.f32 %v22219_v32, %v22230_v33  ;;  %25774 = vst [vmem:[#allocation79_spill] sm:$0xff] %v22253_v3  ;;  %v22262_v6 = vrot.slane %v22127_v24, %v21518_v34  ;;  %v22381_v33 = vld [vmem:[%s25400_s0 + $0x28] sm:$0xff] }
  0xdd   :  { %v22234_v63 = vsel %vm2579_vm7, %v2568_v45, %v2570_v10  ;;  %19742 = vmatmul.mubr.msk.f32.vlgmr.msra.gmra.mrb[0].mxu0 %vm118_vm1, %v2641_v19  ;;  %v22249_v45 = vrot.slane %v22127_v24, %v21504_v27 }
  0xde   :  { %25772 = vst [vmem:[#allocation77_spill] sm:$0xff] %v22234_v63  ;;  %5191 = vrot.lane.b32.xlu1 %v21359_v8, %s21256_s20  ;;  %5189 = vrot.lane.b32.xlu0 %v21340_v5, %s21256_s20  ;;  %v2636_v41 = vmul.f32 %v22212_v59, %v22234_v63  ;;  %v22257_v8 = vrot.slane %v22127_v24, %v21527_v38  ;;  %25776 = vst [vmem:[#allocation81_spill] sm:$0xff] %v22262_v6  ;;  %v22283_v24 = vld [vmem:[%s25400_s0 + $0x38] sm:$0xff] }
  0xdf   :  { %25773 = vst [vmem:[#allocation78_spill] sm:$0xff] %v22249_v45  ;;  %2851 = vmatprep.mubr.f32.mxu0 %v25716_v18  ;;  %v22400_v62 = vrot.slane %v22243_v57, %v21504_v27  ;;  %v22404_v15 = vrot.slane %v22243_v57, %v21511_v30  ;;  %v22408_v53 = vrot.slane %v22243_v57, %v21527_v38 }
  0xe0   :  { %25775 = vst [vmem:[#allocation80_spill] sm:$0xff] %v22257_v8  ;;  %v2576_v5 = vpop.permute.xlu1 %2575  ;;  %2716 = vmatprep.subr.mxu1 %v2636_v41  ;;  %v2574_v1 = vpop.permute.xlu0 %2573  ;;  %v22278_v41 = vsel %vm2579_vm7, %v2570_v10, %v2572_v0 }
  0xe1   :  { %v22266_v32 = vsel %vm2579_vm7, %v2576_v5, %v2578_v40  ;;  %v22270_v59 = vsel %vm2579_vm7, %v2574_v1, %v2576_v5  ;;  %v22274_v63 = vsel %vm2579_vm7, %v2572_v0, %v2574_v1  ;;  %2717 = vmatpush1.msra.mxu1 %v2635_v4  ;;  %25780 = vst [vmem:[#allocation85_spill] sm:$0xff] %v22278_v41  ;;  %25789 = vst [vmem:[#allocation94_spill] sm:$0xff] %v22400_v62 }
  0xe2   :  { %25777 = vst [vmem:[#allocation82_spill] sm:$0xff] %v22266_v32  ;;  %25778 = vst [vmem:[#allocation83_spill] sm:$0xff] %v22270_v59  ;;  %5195 = vrot.lane.b32.xlu1 %v22283_v24, %s21256_s20  ;;  %5193 = vrot.lane.b32.xlu0 %v21354_v7, %s21256_s20  ;;  %v22292_v40 = vrot.slane %v22243_v57, %v21473_v14  ;;  %v2639_v10 = vmul.f32 %v22249_v45, %v22270_v59 }
  0xe3   :  { %25779 = vst [vmem:[#allocation84_spill] sm:$0xff] %v22274_v63  ;;  %v2638_v0 = vmul.f32 %v22253_v3, %v22274_v63  ;;  %v2640_v4 = vmul.f32 %v22257_v8, %v22266_v32  ;;  %19743 = vmatmul.mubr.msk.f32.vlgmr.msra.gmra.mrb[0].mxu1 %vm118_vm1, %v2641_v19  ;;  %v2637_v7 = vmul.f32 %v22262_v6, %v22278_v41  ;;  %v22311_v3 = vld [vmem:[%s25400_s0 + $0x10] sm:$0xff]  ;;  %v22318_v8 = vld [vmem:[%s25400_s0 + $0x8] sm:$0xff]  ;;  %25790 = vst [vmem:[#allocation95_spill] sm:$0xff] %v22404_v15 }
  0xe4   :  { %25781 = vst [vmem:[#allocation86_spill] sm:$0xff] %v22292_v40  ;;  %v2940_v5 = vpop.permute.xlu1 %2939  ;;  %v2938_v1 = vpop.permute.xlu0 %2937  ;;  %2922 = vmatprep.mubr.f32.mxu1 %v25716_v18  ;;  %25791 = vst [vmem:[#allocation96_spill] sm:$0xff] %v22408_v53 }
  0xe5   :  { %2787 = vmatprep.subr.mxu0 %v2638_v0  ;;  %2858 = vmatprep.subr.mxu1 %v2640_v4  ;;  %v22306_v45 = vsel %vm2953_vm8, %v2938_v1, %v2940_v5  ;;  %v22326_v4 = vrot.slane %v22243_v57, %v21475_v16 }
  0xe6   :  { %25782 = vst [vmem:[#allocation87_spill] sm:$0xff] %v22306_v45  ;;  %5559 = vrot.lane.b32.xlu1 %v22311_v3, %s21257_s12  ;;  %5557 = vrot.lane.b32.xlu0 %v22318_v8, %s21257_s12  ;;  %v3008_v0 = vmul.f32 %v22292_v40, %v22306_v45  ;;  %v22338_v40 = vld [vmem:[%s25400_s0 + $0x18] sm:$0xff] }
  0xe7   :  { %25783 = vst [vmem:[#allocation88_spill] sm:$0xff] %v22326_v4  ;;  %2788 = vmatpush1.msra.mxu0 %v2637_v7  ;;  %2859 = vmatpush1.msra.mxu1 %v2639_v10  ;;  %v22345_v10 = vld [vmem:[%s25400_s0] sm:$0xff]  ;;  %v3015_v7 = vld [vmem:[%s25402_s2 + $0x38] sm:$0xff] }
  0xe8   :  { %v2942_v6 = vpop.permute.xlu1 %2941  ;;  %3019 = vmatprep.subr.mxu0 %v3008_v0  ;;  %v2952_v63 = vpop.permute.xlu0 %2951  ;;  %19744 = vmatmul.mubr.msk.f32.vlgmr.msra.gmra.mrb[2].mxu0 %vm118_vm1, %v2641_v19  ;;  %v22360_v0 = vrot.slane %v22243_v57, %v21487_v21  ;;  %v19752_v45 = vld [vmem:[%s25401_s1 + $0x40] ss:$8 sm:$0xf] }
  0xe9   :  { %v22331_v32 = vsel %vm2953_vm8, %v2952_v63, %v2938_v1  ;;  %19745 = vmatmul.mubr.msk.f32.vlgmr.msra.gmra.mrb[2].mxu1 %vm118_vm1, %v2641_v19  ;;  %3083 = vmatprep.mubr.f32.mxu0 %v25716_v18  ;;  %v22353_v1 = vrot.slane %v22243_v57, %v21485_v20 }
  0xea   :  { %25784 = vst [vmem:[#allocation89_spill] sm:$0xff] %v22331_v32  ;;  %5561 = vrot.lane.b32.xlu1 %v22338_v40, %s21257_s12  ;;  %5555 = vrot.lane.b32.xlu0 %v22345_v10, %s21257_s12  ;;  %v3007_v19 = vmul.f32 %v22326_v4, %v22331_v32  ;;  %25786 = vst [vmem:[#allocation91_spill] sm:$0xff] %v22360_v0  ;;  %v19753_v4 = vld [vmem:[%s25401_s1 + $0x40] ss:$8 sm:$0xf0]  ;;  %v22371_v32 = vsel %vm2953_vm8, %v2940_v5, %v2942_v6 }
  0xeb   :  { %25785 = vst [vmem:[#allocation90_spill] sm:$0xff] %v22353_v1  ;;  %3154 = vmatprep.mubr.f32.mxu1 %v25716_v18  ;;  %25787 = vst [vmem:[#allocation92_spill] sm:$0xff] %v22371_v32  ;;  %v22388_v5 = vld [vmem:[%s25400_s0 + $0x20] sm:$0xff]  ;;  %v3009_v42 = vmul.f32 %v22360_v0, %v22371_v32 }
  0xec   :  { %v2946_v59 = vpop.permute.xlu1 %2945  ;;  %3020 = vmatpush1.msra.mxu0 %v3007_v19  ;;  %v2944_v55 = vpop.permute.xlu0 %2943  ;;  %v22394_v19 = vor.u32 %v19753_v4, %v19752_v45  ;;  %v22413_v4 = vrot.slane %v22243_v57, %v21518_v34 }
  0xed   :  { %v22375_v41 = vsel %vm2953_vm8, %v2942_v6, %v2944_v55  ;;  %19748 = vmatmul.mubr.msk.f32.vlgmr.msra.gmra.mrb[0].mxu0 %vm118_vm1, %v3015_v7 }
  0xee   :  { %25788 = vst [vmem:[#allocation93_spill] sm:$0xff] %v22375_v41  ;;  %5565 = vrot.lane.b32.xlu1 %v22381_v33, %s21257_s12  ;;  %5563 = vrot.lane.b32.xlu0 %v22388_v5, %s21257_s12  ;;  %v3010_v6 = vmul.f32 %v22353_v1, %v22375_v41  ;;  %25792 = vst [vmem:[#allocation97_spill] sm:$0xff] %v22413_v4 }
  0xef   :  { %3225 = vmatprep.mubr.f32.mxu0 %v25716_v18 }
  0xf0   :  { %v2950_v1 = vpop.permute.xlu1 %2949  ;;  %3090 = vmatprep.subr.mxu1 %v3010_v6  ;;  %v2948_v45 = vpop.permute.xlu0 %2947  ;;  %v22429_v6 = vsel %vm2953_vm8, %v2944_v55, %v2946_v59 }
  0xf1   :  { %v22417_v0 = vsel %vm2953_vm8, %v2950_v1, %v2952_v63  ;;  %v22421_v41 = vsel %vm2953_vm8, %v2948_v45, %v2950_v1  ;;  %v22425_v32 = vsel %vm2953_vm8, %v2946_v59, %v2948_v45  ;;  %3091 = vmatpush1.msra.mxu1 %v3009_v42  ;;  %25796 = vst [vmem:[#allocation101_spill] sm:$0xff] %v22429_v6  ;;  %v22436_v63 = vld [vmem:[%s25400_s0 + $0x30] sm:$0xff] }
  0xf2   :  { %25793 = vst [vmem:[#allocation98_spill] sm:$0xff] %v22417_v0  ;;  %25794 = vst [vmem:[#allocation99_spill] sm:$0xff] %v22421_v41  ;;  %5569 = vrot.lane.b32.xlu1 %v22283_v24, %s21257_s12  ;;  %5567 = vrot.lane.b32.xlu0 %v22436_v63, %s21257_s12  ;;  %v22443_v42 = vrot.slane %v22394_v19, %v21473_v14  ;;  %v3013_v55 = vmul.f32 %v22400_v62, %v22421_v41 }
  0xf3   :  { %25795 = vst [vmem:[#allocation100_spill] sm:$0xff] %v22425_v32  ;;  %v3012_v59 = vmul.f32 %v22404_v15, %v22425_v32  ;;  %v3014_v57 = vmul.f32 %v22408_v53, %v22417_v0  ;;  %19749 = vmatmul.mubr.msk.f32.vlgmr.msra.gmra.mrb[0].mxu1 %vm118_vm1, %v3015_v7  ;;  %v3011_v22 = vmul.f32 %v22413_v4, %v22429_v6 }
  0xf4   :  { %25797 = vst [vmem:[#allocation102_spill] sm:$0xff] %v22443_v42  ;;  %v3314_v1 = vpop.permute.xlu1 %3313  ;;  %v3312_v45 = vpop.permute.xlu0 %3311  ;;  %3296 = vmatprep.mubr.f32.mxu1 %v25716_v18  ;;  %v22517_v32 = vrot.slane %v22394_v19, %v21504_v27  ;;  %v22528_v41 = vrot.slane %v22394_v19, %v21527_v38 }
  0xf5   :  { %3161 = vmatprep.subr.mxu0 %v3012_v59  ;;  %3232 = vmatprep.subr.mxu1 %v3014_v57  ;;  %v22457_v62 = vsel %vm3327_vm9, %v3312_v45, %v3314_v1  ;;  %v22467_v59 = vrot.slane %v22394_v19, %v21475_v16 }
  0xf6   :  { %25798 = vst [vmem:[#allocation103_spill] sm:$0xff] %v22457_v62  ;;  %5933 = vrot.lane.b32.xlu1 %v22311_v3, %s25520_s19  ;;  %5931 = vrot.lane.b32.xlu0 %v22318_v8, %s25520_s19  ;;  %v3382_v15 = vmul.f32 %v22443_v42, %v22457_v62  ;;  %v22492_v42 = vrot.slane %v22394_v19, %v21487_v21  ;;  %v19758_v62 = vld [vmem:[%s25401_s1 + $0x41] ss:$8 sm:$0xf]  ;;  %25804 = vst [vmem:[#allocation109_spill] sm:$0xff] %v22517_v32 }
  0xf7   :  { %3162 = vmatpush1.msra.mxu0 %v3011_v22  ;;  %3233 = vmatpush1.msra.mxu1 %v3013_v55  ;;  %25799 = vst [vmem:[#allocation104_spill] sm:$0xff] %v22467_v59  ;;  %v22484_v55 = vrot.slane %v22394_v19, %v21485_v20  ;;  %25806 = vst [vmem:[#allocation111_spill] sm:$0xff] %v22528_v41 }
  0xf8   :  { %3393 = vmatprep.subr.mxu0 %v3382_v15  ;;  %19750 = vmatmul.mubr.msk.f32.vlgmr.msra.gmra.mrb[2].mxu0 %vm118_vm1, %v3015_v7  ;;  %v3316_v57 = vpop.permute.xlu1 %3315  ;;  %25802 = vst [vmem:[#allocation107_spill] sm:$0xff] %v22492_v42 }
  0xf9   :  { %v3326_v4 = vpop.permute.xlu0 %3325  ;;  %19751 = vmatmul.mubr.msk.f32.vlgmr.msra.gmra.mrb[2].mxu1 %vm118_vm1, %v3015_v7  ;;  %3457 = vmatprep.mubr.f32.mxu0 %v25716_v18  ;;  %25801 = vst [vmem:[#allocation106_spill] sm:$0xff] %v22484_v55  ;;  %v3389_v7 = vld [vmem:[%s25402_s2 + $0x40] sm:$0xff] }
  0xfa   :  { %5935 = vrot.lane.b32.xlu1 %v22338_v40, %s25520_s19  ;;  %5929 = vrot.lane.b32.xlu0 %v22345_v10, %s25520_s19  ;;  %v22478_v22 = vsel %vm3327_vm9, %v3326_v4, %v3312_v45 }
  0xfb   :  { %25800 = vst [vmem:[#allocation105_spill] sm:$0xff] %v22478_v22  ;;  %v3381_v15 = vmul.f32 %v22467_v59, %v22478_v22  ;;  %3528 = vmatprep.mubr.f32.mxu1 %v25716_v18  ;;  %v22496_v59 = vsel %vm3327_vm9, %v3314_v1, %v3316_v57 }
  0xfc   :  { %v3320_v53 = vpop.permute.xlu1 %3319  ;;  %v3383_v0 = vmul.f32 %v22492_v42, %v22496_v59 }
  0xfd   :  { %3394 = vmatpush1.msra.mxu0 %v3381_v15  ;;  %v3318_v45 = vpop.permute.xlu0 %3317  ;;  %v19759_v15 = vld [vmem:[%s25401_s1 + $0x41] ss:$8 sm:$0xf0] }
  0xfe   :  { %5939 = vrot.lane.b32.xlu1 %v22381_v33, %s25520_s19  ;;  %5937 = vrot.lane.b32.xlu0 %v22388_v5, %s25520_s19  ;;  %v22504_v22 = vsel %vm3327_vm9, %v3316_v57, %v3318_v45  ;;  %v22521_v57 = vrot.slane %v22394_v19, %v21511_v30 }
  0xff   :  { %25803 = vst [vmem:[#allocation108_spill] sm:$0xff] %v22504_v22  ;;  %v3384_v1 = vmul.f32 %v22484_v55, %v22504_v22  ;;  %19754 = vmatmul.mubr.msk.f32.vlgmr.msra.gmra.mrb[0].mxu0 %vm118_vm1, %v3389_v7  ;;  %v22530_v55 = vor.u32 %v19759_v15, %v19758_v62  ;;  %v22534_v22 = vrot.slane %v22394_v19, %v21518_v34 }
 0x100   :  { %25805 = vst [vmem:[#allocation110_spill] sm:$0xff] %v22521_v57  ;;  %3599 = vmatprep.mubr.f32.mxu0 %v25716_v18 }
 0x101   :  { %3464 = vmatprep.subr.mxu1 %v3384_v1  ;;  %25807 = vst [vmem:[#allocation112_spill] sm:$0xff] %v22534_v22  ;;  %v3324_v6 = vpop.permute.xlu1 %3323  ;;  %v22542_v1 = vsel %vm3327_vm9, %v3318_v45, %v3320_v53 }
 0x102   :  { %5943 = vrot.lane.b32.xlu1 %v22283_v24, %s25520_s19  ;;  %5941 = vrot.lane.b32.xlu0 %v22436_v63, %s25520_s19  ;;  %v3322_v29 = vpop.permute.xlu0 %3321  ;;  %v22546_v62 = vsel %vm3327_vm9, %v3324_v6, %v3326_v4 }
 0x103   :  { %25808 = vst [vmem:[#allocation113_spill] sm:$0xff] %v22546_v62  ;;  %v22550_v19 = vsel %vm3327_vm9, %v3322_v29, %v3324_v6  ;;  %v22554_v15 = vsel %vm3327_vm9, %v3320_v53, %v3322_v29  ;;  %3465 = vmatpush1.msra.mxu1 %v3383_v0  ;;  %v3388_v4 = vmul.f32 %v22528_v41, %v22546_v62 }
 0x104   :  { %25809 = vst [vmem:[#allocation114_spill] sm:$0xff] %v22554_v15  ;;  %v3387_v42 = vmul.f32 %v22517_v32, %v22550_v19  ;;  %v3386_v45 = vmul.f32 %v22521_v57, %v22554_v15  ;;  %19755 = vmatmul.mubr.msk.f32.vlgmr.msra.gmra.mrb[0].mxu1 %vm118_vm1, %v3389_v7  ;;  %v22566_v6 = vrot.slane %v22530_v55, %v21473_v14 }
 0x105   :  { %3670 = vmatprep.mubr.f32.mxu1 %v25716_v18  ;;  %v3385_v29 = vmul.f32 %v22534_v22, %v22542_v1  ;;  %3606 = vmatprep.subr.mxu1 %v3388_v4  ;;  %v22639_v22 = vrot.slane %v22530_v55, %v21518_v34 }
 0x106   :  { %25810 = vst [vmem:[#allocation115_spill] sm:$0xff] %v22566_v6  ;;  %6307 = vrot.lane.b32.xlu1 %v22311_v3, %s21259_s28  ;;  %6305 = vrot.lane.b32.xlu0 %v22318_v8, %s21259_s28  ;;  %v3688_v53 = vpop.permute.xlu1 %3687  ;;  %v22586_v3 = vrot.slane %v22530_v55, %v21475_v16 }
 0x107   :  { %3535 = vmatprep.subr.mxu0 %v3386_v45  ;;  %v3686_v0 = vpop.permute.xlu0 %3685  ;;  %3607 = vmatpush1.msra.mxu1 %v3387_v42  ;;  %v19764_v45 = vld [vmem:[%s25401_s1 + $0x42] ss:$8 sm:$0xf]  ;;  %25817 = vst [vmem:[#allocation122_spill] sm:$0xff] %v22639_v22 }
 0x108   :  { %v3708_v32 = vsel %vm3701_vm10, %v3686_v0, %v3688_v53  ;;  %3536 = vmatpush1.msra.mxu0 %v3385_v29  ;;  %19757 = vmatmul.mubr.msk.f32.vlgmr.msra.gmra.mrb[2].mxu1 %vm118_vm1, %v3389_v7  ;;  %25811 = vst [vmem:[#allocation116_spill] sm:$0xff] %v22586_v3 }
 0x109   :  { %v3756_v57 = vmul.f32 %v22566_v6, %v3708_v32  ;;  %19756 = vmatmul.mubr.msk.f32.vlgmr.msra.gmra.mrb[2].mxu0 %vm118_vm1, %v3389_v7  ;;  %3902 = vmatprep.mubr.f32.mxu1 %v25716_v18 }
 0x10a   :  { %6309 = vrot.lane.b32.xlu1 %v22338_v40, %s21259_s28  ;;  %6303 = vrot.lane.b32.xlu0 %v22345_v10, %s21259_s28  ;;  %v22599_v40 = vrot.slane %v22530_v55, %v21485_v20  ;;  %v3763_v10 = vld [vmem:[%s25402_s2 + $0x48] sm:$0xff] }
 0x10b   :  { %3767 = vmatprep.subr.mxu0 %v3756_v57  ;;  %3831 = vmatprep.mubr.f32.mxu0 %v25716_v18  ;;  %v3690_v8 = vpop.permute.xlu1 %3689  ;;  %v22606_v57 = vrot.slane %v22530_v55, %v21487_v21 }
 0x10c   :  { %v3700_v42 = vpop.permute.xlu0 %3699  ;;  %25812 = vst [vmem:[#allocation117_spill] sm:$0xff] %v22599_v40 }
 0x10d   :  { %v3709_v32 = vsel %vm3701_vm10, %v3700_v42, %v3686_v0  ;;  %25813 = vst [vmem:[#allocation118_spill] sm:$0xff] %v22606_v57 }
 0x10e   :  { %v3755_v7 = vmul.f32 %v22586_v3, %v3709_v32  ;;  %6313 = vrot.lane.b32.xlu1 %v22381_v33, %s21259_s28  ;;  %6311 = vrot.lane.b32.xlu0 %v22388_v5, %s21259_s28  ;;  %v19765_v33 = vld [vmem:[%s25401_s1 + $0x42] ss:$8 sm:$0xf0]  ;;  %v3707_v5 = vsel %vm3701_vm10, %v3688_v53, %v3690_v8  ;;  %v22620_v32 = vrot.slane %v22530_v55, %v21504_v27 }
 0x10f   :  { %v3694_v4 = vpop.permute.xlu1 %3693  ;;  %v22624_v3 = vrot.slane %v22530_v55, %v21511_v30  ;;  %v3757_v6 = vmul.f32 %v22606_v57, %v3707_v5 }
 0x110   :  { %3768 = vmatpush1.msra.mxu0 %v3755_v7  ;;  %v3692_v29 = vpop.permute.xlu0 %3691  ;;  %25814 = vst [vmem:[#allocation119_spill] sm:$0xff] %v22620_v32  ;;  %v4087_v7 = vor.u32 %v19765_v33, %v19764_v45 }
 0x111   :  { %v3706_v0 = vsel %vm3701_vm10, %v3690_v8, %v3692_v29  ;;  %25815 = vst [vmem:[#allocation120_spill] sm:$0xff] %v22624_v3  ;;  %19760 = vmatmul.mubr.msk.f32.vlgmr.msra.gmra.mrb[0].mxu0 %vm118_vm1, %v3763_v10  ;;  %v22634_v8 = vrot.slane %v22530_v55, %v21527_v38 }
 0x112   :  { %6317 = vrot.lane.b32.xlu1 %v22283_v24, %s21259_s28  ;;  %6315 = vrot.lane.b32.xlu0 %v22436_v63, %s21259_s28  ;;  %v3758_v53 = vmul.f32 %v22599_v40, %v3706_v0  ;;  %v3705_v24 = vsel %vm3701_vm10, %v3692_v29, %v3694_v4 }
 0x113   :  { %25816 = vst [vmem:[#allocation121_spill] sm:$0xff] %v22634_v8  ;;  %3973 = vmatprep.mubr.f32.mxu0 %v25716_v18 }
 0x114   :  { %v3698_v41 = vpop.permute.xlu1 %3697  ;;  %3838 = vmatprep.subr.mxu1 %v3758_v53  ;;  %v3696_v63 = vpop.permute.xlu0 %3695  ;;  %v22656_v53 = vrot.slane %v4087_v7, %v21473_v14 }
 0x115   :  { %v3702_v0 = vsel %vm3701_vm10, %v3698_v41, %v3700_v42  ;;  %v3703_v45 = vsel %vm3701_vm10, %v3696_v63, %v3698_v41  ;;  %v3704_v33 = vsel %vm3701_vm10, %v3694_v4, %v3696_v63  ;;  %3839 = vmatpush1.msra.mxu1 %v3757_v6  ;;  %v3759_v42 = vmul.f32 %v22639_v22, %v3705_v24 }
 0x116   :  { %v3761_v55 = vmul.f32 %v22620_v32, %v3703_v45  ;;  %v3760_v5 = vmul.f32 %v22624_v3, %v3704_v33  ;;  %v3762_v29 = vmul.f32 %v22634_v8, %v3702_v0  ;;  %19761 = vmatmul.mubr.msk.f32.vlgmr.msra.gmra.mrb[0].mxu1 %vm118_vm1, %v3763_v10  ;;  %25818 = vst [vmem:[#allocation123_spill] sm:$0xff] %v22656_v53 }
 0x117   :  { %4044 = vmatprep.mubr.f32.mxu1 %v25716_v18  ;;  %v22664_v0 = vrot.slane %v4087_v7, %v21475_v16  ;;  %v22698_v32 = vrot.slane %v4087_v7, %v21511_v30  ;;  %v22701_v3 = vrot.slane %v4087_v7, %v21527_v38 }
 0x118   :  { %v4062_v41 = vpop.permute.xlu1 %4061  ;;  %3909 = vmatprep.subr.mxu0 %v3760_v5  ;;  %3980 = vmatprep.subr.mxu1 %v3762_v29  ;;  %v4060_v6 = vpop.permute.xlu0 %4059  ;;  %v22674_v5 = vrot.slane %v4087_v7, %v21485_v20  ;;  %v4137_v29 = vld [vmem:[%s25402_s2 + $0x50] sm:$0xff] }
 0x119   :  { %v4082_v4 = vsel %vm4075_vm11, %v4060_v6, %v4062_v41  ;;  %3910 = vmatpush1.msra.mxu0 %v3759_v42  ;;  %3981 = vmatpush1.msra.mxu1 %v3761_v55  ;;  %25819 = vst [vmem:[#allocation124_spill] sm:$0xff] %v22664_v0  ;;  %v19770_v42 = vld [vmem:[%s25401_s1 + $0x43] ss:$8 sm:$0xf]  ;;  %25823 = vst [vmem:[#allocation128_spill] sm:$0xff] %v22698_v32 }
 0x11a   :  { %v4130_v63 = vmul.f32 %v22656_v53, %v4082_v4  ;;  %19762 = vmatmul.mubr.msk.f32.vlgmr.msra.gmra.mrb[2].mxu0 %vm118_vm1, %v3763_v10  ;;  %19763 = vmatmul.mubr.msk.f32.vlgmr.msra.gmra.mrb[2].mxu1 %vm118_vm1, %v3763_v10  ;;  %25820 = vst [vmem:[#allocation125_spill] sm:$0xff] %v22674_v5  ;;  %v22680_v10 = vrot.slane %v4087_v7, %v21487_v21  ;;  %25824 = vst [vmem:[#allocation129_spill] sm:$0xff] %v22701_v3 }
 0x11b   :  { %4205 = vmatprep.mubr.f32.mxu0 %v25716_v18  ;;  %4276 = vmatprep.mubr.f32.mxu1 %v25716_v18  ;;  %v22693_v53 = vrot.slane %v4087_v7, %v21504_v27 }
 0x11c   :  { %v4064_v24 = vpop.permute.xlu1 %4063  ;;  %4141 = vmatprep.subr.mxu0 %v4130_v63  ;;  %v4074_v45 = vpop.permute.xlu0 %4073  ;;  %25821 = vst [vmem:[#allocation126_spill] sm:$0xff] %v22680_v10 }
 0x11d   :  { %v4083_v33 = vsel %vm4075_vm11, %v4074_v45, %v4060_v6  ;;  %v19771_v6 = vld [vmem:[%s25401_s1 + $0x43] ss:$8 sm:$0xf0]  ;;  %v4081_v4 = vsel %vm4075_vm11, %v4062_v41, %v4064_v24  ;;  %25822 = vst [vmem:[#allocation127_spill] sm:$0xff] %v22693_v53 }
 0x11e   :  { %v4129_v55 = vmul.f32 %v22664_v0, %v4083_v33  ;;  %v4461_v41 = vor.u32 %v19771_v6, %v19770_v42 }
 0x120   :  { %v4068_v63 = vpop.permute.xlu1 %4067  ;;  %4142 = vmatpush1.msra.mxu0 %v4129_v55  ;;  %v4066_v33 = vpop.permute.xlu0 %4065  ;;  %v4131_v55 = vmul.f32 %v22680_v10, %v4081_v4 }
 0x121   :  { %v4080_v0 = vsel %vm4075_vm11, %v4064_v24, %v4066_v33  ;;  %19766 = vmatmul.mubr.msk.f32.vlgmr.msra.gmra.mrb[0].mxu0 %vm118_vm1, %v4137_v29  ;;  %v22706_v24 = vrot.slane %v4087_v7, %v21518_v34  ;;  %v4079_v8 = vsel %vm4075_vm11, %v4066_v33, %v4068_v63  ;;  %v22730_v33 = vrot.slane %v4461_v41, %v21475_v16 }
 0x122   :  { %v4132_v22 = vmul.f32 %v22674_v5, %v4080_v0  ;;  %4347 = vmatprep.mubr.f32.mxu0 %v25716_v18 }
 0x123   :  { %25825 = vst [vmem:[#allocation130_spill] sm:$0xff] %v22706_v24  ;;  %25827 = vst [vmem:[#allocation132_spill] sm:$0xff] %v22730_v33 }
 0x124   :  { %v4072_v57 = vpop.permute.xlu1 %4071  ;;  %4212 = vmatprep.subr.mxu1 %v4132_v22  ;;  %v4070_v0 = vpop.permute.xlu0 %4069  ;;  %v22722_v22 = vrot.slane %v4461_v41, %v21473_v14 }
 0x125   :  { %v4076_v5 = vsel %vm4075_vm11, %v4072_v57, %v4074_v45  ;;  %v4077_v40 = vsel %vm4075_vm11, %v4070_v0, %v4072_v57  ;;  %v4078_v42 = vsel %vm4075_vm11, %v4068_v63, %v4070_v0  ;;  %4213 = vmatpush1.msra.mxu1 %v4131_v55  ;;  %v4133_v45 = vmul.f32 %v22706_v24, %v4079_v8 }
 0x126   :  { %v4135_v7 = vmul.f32 %v22693_v53, %v4077_v40  ;;  %v4134_v6 = vmul.f32 %v22698_v32, %v4078_v42  ;;  %v4136_v4 = vmul.f32 %v22701_v3, %v4076_v5  ;;  %19767 = vmatmul.mubr.msk.f32.vlgmr.msra.gmra.mrb[0].mxu1 %vm118_vm1, %v4137_v29  ;;  %25826 = vst [vmem:[#allocation131_spill] sm:$0xff] %v22722_v22 }
 0x127   :  { %4418 = vmatprep.mubr.f32.mxu1 %v25716_v18  ;;  %v22764_v24 = vrot.slane %v4461_v41, %v21511_v30  ;;  %v22767_v53 = vrot.slane %v4461_v41, %v21527_v38 }
 0x128   :  { %v4436_v57 = vpop.permute.xlu1 %4435  ;;  %4283 = vmatprep.subr.mxu0 %v4134_v6  ;;  %4354 = vmatprep.subr.mxu1 %v4136_v4  ;;  %v4434_v63 = vpop.permute.xlu0 %4433  ;;  %v4511_v6 = vld [vmem:[%s25402_s2 + $0x58] sm:$0xff] }
 0x129   :  { %v4456_v40 = vsel %vm4449_vm12, %v4434_v63, %v4436_v57  ;;  %4284 = vmatpush1.msra.mxu0 %v4133_v45  ;;  %4355 = vmatpush1.msra.mxu1 %v4135_v7  ;;  %v22740_v7 = vrot.slane %v4461_v41, %v21485_v20  ;;  %v19776_v4 = vld [vmem:[%s25401_s1 + $0x44] ss:$8 sm:$0xf]  ;;  %25831 = vst [vmem:[#allocation136_spill] sm:$0xff] %v22764_v24  ;;  %25832 = vst [vmem:[#allocation137_spill] sm:$0xff] %v22767_v53 }
 0x12a   :  { %v4504_v5 = vmul.f32 %v22722_v22, %v4456_v40  ;;  %19768 = vmatmul.mubr.msk.f32.vlgmr.msra.gmra.mrb[2].mxu0 %vm118_vm1, %v4137_v29  ;;  %19769 = vmatmul.mubr.msk.f32.vlgmr.msra.gmra.mrb[2].mxu1 %vm118_vm1, %v4137_v29  ;;  %v22746_v29 = vrot.slane %v4461_v41, %v21487_v21  ;;  %v19777_v45 = vld [vmem:[%s25401_s1 + $0x44] ss:$8 sm:$0xf0] }
 0x12b   :  { %4579 = vmatprep.mubr.f32.mxu0 %v25716_v18  ;;  %4650 = vmatprep.mubr.f32.mxu1 %v25716_v18  ;;  %25828 = vst [vmem:[#allocation133_spill] sm:$0xff] %v22740_v7 }
 0x12c   :  { %v4438_v8 = vpop.permute.xlu1 %4437  ;;  %4515 = vmatprep.subr.mxu0 %v4504_v5  ;;  %v4448_v55 = vpop.permute.xlu0 %4447  ;;  %25829 = vst [vmem:[#allocation134_spill] sm:$0xff] %v22746_v29 }
 0x12d   :  { %v4457_v0 = vsel %vm4449_vm12, %v4448_v55, %v4434_v63  ;;  %v4455_v63 = vsel %vm4449_vm12, %v4436_v57, %v4438_v8  ;;  %v4835_v57 = vor.u32 %v19777_v45, %v19776_v4 }
 0x12e   :  { %v4503_v42 = vmul.f32 %v22730_v33, %v4457_v0  ;;  %v22759_v33 = vrot.slane %v4461_v41, %v21504_v27 }
 0x130   :  { %v4442_v40 = vpop.permute.xlu1 %4441  ;;  %4516 = vmatpush1.msra.mxu0 %v4503_v42  ;;  %v4440_v5 = vpop.permute.xlu0 %4439  ;;  %25830 = vst [vmem:[#allocation135_spill] sm:$0xff] %v22759_v33  ;;  %v4505_v42 = vmul.f32 %v22746_v29, %v4455_v63 }
 0x131   :  { %v4454_v0 = vsel %vm4449_vm12, %v4438_v8, %v4440_v5  ;;  %19772 = vmatmul.mubr.msk.f32.vlgmr.msra.gmra.mrb[0].mxu0 %vm118_vm1, %v4511_v6  ;;  %v22772_v8 = vrot.slane %v4461_v41, %v21518_v34  ;;  %v4453_v32 = vsel %vm4449_vm12, %v4440_v5, %v4442_v40  ;;  %v22796_v5 = vrot.slane %v4835_v57, %v21475_v16 }
 0x132   :  { %v4506_v22 = vmul.f32 %v22740_v7, %v4454_v0  ;;  %4721 = vmatprep.mubr.f32.mxu0 %v25716_v18 }
 0x133   :  { %25833 = vst [vmem:[#allocation138_spill] sm:$0xff] %v22772_v8  ;;  %25835 = vst [vmem:[#allocation140_spill] sm:$0xff] %v22796_v5 }
 0x134   :  { %v4446_v3 = vpop.permute.xlu1 %4445  ;;  %4586 = vmatprep.subr.mxu1 %v4506_v22  ;;  %v4444_v0 = vpop.permute.xlu0 %4443  ;;  %v22788_v22 = vrot.slane %v4835_v57, %v21473_v14 }
 0x135   :  { %v4450_v7 = vsel %vm4449_vm12, %v4446_v3, %v4448_v55  ;;  %v4451_v10 = vsel %vm4449_vm12, %v4444_v0, %v4446_v3  ;;  %v4452_v4 = vsel %vm4449_vm12, %v4442_v40, %v4444_v0  ;;  %4587 = vmatpush1.msra.mxu1 %v4505_v42  ;;  %v4507_v55 = vmul.f32 %v22772_v8, %v4453_v32 }
 0x136   :  { %v4509_v41 = vmul.f32 %v22759_v33, %v4451_v10  ;;  %v4508_v45 = vmul.f32 %v22764_v24, %v4452_v4  ;;  %v4510_v63 = vmul.f32 %v22767_v53, %v4450_v7  ;;  %19773 = vmatmul.mubr.msk.f32.vlgmr.msra.gmra.mrb[0].mxu1 %vm118_vm1, %v4511_v6  ;;  %25834 = vst [vmem:[#allocation139_spill] sm:$0xff] %v22788_v22 }
 0x137   :  { %4792 = vmatprep.mubr.f32.mxu1 %v25716_v18  ;;  %v22830_v8 = vrot.slane %v4835_v57, %v21511_v30  ;;  %v22833_v33 = vrot.slane %v4835_v57, %v21527_v38 }
 0x138   :  { %v4810_v3 = vpop.permute.xlu1 %4809  ;;  %4657 = vmatprep.subr.mxu0 %v4508_v45  ;;  %4728 = vmatprep.subr.mxu1 %v4510_v63  ;;  %v4808_v40 = vpop.permute.xlu0 %4807  ;;  %v4885_v45 = vld [vmem:[%s25402_s2 + $0x60] sm:$0xff] }
 0x139   :  { %v4830_v10 = vsel %vm4823_vm13, %v4808_v40, %v4810_v3  ;;  %4658 = vmatpush1.msra.mxu0 %v4507_v55  ;;  %4729 = vmatpush1.msra.mxu1 %v4509_v41  ;;  %v22806_v41 = vrot.slane %v4835_v57, %v21485_v20  ;;  %v19782_v63 = vld [vmem:[%s25401_s1 + $0x46] ss:$8 sm:$0xf]  ;;  %25839 = vst [vmem:[#allocation144_spill] sm:$0xff] %v22830_v8  ;;  %25840 = vst [vmem:[#allocation145_spill] sm:$0xff] %v22833_v33 }
 0x13a   :  { %v4878_v7 = vmul.f32 %v22788_v22, %v4830_v10  ;;  %19774 = vmatmul.mubr.msk.f32.vlgmr.msra.gmra.mrb[2].mxu0 %vm118_vm1, %v4511_v6  ;;  %19775 = vmatmul.mubr.msk.f32.vlgmr.msra.gmra.mrb[2].mxu1 %vm118_vm1, %v4511_v6  ;;  %v22812_v6 = vrot.slane %v4835_v57, %v21487_v21  ;;  %v19783_v55 = vld [vmem:[%s25401_s1 + $0x46] ss:$8 sm:$0xf0] }
 0x13b   :  { %4953 = vmatprep.mubr.f32.mxu0 %v25716_v18  ;;  %5024 = vmatprep.mubr.f32.mxu1 %v25716_v18  ;;  %25836 = vst [vmem:[#allocation141_spill] sm:$0xff] %v22806_v41 }
 0x13c   :  { %v4812_v32 = vpop.permute.xlu1 %4811  ;;  %4889 = vmatprep.subr.mxu0 %v4878_v7  ;;  %v4822_v42 = vpop.permute.xlu0 %4821  ;;  %25837 = vst [vmem:[#allocation142_spill] sm:$0xff] %v22812_v6 }
 0x13d   :  { %v4831_v0 = vsel %vm4823_vm13, %v4822_v42, %v4808_v40  ;;  %v4829_v40 = vsel %vm4823_vm13, %v4810_v3, %v4812_v32  ;;  %v5209_v3 = vor.u32 %v19783_v55, %v19782_v63 }
 0x13e   :  { %v4877_v4 = vmul.f32 %v22796_v5, %v4831_v0  ;;  %v22825_v5 = vrot.slane %v4835_v57, %v21504_v27 }
 0x140   :  { %v4816_v10 = vpop.permute.xlu1 %4815  ;;  %4890 = vmatpush1.msra.mxu0 %v4877_v4  ;;  %v4814_v7 = vpop.permute.xlu0 %4813  ;;  %25838 = vst [vmem:[#allocation143_spill] sm:$0xff] %v22825_v5  ;;  %v4879_v4 = vmul.f32 %v22812_v6, %v4829_v40 }
 0x141   :  { %v4828_v0 = vsel %vm4823_vm13, %v4812_v32, %v4814_v7  ;;  %19778 = vmatmul.mubr.msk.f32.vlgmr.msra.gmra.mrb[0].mxu0 %vm118_vm1, %v4885_v45  ;;  %v22838_v32 = vrot.slane %v4835_v57, %v21518_v34  ;;  %v4827_v24 = vsel %vm4823_vm13, %v4814_v7, %v4816_v10  ;;  %v22862_v7 = vrot.slane %v5209_v3, %v21475_v16 }
 0x142   :  { %v4880_v22 = vmul.f32 %v22806_v41, %v4828_v0  ;;  %5095 = vmatprep.mubr.f32.mxu0 %v25716_v18 }
 0x143   :  { %25841 = vst [vmem:[#allocation146_spill] sm:$0xff] %v22838_v32  ;;  %25843 = vst [vmem:[#allocation148_spill] sm:$0xff] %v22862_v7 }
 0x144   :  { %v4820_v53 = vpop.permute.xlu1 %4819  ;;  %4960 = vmatprep.subr.mxu1 %v4880_v22  ;;  %v4818_v0 = vpop.permute.xlu0 %4817  ;;  %v22854_v22 = vrot.slane %v5209_v3, %v21473_v14 }
 0x145   :  { %v4824_v41 = vsel %vm4823_vm13, %v4820_v53, %v4822_v42  ;;  %v4825_v29 = vsel %vm4823_vm13, %v4818_v0, %v4820_v53  ;;  %v4826_v63 = vsel %vm4823_vm13, %v4816_v10, %v4818_v0  ;;  %4961 = vmatpush1.msra.mxu1 %v4879_v4  ;;  %v4881_v42 = vmul.f32 %v22838_v32, %v4827_v24 }
 0x146   :  { %v4883_v57 = vmul.f32 %v22825_v5, %v4825_v29  ;;  %v4882_v55 = vmul.f32 %v22830_v8, %v4826_v63  ;;  %v4884_v40 = vmul.f32 %v22833_v33, %v4824_v41  ;;  %19779 = vmatmul.mubr.msk.f32.vlgmr.msra.gmra.mrb[0].mxu1 %vm118_vm1, %v4885_v45  ;;  %25842 = vst [vmem:[#allocation147_spill] sm:$0xff] %v22854_v22 }
 0x147   :  { %5166 = vmatprep.mubr.f32.mxu1 %v25716_v18  ;;  %v22896_v32 = vrot.slane %v5209_v3, %v21511_v30  ;;  %v22899_v5 = vrot.slane %v5209_v3, %v21527_v38 }
 0x148   :  { %v5186_v53 = vpop.permute.xlu1 %5185  ;;  %5031 = vmatprep.subr.mxu0 %v4882_v55  ;;  %5102 = vmatprep.subr.mxu1 %v4884_v40  ;;  %v5184_v10 = vpop.permute.xlu0 %5183  ;;  %v5259_v55 = vld [vmem:[%s25402_s2 + $0x70] sm:$0xff] }
 0x149   :  { %v5203_v29 = vsel %vm25567_vm14, %v5184_v10, %v5186_v53  ;;  %5032 = vmatpush1.msra.mxu0 %v4881_v42  ;;  %5103 = vmatpush1.msra.mxu1 %v4883_v57  ;;  %v22872_v57 = vrot.slane %v5209_v3, %v21485_v20  ;;  %v19788_v40 = vld [vmem:[%s25401_s1 + $0x47] ss:$8 sm:$0xf]  ;;  %25847 = vst [vmem:[#allocation152_spill] sm:$0xff] %v22896_v32  ;;  %25848 = vst [vmem:[#allocation153_spill] sm:$0xff] %v22899_v5 }
 0x14a   :  { %v5252_v41 = vmul.f32 %v22854_v22, %v5203_v29  ;;  %19780 = vmatmul.mubr.msk.f32.vlgmr.msra.gmra.mrb[2].mxu0 %vm118_vm1, %v4885_v45  ;;  %19781 = vmatmul.mubr.msk.f32.vlgmr.msra.gmra.mrb[2].mxu1 %vm118_vm1, %v4885_v45  ;;  %v22878_v45 = vrot.slane %v5209_v3, %v21487_v21  ;;  %v19789_v42 = vld [vmem:[%s25401_s1 + $0x47] ss:$8 sm:$0xf0] }
 0x14b   :  { %5327 = vmatprep.mubr.f32.mxu0 %v25716_v18  ;;  %5398 = vmatprep.mubr.f32.mxu1 %v25716_v18  ;;  %25844 = vst [vmem:[#allocation149_spill] sm:$0xff] %v22872_v57 }
 0x14c   :  { %v5188_v24 = vpop.permute.xlu1 %5187  ;;  %5263 = vmatprep.subr.mxu0 %v5252_v41  ;;  %v5182_v4 = vpop.permute.xlu0 %5181  ;;  %25845 = vst [vmem:[#allocation150_spill] sm:$0xff] %v22878_v45 }
 0x14d   :  { %v5204_v0 = vsel %vm25567_vm14, %v5182_v4, %v5184_v10  ;;  %v5202_v10 = vsel %vm25567_vm14, %v5186_v53, %v5188_v24  ;;  %v5583_v53 = vor.u32 %v19789_v42, %v19788_v40 }
 0x14e   :  { %v5251_v63 = vmul.f32 %v22862_v7, %v5204_v0  ;;  %v22891_v7 = vrot.slane %v5209_v3, %v21504_v27 }
 0x150   :  { %v5192_v29 = vpop.permute.xlu1 %5191  ;;  %5264 = vmatpush1.msra.mxu0 %v5251_v63  ;;  %v5190_v41 = vpop.permute.xlu0 %5189  ;;  %25846 = vst [vmem:[#allocation151_spill] sm:$0xff] %v22891_v7  ;;  %v5253_v63 = vmul.f32 %v22878_v45, %v5202_v10 }
 0x151   :  { %v5201_v0 = vsel %vm25567_vm14, %v5188_v24, %v5190_v41  ;;  %19784 = vmatmul.mubr.msk.f32.vlgmr.msra.gmra.mrb[0].mxu0 %vm118_vm1, %v5259_v55  ;;  %v22904_v24 = vrot.slane %v5209_v3, %v21518_v34  ;;  %v5200_v8 = vsel %vm25567_vm14, %v5190_v41, %v5192_v29  ;;  %v22928_v41 = vrot.slane %v5583_v53, %v21475_v16 }
 0x152   :  { %v5254_v22 = vmul.f32 %v22872_v57, %v5201_v0  ;;  %5469 = vmatprep.mubr.f32.mxu0 %v25716_v18 }
 0x153   :  { %25849 = vst [vmem:[#allocation154_spill] sm:$0xff] %v22904_v24  ;;  %25851 = vst [vmem:[#allocation156_spill] sm:$0xff] %v22928_v41 }
 0x154   :  { %v5196_v33 = vpop.permute.xlu1 %5195  ;;  %5334 = vmatprep.subr.mxu1 %v5254_v22  ;;  %v5194_v0 = vpop.permute.xlu0 %5193  ;;  %v22920_v22 = vrot.slane %v5583_v53, %v21473_v14 }
 0x155   :  { %v5205_v57 = vsel %vm25567_vm14, %v5196_v33, %v5182_v4  ;;  %v5198_v6 = vsel %vm25567_vm14, %v5194_v0, %v5196_v33  ;;  %v5199_v40 = vsel %vm25567_vm14, %v5192_v29, %v5194_v0  ;;  %5335 = vmatpush1.msra.mxu1 %v5253_v63  ;;  %v5255_v4 = vmul.f32 %v22904_v24, %v5200_v8 }
 0x156   :  { %v5257_v3 = vmul.f32 %v22891_v7, %v5198_v6  ;;  %v5256_v42 = vmul.f32 %v22896_v32, %v5199_v40  ;;  %v5258_v10 = vmul.f32 %v22899_v5, %v5205_v57  ;;  %19785 = vmatmul.mubr.msk.f32.vlgmr.msra.gmra.mrb[0].mxu1 %vm118_vm1, %v5259_v55  ;;  %25850 = vst [vmem:[#allocation155_spill] sm:$0xff] %v22920_v22  ;;  %vm5945_vm14 = vcmp.lt.s32.totalorder %v21467_v13, 120 }
 0x157   :  { %5540 = vmatprep.mubr.f32.mxu1 %v25716_v18  ;;  %v22962_v24 = vrot.slane %v5583_v53, %v21511_v30  ;;  %v22965_v7 = vrot.slane %v5583_v53, %v21527_v38 }
 0x158   :  { %v5560_v33 = vpop.permute.xlu1 %5559  ;;  %5405 = vmatprep.subr.mxu0 %v5256_v42  ;;  %5476 = vmatprep.subr.mxu1 %v5258_v10  ;;  %v5558_v29 = vpop.permute.xlu0 %5557  ;;  %v5633_v42 = vld [vmem:[%s25402_s2 + $0x78] sm:$0xff] }
 0x159   :  { %v5577_v6 = vsel %vm25576_vm15, %v5558_v29, %v5560_v33  ;;  %5406 = vmatpush1.msra.mxu0 %v5255_v4  ;;  %5477 = vmatpush1.msra.mxu1 %v5257_v3  ;;  %v22938_v3 = vrot.slane %v5583_v53, %v21485_v20  ;;  %v19794_v10 = vld [vmem:[%s25401_s1 + $0x80] ss:$8 sm:$0xf]  ;;  %25855 = vst [vmem:[#allocation160_spill] sm:$0xff] %v22962_v24  ;;  %25856 = vst [vmem:[#allocation161_spill] sm:$0xff] %v22965_v7 }
 0x15a   :  { %v5626_v57 = vmul.f32 %v22920_v22, %v5577_v6  ;;  %19786 = vmatmul.mubr.msk.f32.vlgmr.msra.gmra.mrb[2].mxu0 %vm118_vm1, %v5259_v55  ;;  %19787 = vmatmul.mubr.msk.f32.vlgmr.msra.gmra.mrb[2].mxu1 %vm118_vm1, %v5259_v55  ;;  %v22944_v55 = vrot.slane %v5583_v53, %v21487_v21  ;;  %v19795_v4 = vld [vmem:[%s25401_s1 + $0x80] ss:$8 sm:$0xf0] }
 0x15b   :  { %5701 = vmatprep.mubr.f32.mxu0 %v25716_v18  ;;  %5772 = vmatprep.mubr.f32.mxu1 %v25716_v18  ;;  %25852 = vst [vmem:[#allocation157_spill] sm:$0xff] %v22938_v3 }
 0x15c   :  { %v5562_v8 = vpop.permute.xlu1 %5561  ;;  %5637 = vmatprep.subr.mxu0 %v5626_v57  ;;  %v5556_v63 = vpop.permute.xlu0 %5555  ;;  %25853 = vst [vmem:[#allocation158_spill] sm:$0xff] %v22944_v55 }
 0x15d   :  { %v5578_v0 = vsel %vm25576_vm15, %v5556_v63, %v5558_v29  ;;  %v5576_v29 = vsel %vm25576_vm15, %v5560_v33, %v5562_v8  ;;  %v5957_v33 = vor.u32 %v19795_v4, %v19794_v10 }
 0x15e   :  { %v5625_v40 = vmul.f32 %v22928_v41, %v5578_v0  ;;  %v22957_v41 = vrot.slane %v5583_v53, %v21504_v27 }
 0x160   :  { %v5566_v6 = vpop.permute.xlu1 %5565  ;;  %5638 = vmatpush1.msra.mxu0 %v5625_v40  ;;  %v5564_v57 = vpop.permute.xlu0 %5563  ;;  %25854 = vst [vmem:[#allocation159_spill] sm:$0xff] %v22957_v41  ;;  %v5627_v40 = vmul.f32 %v22944_v55, %v5576_v29 }
 0x161   :  { %v5575_v0 = vsel %vm25576_vm15, %v5562_v8, %v5564_v57  ;;  %19790 = vmatmul.mubr.msk.f32.vlgmr.msra.gmra.mrb[0].mxu0 %vm118_vm1, %v5633_v42  ;;  %v22970_v8 = vrot.slane %v5583_v53, %v21518_v34  ;;  %v5574_v32 = vsel %vm25576_vm15, %v5564_v57, %v5566_v6  ;;  %v22994_v57 = vrot.slane %v5957_v33, %v21475_v16 }
 0x162   :  { %v5628_v22 = vmul.f32 %v22938_v3, %v5575_v0  ;;  %5843 = vmatprep.mubr.f32.mxu0 %v25716_v18 }
 0x163   :  { %25857 = vst [vmem:[#allocation162_spill] sm:$0xff] %v22970_v8  ;;  %25859 = vst [vmem:[#allocation164_spill] sm:$0xff] %v22994_v57 }
 0x164   :  { %v5570_v5 = vpop.permute.xlu1 %5569  ;;  %5708 = vmatprep.subr.mxu1 %v5628_v22  ;;  %v5568_v0 = vpop.permute.xlu0 %5567  ;;  %v22986_v22 = vrot.slane %v5957_v33, %v21473_v14 }
 0x165   :  { %v5579_v3 = vsel %vm25576_vm15, %v5570_v5, %v5556_v63  ;;  %v5572_v45 = vsel %vm25576_vm15, %v5568_v0, %v5570_v5  ;;  %v5573_v10 = vsel %vm25576_vm15, %v5566_v6, %v5568_v0  ;;  %5709 = vmatpush1.msra.mxu1 %v5627_v40  ;;  %v5629_v63 = vmul.f32 %v22970_v8, %v5574_v32 }
 0x166   :  { %v5631_v53 = vmul.f32 %v22957_v41, %v5572_v45  ;;  %v5630_v4 = vmul.f32 %v22962_v24, %v5573_v10  ;;  %v5632_v29 = vmul.f32 %v22965_v7, %v5579_v3  ;;  %19791 = vmatmul.mubr.msk.f32.vlgmr.msra.gmra.mrb[0].mxu1 %vm118_vm1, %v5633_v42  ;;  %25858 = vst [vmem:[#allocation163_spill] sm:$0xff] %v22986_v22  ;;  %vm6319_vm15 = vcmp.lt.s32.totalorder %v21467_v13, 119 }
 0x167   :  { %5914 = vmatprep.mubr.f32.mxu1 %v25716_v18  ;;  %v23028_v8 = vrot.slane %v5957_v33, %v21511_v30  ;;  %v23031_v41 = vrot.slane %v5957_v33, %v21527_v38 }
 0x168   :  { %v5934_v5 = vpop.permute.xlu1 %5933  ;;  %5779 = vmatprep.subr.mxu0 %v5630_v4  ;;  %5850 = vmatprep.subr.mxu1 %v5632_v29  ;;  %v5932_v6 = vpop.permute.xlu0 %5931  ;;  %v6007_v4 = vld [vmem:[%s25402_s2 + $0x80] sm:$0xff] }
 0x169   :  { %v5951_v45 = vsel %vm5945_vm14, %v5932_v6, %v5934_v5  ;;  %5780 = vmatpush1.msra.mxu0 %v5629_v63  ;;  %5851 = vmatpush1.msra.mxu1 %v5631_v53  ;;  %v23004_v53 = vrot.slane %v5957_v33, %v21485_v20  ;;  %v19800_v29 = vld [vmem:[%s25401_s1 + $0x81] ss:$8 sm:$0xf]  ;;  %25863 = vst [vmem:[#allocation168_spill] sm:$0xff] %v23028_v8  ;;  %25864 = vst [vmem:[#allocation169_spill] sm:$0xff] %v23031_v41 }
 0x16a   :  { %v6000_v3 = vmul.f32 %v22986_v22, %v5951_v45  ;;  %19792 = vmatmul.mubr.msk.f32.vlgmr.msra.gmra.mrb[2].mxu0 %vm118_vm1, %v5633_v42  ;;  %19793 = vmatmul.mubr.msk.f32.vlgmr.msra.gmra.mrb[2].mxu1 %vm118_vm1, %v5633_v42  ;;  %v23010_v42 = vrot.slane %v5957_v33, %v21487_v21  ;;  %v19801_v63 = vld [vmem:[%s25401_s1 + $0x81] ss:$8 sm:$0xf0] }
 0x16b   :  { %6075 = vmatprep.mubr.f32.mxu0 %v25716_v18  ;;  %6146 = vmatprep.mubr.f32.mxu1 %v25716_v18  ;;  %25860 = vst [vmem:[#allocation165_spill] sm:$0xff] %v23004_v53 }
 0x16c   :  { %v5936_v32 = vpop.permute.xlu1 %5935  ;;  %6011 = vmatprep.subr.mxu0 %v6000_v3  ;;  %v5930_v40 = vpop.permute.xlu0 %5929  ;;  %25861 = vst [vmem:[#allocation166_spill] sm:$0xff] %v23010_v42 }
 0x16d   :  { %v5952_v0 = vsel %vm5945_vm14, %v5930_v40, %v5932_v6  ;;  %v5950_v6 = vsel %vm5945_vm14, %v5934_v5, %v5936_v32  ;;  %v6331_v5 = vor.u32 %v19801_v63, %v19800_v29 }
 0x16e   :  { %v5999_v10 = vmul.f32 %v22994_v57, %v5952_v0  ;;  %v23023_v57 = vrot.slane %v5957_v33, %v21504_v27 }
 0x170   :  { %v5940_v45 = vpop.permute.xlu1 %5939  ;;  %6012 = vmatpush1.msra.mxu0 %v5999_v10  ;;  %v5938_v3 = vpop.permute.xlu0 %5937  ;;  %25862 = vst [vmem:[#allocation167_spill] sm:$0xff] %v23023_v57  ;;  %v6001_v10 = vmul.f32 %v23010_v42, %v5950_v6 }
 0x171   :  { %v5949_v0 = vsel %vm5945_vm14, %v5936_v32, %v5938_v3  ;;  %19796 = vmatmul.mubr.msk.f32.vlgmr.msra.gmra.mrb[0].mxu0 %vm118_vm1, %v6007_v4  ;;  %v23036_v32 = vrot.slane %v5957_v33, %v21518_v34  ;;  %v5948_v24 = vsel %vm5945_vm14, %v5938_v3, %v5940_v45  ;;  %v23060_v3 = vrot.slane %v6331_v5, %v21475_v16 }
 0x172   :  { %v6002_v22 = vmul.f32 %v23004_v53, %v5949_v0  ;;  %6217 = vmatprep.mubr.f32.mxu0 %v25716_v18 }
 0x173   :  { %25865 = vst [vmem:[#allocation170_spill] sm:$0xff] %v23036_v32  ;;  %25867 = vst [vmem:[#allocation172_spill] sm:$0xff] %v23060_v3 }
 0x174   :  { %v5944_v7 = vpop.permute.xlu1 %5943  ;;  %6082 = vmatprep.subr.mxu1 %v6002_v22  ;;  %v5942_v0 = vpop.permute.xlu0 %5941  ;;  %v23052_v22 = vrot.slane %v6331_v5, %v21473_v14 }
 0x175   :  { %v5953_v53 = vsel %vm5945_vm14, %v5944_v7, %v5930_v40  ;;  %v5946_v55 = vsel %vm5945_vm14, %v5942_v0, %v5944_v7  ;;  %v5947_v29 = vsel %vm5945_vm14, %v5940_v45, %v5942_v0  ;;  %6083 = vmatpush1.msra.mxu1 %v6001_v10  ;;  %v6003_v40 = vmul.f32 %v23036_v32, %v5948_v24  ;;  %v19806_v0 = vld [vmem:[%s25401_s1 + $0x82] ss:$8 sm:$0xf] }
 0x176   :  { %v6005_v33 = vmul.f32 %v23023_v57, %v5946_v55  ;;  %v6004_v63 = vmul.f32 %v23028_v8, %v5947_v29  ;;  %v6006_v6 = vmul.f32 %v23031_v41, %v5953_v53  ;;  %19797 = vmatmul.mubr.msk.f32.vlgmr.msra.gmra.mrb[0].mxu1 %vm118_vm1, %v6007_v4  ;;  %25866 = vst [vmem:[#allocation171_spill] sm:$0xff] %v23052_v22  ;;  %v19812_v41 = vld [vmem:[%s25401_s1 + $0x83] ss:$8 sm:$0xf] }
 0x177   :  { %6288 = vmatprep.mubr.f32.mxu1 %v25716_v18  ;;  %v23091_v32 = vrot.slane %v6331_v5, %v21504_v27  ;;  %v23094_v57 = vrot.slane %v6331_v5, %v21511_v30  ;;  %v23097_v8 = vrot.slane %v6331_v5, %v21527_v38 }
 0x178   :  { %v6308_v7 = vpop.permute.xlu1 %6307  ;;  %6153 = vmatprep.subr.mxu0 %v6004_v63  ;;  %6224 = vmatprep.subr.mxu1 %v6006_v6  ;;  %v6306_v45 = vpop.permute.xlu0 %6305  ;;  %v23076_v63 = vrot.slane %v6331_v5, %v21485_v20  ;;  %v6381_v6 = vld [vmem:[%s25402_s2 + $0x88] sm:$0xff] }
 0x179   :  { %v6325_v55 = vsel %vm6319_vm15, %v6306_v45, %v6308_v7  ;;  %6154 = vmatpush1.msra.mxu0 %v6003_v40  ;;  %6225 = vmatpush1.msra.mxu1 %v6005_v33  ;;  %v19807_v33 = vld [vmem:[%s25401_s1 + $0x82] ss:$8 sm:$0xf0]  ;;  %v23082_v40 = vrot.slane %v6331_v5, %v21487_v21  ;;  %25870 = vst [vmem:[#allocation175_spill] sm:$0xff] %v23091_v32 }
 0x17a   :  { %v6374_v53 = vmul.f32 %v23052_v22, %v6325_v55  ;;  %19798 = vmatmul.mubr.msk.f32.vlgmr.msra.gmra.mrb[2].mxu0 %vm118_vm1, %v6007_v4  ;;  %19799 = vmatmul.mubr.msk.f32.vlgmr.msra.gmra.mrb[2].mxu1 %vm118_vm1, %v6007_v4  ;;  %25868 = vst [vmem:[#allocation173_spill] sm:$0xff] %v23076_v63  ;;  %v6680_v22 = vor.u32 %v19807_v33, %v19806_v0 }
 0x17b   :  { %6449 = vmatprep.mubr.f32.mxu0 %v25716_v18  ;;  %6520 = vmatprep.mubr.f32.mxu1 %v25716_v18  ;;  %25869 = vst [vmem:[#allocation174_spill] sm:$0xff] %v23082_v40  ;;  %v23102_v0 = vrot.slane %v6331_v5, %v21518_v34  ;;  %v19813_v5 = vld [vmem:[%s25401_s1 + $0x83] ss:$8 sm:$0xf0] }
 0x17c   :  { %v6310_v24 = vpop.permute.xlu1 %6309  ;;  %6385 = vmatprep.subr.mxu0 %v6374_v53  ;;  %v6304_v10 = vpop.permute.xlu0 %6303  ;;  %v23108_v33 = vrot.slane %v6680_v22, %v21473_v14  ;;  %v23128_v42 = vrot.slane %v6680_v22, %v21487_v21 }
 0x17d   :  { %v6326_v29 = vsel %vm6319_vm15, %v6304_v10, %v6306_v45  ;;  %v6324_v55 = vsel %vm6319_vm15, %v6308_v7, %v6310_v24  ;;  %25871 = vst [vmem:[#allocation176_spill] sm:$0xff] %v23102_v0 }
 0x17e   :  { %v6373_v4 = vmul.f32 %v23060_v3, %v6326_v29  ;;  %v6375_v7 = vmul.f32 %v23082_v40, %v6324_v55 }
 0x180   :  { %v6314_v45 = vpop.permute.xlu1 %6313  ;;  %6386 = vmatpush1.msra.mxu0 %v6373_v4  ;;  %v6312_v53 = vpop.permute.xlu0 %6311 }
 0x181   :  { %v6323_v29 = vsel %vm6319_vm15, %v6310_v24, %v6312_v53  ;;  %19802 = vmatmul.mubr.msk.f32.vlgmr.msra.gmra.mrb[0].mxu0 %vm118_vm1, %v6381_v6  ;;  %v23105_v24 = vrot.slane %v6680_v22, %v21475_v16  ;;  %v6322_v4 = vsel %vm6319_vm15, %v6312_v53, %v6314_v45 }
 0x182   :  { %v6376_v3 = vmul.f32 %v23076_v63, %v6323_v29  ;;  %6591 = vmatprep.mubr.f32.mxu0 %v25716_v18 }
 0x184   :  { %v6318_v29 = vpop.permute.xlu1 %6317  ;;  %6456 = vmatprep.subr.mxu1 %v6376_v3  ;;  %v6316_v63 = vpop.permute.xlu0 %6315  ;;  %v23125_v3 = vrot.slane %v6680_v22, %v21485_v20 }
 0x185   :  { %v6327_v55 = vsel %vm6319_vm15, %v6318_v29, %v6304_v10  ;;  %v6320_v40 = vsel %vm6319_vm15, %v6316_v63, %v6318_v29  ;;  %v6321_v53 = vsel %vm6319_vm15, %v6314_v45, %v6316_v63  ;;  %6457 = vmatpush1.msra.mxu1 %v6375_v7  ;;  %v23135_v29 = vrot.slane %v6680_v22, %v21527_v38 }
 0x186   :  { %v6379_v15 = vmul.f32 %v23091_v32, %v6320_v40  ;;  %19803 = vmatmul.mubr.msk.f32.vlgmr.msra.gmra.mrb[0].mxu1 %vm118_vm1, %v6381_v6  ;;  %v6378_v62 = vmul.f32 %v23094_v57, %v6321_v53  ;;  %v6380_v10 = vmul.f32 %v23097_v8, %v6327_v55  ;;  %v6377_v63 = vmul.f32 %v23102_v0, %v6322_v4 }
 0x187   :  { %6662 = vmatprep.mubr.f32.mxu1 %v25716_v18  ;;  %v23140_v45 = vrot.slane %v6680_v22, %v21511_v30  ;;  %v23143_v7 = vrot.slane %v6680_v22, %v21504_v27  ;;  %v7029_v40 = vor.u32 %v19813_v5, %v19812_v41  ;;  %v23146_v53 = vrot.slane %v6680_v22, %v21518_v34 }
 0x188   :  { %6527 = vmatprep.subr.mxu0 %v6378_v62  ;;  %6598 = vmatprep.subr.mxu1 %v6380_v10  ;;  %v6723_v55 = vmul.f32 %v23108_v33, %v21522_v36  ;;  %v6725_v4 = vmul.f32 %v23125_v3, %v21557_v48  ;;  %v6722_v0 = vmul.f32 %v23105_v24, %v21498_v26 }
 0x189   :  { %6528 = vmatpush1.msra.mxu0 %v6377_v63  ;;  %6599 = vmatpush1.msra.mxu1 %v6379_v15  ;;  %v6724_v32 = vmul.f32 %v23128_v42, %v21531_v39  ;;  %v23159_v62 = vrot.slane %v7029_v40, %v21473_v14  ;;  %v6729_v36 = vmul.f32 %v23135_v29, %v21494_v25  ;;  %v6730_v39 = vld [vmem:[%s25402_s2 + $0x90] sm:$0xff] }
 0x18a   :  { %19804 = vmatmul.mubr.msk.f32.vlgmr.msra.gmra.mrb[2].mxu0 %vm118_vm1, %v6381_v6  ;;  %19805 = vmatmul.mubr.msk.f32.vlgmr.msra.gmra.mrb[2].mxu1 %vm118_vm1, %v6381_v6  ;;  %v6727_v48 = vmul.f32 %v23140_v45, %v21565_v50  ;;  %v23166_v26 = vrot.slane %v7029_v40, %v21485_v20  ;;  %v23172_v15 = vrot.slane %v7029_v40, %v21475_v16  ;;  %v19818_v25 = vld [vmem:[%s25401_s1 + $0x84] ss:$8 sm:$0xf] }
 0x18b   :  { %6734 = vmatprep.subr.mxu0 %v6723_v55  ;;  %6805 = vmatprep.subr.mxu1 %v6725_v4  ;;  %v23175_v41 = vrot.slane %v7029_v40, %v21487_v21  ;;  %v19819_v50 = vld [vmem:[%s25401_s1 + $0x84] ss:$8 sm:$0xf0]  ;;  %v6726_v22 = vmul.f32 %v23146_v53, %v21569_v51  ;;  %v23190_v6 = vrot.slane %v7029_v40, %v21527_v38 }
 0x18c   :  { %6735 = vmatpush1.msra.mxu0 %v6722_v0  ;;  %6806 = vmatpush1.msra.mxu1 %v6724_v32  ;;  %v6728_v32 = vmul.f32 %v23143_v7, %v21561_v49  ;;  %v7072_v0 = vmul.f32 %v23159_v62, %v21660_v46  ;;  %v7074_v49 = vmul.f32 %v23166_v26, %v21703_v12 }
 0x18d   :  { %6876 = vmatprep.subr.mxu0 %v6727_v48  ;;  %6947 = vmatprep.subr.mxu1 %v6729_v36  ;;  %v23199_v5 = vrot.slane %v7029_v40, %v21511_v30  ;;  %v7378_v51 = vor.u32 %v19819_v50, %v19818_v25  ;;  %v23202_v10 = vrot.slane %v7029_v40, %v21504_v27 }
 0x18e   :  { %6798 = vmatprep.mubr.f32.mxu0 %v25716_v18  ;;  %6869 = vmatprep.mubr.f32.mxu1 %v25716_v18  ;;  %v23205_v63 = vrot.slane %v7029_v40, %v21518_v34  ;;  %v7071_v46 = vmul.f32 %v23172_v15, %v21603_v9  ;;  %v7073_v12 = vmul.f32 %v23175_v41, %v21640_v31  ;;  %v7079_v31 = vld [vmem:[%s25402_s2 + $0x98] sm:$0xff] }
 0x18f   :  { %19808 = vmatmul.mubr.msk.f32.vlgmr.msra.gmra.mrb[0].mxu0 %vm118_vm1, %v6730_v39  ;;  %19809 = vmatmul.mubr.msk.f32.vlgmr.msra.gmra.mrb[0].mxu1 %vm118_vm1, %v6730_v39  ;;  %v23214_v55 = vrot.slane %v7378_v51, %v21473_v14  ;;  %v7076_v40 = vmul.f32 %v23199_v5, %v21687_v58  ;;  %v7078_v9 = vmul.f32 %v23190_v6, %v21634_v28  ;;  %v19824_v58 = vld [vmem:[%s25401_s1 + $0x85] ss:$8 sm:$0xf] }
 0x190   :  { %6877 = vmatpush1.msra.mxu0 %v6726_v22  ;;  %6948 = vmatpush1.msra.mxu1 %v6728_v32  ;;  %v23223_v4 = vrot.slane %v7378_v51, %v21485_v20  ;;  %v23229_v36 = vrot.slane %v7378_v51, %v21475_v16  ;;  %v23232_v48 = vrot.slane %v7378_v51, %v21487_v21  ;;  %v19825_v28 = vld [vmem:[%s25401_s1 + $0x85] ss:$8 sm:$0xf0] }
 0x191   :  { %7083 = vmatprep.subr.mxu0 %v7072_v0  ;;  %7154 = vmatprep.subr.mxu1 %v7074_v49  ;;  %v7075_v25 = vmul.f32 %v23205_v63, %v21679_v56  ;;  %v23247_v50 = vrot.slane %v7378_v51, %v21527_v38  ;;  %v7421_v32 = vmul.f32 %v23214_v55, %v21758_v23 }
 0x192   :  { %6940 = vmatprep.mubr.f32.mxu0 %v25716_v18  ;;  %7011 = vmatprep.mubr.f32.mxu1 %v25716_v18  ;;  %25872 = vst [vmem:[#allocation177_spill] sm:$0xff] %v23229_v36  ;;  %25873 = vst [vmem:[#allocation178_spill] sm:$0xff] %v23232_v48  ;;  %v23256_v22 = vrot.slane %v7378_v51, %v21511_v30  ;;  %v7727_v56 = vor.u32 %v19825_v28, %v19824_v58 }
 0x193   :  { %19810 = vmatmul.mubr.msk.f32.vlgmr.msra.gmra.mrb[2].mxu0 %vm118_vm1, %v6730_v39  ;;  %19811 = vmatmul.mubr.msk.f32.vlgmr.msra.gmra.mrb[2].mxu1 %vm118_vm1, %v6730_v39  ;;  %v7077_v39 = vmul.f32 %v23202_v10, %v21672_v54  ;;  %25874 = vst [vmem:[#allocation179_spill] sm:$0xff] %v23247_v50  ;;  %v7423_v54 = vmul.f32 %v23223_v4, %v21814_v35 }
 0x194   :  { %7084 = vmatpush1.msra.mxu0 %v7071_v46  ;;  %7155 = vmatpush1.msra.mxu1 %v7073_v12  ;;  %25875 = vst [vmem:[#allocation180_spill] sm:$0xff] %v23256_v22  ;;  %v23259_v0 = vrot.slane %v7378_v51, %v21504_v27  ;;  %v23262_v49 = vrot.slane %v7378_v51, %v21518_v34 }
 0x195   :  { %7225 = vmatprep.subr.mxu0 %v7076_v40  ;;  %7296 = vmatprep.subr.mxu1 %v7078_v9  ;;  %v7420_v23 = vmul.f32 %v23229_v36, %v21714_v47  ;;  %v7422_v35 = vmul.f32 %v23232_v48, %v21764_v52  ;;  %v23271_v46 = vrot.slane %v7727_v56, %v21473_v14  ;;  %v7428_v52 = vld [vmem:[%s25402_s2 + $0xa0] sm:$0xff] }
 0x196   :  { %7147 = vmatprep.mubr.f32.mxu0 %v25716_v18  ;;  %7218 = vmatprep.mubr.f32.mxu1 %v25716_v18  ;;  %25876 = vst [vmem:[#allocation181_spill] sm:$0xff] %v23259_v0  ;;  %25877 = vst [vmem:[#allocation182_spill] sm:$0xff] %v23262_v49  ;;  %v7425_v51 = vmul.f32 %v23256_v22, %v21805_v17  ;;  %v7427_v47 = vmul.f32 %v23247_v50, %v21733_v2  ;;  %v19830_v17 = vld [vmem:[%s25401_s1 + $0x86] ss:$8 sm:$0xf] }
 0x197   :  { %19814 = vmatmul.mubr.msk.f32.vlgmr.msra.gmra.mrb[0].mxu0 %vm118_vm1, %v7079_v31  ;;  %19815 = vmatmul.mubr.msk.f32.vlgmr.msra.gmra.mrb[0].mxu1 %vm118_vm1, %v7079_v31  ;;  %25878 = vst [vmem:[#allocation183_spill] sm:$0xff] %v23271_v46  ;;  %v23280_v12 = vrot.slane %v7727_v56, %v21485_v20  ;;  %v23286_v40 = vrot.slane %v7727_v56, %v21475_v16  ;;  %v19831_v2 = vld [vmem:[%s25401_s1 + $0x86] ss:$8 sm:$0xf0] }
 0x198   :  { %7226 = vmatpush1.msra.mxu0 %v7075_v25  ;;  %7297 = vmatpush1.msra.mxu1 %v7077_v39  ;;  %v23289_v9 = vrot.slane %v7727_v56, %v21487_v21  ;;  %v7424_v58 = vmul.f32 %v23262_v49, %v21809_v11  ;;  %v23304_v28 = vrot.slane %v7727_v56, %v21527_v38  ;;  %v25995_v22 = vld [vmem:[#allocation24_spill] sm:$0xff] }
 0x199   :  { %7432 = vmatprep.subr.mxu0 %v7421_v32  ;;  %7503 = vmatprep.subr.mxu1 %v7423_v54  ;;  %25879 = vst [vmem:[#allocation184_spill] sm:$0xff] %v23280_v12  ;;  %25880 = vst [vmem:[#allocation185_spill] sm:$0xff] %v23286_v40  ;;  %v7770_v39 = vmul.f32 %v23271_v46, %v21882_v61  ;;  %v23313_v25 = vrot.slane %v7727_v56, %v21511_v30 }
 0x19a   :  { %7289 = vmatprep.mubr.f32.mxu0 %v25716_v18  ;;  %7360 = vmatprep.mubr.f32.mxu1 %v25716_v18  ;;  %25881 = vst [vmem:[#allocation186_spill] sm:$0xff] %v23289_v9  ;;  %25882 = vst [vmem:[#allocation187_spill] sm:$0xff] %v23304_v28  ;;  %v8076_v11 = vor.u32 %v19831_v2, %v19830_v17  ;;  %v23316_v32 = vrot.slane %v7727_v56, %v21504_v27  ;;  %v19836_v2 = vld [vmem:[%s25401_s1 + $0x87] ss:$8 sm:$0xf] }
 0x19b   :  { %19816 = vmatmul.mubr.msk.f32.vlgmr.msra.gmra.mrb[2].mxu0 %vm118_vm1, %v7079_v31  ;;  %19817 = vmatmul.mubr.msk.f32.vlgmr.msra.gmra.mrb[2].mxu1 %vm118_vm1, %v7079_v31  ;;  %v7426_v31 = vmul.f32 %v23259_v0, %v21801_v37  ;;  %v7772_v37 = vmul.f32 %v23280_v12, %v21930_v43  ;;  %25883 = vst [vmem:[#allocation188_spill] sm:$0xff] %v23313_v25  ;;  %v25980_v12 = vld [vmem:[#allocation15_spill] sm:$0xff] }
 0x19c   :  { %7433 = vmatpush1.msra.mxu0 %v7420_v23  ;;  %7504 = vmatpush1.msra.mxu1 %v7422_v35  ;;  %25884 = vst [vmem:[#allocation189_spill] sm:$0xff] %v23316_v32  ;;  %v23319_v54 = vrot.slane %v7727_v56, %v21518_v34  ;;  %v7769_v61 = vmul.f32 %v23286_v40, %v21837_v60  ;;  %v25887_v56 = vld [vmem:[#allocation36_spill] sm:$0xff] }
 0x19d   :  { %7574 = vmatprep.subr.mxu0 %v7425_v51  ;;  %7645 = vmatprep.subr.mxu1 %v7427_v47  ;;  %v7771_v43 = vmul.f32 %v23289_v9, %v21886_v44  ;;  %v23328_v23 = vrot.slane %v8076_v11, %v21473_v14  ;;  %v7774_v35 = vmul.f32 %v23313_v25, %v25887_v56  ;;  %v25888_v51 = vld [vmem:[#allocation28_spill] sm:$0xff]  ;;  %v7777_v44 = vld [vmem:[%s25402_s2 + $0xa8] sm:$0xff] }
 0x19e   :  { %7496 = vmatprep.mubr.f32.mxu0 %v25716_v18  ;;  %7567 = vmatprep.mubr.f32.mxu1 %v25716_v18  ;;  %25885 = vst [vmem:[#allocation190_spill] sm:$0xff] %v23319_v54  ;;  %v7776_v60 = vmul.f32 %v23304_v28, %v25888_v51  ;;  %v23337_v47 = vrot.slane %v8076_v11, %v21485_v20  ;;  %v25895_v56 = vld [vmem:[#allocation44_spill] sm:$0xff]  ;;  %v25896_v51 = vld [vmem:[#allocation53_spill] sm:$0xff]  ;;  %v25900_v28 = vld [vmem:[#allocation39_spill] sm:$0xff] }
 0x19f   :  { %19820 = vmatmul.mubr.msk.f32.vlgmr.msra.gmra.mrb[0].mxu0 %vm118_vm1, %v7428_v52  ;;  %19821 = vmatmul.mubr.msk.f32.vlgmr.msra.gmra.mrb[0].mxu1 %vm118_vm1, %v7428_v52  ;;  %25886 = vst [vmem:[#allocation191_spill] sm:$0xff] %v23328_v23  ;;  %v23343_v17 = vrot.slane %v8076_v11, %v21475_v16  ;;  %v25977_v9 = vld [vmem:[#allocation12_spill] sm:$0xff] }
 0x1a0   :  { %7575 = vmatpush1.msra.mxu0 %v7424_v58  ;;  %7646 = vmatpush1.msra.mxu1 %v7426_v31  ;;  %25889 = vst [vmem:[#allocation36_spill] sm:$0xff] %v23337_v47  ;;  %v19837_v31 = vld [vmem:[%s25401_s1 + $0x87] ss:$8 sm:$0xf0] }
 0x1a1   :  { %7781 = vmatprep.subr.mxu0 %v7770_v39  ;;  %7852 = vmatprep.subr.mxu1 %v7772_v37  ;;  %25890 = vst [vmem:[#allocation28_spill] sm:$0xff] %v23343_v17  ;;  %v25892_v58 = vld [vmem:[#allocation35_spill] sm:$0xff]  ;;  %v25893_v37 = vld [vmem:[#allocation37_spill] sm:$0xff] }
 0x1a2   :  { %7638 = vmatprep.mubr.f32.mxu0 %v25716_v18  ;;  %7709 = vmatprep.mubr.f32.mxu1 %v25716_v18  ;;  %v7775_v39 = vmul.f32 %v23316_v32, %v25892_v58  ;;  %v23370_v58 = vrot.slane %v8076_v11, %v21511_v30  ;;  %v23376_v32 = vrot.slane %v8076_v11, %v21518_v34 }
 0x1a3   :  { %19822 = vmatmul.mubr.msk.f32.vlgmr.msra.gmra.mrb[2].mxu0 %vm118_vm1, %v7428_v52  ;;  %19823 = vmatmul.mubr.msk.f32.vlgmr.msra.gmra.mrb[2].mxu1 %vm118_vm1, %v7428_v52  ;;  %v23346_v52 = vrot.slane %v8076_v11, %v21487_v21 }
 0x1a4   :  { %7782 = vmatpush1.msra.mxu0 %v7769_v61  ;;  %7853 = vmatpush1.msra.mxu1 %v7771_v43  ;;  %v7773_v61 = vmul.f32 %v23319_v54, %v25893_v37  ;;  %v23361_v43 = vrot.slane %v8076_v11, %v21527_v38  ;;  %25897 = vst [vmem:[#allocation37_spill] sm:$0xff] %v23370_v58  ;;  %25899 = vst [vmem:[#allocation53_spill] sm:$0xff] %v23376_v32 }
 0x1a5   :  { %25891 = vst [vmem:[#allocation192_spill] sm:$0xff] %v23346_v52  ;;  %7923 = vmatprep.subr.mxu0 %v7774_v35  ;;  %7994 = vmatprep.subr.mxu1 %v7776_v60  ;;  %v8119_v35 = vmul.f32 %v23328_v23, %v25895_v56  ;;  %v8121_v60 = vmul.f32 %v23337_v47, %v25896_v51  ;;  %v25901_v23 = vld [vmem:[#allocation45_spill] sm:$0xff]  ;;  %v25916_v47 = vld [vmem:[#allocation55_spill] sm:$0xff] }
 0x1a6   :  { %7845 = vmatprep.mubr.f32.mxu0 %v25716_v18  ;;  %7916 = vmatprep.mubr.f32.mxu1 %v25716_v18  ;;  %25894 = vst [vmem:[#allocation35_spill] sm:$0xff] %v23361_v43  ;;  %v8425_v37 = vor.u32 %v19837_v31, %v19836_v2  ;;  %v23373_v54 = vrot.slane %v8076_v11, %v21504_v27  ;;  %v25903_v11 = vld [vmem:[#allocation51_spill] sm:$0xff] }
 0x1a7   :  { %19826 = vmatmul.mubr.msk.f32.vlgmr.msra.gmra.mrb[0].mxu0 %vm118_vm1, %v7777_v44  ;;  %19827 = vmatmul.mubr.msk.f32.vlgmr.msra.gmra.mrb[0].mxu1 %vm118_vm1, %v7777_v44  ;;  %v8118_v56 = vmul.f32 %v23343_v17, %v25900_v28  ;;  %v8120_v51 = vmul.f32 %v23346_v52, %v25901_v23  ;;  %v8123_v31 = vmul.f32 %v23370_v58, %v25903_v11  ;;  %v8126_v23 = vld [vmem:[%s25402_s2 + $0xb0] sm:$0xff] }
 0x1a8   :  { %7924 = vmatpush1.msra.mxu0 %v7773_v61  ;;  %7995 = vmatpush1.msra.mxu1 %v7775_v39  ;;  %25898 = vst [vmem:[#allocation44_spill] sm:$0xff] %v23373_v54  ;;  %v23385_v2 = vrot.slane %v8425_v37, %v21473_v14  ;;  %v25904_v39 = vld [vmem:[#allocation41_spill] sm:$0xff]  ;;  %v23394_v61 = vrot.slane %v8425_v37, %v21485_v20  ;;  %v25911_v52 = vld [vmem:[#allocation60_spill] sm:$0xff] }
 0x1a9   :  { %8130 = vmatprep.subr.mxu0 %v8119_v35  ;;  %8201 = vmatprep.subr.mxu1 %v8121_v60  ;;  %v8125_v28 = vmul.f32 %v23361_v43, %v25904_v39  ;;  %v23400_v35 = vrot.slane %v8425_v37, %v21475_v16  ;;  %v19842_v60 = vld [vmem:[%s25401_s1 + $0xc0] ss:$8 sm:$0xf]  ;;  %v23418_v58 = vrot.slane %v8425_v37, %v21527_v38 }
 0x1aa   :  { %7987 = vmatprep.mubr.f32.mxu0 %v25716_v18  ;;  %8058 = vmatprep.mubr.f32.mxu1 %v25716_v18  ;;  %25902 = vst [vmem:[#allocation39_spill] sm:$0xff] %v23385_v2  ;;  %25905 = vst [vmem:[#allocation45_spill] sm:$0xff] %v23394_v61  ;;  %v19843_v11 = vld [vmem:[%s25401_s1 + $0xc0] ss:$8 sm:$0xf0]  ;;  %v23433_v17 = vrot.slane %v8425_v37, %v21518_v34 }
 0x1ab   :  { %19828 = vmatmul.mubr.msk.f32.vlgmr.msra.gmra.mrb[2].mxu0 %vm118_vm1, %v7777_v44  ;;  %19829 = vmatmul.mubr.msk.f32.vlgmr.msra.gmra.mrb[2].mxu1 %vm118_vm1, %v7777_v44  ;;  %25906 = vst [vmem:[#allocation51_spill] sm:$0xff] %v23400_v35  ;;  %v23403_v44 = vrot.slane %v8425_v37, %v21487_v21  ;;  %v25909_v39 = vld [vmem:[#allocation52_spill] sm:$0xff] }
 0x1ac   :  { %8131 = vmatpush1.msra.mxu0 %v8118_v56  ;;  %8202 = vmatpush1.msra.mxu1 %v8120_v51  ;;  %v25908_v56 = vld [vmem:[#allocation50_spill] sm:$0xff]  ;;  %v8122_v43 = vmul.f32 %v23376_v32, %v25909_v39  ;;  %v8774_v39 = vor.u32 %v19843_v11, %v19842_v60  ;;  %v23430_v32 = vrot.slane %v8425_v37, %v21504_v27  ;;  %v25920_v11 = vld [vmem:[#allocation57_spill] sm:$0xff] }
 0x1ad   :  { %25907 = vst [vmem:[#allocation41_spill] sm:$0xff] %v23403_v44  ;;  %8272 = vmatprep.subr.mxu0 %v8123_v31  ;;  %8343 = vmatprep.subr.mxu1 %v8125_v28  ;;  %v8124_v51 = vmul.f32 %v23373_v54, %v25908_v56  ;;  %25910 = vst [vmem:[#allocation50_spill] sm:$0xff] %v23418_v58  ;;  %v8468_v31 = vmul.f32 %v23385_v2, %v25911_v52  ;;  %v25912_v28 = vld [vmem:[#allocation69_spill] sm:$0xff] }
 0x1ae   :  { %8194 = vmatprep.mubr.f32.mxu0 %v25716_v18  ;;  %8265 = vmatprep.mubr.f32.mxu1 %v25716_v18  ;;  %v8470_v56 = vmul.f32 %v23394_v61, %v25912_v28  ;;  %v23427_v54 = vrot.slane %v8425_v37, %v21511_v30  ;;  %25914 = vst [vmem:[#allocation60_spill] sm:$0xff] %v23430_v32  ;;  %25915 = vst [vmem:[#allocation69_spill] sm:$0xff] %v23433_v17  ;;  %v25917_v2 = vld [vmem:[#allocation61_spill] sm:$0xff]  ;;  %v25919_v37 = vld [vmem:[#allocation67_spill] sm:$0xff] }
 0x1af   :  { %19832 = vmatmul.mubr.msk.f32.vlgmr.msra.gmra.mrb[0].mxu0 %vm118_vm1, %v8126_v23  ;;  %19833 = vmatmul.mubr.msk.f32.vlgmr.msra.gmra.mrb[0].mxu1 %vm118_vm1, %v8126_v23  ;;  %v8467_v52 = vmul.f32 %v23400_v35, %v25916_v47  ;;  %v8469_v28 = vmul.f32 %v23403_v44, %v25917_v2  ;;  %v8474_v47 = vmul.f32 %v23418_v58, %v25920_v11  ;;  %v8475_v2 = vld [vmem:[%s25402_s2 + $0xb8] sm:$0xff]  ;;  %v25925_v11 = vld [vmem:[#allocation68_spill] sm:$0xff]  ;;  %v25932_v61 = vld [vmem:[#allocation71_spill] sm:$0xff] }
 0x1b0   :  { %25913 = vst [vmem:[#allocation52_spill] sm:$0xff] %v23427_v54  ;;  %8273 = vmatpush1.msra.mxu0 %v8122_v43  ;;  %8344 = vmatpush1.msra.mxu1 %v8124_v51  ;;  %v23442_v43 = vrot.slane %v8774_v39, %v21473_v14  ;;  %v8472_v60 = vmul.f32 %v23427_v54, %v25919_v37  ;;  %v19849_v37 = vld [vmem:[%s25401_s1 + $0xc1] ss:$8 sm:$0xf0] }
 0x1b1   :  { %8479 = vmatprep.subr.mxu0 %v8468_v31  ;;  %8550 = vmatprep.subr.mxu1 %v8470_v56  ;;  %v23451_v51 = vrot.slane %v8774_v39, %v21485_v20  ;;  %v23457_v31 = vrot.slane %v8774_v39, %v21475_v16  ;;  %v19848_v56 = vld [vmem:[%s25401_s1 + $0xc1] ss:$8 sm:$0xf]  ;;  %v8471_v54 = vmul.f32 %v23433_v17, %v25925_v11 }
 0x1b2   :  { %8336 = vmatprep.mubr.f32.mxu0 %v25716_v18  ;;  %8407 = vmatprep.mubr.f32.mxu1 %v25716_v18  ;;  %25918 = vst [vmem:[#allocation55_spill] sm:$0xff] %v23442_v43  ;;  %v23475_v58 = vrot.slane %v8774_v39, %v21527_v38  ;;  %v25927_v44 = vld [vmem:[#allocation76_spill] sm:$0xff]  ;;  %v9123_v11 = vor.u32 %v19849_v37, %v19848_v56  ;;  %v25936_v37 = vld [vmem:[#allocation73_spill] sm:$0xff] }
 0x1b3   :  { %19834 = vmatmul.mubr.msk.f32.vlgmr.msra.gmra.mrb[2].mxu0 %vm118_vm1, %v8126_v23  ;;  %19835 = vmatmul.mubr.msk.f32.vlgmr.msra.gmra.mrb[2].mxu1 %vm118_vm1, %v8126_v23  ;;  %25921 = vst [vmem:[#allocation61_spill] sm:$0xff] %v23451_v51  ;;  %25922 = vst [vmem:[#allocation67_spill] sm:$0xff] %v23457_v31  ;;  %v23460_v23 = vrot.slane %v8774_v39, %v21487_v21  ;;  %v23487_v17 = vrot.slane %v8774_v39, %v21504_v27 }
 0x1b4   :  { %8480 = vmatpush1.msra.mxu0 %v8467_v52  ;;  %8551 = vmatpush1.msra.mxu1 %v8469_v28  ;;  %v25924_v52 = vld [vmem:[#allocation66_spill] sm:$0xff]  ;;  %v23490_v35 = vrot.slane %v8774_v39, %v21518_v34 }
 0x1b5   :  { %25923 = vst [vmem:[#allocation57_spill] sm:$0xff] %v23460_v23  ;;  %8621 = vmatprep.subr.mxu0 %v8472_v60  ;;  %8692 = vmatprep.subr.mxu1 %v8474_v47  ;;  %v8473_v28 = vmul.f32 %v23430_v32, %v25924_v52  ;;  %25926 = vst [vmem:[#allocation66_spill] sm:$0xff] %v23475_v58  ;;  %v8817_v60 = vmul.f32 %v23442_v43, %v25927_v44  ;;  %v25928_v47 = vld [vmem:[#allocation85_spill] sm:$0xff] }
 0x1b6   :  { %8543 = vmatprep.mubr.f32.mxu0 %v25716_v18  ;;  %8614 = vmatprep.mubr.f32.mxu1 %v25716_v18  ;;  %v8819_v52 = vmul.f32 %v23451_v51, %v25928_v47  ;;  %v23484_v32 = vrot.slane %v8774_v39, %v21511_v30  ;;  %25930 = vst [vmem:[#allocation76_spill] sm:$0xff] %v23487_v17  ;;  %25931 = vst [vmem:[#allocation85_spill] sm:$0xff] %v23490_v35  ;;  %v25933_v43 = vld [vmem:[#allocation77_spill] sm:$0xff]  ;;  %v25935_v39 = vld [vmem:[#allocation83_spill] sm:$0xff] }
 0x1b7   :  { %19838 = vmatmul.mubr.msk.f32.vlgmr.msra.gmra.mrb[0].mxu0 %vm118_vm1, %v8475_v2  ;;  %19839 = vmatmul.mubr.msk.f32.vlgmr.msra.gmra.mrb[0].mxu1 %vm118_vm1, %v8475_v2  ;;  %v8816_v44 = vmul.f32 %v23457_v31, %v25932_v61  ;;  %v8818_v47 = vmul.f32 %v23460_v23, %v25933_v43  ;;  %v8823_v61 = vmul.f32 %v23475_v58, %v25936_v37  ;;  %v8824_v43 = vld [vmem:[%s25402_s2 + $0xc0] sm:$0xff]  ;;  %v25941_v37 = vld [vmem:[#allocation84_spill] sm:$0xff]  ;;  %v25948_v51 = vld [vmem:[#allocation87_spill] sm:$0xff] }
 0x1b8   :  { %25929 = vst [vmem:[#allocation68_spill] sm:$0xff] %v23484_v32  ;;  %8622 = vmatpush1.msra.mxu0 %v8471_v54  ;;  %8693 = vmatpush1.msra.mxu1 %v8473_v28  ;;  %v23499_v54 = vrot.slane %v9123_v11, %v21473_v14  ;;  %v8821_v56 = vmul.f32 %v23484_v32, %v25935_v39  ;;  %v19855_v39 = vld [vmem:[%s25401_s1 + $0xc2] ss:$8 sm:$0xf0] }
 0x1b9   :  { %8828 = vmatprep.subr.mxu0 %v8817_v60  ;;  %8899 = vmatprep.subr.mxu1 %v8819_v52  ;;  %v23508_v28 = vrot.slane %v9123_v11, %v21485_v20  ;;  %v23514_v60 = vrot.slane %v9123_v11, %v21475_v16  ;;  %v19854_v52 = vld [vmem:[%s25401_s1 + $0xc2] ss:$8 sm:$0xf]  ;;  %v8820_v32 = vmul.f32 %v23490_v35, %v25941_v37 }
 0x1ba   :  { %8685 = vmatprep.mubr.f32.mxu0 %v25716_v18  ;;  %8756 = vmatprep.mubr.f32.mxu1 %v25716_v18  ;;  %25934 = vst [vmem:[#allocation71_spill] sm:$0xff] %v23499_v54  ;;  %v23532_v58 = vrot.slane %v9123_v11, %v21527_v38  ;;  %v25943_v23 = vld [vmem:[#allocation92_spill] sm:$0xff]  ;;  %v9472_v37 = vor.u32 %v19855_v39, %v19854_v52  ;;  %v25952_v39 = vld [vmem:[#allocation89_spill] sm:$0xff] }
 0x1bb   :  { %19840 = vmatmul.mubr.msk.f32.vlgmr.msra.gmra.mrb[2].mxu0 %vm118_vm1, %v8475_v2  ;;  %19841 = vmatmul.mubr.msk.f32.vlgmr.msra.gmra.mrb[2].mxu1 %vm118_vm1, %v8475_v2  ;;  %25937 = vst [vmem:[#allocation77_spill] sm:$0xff] %v23508_v28  ;;  %25938 = vst [vmem:[#allocation83_spill] sm:$0xff] %v23514_v60  ;;  %v23517_v2 = vrot.slane %v9123_v11, %v21487_v21  ;;  %v23544_v35 = vrot.slane %v9123_v11, %v21504_v27 }
 0x1bc   :  { %8829 = vmatpush1.msra.mxu0 %v8816_v44  ;;  %8900 = vmatpush1.msra.mxu1 %v8818_v47  ;;  %v25940_v44 = vld [vmem:[#allocation82_spill] sm:$0xff]  ;;  %v23547_v31 = vrot.slane %v9123_v11, %v21518_v34 }
 0x1bd   :  { %25939 = vst [vmem:[#allocation73_spill] sm:$0xff] %v23517_v2  ;;  %8970 = vmatprep.subr.mxu0 %v8821_v56  ;;  %9041 = vmatprep.subr.mxu1 %v8823_v61  ;;  %v8822_v47 = vmul.f32 %v23487_v17, %v25940_v44  ;;  %25942 = vst [vmem:[#allocation82_spill] sm:$0xff] %v23532_v58  ;;  %v9166_v56 = vmul.f32 %v23499_v54, %v25943_v23  ;;  %v25944_v61 = vld [vmem:[#allocation101_spill] sm:$0xff] }
 0x1be   :  { %8892 = vmatprep.mubr.f32.mxu0 %v25716_v18  ;;  %8963 = vmatprep.mubr.f32.mxu1 %v25716_v18  ;;  %v9168_v44 = vmul.f32 %v23508_v28, %v25944_v61  ;;  %v23541_v17 = vrot.slane %v9123_v11, %v21511_v30  ;;  %25946 = vst [vmem:[#allocation92_spill] sm:$0xff] %v23544_v35  ;;  %25947 = vst [vmem:[#allocation101_spill] sm:$0xff] %v23547_v31  ;;  %v25949_v54 = vld [vmem:[#allocation93_spill] sm:$0xff]  ;;  %v25951_v11 = vld [vmem:[#allocation99_spill] sm:$0xff] }
 0x1bf   :  { %19844 = vmatmul.mubr.msk.f32.vlgmr.msra.gmra.mrb[0].mxu0 %vm118_vm1, %v8824_v43  ;;  %19845 = vmatmul.mubr.msk.f32.vlgmr.msra.gmra.mrb[0].mxu1 %vm118_vm1, %v8824_v43  ;;  %v9165_v23 = vmul.f32 %v23514_v60, %v25948_v51  ;;  %v9167_v61 = vmul.f32 %v23517_v2, %v25949_v54  ;;  %v9172_v51 = vmul.f32 %v23532_v58, %v25952_v39 }
 0x1c0   :  { %25945 = vst [vmem:[#allocation84_spill] sm:$0xff] %v23541_v17  ;;  %8971 = vmatpush1.msra.mxu0 %v8820_v32  ;;  %9042 = vmatpush1.msra.mxu1 %v8822_v47  ;;  %v23556_v32 = vrot.slane %v9472_v37, %v21473_v14  ;;  %v9170_v52 = vmul.f32 %v23541_v17, %v25951_v11  ;;  %v9173_v14 = vld [vmem:[%s25402_s2 + $0xc8] sm:$0xff]  ;;  %v25957_v11 = vld [vmem:[#allocation100_spill] sm:$0xff] }
 0x1c1   :  { %9177 = vmatprep.subr.mxu0 %v9166_v56  ;;  %9248 = vmatprep.subr.mxu1 %v9168_v44  ;;  %v23565_v47 = vrot.slane %v9472_v37, %v21485_v20  ;;  %v23571_v54 = vrot.slane %v9472_v37, %v21475_v16  ;;  %v25956_v56 = vld [vmem:[#allocation98_spill] sm:$0xff]  ;;  %v9169_v20 = vmul.f32 %v23547_v31, %v25957_v11 }
 0x1c2   :  { %9034 = vmatprep.mubr.f32.mxu0 %v25716_v18  ;;  %9105 = vmatprep.mubr.f32.mxu1 %v25716_v18  ;;  %25950 = vst [vmem:[#allocation87_spill] sm:$0xff] %v23556_v32  ;;  %v9171_v44 = vmul.f32 %v23544_v35, %v25956_v56  ;;  %v9515_v16 = vmul.f32 %v23556_v32, %v22496_v59  ;;  %v25966_v11 = vld [vmem:[#allocation114_spill] sm:$0xff] }
 0x1c3   :  { %19846 = vmatmul.mubr.msk.f32.vlgmr.msra.gmra.mrb[2].mxu0 %vm118_vm1, %v8824_v43  ;;  %19847 = vmatmul.mubr.msk.f32.vlgmr.msra.gmra.mrb[2].mxu1 %vm118_vm1, %v8824_v43  ;;  %25953 = vst [vmem:[#allocation93_spill] sm:$0xff] %v23565_v47  ;;  %25954 = vst [vmem:[#allocation99_spill] sm:$0xff] %v23571_v54  ;;  %v23574_v43 = vrot.slane %v9472_v37, %v21487_v21  ;;  %v9517_v21 = vmul.f32 %v23565_v47, %v22542_v1 }
 0x1c4   :  { %9178 = vmatpush1.msra.mxu0 %v9165_v23  ;;  %9249 = vmatpush1.msra.mxu1 %v9167_v61  ;;  %v23583_v23 = vrot.slane %v9472_v37, %v21527_v38  ;;  %v23592_v61 = vrot.slane %v9472_v37, %v21511_v30  ;;  %v25961_v38 = vld [vmem:[#allocation103_spill] sm:$0xff]  ;;  %v23602_v59 = vrot.slane %v9472_v37, %v21518_v34  ;;  %v25964_v30 = vld [vmem:[#allocation105_spill] sm:$0xff]  ;;  %v9522_v34 = vld [vmem:[%s25402_s2 + $0xd0] sm:$0xff] }
 0x1c5   :  { %25955 = vst [vmem:[#allocation89_spill] sm:$0xff] %v23574_v43  ;;  %9319 = vmatprep.subr.mxu0 %v9170_v52  ;;  %9390 = vmatprep.subr.mxu1 %v9172_v51  ;;  %v23595_v52 = vrot.slane %v9472_v37, %v21504_v27  ;;  %v9514_v39 = vmul.f32 %v23571_v54, %v25961_v38  ;;  %v25962_v51 = vld [vmem:[#allocation108_spill] sm:$0xff]  ;;  %v25965_v37 = vld [vmem:[#allocation113_spill] sm:$0xff] }
 0x1c6   :  { %9241 = vmatprep.mubr.f32.mxu0 %v25716_v18  ;;  %9312 = vmatprep.mubr.f32.mxu1 %v25716_v18  ;;  %25958 = vst [vmem:[#allocation98_spill] sm:$0xff] %v23583_v23  ;;  %25959 = vst [vmem:[#allocation100_spill] sm:$0xff] %v23592_v61  ;;  %v9516_v56 = vmul.f32 %v23574_v43, %v25962_v51  ;;  %v9519_v27 = vmul.f32 %v23592_v61, %v22550_v19  ;;  %v25618_v19 = vmov 1.0|1.0  }
 0x1c7   :  { %19850 = vmatmul.mubr.msk.f32.vlgmr.msra.gmra.mrb[0].mxu0 %vm118_vm1, %v9173_v14  ;;  %19851 = vmatmul.mubr.msk.f32.vlgmr.msra.gmra.mrb[0].mxu1 %vm118_vm1, %v9173_v14  ;;  %25960 = vst [vmem:[#allocation193_spill] sm:$0xff] %v23595_v52  ;;  %25963 = vst [vmem:[#allocation103_spill] sm:$0xff] %v23602_v59  ;;  %v9521_v1 = vmul.f32 %v23583_v23, %v25964_v30 }
 0x1c8   :  { %9320 = vmatpush1.msra.mxu0 %v9169_v20  ;;  %9391 = vmatpush1.msra.mxu1 %v9171_v44  ;;  %v9520_v44 = vmul.f32 %v23595_v52, %v25965_v37 }
 0x1c9   :  { %9526 = vmatprep.subr.mxu0 %v9515_v16  ;;  %9597 = vmatprep.subr.mxu1 %v9517_v21 }
 0x1ca   :  { %9383 = vmatprep.mubr.f32.mxu0 %v25716_v18  ;;  %9454 = vmatprep.mubr.f32.mxu1 %v25716_v18 }
 0x1cb   :  { %19852 = vmatmul.mubr.msk.f32.vlgmr.msra.gmra.mrb[2].mxu0 %vm118_vm1, %v9173_v14  ;;  %19853 = vmatmul.mubr.msk.f32.vlgmr.msra.gmra.mrb[2].mxu1 %vm118_vm1, %v9173_v14  ;;  %v9518_v14 = vmul.f32 %v23602_v59, %v25966_v11 }
 0x1cc   :  { %9527 = vmatpush1.msra.mxu0 %v9514_v39  ;;  %9598 = vmatpush1.msra.mxu1 %v9516_v56 }
 0x1cd   :  { %9668 = vmatprep.subr.mxu0 %v9519_v27  ;;  %9739 = vmatprep.subr.mxu1 %v9521_v1 }
 0x1ce   :  { %9590 = vmatprep.mubr.f32.mxu0 %v25716_v18  ;;  %9661 = vmatprep.mubr.f32.mxu1 %v25716_v18 }
 0x1cf   :  { %19856 = vmatmul.mubr.msk.f32.vlgmr.msra.gmra.mrb[0].mxu0 %vm118_vm1, %v9522_v34  ;;  %19857 = vmatmul.mubr.msk.f32.vlgmr.msra.gmra.mrb[0].mxu1 %vm118_vm1, %v9522_v34 }
 0x1d0   :  { %9669 = vmatpush1.msra.mxu0 %v9518_v14  ;;  %9740 = vmatpush1.msra.mxu1 %v9520_v44 }
 0x1d1   :  { %9732 = vmatprep.mubr.f32.mxu0 %v25716_v18  ;;  %9803 = vmatprep.mubr.f32.mxu1 %v25716_v18 }
 0x1d2   :  { %20528 = vmatprep.subr.bf16.mxu0 %v25618_v19  ;;  %20544 = vmatprep.subr.bf16.mxu1 %v25618_v19 }
 0x1d3   :  { %19858 = vmatmul.mubr.msk.f32.vlgmr.msra.gmra.mrb[2].mxu0 %vm118_vm1, %v9522_v34  ;;  %19859 = vmatmul.mubr.msk.f32.vlgmr.msra.gmra.mrb[2].mxu1 %vm118_vm1, %v9522_v34 }
 0x1d4   :  { %20529 = vmatpush3.bf16.msra.mxu0 %v25618_v19  ;;  %20545 = vmatpush3.bf16.msra.mxu1 %v25618_v19 }
 0x1d5   :  { %20530 = vmatprep.subr.bf16.mxu0 %v25618_v19  ;;  %20546 = vmatprep.subr.bf16.mxu1 %v25618_v19 }
 0x1d8   :  { %20531 = vmatpush3.bf16.msra.mxu0 %v25618_v19  ;;  %20547 = vmatpush3.bf16.msra.mxu1 %v25618_v19 }
 0x1d9   :  { %20532 = vmatprep.subr.bf16.mxu0 %v25618_v19  ;;  %20548 = vmatprep.subr.bf16.mxu1 %v25618_v19 }
 0x1dc   :  { %20533 = vmatpush3.bf16.msra.mxu0 %v25618_v19  ;;  %20549 = vmatpush3.bf16.msra.mxu1 %v25618_v19 }
 0x1dd   :  { %20534 = vmatprep.subr.bf16.mxu0 %v25618_v19  ;;  %20550 = vmatprep.subr.bf16.mxu1 %v25618_v19 }
 0x1e0   :  { %20535 = vmatpush3.bf16.msra.mxu0 %v25618_v19  ;;  %20551 = vmatpush3.bf16.msra.mxu1 %v25618_v19 }
 0x1e1   :  { %20536 = vmatprep.subr.bf16.mxu0 %v25618_v19  ;;  %20552 = vmatprep.subr.bf16.mxu1 %v25618_v19 }
 0x1e4   :  { %20537 = vmatpush3.bf16.msra.mxu0 %v25618_v19  ;;  %20553 = vmatpush3.bf16.msra.mxu1 %v25618_v19 }
 0x1e5   :  { %20538 = vmatprep.subr.bf16.mxu0 %v25618_v19  ;;  %20554 = vmatprep.subr.bf16.mxu1 %v25618_v19 }
 0x1e8   :  { %20539 = vmatpush3.bf16.msra.mxu0 %v25618_v19  ;;  %20555 = vmatpush3.bf16.msra.mxu1 %v25618_v19 }
 0x1e9   :  { %20540 = vmatprep.subr.bf16.mxu0 %v25618_v19  ;;  %20556 = vmatprep.subr.bf16.mxu1 %v25618_v19 }
 0x1ec   :  { %20541 = vmatpush3.bf16.msra.mxu0 %v25618_v19  ;;  %20557 = vmatpush3.bf16.msra.mxu1 %v25618_v19 }
 0x1ed   :  { %20542 = vmatprep.subr.bf16.mxu0 %v25618_v19  ;;  %20558 = vmatprep.subr.bf16.mxu1 %v25618_v19 }
 0x1f0   :  { %20543 = vmatpush3.bf16.msra.mxu0 %v25618_v19  ;;  %20559 = vmatpush3.bf16.msra.mxu1 %v25618_v19 }
 0x1f1   :  { %20560 = vmatprep.subr.bf16.mxu0 %v25618_v19  ;;  %20576 = vmatprep.subr.bf16.mxu1 %v25618_v19 }
 0x2a2   :  { %v23661_v20 = vpop.f32.mrb[0].mxu0  ;;  %v23663_v16 = vpop.f32.mrb[0].mxu1 }
 0x2a3   :  { %v23665_v21 = vpop.f32.mrb[1].mxu0  ;;  %v23667_v38 = vpop.f32.mrb[1].mxu1  ;;  %v10098_v34 = vmul.f32 %v23661_v20, %v23661_v20  ;;  %v10100_v37 = vmul.f32 %v23663_v16, %v23663_v16 }
 0x2a4   :  { %9882 = vmatprep.mubr.f32.mxu0 %v23665_v21  ;;  %9952 = vmatprep.mubr.f32.mxu1 %v23667_v38  ;;  %v10099_v30 = vmul.f32 %v23665_v21, %v23665_v21  ;;  %v10101_v1 = vmul.f32 %v23667_v38, %v23667_v38 }
 0x2a5   :  { %9883 = vmatmul.mubr.f32.vlgmr.msra.gmra.mrb[4].mxu0 %v23661_v20  ;;  %9953 = vmatmul.mubr.f32.vlgmr.msra.gmra.mrb[4].mxu1 %v23663_v16 }
 0x2a6   :  { %20561 = vmatpush3.bf16.msra.mxu0 %v25618_v19  ;;  %20577 = vmatpush3.bf16.msra.mxu1 %v25618_v19  ;;  %v23675_v39 = vpop.f32.mrb[2].mxu0  ;;  %v23677_v51 = vpop.f32.mrb[2].mxu1 }
 0x2a7   :  { %v23679_v56 = vpop.f32.mrb[3].mxu0  ;;  %v23681_v27 = vpop.f32.mrb[3].mxu1  ;;  %20562 = vmatprep.subr.bf16.mxu0 %v25618_v19  ;;  %20578 = vmatprep.subr.bf16.mxu1 %v25618_v19  ;;  %v10102_v14 = vmul.f32 %v23675_v39, %v23675_v39 }
 0x2a8   :  { %10022 = vmatprep.mubr.f32.mxu0 %v23679_v56  ;;  %10092 = vmatprep.mubr.f32.mxu1 %v23681_v27  ;;  %v10103_v44 = vmul.f32 %v23679_v56, %v23679_v56  ;;  %v10105_v11 = vmul.f32 %v23681_v27, %v23681_v27 }
 0x2aa   :  { %20563 = vmatpush3.bf16.msra.mxu0 %v25618_v19  ;;  %20579 = vmatpush3.bf16.msra.mxu1 %v25618_v19 }
 0x2ab   :  { %20564 = vmatprep.subr.bf16.mxu0 %v25618_v19  ;;  %20580 = vmatprep.subr.bf16.mxu1 %v25618_v19 }
 0x2ae   :  { %20565 = vmatpush3.bf16.msra.mxu0 %v25618_v19  ;;  %20581 = vmatpush3.bf16.msra.mxu1 %v25618_v19 }
 0x2af   :  { %20566 = vmatprep.subr.bf16.mxu0 %v25618_v19  ;;  %20582 = vmatprep.subr.bf16.mxu1 %v25618_v19 }
 0x2b2   :  { %20567 = vmatpush3.bf16.msra.mxu0 %v25618_v19  ;;  %20583 = vmatpush3.bf16.msra.mxu1 %v25618_v19 }
 0x2b3   :  { %20568 = vmatprep.subr.bf16.mxu0 %v25618_v19  ;;  %20584 = vmatprep.subr.bf16.mxu1 %v25618_v19 }
 0x2b6   :  { %20569 = vmatpush3.bf16.msra.mxu0 %v25618_v19  ;;  %20585 = vmatpush3.bf16.msra.mxu1 %v25618_v19 }
 0x2b7   :  { %20570 = vmatprep.subr.bf16.mxu0 %v25618_v19  ;;  %20586 = vmatprep.subr.bf16.mxu1 %v25618_v19 }
 0x2ba   :  { %20571 = vmatpush3.bf16.msra.mxu0 %v25618_v19  ;;  %20587 = vmatpush3.bf16.msra.mxu1 %v25618_v19 }
 0x2bb   :  { %20572 = vmatprep.subr.bf16.mxu0 %v25618_v19  ;;  %20588 = vmatprep.subr.bf16.mxu1 %v25618_v19 }
 0x2be   :  { %20573 = vmatpush3.bf16.msra.mxu0 %v25618_v19  ;;  %20589 = vmatpush3.bf16.msra.mxu1 %v25618_v19 }
 0x2bf   :  { %20574 = vmatprep.subr.bf16.mxu0 %v25618_v19  ;;  %20590 = vmatprep.subr.bf16.mxu1 %v25618_v19 }
 0x2c2   :  { %20575 = vmatpush3.bf16.msra.mxu0 %v25618_v19  ;;  %20591 = vmatpush3.bf16.msra.mxu1 %v25618_v19 }
 0x2c3   :  { %20592 = vmatprep.subr.bf16.mxu0 %v25618_v19  ;;  %20608 = vmatprep.subr.bf16.mxu1 %v25618_v19 }
 0x2c5   :  { %10023 = vmatmul.mubr.f32.vlgmr.msra.gmra.mrb[6].mxu0 %v23675_v39  ;;  %10093 = vmatmul.mubr.f32.vlgmr.msra.gmra.mrb[6].mxu1 %v23677_v51 }
 0x2c6   :  { %20593 = vmatpush3.bf16.msra.mxu0 %v25618_v19  ;;  %10170 = vmatprep.mubr.f32.mxu0 %v10099_v30  ;;  %v10104_v30 = vmul.f32 %v23677_v51, %v23677_v51 }
 0x2c7   :  { %20609 = vmatpush3.bf16.msra.mxu1 %v25618_v19  ;;  %10240 = vmatprep.mubr.f32.mxu1 %v10101_v1  ;;  %v21261_v1 = vmov 0  }
 0x2c8   :  { %20594 = vmatprep.subr.bf16.mxu0 %v25618_v19  ;;  %20610 = vmatprep.subr.bf16.mxu1 %v25618_v19 }
 0x2c9   :  { %21221 = vset.pattern.permute.xlu0 %v21261_v1  ;;  %21220 = vset.pattern.permute.xlu1 %v21261_v1 }
 0x2ca   :  { %20595 = vmatpush3.bf16.msra.mxu0 %v25618_v19 }
 0x2cb   :  { %20611 = vmatpush3.bf16.msra.mxu1 %v25618_v19  ;;  %20596 = vmatprep.subr.bf16.mxu0 %v25618_v19 }
 0x2cc   :  { %20612 = vmatprep.subr.bf16.mxu1 %v25618_v19 }
 0x2ce   :  { %20597 = vmatpush3.bf16.msra.mxu0 %v25618_v19 }
 0x2cf   :  { %20613 = vmatpush3.bf16.msra.mxu1 %v25618_v19  ;;  %20598 = vmatprep.subr.bf16.mxu0 %v25618_v19 }
 0x2d0   :  { %20614 = vmatprep.subr.bf16.mxu1 %v25618_v19 }
 0x2d2   :  { %20599 = vmatpush3.bf16.msra.mxu0 %v25618_v19 }
 0x2d3   :  { %20615 = vmatpush3.bf16.msra.mxu1 %v25618_v19  ;;  %20600 = vmatprep.subr.bf16.mxu0 %v25618_v19 }
 0x2d4   :  { %20616 = vmatprep.subr.bf16.mxu1 %v25618_v19 }
 0x2d6   :  { %20601 = vmatpush3.bf16.msra.mxu0 %v25618_v19 }
 0x2d7   :  { %20617 = vmatpush3.bf16.msra.mxu1 %v25618_v19  ;;  %20602 = vmatprep.subr.bf16.mxu0 %v25618_v19 }
 0x2d8   :  { %20618 = vmatprep.subr.bf16.mxu1 %v25618_v19 }
 0x2da   :  { %20603 = vmatpush3.bf16.msra.mxu0 %v25618_v19 }
 0x2db   :  { %20619 = vmatpush3.bf16.msra.mxu1 %v25618_v19  ;;  %20604 = vmatprep.subr.bf16.mxu0 %v25618_v19 }
 0x2dc   :  { %20620 = vmatprep.subr.bf16.mxu1 %v25618_v19 }
 0x2de   :  { %20605 = vmatpush3.bf16.msra.mxu0 %v25618_v19 }
 0x2df   :  { %20621 = vmatpush3.bf16.msra.mxu1 %v25618_v19  ;;  %20606 = vmatprep.subr.bf16.mxu0 %v25618_v19 }
 0x2e0   :  { %20622 = vmatprep.subr.bf16.mxu1 %v25618_v19 }
 0x2e2   :  { %20607 = vmatpush3.bf16.msra.mxu0 %v25618_v19 }
 0x2e3   :  { %20623 = vmatpush3.bf16.msra.mxu1 %v25618_v19  ;;  %20624 = vmatprep.subr.bf16.mxu0 %v25618_v19 }
 0x2e4   :  { %20640 = vmatprep.subr.bf16.mxu1 %v25618_v19 }
 0x2e5   :  { %10171 = vmatmul.mubr.f32.vlgmr.msra.gmra.mrb[8].mxu0 %v10098_v34  ;;  %v10432_v34 = vld [vmem:[%s25403_s4] sm:$0xff] }
 0x2e6   :  { %10241 = vmatmul.mubr.f32.vlgmr.msra.gmra.mrb[8].mxu1 %v10100_v37  ;;  %20625 = vmatpush3.bf16.msra.mxu0 %v25618_v19  ;;  %v10418_v37 = vld [vmem:[%s25404_s3] sm:$0xff] }
 0x2e7   :  { %10310 = vmatprep.mubr.f32.mxu0 %v10103_v44  ;;  %20641 = vmatpush3.bf16.msra.mxu1 %v25618_v19 }
 0x2e8   :  { %10380 = vmatprep.mubr.f32.mxu1 %v10105_v11  ;;  %20626 = vmatprep.subr.bf16.mxu0 %v25618_v19 }
 0x2e9   :  { %20642 = vmatprep.subr.bf16.mxu1 %v25618_v19  ;;  %10435 = vperm.xlu0 %21221, %v10432_v34  }
 0x2ea   :  { %20627 = vmatpush3.bf16.msra.mxu0 %v25618_v19  ;;  %10421 = vperm.xlu1 %21220, %v10418_v37  }
 0x2eb   :  { %20643 = vmatpush3.bf16.msra.mxu1 %v25618_v19  ;;  %20628 = vmatprep.subr.bf16.mxu0 %v25618_v19 }
 0x2ec   :  { %20644 = vmatprep.subr.bf16.mxu1 %v25618_v19 }
 0x2ee   :  { %20629 = vmatpush3.bf16.msra.mxu0 %v25618_v19 }
 0x2ef   :  { %20645 = vmatpush3.bf16.msra.mxu1 %v25618_v19  ;;  %20630 = vmatprep.subr.bf16.mxu0 %v25618_v19 }
 0x2f0   :  { %20646 = vmatprep.subr.bf16.mxu1 %v25618_v19 }
 0x2f2   :  { %20631 = vmatpush3.bf16.msra.mxu0 %v25618_v19 }
 0x2f3   :  { %20647 = vmatpush3.bf16.msra.mxu1 %v25618_v19  ;;  %20632 = vmatprep.subr.bf16.mxu0 %v25618_v19 }
 0x2f4   :  { %20648 = vmatprep.subr.bf16.mxu1 %v25618_v19 }
 0x2f6   :  { %20633 = vmatpush3.bf16.msra.mxu0 %v25618_v19 }
 0x2f7   :  { %20649 = vmatpush3.bf16.msra.mxu1 %v25618_v19  ;;  %20634 = vmatprep.subr.bf16.mxu0 %v25618_v19 }
 0x2f8   :  { %20650 = vmatprep.subr.bf16.mxu1 %v25618_v19 }
 0x2fa   :  { %20635 = vmatpush3.bf16.msra.mxu0 %v25618_v19 }
 0x2fb   :  { %20651 = vmatpush3.bf16.msra.mxu1 %v25618_v19  ;;  %20636 = vmatprep.subr.bf16.mxu0 %v25618_v19 }
 0x2fc   :  { %20652 = vmatprep.subr.bf16.mxu1 %v25618_v19 }
 0x2fe   :  { %20637 = vmatpush3.bf16.msra.mxu0 %v25618_v19 }
 0x2ff   :  { %20653 = vmatpush3.bf16.msra.mxu1 %v25618_v19  ;;  %20638 = vmatprep.subr.bf16.mxu0 %v25618_v19 }
 0x300   :  { %20654 = vmatprep.subr.bf16.mxu1 %v25618_v19 }
 0x302   :  { %20639 = vmatpush3.bf16.msra.mxu0 %v25618_v19 }
 0x303   :  { %20655 = vmatpush3.bf16.msra.mxu1 %v25618_v19 }
 0x305   :  { %10311 = vmatmul.mubr.f32.vlgmr.msra.gmra.mrb[10].mxu0 %v10102_v14 }
 0x306   :  { %10381 = vmatmul.mubr.f32.vlgmr.msra.gmra.mrb[10].mxu1 %v10104_v30  ;;  %10555 = vmatprep.mubr.f32.mxu0 %v25716_v18 }
 0x307   :  { %10626 = vmatprep.mubr.f32.mxu1 %v25716_v18 }
 0x378   :  { %v20000_v44 = vpop.f32.mrb[4].mxu0  ;;  %v20035_v11 = vpop.f32.mrb[4].mxu1 }
 0x379   :  { %v20001_v14 = vpop.f32.mrb[5].mxu0  ;;  %v20036_v30 = vpop.f32.mrb[5].mxu1 }
 0x37a   :  { %v20002_v19 = vadd.f32 %v20001_v14, %v20000_v44  ;;  %v20037_v59 = vadd.f32 %v20036_v30, %v20035_v11 }
 0x37c   :  { %v9955_v52 = vadd.f32 %v20037_v59, %v20002_v19 }
 0x398   :  { %v20070_v61 = vpop.f32.mrb[6].mxu0  ;;  %v20105_v23 = vpop.f32.mrb[6].mxu1 }
 0x399   :  { %v20071_v43 = vpop.f32.mrb[7].mxu0  ;;  %v20106_v54 = vpop.f32.mrb[7].mxu1 }
 0x39a   :  { %v20072_v47 = vadd.f32 %v20071_v43, %v20070_v61  ;;  %v20107_v32 = vadd.f32 %v20106_v54, %v20105_v23 }
 0x39c   :  { %v10025_v1 = vadd.f32 %v20072_v47, %v9955_v52  ;;  %v10436_v52 = vpop.permute.xlu0 %10435 }
 0x39e   :  { %v10095_v34 = vadd.f32 %v20107_v32, %v10025_v1 }
 0x3a0   :  { %v10386_v31 = vmul.f32 0.0009765625, %v10095_v34 }
 0x3a2   :  { %10392 = vperm.xlu0 %21221, %v10386_v31   ;;  %v10388_v54 = vmul.f32 %v10386_v31, %v10386_v31 }
 0x3b8   :  { %v20140_v35 = vpop.f32.mrb[8].mxu0 }
 0x3b9   :  { %v20175_v17 = vpop.f32.mrb[8].mxu1  ;;  %v20141_v37 = vpop.f32.mrb[9].mxu0 }
 0x3ba   :  { %v20142_v58 = vadd.f32 %v20141_v37, %v20140_v35  ;;  %v20176_v2 = vpop.f32.mrb[9].mxu1  ;;  %v10422_v35 = vpop.permute.xlu1 %10421 }
 0x3bb   :  { %v20177_v60 = vadd.f32 %v20176_v2, %v20175_v17 }
 0x3bd   :  { %v10243_v28 = vadd.f32 %v20177_v60, %v20142_v58 }
 0x3d8   :  { %v20210_v44 = vpop.f32.mrb[10].mxu0 }
 0x3d9   :  { %v20245_v11 = vpop.f32.mrb[10].mxu1  ;;  %v20211_v59 = vpop.f32.mrb[11].mxu0 }
 0x3da   :  { %v20212_v19 = vadd.f32 %v20211_v59, %v20210_v44  ;;  %v20246_v14 = vpop.f32.mrb[11].mxu1 }
 0x3db   :  { %v20247_v30 = vadd.f32 %v20246_v14, %v20245_v11 }
 0x3dc   :  { %v10313_v25 = vadd.f32 %v20212_v19, %v10243_v28 }
 0x3de   :  { %v10383_v43 = vadd.f32 %v20247_v30, %v10313_v25 }
 0x3e0   :  { %v10387_v47 = vmul.f32 0.0009765625, %v10383_v43 }
 0x3e2   :  { %v10389_v32 = vsub.f32 %v10387_v47, %v10388_v54 }
 0x3e4   :  { %v10403_v23 = vadd.f32 1e-05, %v10389_v32 }
 0x3e6   :  { %21222 = vrsqrt.f32 %v10403_v23 }
 0x3f0   :  { %v21223_v61 = vpop.eup %21222 }
 0x3f1   :  { %10407 = vperm.xlu1 %21220, %v21223_v61  }
 0x421   :  { %v10393_v1 = vpop.permute.xlu0 %10392 }
 0x422   :  { %v10395_v17 = vsub.f32 %v23661_v20, %v10393_v1  ;;  %v10396_v58 = vsub.f32 %v23665_v21, %v10393_v1  ;;  %v10397_v60 = vsub.f32 %v23663_v16, %v10393_v1  ;;  %v10398_v2 = vsub.f32 %v23667_v38, %v10393_v1 }
 0x423   :  { %v10399_v25 = vsub.f32 %v23675_v39, %v10393_v1  ;;  %v10402_v31 = vsub.f32 %v23681_v27, %v10393_v1  ;;  %v10400_v21 = vsub.f32 %v23679_v56, %v10393_v1  ;;  %v10401_v16 = vsub.f32 %v23677_v51, %v10393_v1 }
 0x470   :  { %v10408_v28 = vpop.permute.xlu1 %10407 }
 0x471   :  { %v10410_v34 = vmul.f32 %v10408_v28, %v10395_v17  ;;  %v10411_v37 = vmul.f32 %v10408_v28, %v10396_v58  ;;  %v10412_v44 = vmul.f32 %v10408_v28, %v10397_v60  ;;  %v10413_v11 = vmul.f32 %v10408_v28, %v10398_v2 }
 0x472   :  { %v10414_v59 = vmul.f32 %v10408_v28, %v10399_v25  ;;  %v10417_v19 = vmul.f32 %v10408_v28, %v10402_v31  ;;  %v10415_v39 = vmul.f32 %v10408_v28, %v10400_v21  ;;  %v10416_v47 = vmul.f32 %v10408_v28, %v10401_v16  ;;  %v25968_v16 = vld [vmem:[#allocation3_spill] sm:$0xff] }
 0x473   :  { %v10424_v14 = vmul.f32 %v10422_v35, %v10410_v34  ;;  %v10425_v30 = vmul.f32 %v10422_v35, %v10411_v37  ;;  %v10426_v20 = vmul.f32 %v10422_v35, %v10412_v44  ;;  %v10427_v27 = vmul.f32 %v10422_v35, %v10413_v11 }
 0x474   :  { %v10431_v43 = vmul.f32 %v10422_v35, %v10417_v19  ;;  %v10428_v32 = vmul.f32 %v10422_v35, %v10414_v59  ;;  %v10429_v51 = vmul.f32 %v10422_v35, %v10415_v39  ;;  %v10430_v56 = vmul.f32 %v10422_v35, %v10416_v47  ;;  %v25967_v19 = vld [vmem:[#allocation2_spill] sm:$0xff] }
 0x475   :  { %v10438_v38 = vadd.f32 %v10436_v52, %v10424_v14  ;;  %v10439_v54 = vadd.f32 %v10436_v52, %v10425_v30  ;;  %v10440_v23 = vadd.f32 %v10436_v52, %v10426_v20  ;;  %v10441_v1 = vadd.f32 %v10436_v52, %v10427_v27 }
 0x476   :  { %v10445_v61 = vadd.f32 %v10436_v52, %v10431_v43  ;;  %v10442_v60 = vadd.f32 %v10436_v52, %v10428_v32  ;;  %v10443_v31 = vadd.f32 %v10436_v52, %v10429_v51  ;;  %v10444_v28 = vadd.f32 %v10436_v52, %v10430_v56  ;;  %v25969_v32 = vld [vmem:[#allocation4_spill] sm:$0xff] }
 0x477   :  { %v23811_v17 = vmax.f32 %v10438_v38, 0.0  ;;  %v23813_v58 = vmax.f32 %v10439_v54, 0.0  ;;  %v23819_v2 = vmax.f32 %v10440_v23, 0.0  ;;  %v23827_v34 = vmax.f32 %v10441_v1, 0.0  ;;  %v10487_v38 = vld [vmem:[%s25405_s5] sm:$0xff] }
 0x478   :  { %v23821_v25 = vmax.f32 %v10445_v61, 0.0  ;;  %v23829_v37 = vmax.f32 %v10442_v60, 0.0  ;;  %v23835_v35 = vmax.f32 %v10443_v31, 0.0  ;;  %v23837_v44 = vmax.f32 %v10444_v28, 0.0  ;;  %v25970_v61 = vld [vmem:[#allocation5_spill] sm:$0xff] }
 0x479   :  { %10457 = vrot.lane.b32.xlu0 %v23813_v58, %s21243_s9  ;;  %10455 = vrot.lane.b32.xlu1 %v23811_v17, %s21243_s9 }
 0x47d   :  { %10459 = vrot.lane.b32.xlu0 %v23819_v2, %s21243_s9  ;;  %10469 = vrot.lane.b32.xlu1 %v23821_v25, %s21243_s9 }
 0x481   :  { %10463 = vrot.lane.b32.xlu0 %v23829_v37, %s21243_s9  ;;  %10461 = vrot.lane.b32.xlu1 %v23827_v34, %s21243_s9 }
 0x485   :  { %10467 = vrot.lane.b32.xlu0 %v23837_v44, %s21243_s9  ;;  %10465 = vrot.lane.b32.xlu1 %v23835_v35, %s21243_s9 }
 0x489   :  { %11064 = vrot.lane.b32.xlu0 %v23813_v58, %s21244_s22  ;;  %11062 = vrot.lane.b32.xlu1 %v23811_v17, %s21244_s22 }
 0x48d   :  { %11066 = vrot.lane.b32.xlu0 %v23819_v2, %s21244_s22  ;;  %11076 = vrot.lane.b32.xlu1 %v23821_v25, %s21244_s22 }
 0x491   :  { %11070 = vrot.lane.b32.xlu0 %v23829_v37, %s21244_s22  ;;  %11068 = vrot.lane.b32.xlu1 %v23827_v34, %s21244_s22 }
 0x495   :  { %11074 = vrot.lane.b32.xlu0 %v23837_v44, %s21244_s22  ;;  %11072 = vrot.lane.b32.xlu1 %v23835_v35, %s21244_s22 }
 0x499   :  { %11392 = vrot.lane.b32.xlu0 %v23813_v58, %s21245_s23  ;;  %11390 = vrot.lane.b32.xlu1 %v23811_v17, %s21245_s23 }
 0x49d   :  { %11394 = vrot.lane.b32.xlu0 %v23819_v2, %s21245_s23  ;;  %11404 = vrot.lane.b32.xlu1 %v23821_v25, %s21245_s23 }
 0x4a1   :  { %11398 = vrot.lane.b32.xlu0 %v23829_v37, %s21245_s23  ;;  %11396 = vrot.lane.b32.xlu1 %v23827_v34, %s21245_s23 }
 0x4a5   :  { %11402 = vrot.lane.b32.xlu0 %v23837_v44, %s21245_s23  ;;  %11400 = vrot.lane.b32.xlu1 %v23835_v35, %s21245_s23 }
 0x4a9   :  { %11720 = vrot.lane.b32.xlu0 %v23813_v58, %s21246_s24  ;;  %11718 = vrot.lane.b32.xlu1 %v23811_v17, %s21246_s24 }
 0x4ad   :  { %11722 = vrot.lane.b32.xlu0 %v23819_v2, %s21246_s24  ;;  %11732 = vrot.lane.b32.xlu1 %v23821_v25, %s21246_s24 }
 0x4b1   :  { %11726 = vrot.lane.b32.xlu0 %v23829_v37, %s21246_s24  ;;  %11724 = vrot.lane.b32.xlu1 %v23827_v34, %s21246_s24 }
 0x4b5   :  { %11730 = vrot.lane.b32.xlu0 %v23837_v44, %s21246_s24  ;;  %11728 = vrot.lane.b32.xlu1 %v23835_v35, %s21246_s24 }
 0x4b9   :  { %12048 = vrot.lane.b32.xlu0 %v23813_v58, %s21247_s25  ;;  %12046 = vrot.lane.b32.xlu1 %v23811_v17, %s21247_s25 }
 0x4bd   :  { %12050 = vrot.lane.b32.xlu0 %v23819_v2, %s21247_s25  ;;  %12060 = vrot.lane.b32.xlu1 %v23821_v25, %s21247_s25 }
 0x4c1   :  { %12054 = vrot.lane.b32.xlu0 %v23829_v37, %s21247_s25  ;;  %12052 = vrot.lane.b32.xlu1 %v23827_v34, %s21247_s25 }
 0x4c5   :  { %12058 = vrot.lane.b32.xlu0 %v23837_v44, %s21247_s25  ;;  %12056 = vrot.lane.b32.xlu1 %v23835_v35, %s21247_s25 }
 0x4c9   :  { %12376 = vrot.lane.b32.xlu0 %v23813_v58, %s21248_s26  ;;  %12374 = vrot.lane.b32.xlu1 %v23811_v17, %s21248_s26 }
 0x4cd   :  { %12378 = vrot.lane.b32.xlu0 %v23819_v2, %s21248_s26  ;;  %12388 = vrot.lane.b32.xlu1 %v23821_v25, %s21248_s26 }
 0x4d1   :  { %12382 = vrot.lane.b32.xlu0 %v23829_v37, %s21248_s26  ;;  %12380 = vrot.lane.b32.xlu1 %v23827_v34, %s21248_s26 }
 0x4d5   :  { %12386 = vrot.lane.b32.xlu0 %v23837_v44, %s21248_s26  ;;  %12384 = vrot.lane.b32.xlu1 %v23835_v35, %s21248_s26 }
 0x4d9   :  { %12704 = vrot.lane.b32.xlu0 %v23813_v58, %s21249_s27  ;;  %12702 = vrot.lane.b32.xlu1 %v23811_v17, %s21249_s27 }
 0x4dd   :  { %12706 = vrot.lane.b32.xlu0 %v23819_v2, %s21249_s27  ;;  %12716 = vrot.lane.b32.xlu1 %v23821_v25, %s21249_s27 }
 0x4e1   :  { %12710 = vrot.lane.b32.xlu0 %v23829_v37, %s21249_s27  ;;  %12708 = vrot.lane.b32.xlu1 %v23827_v34, %s21249_s27 }
 0x4e5   :  { %12714 = vrot.lane.b32.xlu0 %v23837_v44, %s21249_s27  ;;  %12712 = vrot.lane.b32.xlu1 %v23835_v35, %s21249_s27 }
 0x4e9   :  { %13032 = vrot.lane.b32.xlu0 %v23813_v58, %s21250_s11  ;;  %13030 = vrot.lane.b32.xlu1 %v23811_v17, %s21250_s11 }
 0x4eb   :  { %v10458_v52 = vpop.permute.xlu0 %10457  ;;  %v10456_v11 = vpop.permute.xlu1 %10455 }
 0x4ec   :  { %v23945_v59 = vsel %vm56_vm0, %v10456_v11, %v10458_v52 }
 0x4ed   :  { %13034 = vrot.lane.b32.xlu0 %v23819_v2, %s21250_s11  ;;  %13044 = vrot.lane.b32.xlu1 %v23821_v25, %s21250_s11  ;;  %v10480_v14 = vmul.f32 %v23945_v59, %v25967_v19 }
 0x4ef   :  { %v10460_v30 = vpop.permute.xlu0 %10459  ;;  %10491 = vmatprep.subr.mxu0 %v10480_v14  ;;  %v10470_v20 = vpop.permute.xlu1 %10469  ;;  %v25972_v14 = vld [vmem:[#allocation7_spill] sm:$0xff] }
 0x4f0   :  { %v23955_v21 = vsel %vm56_vm0, %v10470_v20, %v10456_v11  ;;  %v23968_v54 = vsel %vm56_vm0, %v10458_v52, %v10460_v30  ;;  %v25971_v11 = vld [vmem:[#allocation6_spill] sm:$0xff] }
 0x4f1   :  { %v10479_v43 = vmul.f32 %v23955_v21, %v25968_v16  ;;  %13038 = vrot.lane.b32.xlu0 %v23829_v37, %s21250_s11  ;;  %13036 = vrot.lane.b32.xlu1 %v23827_v34, %s21250_s11  ;;  %v10481_v51 = vmul.f32 %v23968_v54, %v25970_v61 }
 0x4f3   :  { %v10464_v39 = vpop.permute.xlu0 %10463  ;;  %10492 = vmatpush1.msra.mxu0 %v10479_v43  ;;  %v10462_v47 = vpop.permute.xlu1 %10461  ;;  %v25974_v43 = vld [vmem:[#allocation9_spill] sm:$0xff] }
 0x4f4   :  { %v23972_v27 = vsel %vm56_vm0, %v10460_v30, %v10462_v47  ;;  %19860 = vmatmul.mubr.msk.f32.vlgmr.msra.gmra.mrb[12].mxu0 %vm118_vm1, %v10487_v38  ;;  %v23986_v60 = vsel %vm56_vm0, %v10462_v47, %v10464_v39 }
 0x4f5   :  { %13042 = vrot.lane.b32.xlu0 %v23837_v44, %s21250_s11  ;;  %13040 = vrot.lane.b32.xlu1 %v23835_v35, %s21250_s11  ;;  %v10482_v23 = vmul.f32 %v23972_v27, %v25969_v32 }
 0x4f6   :  { %10697 = vmatprep.mubr.f32.mxu0 %v25716_v18 }
 0x4f7   :  { %v10468_v56 = vpop.permute.xlu0 %10467  ;;  %10562 = vmatprep.subr.mxu1 %v10482_v23  ;;  %v10466_v1 = vpop.permute.xlu1 %10465 }
 0x4f8   :  { %v23990_v31 = vsel %vm56_vm0, %v10468_v56, %v10470_v20  ;;  %v23994_v28 = vsel %vm56_vm0, %v10466_v1, %v10468_v56  ;;  %v23998_v52 = vsel %vm56_vm0, %v10464_v39, %v10466_v1  ;;  %10563 = vmatpush1.msra.mxu1 %v10481_v51  ;;  %v25973_v20 = vld [vmem:[#allocation8_spill] sm:$0xff]  ;;  %v10483_v39 = vmul.f32 %v23986_v60, %v25974_v43 }
 0x4f9   :  { %v10485_v19 = vmul.f32 %v23994_v28, %v25971_v11  ;;  %13360 = vrot.lane.b32.xlu0 %v23813_v58, %s21251_s18  ;;  %13358 = vrot.lane.b32.xlu1 %v23811_v17, %s21251_s18  ;;  %v10484_v30 = vmul.f32 %v23998_v52, %v25972_v14  ;;  %v10486_v16 = vmul.f32 %v23990_v31, %v25973_v20  ;;  %v25975_v14 = vld [vmem:[#allocation10_spill] sm:$0xff]  ;;  %v25976_v20 = vld [vmem:[#allocation11_spill] sm:$0xff]  ;;  %vm26122_vm0 = vcmp.lt.s32.totalorder %v21467_v13, 127 }
 0x4fa   :  { %19861 = vmatmul.mubr.msk.f32.vlgmr.msra.gmra.mrb[12].mxu1 %vm118_vm1, %v10487_v38 }
 0x4fb   :  { %v11065_v47 = vpop.permute.xlu0 %11064  ;;  %v11063_v32 = vpop.permute.xlu1 %11062  ;;  %10768 = vmatprep.mubr.f32.mxu1 %v25716_v18  ;;  %10633 = vmatprep.subr.mxu0 %v10484_v30 }
 0x4fc   :  { %10704 = vmatprep.subr.mxu1 %v10486_v16  ;;  %10634 = vmatpush1.msra.mxu0 %v10483_v39  ;;  %v24026_v51 = vsel %vm709_vm2, %v11063_v32, %v11065_v47 }
 0x4fd   :  { %10705 = vmatpush1.msra.mxu1 %v10485_v19  ;;  %13362 = vrot.lane.b32.xlu0 %v23819_v2, %s21251_s18  ;;  %v11087_v30 = vmul.f32 %v24026_v51, %v25975_v14 }
 0x4fe   :  { %13372 = vrot.lane.b32.xlu1 %v23821_v25, %s21251_s18  ;;  %19862 = vmatmul.mubr.msk.f32.vlgmr.msra.gmra.mrb[14].mxu0 %vm118_vm1, %v10487_v38 }
 0x4ff   :  { %19863 = vmatmul.mubr.msk.f32.vlgmr.msra.gmra.mrb[14].mxu1 %vm118_vm1, %v10487_v38  ;;  %v11067_v23 = vpop.permute.xlu0 %11066  ;;  %v11077_v61 = vpop.permute.xlu1 %11076  ;;  %10778 = vmatprep.subr.mxu0 %v23813_v58  ;;  %v10454_v38 = vld [vmem:[%s25405_s5 + $0x68] sm:$0xff] }
 0x500   :  { %10849 = vmatprep.subr.mxu1 %v23827_v34  ;;  %10779 = vmatpush1.msra.mxu0 %v23811_v17  ;;  %v24045_v19 = vsel %vm709_vm2, %v11077_v61, %v11063_v32  ;;  %v24057_v43 = vsel %vm709_vm2, %v11065_v47, %v11067_v23 }
 0x501   :  { %10850 = vmatpush1.msra.mxu1 %v23819_v2  ;;  %10920 = vmatprep.subr.mxu0 %v23835_v35  ;;  %v11086_v40 = vmul.f32 %v24045_v19, %v25977_v9 }
 0x502   :  { %10991 = vmatprep.subr.mxu1 %v23821_v25  ;;  %10842 = vmatprep.mubr.f32.mxu0 %v25716_v18 }
 0x503   :  { %10913 = vmatprep.mubr.f32.mxu1 %v25716_v18  ;;  %v11071_v56 = vpop.permute.xlu0 %11070  ;;  %v11069_v1 = vpop.permute.xlu1 %11068  ;;  %13366 = vrot.lane.b32.xlu0 %v23829_v37, %s21251_s18 }
 0x504   :  { %13364 = vrot.lane.b32.xlu1 %v23827_v34, %s21251_s18  ;;  %v24041_v11 = vsel %vm709_vm2, %v11067_v23, %v11069_v1  ;;  %19864 = vmatmul.mubr.msk.f32.vlgmr.msra.gmra.mrb[12].mxu0 %vm118_vm1, %v10454_v38  ;;  %v25978_v23 = vld [vmem:[#allocation13_spill] sm:$0xff]  ;;  %v24088_v49 = vsel %vm709_vm2, %v11069_v1, %v11071_v56 }
 0x505   :  { %19865 = vmatmul.mubr.msk.f32.vlgmr.msra.gmra.mrb[12].mxu1 %vm118_vm1, %v10454_v38  ;;  %10921 = vmatpush1.msra.mxu0 %v23829_v37  ;;  %v11089_v16 = vmul.f32 %v24041_v11, %v25976_v20  ;;  %v25979_v20 = vld [vmem:[#allocation14_spill] sm:$0xff] }
 0x506   :  { %10992 = vmatpush1.msra.mxu1 %v23837_v44  ;;  %11098 = vmatprep.subr.mxu0 %v11087_v30  ;;  %v11088_v30 = vmul.f32 %v24057_v43, %v25978_v23 }
 0x507   :  { %10984 = vmatprep.mubr.f32.mxu0 %v25716_v18  ;;  %v11075_v39 = vpop.permute.xlu0 %11074  ;;  %v11073_v32 = vpop.permute.xlu1 %11072  ;;  %13370 = vrot.lane.b32.xlu0 %v23837_v44, %s21251_s18 }
 0x508   :  { %13368 = vrot.lane.b32.xlu1 %v23835_v35, %s21251_s18  ;;  %v24068_v14 = vsel %vm709_vm2, %v11075_v39, %v11077_v61  ;;  %v24072_v47 = vsel %vm709_vm2, %v11071_v56, %v11073_v32  ;;  %19866 = vmatmul.mubr.msk.f32.vlgmr.msra.gmra.mrb[14].mxu0 %vm118_vm1, %v10454_v38  ;;  %v24078_v9 = vsel %vm709_vm2, %v11073_v32, %v11075_v39  ;;  %v25981_v32 = vld [vmem:[#allocation16_spill] sm:$0xff]  ;;  %v11094_v56 = vld [vmem:[%s25405_s5 + $0x8] sm:$0xff]  ;;  %vm26124_vm2 = vmmov %vm26122_vm0 }
 0x509   :  { %11055 = vmatprep.mubr.f32.mxu1 %v25716_v18  ;;  %11099 = vmatpush1.msra.mxu0 %v11086_v40  ;;  %v11091_v61 = vmul.f32 %v24072_v47, %v25979_v20  ;;  %v11093_v46 = vmul.f32 %v24068_v14, %v25980_v12  ;;  %v11092_v40 = vmul.f32 %v24078_v9, %v25981_v32 }
 0x50a   :  { %11169 = vmatprep.subr.mxu1 %v11089_v16  ;;  %19867 = vmatmul.mubr.msk.f32.vlgmr.msra.gmra.mrb[14].mxu1 %vm118_vm1, %v10454_v38  ;;  %v25983_v38 = vld [vmem:[#allocation17_spill] sm:$0xff]  ;;  %v25984_v16 = vld [vmem:[#allocation18_spill] sm:$0xff] }
 0x50b   :  { %v11393_v0 = vpop.permute.xlu0 %11392  ;;  %11162 = vmatprep.mubr.f32.mxu0 %v25716_v18  ;;  %v11391_v39 = vpop.permute.xlu1 %11390  ;;  %11170 = vmatpush1.msra.mxu1 %v11088_v30  ;;  %v11090_v1 = vmul.f32 %v24088_v49, %v25983_v38 }
 0x50c   :  { %13688 = vrot.lane.b32.xlu0 %v23813_v58, %s21252_s10  ;;  %v24098_v12 = vsel %vm1083_vm3, %v11391_v39, %v11393_v0  ;;  %13686 = vrot.lane.b32.xlu1 %v23811_v17, %s21252_s10 }
 0x50d   :  { %25982 = vst [vmem:[#allocation108_spill] sm:$0xff] %v24098_v12  ;;  %11233 = vmatprep.mubr.f32.mxu1 %v25716_v18  ;;  %11240 = vmatprep.subr.mxu0 %v11091_v61  ;;  %v11415_v23 = vmul.f32 %v24098_v12, %v25984_v16  ;;  %v11422_v16 = vld [vmem:[%s25405_s5 + $0x10] sm:$0xff] }
 0x50e   :  { %11311 = vmatprep.subr.mxu1 %v11093_v46  ;;  %19868 = vmatmul.mubr.msk.f32.vlgmr.msra.gmra.mrb[12].mxu0 %vm118_vm1, %v11094_v56  ;;  %v25986_v46 = vld [vmem:[#allocation19_spill] sm:$0xff] }
 0x50f   :  { %19869 = vmatmul.mubr.msk.f32.vlgmr.msra.gmra.mrb[12].mxu1 %vm118_vm1, %v11094_v56  ;;  %v11395_v30 = vpop.permute.xlu0 %11394  ;;  %v11405_v20 = vpop.permute.xlu1 %11404  ;;  %11241 = vmatpush1.msra.mxu0 %v11090_v1 }
 0x510   :  { %11312 = vmatpush1.msra.mxu1 %v11092_v40  ;;  %v24114_v32 = vsel %vm1083_vm3, %v11405_v20, %v11391_v39  ;;  %13690 = vrot.lane.b32.xlu0 %v23819_v2, %s21252_s10  ;;  %v24125_v38 = vsel %vm1083_vm3, %v11393_v0, %v11395_v30  ;;  %v25988_v0 = vld [vmem:[#allocation20_spill] sm:$0xff] }
 0x511   :  { %25985 = vst [vmem:[#allocation105_spill] sm:$0xff] %v24114_v32  ;;  %13700 = vrot.lane.b32.xlu1 %v23821_v25, %s21252_s10  ;;  %v11414_v61 = vmul.f32 %v24114_v32, %v25986_v46  ;;  %11426 = vmatprep.subr.mxu0 %v11415_v23  ;;  %v25989_v46 = vld [vmem:[#allocation21_spill] sm:$0xff] }
 0x512   :  { %11304 = vmatprep.mubr.f32.mxu0 %v25716_v18  ;;  %11375 = vmatprep.mubr.f32.mxu1 %v25716_v18 }
 0x513   :  { %v11399_v40 = vpop.permute.xlu0 %11398  ;;  %19870 = vmatmul.mubr.msk.f32.vlgmr.msra.gmra.mrb[14].mxu0 %vm118_vm1, %v11094_v56  ;;  %v11397_v39 = vpop.permute.xlu1 %11396  ;;  %19871 = vmatmul.mubr.msk.f32.vlgmr.msra.gmra.mrb[14].mxu1 %vm118_vm1, %v11094_v56 }
 0x514   :  { %11427 = vmatpush1.msra.mxu0 %v11414_v61  ;;  %v24131_v1 = vsel %vm1083_vm3, %v11395_v30, %v11397_v39  ;;  %13694 = vrot.lane.b32.xlu0 %v23829_v37, %s21252_s10  ;;  %v11416_v61 = vmul.f32 %v24125_v38, %v25989_v46 }
 0x515   :  { %25987 = vst [vmem:[#allocation113_spill] sm:$0xff] %v24131_v1  ;;  %13692 = vrot.lane.b32.xlu1 %v23827_v34, %s21252_s10  ;;  %v11417_v23 = vmul.f32 %v24131_v1, %v25988_v0  ;;  %11490 = vmatprep.mubr.f32.mxu0 %v25716_v18 }
 0x516   :  { %11561 = vmatprep.mubr.f32.mxu1 %v25716_v18 }
 0x517   :  { %v11403_v56 = vpop.permute.xlu0 %11402  ;;  %11497 = vmatprep.subr.mxu1 %v11417_v23  ;;  %v11401_v30 = vpop.permute.xlu1 %11400  ;;  %19872 = vmatmul.mubr.msk.f32.vlgmr.msra.gmra.mrb[12].mxu0 %vm118_vm1, %v11422_v16  ;;  %v24163_v23 = vsel %vm1083_vm3, %v11397_v39, %v11399_v40  ;;  %v25996_v39 = vld [vmem:[#allocation25_spill] sm:$0xff] }
 0x518   :  { %v24150_v32 = vsel %vm1083_vm3, %v11403_v56, %v11405_v20  ;;  %v24154_v50 = vsel %vm1083_vm3, %v11401_v30, %v11403_v56  ;;  %v24158_v0 = vsel %vm1083_vm3, %v11399_v40, %v11401_v30  ;;  %11498 = vmatpush1.msra.mxu1 %v11416_v61  ;;  %11632 = vmatprep.mubr.f32.mxu0 %v25716_v18  ;;  %v25993_v20 = vld [vmem:[#allocation22_spill] sm:$0xff]  ;;  %v25994_v56 = vld [vmem:[#allocation23_spill] sm:$0xff]  ;;  %vm26126_vm3 = vmmov %vm26122_vm0 }
 0x519   :  { %25990 = vst [vmem:[#allocation114_spill] sm:$0xff] %v24150_v32  ;;  %25991 = vst [vmem:[#allocation2_spill] sm:$0xff] %v24154_v50  ;;  %13698 = vrot.lane.b32.xlu0 %v23837_v44, %s21252_s10  ;;  %13696 = vrot.lane.b32.xlu1 %v23835_v35, %s21252_s10  ;;  %v11420_v46 = vmul.f32 %v24154_v50, %v25993_v20  ;;  %v11419_v30 = vmul.f32 %v24158_v0, %v25994_v56 }
 0x51a   :  { %25992 = vst [vmem:[#allocation3_spill] sm:$0xff] %v24158_v0  ;;  %v11421_v61 = vmul.f32 %v24150_v32, %v25995_v22  ;;  %19873 = vmatmul.mubr.msk.f32.vlgmr.msra.gmra.mrb[12].mxu1 %vm118_vm1, %v11422_v16  ;;  %v11418_v48 = vmul.f32 %v24163_v23, %v25996_v39  ;;  %v25998_v22 = vld [vmem:[#allocation26_spill] sm:$0xff] }
 0x51b   :  { %v11721_v1 = vpop.permute.xlu0 %11720  ;;  %v11719_v40 = vpop.permute.xlu1 %11718  ;;  %11703 = vmatprep.mubr.f32.mxu1 %v25716_v18  ;;  %11568 = vmatprep.subr.mxu0 %v11419_v30 }
 0x51c   :  { %11639 = vmatprep.subr.mxu1 %v11421_v61  ;;  %v24181_v20 = vsel %vm1457_vm4, %v11719_v40, %v11721_v1  ;;  %11569 = vmatpush1.msra.mxu0 %v11418_v48  ;;  %v26000_v48 = vld [vmem:[#allocation27_spill] sm:$0xff]  ;;  %v11750_v61 = vld [vmem:[%s25405_s5 + $0x18] sm:$0xff] }
 0x51d   :  { %25997 = vst [vmem:[#allocation4_spill] sm:$0xff] %v24181_v20  ;;  %14016 = vrot.lane.b32.xlu0 %v23813_v58, %s21253_s21  ;;  %14014 = vrot.lane.b32.xlu1 %v23811_v17, %s21253_s21  ;;  %v11743_v56 = vmul.f32 %v24181_v20, %v25998_v22 }
 0x51e   :  { %11640 = vmatpush1.msra.mxu1 %v11420_v46  ;;  %19874 = vmatmul.mubr.msk.f32.vlgmr.msra.gmra.mrb[14].mxu0 %vm118_vm1, %v11422_v16 }
 0x51f   :  { %v11723_v0 = vpop.permute.xlu0 %11722  ;;  %11754 = vmatprep.subr.mxu0 %v11743_v56  ;;  %v11733_v39 = vpop.permute.xlu1 %11732  ;;  %19875 = vmatmul.mubr.msk.f32.vlgmr.msra.gmra.mrb[14].mxu1 %vm118_vm1, %v11422_v16 }
 0x520   :  { %v24192_v30 = vsel %vm1457_vm4, %v11733_v39, %v11719_v40  ;;  %11818 = vmatprep.mubr.f32.mxu0 %v25716_v18  ;;  %11889 = vmatprep.mubr.f32.mxu1 %v25716_v18  ;;  %v24208_v16 = vsel %vm1457_vm4, %v11721_v1, %v11723_v0  ;;  %v26004_v1 = vld [vmem:[#allocation30_spill] sm:$0xff] }
 0x521   :  { %25999 = vst [vmem:[#allocation5_spill] sm:$0xff] %v24192_v30  ;;  %14018 = vrot.lane.b32.xlu0 %v23819_v2, %s21253_s21  ;;  %14028 = vrot.lane.b32.xlu1 %v23821_v25, %s21253_s21  ;;  %v11742_v46 = vmul.f32 %v24192_v30, %v26000_v48  ;;  %26001 = vst [vmem:[#allocation6_spill] sm:$0xff] %v24208_v16  ;;  %v26003_v48 = vld [vmem:[#allocation29_spill] sm:$0xff]  ;;  %v11744_v20 = vmul.f32 %v24208_v16, %v26004_v1  ;;  %v26010_v1 = vld [vmem:[#allocation32_spill] sm:$0xff] }
 0x523   :  { %v11727_v40 = vpop.permute.xlu0 %11726  ;;  %11755 = vmatpush1.msra.mxu0 %v11742_v46  ;;  %v11725_v22 = vpop.permute.xlu1 %11724 }
 0x524   :  { %v24212_v56 = vsel %vm1457_vm4, %v11723_v0, %v11725_v22  ;;  %19876 = vmatmul.mubr.msk.f32.vlgmr.msra.gmra.mrb[12].mxu0 %vm118_vm1, %v11750_v61 }
 0x525   :  { %26002 = vst [vmem:[#allocation7_spill] sm:$0xff] %v24212_v56  ;;  %14022 = vrot.lane.b32.xlu0 %v23829_v37, %s21253_s21  ;;  %14020 = vrot.lane.b32.xlu1 %v23827_v34, %s21253_s21  ;;  %v11745_v30 = vmul.f32 %v24212_v56, %v26003_v48  ;;  %v24238_v48 = vsel %vm1457_vm4, %v11725_v22, %v11727_v40  ;;  %v26011_v56 = vld [vmem:[#allocation33_spill] sm:$0xff]  ;;  %v26012_v22 = vld [vmem:[#allocation34_spill] sm:$0xff] }
 0x526   :  { %11960 = vmatprep.mubr.f32.mxu0 %v25716_v18  ;;  %26008 = vst [vmem:[#allocation11_spill] sm:$0xff] %v24238_v48  ;;  %v11746_v16 = vmul.f32 %v24238_v48, %v26012_v22 }
 0x527   :  { %v11731_v46 = vpop.permute.xlu0 %11730  ;;  %11825 = vmatprep.subr.mxu1 %v11745_v30  ;;  %v11729_v0 = vpop.permute.xlu1 %11728 }
 0x528   :  { %v24226_v32 = vsel %vm1457_vm4, %v11731_v46, %v11733_v39  ;;  %v24230_v50 = vsel %vm1457_vm4, %v11729_v0, %v11731_v46  ;;  %v24234_v12 = vsel %vm1457_vm4, %v11727_v40, %v11729_v0  ;;  %11826 = vmatpush1.msra.mxu1 %v11744_v20  ;;  %v26009_v39 = vld [vmem:[#allocation31_spill] sm:$0xff]  ;;  %vm26127_vm4 = vmmov %vm26122_vm0 }
 0x529   :  { %26005 = vst [vmem:[#allocation8_spill] sm:$0xff] %v24226_v32  ;;  %26006 = vst [vmem:[#allocation9_spill] sm:$0xff] %v24230_v50  ;;  %14026 = vrot.lane.b32.xlu0 %v23837_v44, %s21253_s21  ;;  %14024 = vrot.lane.b32.xlu1 %v23835_v35, %s21253_s21  ;;  %v11748_v30 = vmul.f32 %v24230_v50, %v26009_v39  ;;  %v11747_v46 = vmul.f32 %v24234_v12, %v26010_v1 }
 0x52a   :  { %26007 = vst [vmem:[#allocation10_spill] sm:$0xff] %v24234_v12  ;;  %v11749_v0 = vmul.f32 %v24226_v32, %v26011_v56  ;;  %19877 = vmatmul.mubr.msk.f32.vlgmr.msra.gmra.mrb[12].mxu1 %vm118_vm1, %v11750_v61  ;;  %v26014_v56 = vld [vmem:[#allocation38_spill] sm:$0xff] }
 0x52b   :  { %v12049_v20 = vpop.permute.xlu0 %12048  ;;  %v12047_v40 = vpop.permute.xlu1 %12046  ;;  %12031 = vmatprep.mubr.f32.mxu1 %v25716_v18  ;;  %11896 = vmatprep.subr.mxu0 %v11747_v46 }
 0x52c   :  { %11967 = vmatprep.subr.mxu1 %v11749_v0  ;;  %v24256_v39 = vsel %vm1831_vm5, %v12047_v40, %v12049_v20  ;;  %11897 = vmatpush1.msra.mxu0 %v11746_v16  ;;  %v26016_v16 = vld [vmem:[#allocation40_spill] sm:$0xff]  ;;  %v12078_v0 = vld [vmem:[%s25405_s5 + $0x20] sm:$0xff] }
 0x52d   :  { %26013 = vst [vmem:[#allocation12_spill] sm:$0xff] %v24256_v39  ;;  %14344 = vrot.lane.b32.xlu0 %v23813_v58, %s21254_s15  ;;  %14342 = vrot.lane.b32.xlu1 %v23811_v17, %s21254_s15  ;;  %v12071_v1 = vmul.f32 %v24256_v39, %v26014_v56 }
 0x52e   :  { %11968 = vmatpush1.msra.mxu1 %v11748_v30  ;;  %19878 = vmatmul.mubr.msk.f32.vlgmr.msra.gmra.mrb[14].mxu0 %vm118_vm1, %v11750_v61 }
 0x52f   :  { %v12051_v12 = vpop.permute.xlu0 %12050  ;;  %12082 = vmatprep.subr.mxu0 %v12071_v1  ;;  %v12061_v22 = vpop.permute.xlu1 %12060  ;;  %19879 = vmatmul.mubr.msk.f32.vlgmr.msra.gmra.mrb[14].mxu1 %vm118_vm1, %v11750_v61 }
 0x530   :  { %v24267_v46 = vsel %vm1831_vm5, %v12061_v22, %v12047_v40  ;;  %12146 = vmatprep.mubr.f32.mxu0 %v25716_v18  ;;  %12217 = vmatprep.mubr.f32.mxu1 %v25716_v18  ;;  %v24283_v61 = vsel %vm1831_vm5, %v12049_v20, %v12051_v12  ;;  %v26020_v20 = vld [vmem:[#allocation43_spill] sm:$0xff] }
 0x531   :  { %26015 = vst [vmem:[#allocation13_spill] sm:$0xff] %v24267_v46  ;;  %14346 = vrot.lane.b32.xlu0 %v23819_v2, %s21254_s15  ;;  %14356 = vrot.lane.b32.xlu1 %v23821_v25, %s21254_s15  ;;  %v12070_v30 = vmul.f32 %v24267_v46, %v26016_v16  ;;  %26017 = vst [vmem:[#allocation14_spill] sm:$0xff] %v24283_v61  ;;  %v26019_v16 = vld [vmem:[#allocation42_spill] sm:$0xff]  ;;  %v12072_v39 = vmul.f32 %v24283_v61, %v26020_v20  ;;  %v26026_v20 = vld [vmem:[#allocation47_spill] sm:$0xff] }
 0x533   :  { %v12055_v40 = vpop.permute.xlu0 %12054  ;;  %12083 = vmatpush1.msra.mxu0 %v12070_v30  ;;  %v12053_v56 = vpop.permute.xlu1 %12052 }
 0x534   :  { %v24287_v1 = vsel %vm1831_vm5, %v12051_v12, %v12053_v56  ;;  %19880 = vmatmul.mubr.msk.f32.vlgmr.msra.gmra.mrb[12].mxu0 %vm118_vm1, %v12078_v0 }
 0x535   :  { %26018 = vst [vmem:[#allocation15_spill] sm:$0xff] %v24287_v1  ;;  %14350 = vrot.lane.b32.xlu0 %v23829_v37, %s21254_s15  ;;  %14348 = vrot.lane.b32.xlu1 %v23827_v34, %s21254_s15  ;;  %v12073_v46 = vmul.f32 %v24287_v1, %v26019_v16  ;;  %v24313_v16 = vsel %vm1831_vm5, %v12053_v56, %v12055_v40  ;;  %v26027_v1 = vld [vmem:[#allocation48_spill] sm:$0xff]  ;;  %v26028_v56 = vld [vmem:[#allocation49_spill] sm:$0xff] }
 0x536   :  { %12288 = vmatprep.mubr.f32.mxu0 %v25716_v18  ;;  %26024 = vst [vmem:[#allocation19_spill] sm:$0xff] %v24313_v16  ;;  %v12074_v61 = vmul.f32 %v24313_v16, %v26028_v56 }
 0x537   :  { %v12059_v30 = vpop.permute.xlu0 %12058  ;;  %12153 = vmatprep.subr.mxu1 %v12073_v46  ;;  %v12057_v12 = vpop.permute.xlu1 %12056 }
 0x538   :  { %v24301_v32 = vsel %vm1831_vm5, %v12059_v30, %v12061_v22  ;;  %v24305_v50 = vsel %vm1831_vm5, %v12057_v12, %v12059_v30  ;;  %v24309_v48 = vsel %vm1831_vm5, %v12055_v40, %v12057_v12  ;;  %12154 = vmatpush1.msra.mxu1 %v12072_v39  ;;  %v26025_v22 = vld [vmem:[#allocation46_spill] sm:$0xff]  ;;  %vm26130_vm5 = vmmov %vm26122_vm0 }
 0x539   :  { %26021 = vst [vmem:[#allocation16_spill] sm:$0xff] %v24301_v32  ;;  %26022 = vst [vmem:[#allocation17_spill] sm:$0xff] %v24305_v50  ;;  %14354 = vrot.lane.b32.xlu0 %v23837_v44, %s21254_s15  ;;  %14352 = vrot.lane.b32.xlu1 %v23835_v35, %s21254_s15  ;;  %v12076_v46 = vmul.f32 %v24305_v50, %v26025_v22  ;;  %v12075_v30 = vmul.f32 %v24309_v48, %v26026_v20 }
 0x53a   :  { %26023 = vst [vmem:[#allocation18_spill] sm:$0xff] %v24309_v48  ;;  %v12077_v12 = vmul.f32 %v24301_v32, %v26027_v1  ;;  %19881 = vmatmul.mubr.msk.f32.vlgmr.msra.gmra.mrb[12].mxu1 %vm118_vm1, %v12078_v0  ;;  %v26030_v1 = vld [vmem:[#allocation54_spill] sm:$0xff] }
 0x53b   :  { %v12377_v39 = vpop.permute.xlu0 %12376  ;;  %v12375_v40 = vpop.permute.xlu1 %12374  ;;  %12359 = vmatprep.mubr.f32.mxu1 %v25716_v18  ;;  %12224 = vmatprep.subr.mxu0 %v12075_v30 }
 0x53c   :  { %12295 = vmatprep.subr.mxu1 %v12077_v12  ;;  %v24331_v22 = vsel %vm2205_vm6, %v12375_v40, %v12377_v39  ;;  %12225 = vmatpush1.msra.mxu0 %v12074_v61  ;;  %v26032_v61 = vld [vmem:[#allocation56_spill] sm:$0xff]  ;;  %v12406_v12 = vld [vmem:[%s25405_s5 + $0x28] sm:$0xff] }
 0x53d   :  { %26029 = vst [vmem:[#allocation20_spill] sm:$0xff] %v24331_v22  ;;  %14672 = vrot.lane.b32.xlu0 %v23813_v58, %s21255_s30  ;;  %14670 = vrot.lane.b32.xlu1 %v23811_v17, %s21255_s30  ;;  %v12399_v20 = vmul.f32 %v24331_v22, %v26030_v1 }
 0x53e   :  { %12296 = vmatpush1.msra.mxu1 %v12076_v46  ;;  %19882 = vmatmul.mubr.msk.f32.vlgmr.msra.gmra.mrb[14].mxu0 %vm118_vm1, %v12078_v0 }
 0x53f   :  { %v12379_v48 = vpop.permute.xlu0 %12378  ;;  %12410 = vmatprep.subr.mxu0 %v12399_v20  ;;  %v12389_v56 = vpop.permute.xlu1 %12388  ;;  %19883 = vmatmul.mubr.msk.f32.vlgmr.msra.gmra.mrb[14].mxu1 %vm118_vm1, %v12078_v0 }
 0x540   :  { %v24342_v30 = vsel %vm2205_vm6, %v12389_v56, %v12375_v40  ;;  %12474 = vmatprep.mubr.f32.mxu0 %v25716_v18  ;;  %12545 = vmatprep.mubr.f32.mxu1 %v25716_v18  ;;  %v24358_v0 = vsel %vm2205_vm6, %v12377_v39, %v12379_v48  ;;  %v26036_v39 = vld [vmem:[#allocation59_spill] sm:$0xff] }
 0x541   :  { %26031 = vst [vmem:[#allocation21_spill] sm:$0xff] %v24342_v30  ;;  %14674 = vrot.lane.b32.xlu0 %v23819_v2, %s21255_s30  ;;  %14684 = vrot.lane.b32.xlu1 %v23821_v25, %s21255_s30  ;;  %v12398_v46 = vmul.f32 %v24342_v30, %v26032_v61  ;;  %26033 = vst [vmem:[#allocation22_spill] sm:$0xff] %v24358_v0  ;;  %v26035_v61 = vld [vmem:[#allocation58_spill] sm:$0xff]  ;;  %v12400_v22 = vmul.f32 %v24358_v0, %v26036_v39 }
 0x542   :  { %v26044_v0 = vld [vmem:[#allocation62_spill] sm:$0xff] }
 0x543   :  { %v12383_v40 = vpop.permute.xlu0 %12382  ;;  %12411 = vmatpush1.msra.mxu0 %v12398_v46  ;;  %v12381_v1 = vpop.permute.xlu1 %12380 }
 0x544   :  { %v24362_v20 = vsel %vm2205_vm6, %v12379_v48, %v12381_v1  ;;  %19884 = vmatmul.mubr.msk.f32.vlgmr.msra.gmra.mrb[12].mxu0 %vm118_vm1, %v12406_v12  ;;  %v24376_v48 = vsel %vm2205_vm6, %v12381_v1, %v12383_v40 }
 0x545   :  { %26034 = vst [vmem:[#allocation23_spill] sm:$0xff] %v24362_v20  ;;  %14678 = vrot.lane.b32.xlu0 %v23829_v37, %s21255_s30  ;;  %14676 = vrot.lane.b32.xlu1 %v23827_v34, %s21255_s30  ;;  %v12401_v30 = vmul.f32 %v24362_v20, %v26035_v61  ;;  %26037 = vst [vmem:[#allocation24_spill] sm:$0xff] %v24376_v48  ;;  %v26043_v20 = vld [vmem:[#allocation65_spill] sm:$0xff] }
 0x546   :  { %12616 = vmatprep.mubr.f32.mxu0 %v25716_v18 }
 0x547   :  { %v12387_v46 = vpop.permute.xlu0 %12386  ;;  %12481 = vmatprep.subr.mxu1 %v12401_v30  ;;  %v12385_v32 = vpop.permute.xlu1 %12384  ;;  %v26041_v30 = vld [vmem:[#allocation64_spill] sm:$0xff] }
 0x548   :  { %v24380_v50 = vsel %vm2205_vm6, %v12387_v46, %v12389_v56  ;;  %v24384_v16 = vsel %vm2205_vm6, %v12385_v32, %v12387_v46  ;;  %v24388_v61 = vsel %vm2205_vm6, %v12383_v40, %v12385_v32  ;;  %12482 = vmatpush1.msra.mxu1 %v12400_v22  ;;  %v26042_v56 = vld [vmem:[#allocation63_spill] sm:$0xff]  ;;  %v12402_v46 = vmul.f32 %v24376_v48, %v26043_v20  ;;  %v26046_v20 = vld [vmem:[#allocation70_spill] sm:$0xff]  ;;  %vm26131_vm6 = vmmov %vm26122_vm0 }
 0x549   :  { %26038 = vst [vmem:[#allocation25_spill] sm:$0xff] %v24380_v50  ;;  %26039 = vst [vmem:[#allocation26_spill] sm:$0xff] %v24384_v16  ;;  %14682 = vrot.lane.b32.xlu0 %v23837_v44, %s21255_s30  ;;  %14680 = vrot.lane.b32.xlu1 %v23835_v35, %s21255_s30  ;;  %v12405_v1 = vmul.f32 %v24380_v50, %v26041_v30  ;;  %v12403_v39 = vmul.f32 %v24388_v61, %v26042_v56 }
 0x54a   :  { %26040 = vst [vmem:[#allocation27_spill] sm:$0xff] %v24388_v61  ;;  %v12404_v32 = vmul.f32 %v24384_v16, %v26044_v0  ;;  %19885 = vmatmul.mubr.msk.f32.vlgmr.msra.gmra.mrb[12].mxu1 %vm118_vm1, %v12406_v12 }
 0x54b   :  { %v12705_v22 = vpop.permute.xlu0 %12704  ;;  %12552 = vmatprep.subr.mxu0 %v12403_v39  ;;  %12623 = vmatprep.subr.mxu1 %v12405_v1  ;;  %v12703_v40 = vpop.permute.xlu1 %12702  ;;  %v26048_v39 = vld [vmem:[#allocation72_spill] sm:$0xff] }
 0x54c   :  { %v24405_v36 = vsel %vm2579_vm7, %v12703_v40, %v12705_v22  ;;  %12553 = vmatpush1.msra.mxu0 %v12402_v46  ;;  %12624 = vmatpush1.msra.mxu1 %v12404_v32 }
 0x54d   :  { %26045 = vst [vmem:[#allocation29_spill] sm:$0xff] %v24405_v36  ;;  %15002 = vrot.lane.b32.xlu0 %v23819_v2, %s21256_s20  ;;  %15000 = vrot.lane.b32.xlu1 %v23813_v58, %s21256_s20  ;;  %v12727_v0 = vmul.f32 %v24405_v36, %v26046_v20 }
 0x54e   :  { %19886 = vmatmul.mubr.msk.f32.vlgmr.msra.gmra.mrb[14].mxu0 %vm118_vm1, %v12406_v12  ;;  %12687 = vmatprep.mubr.f32.mxu1 %v25716_v18 }
 0x54f   :  { %v12707_v30 = vpop.permute.xlu0 %12706  ;;  %12738 = vmatprep.subr.mxu0 %v12727_v0  ;;  %v12717_v1 = vpop.permute.xlu1 %12716  ;;  %19887 = vmatmul.mubr.msk.f32.vlgmr.msra.gmra.mrb[14].mxu1 %vm118_vm1, %v12406_v12  ;;  %v12734_v12 = vld [vmem:[%s25405_s5 + $0x30] sm:$0xff] }
 0x550   :  { %v24418_v56 = vsel %vm2579_vm7, %v12717_v1, %v12703_v40  ;;  %12802 = vmatprep.mubr.f32.mxu0 %v25716_v18  ;;  %12873 = vmatprep.mubr.f32.mxu1 %v25716_v18  ;;  %v24433_v32 = vsel %vm2579_vm7, %v12705_v22, %v12707_v30  ;;  %v26052_v22 = vld [vmem:[#allocation75_spill] sm:$0xff] }
 0x551   :  { %26047 = vst [vmem:[#allocation30_spill] sm:$0xff] %v24418_v56  ;;  %15004 = vrot.lane.b32.xlu0 %v23827_v34, %s21256_s20  ;;  %14998 = vrot.lane.b32.xlu1 %v23811_v17, %s21256_s20  ;;  %v12726_v46 = vmul.f32 %v24418_v56, %v26048_v39  ;;  %26049 = vst [vmem:[#allocation31_spill] sm:$0xff] %v24433_v32  ;;  %v26051_v39 = vld [vmem:[#allocation74_spill] sm:$0xff]  ;;  %v12728_v36 = vmul.f32 %v24433_v32, %v26052_v22 }
 0x552   :  { %v26060_v32 = vld [vmem:[#allocation78_spill] sm:$0xff] }
 0x553   :  { %v12711_v40 = vpop.permute.xlu0 %12710  ;;  %12739 = vmatpush1.msra.mxu0 %v12726_v46  ;;  %v12709_v20 = vpop.permute.xlu1 %12708 }
 0x554   :  { %v24437_v0 = vsel %vm2579_vm7, %v12707_v30, %v12709_v20  ;;  %19888 = vmatmul.mubr.msk.f32.vlgmr.msra.gmra.mrb[12].mxu0 %vm118_vm1, %v12734_v12  ;;  %v24451_v30 = vsel %vm2579_vm7, %v12709_v20, %v12711_v40 }
 0x555   :  { %26050 = vst [vmem:[#allocation32_spill] sm:$0xff] %v24437_v0  ;;  %15008 = vrot.lane.b32.xlu0 %v23835_v35, %s21256_s20  ;;  %15006 = vrot.lane.b32.xlu1 %v23829_v37, %s21256_s20  ;;  %v12729_v56 = vmul.f32 %v24437_v0, %v26051_v39  ;;  %26053 = vst [vmem:[#allocation33_spill] sm:$0xff] %v24451_v30  ;;  %v26059_v0 = vld [vmem:[#allocation81_spill] sm:$0xff] }
 0x556   :  { %12944 = vmatprep.mubr.f32.mxu0 %v25716_v18 }
 0x557   :  { %v12715_v46 = vpop.permute.xlu0 %12714  ;;  %12809 = vmatprep.subr.mxu1 %v12729_v56  ;;  %v12713_v61 = vpop.permute.xlu1 %12712  ;;  %v26057_v56 = vld [vmem:[#allocation80_spill] sm:$0xff] }
 0x558   :  { %v24455_v50 = vsel %vm2579_vm7, %v12715_v46, %v12717_v1  ;;  %v24459_v16 = vsel %vm2579_vm7, %v12713_v61, %v12715_v46  ;;  %v24463_v39 = vsel %vm2579_vm7, %v12711_v40, %v12713_v61  ;;  %12810 = vmatpush1.msra.mxu1 %v12728_v36  ;;  %v26058_v1 = vld [vmem:[#allocation79_spill] sm:$0xff]  ;;  %v12730_v46 = vmul.f32 %v24451_v30, %v26059_v0  ;;  %v26062_v0 = vld [vmem:[#allocation86_spill] sm:$0xff]  ;;  %vm26132_vm7 = vmmov %vm26122_vm0 }
 0x559   :  { %26054 = vst [vmem:[#allocation34_spill] sm:$0xff] %v24455_v50  ;;  %26055 = vst [vmem:[#allocation38_spill] sm:$0xff] %v24459_v16  ;;  %15012 = vrot.lane.b32.xlu0 %v23821_v25, %s21256_s20  ;;  %15010 = vrot.lane.b32.xlu1 %v23837_v44, %s21256_s20  ;;  %v12733_v20 = vmul.f32 %v24455_v50, %v26057_v56  ;;  %v12731_v22 = vmul.f32 %v24463_v39, %v26058_v1 }
 0x55a   :  { %26056 = vst [vmem:[#allocation40_spill] sm:$0xff] %v24463_v39  ;;  %v12732_v61 = vmul.f32 %v24459_v16, %v26060_v32  ;;  %19889 = vmatmul.mubr.msk.f32.vlgmr.msra.gmra.mrb[12].mxu1 %vm118_vm1, %v12734_v12 }
 0x55b   :  { %v13033_v36 = vpop.permute.xlu0 %13032  ;;  %12880 = vmatprep.subr.mxu0 %v12731_v22  ;;  %12951 = vmatprep.subr.mxu1 %v12733_v20  ;;  %v13031_v40 = vpop.permute.xlu1 %13030  ;;  %v26064_v22 = vld [vmem:[#allocation88_spill] sm:$0xff] }
 0x55c   :  { %v24480_v48 = vsel %vm2953_vm8, %v13031_v40, %v13033_v36  ;;  %12881 = vmatpush1.msra.mxu0 %v12730_v46  ;;  %12952 = vmatpush1.msra.mxu1 %v12732_v61 }
 0x55d   :  { %26061 = vst [vmem:[#allocation42_spill] sm:$0xff] %v24480_v48  ;;  %15330 = vrot.lane.b32.xlu0 %v23819_v2, %s21257_s12  ;;  %15328 = vrot.lane.b32.xlu1 %v23813_v58, %s21257_s12  ;;  %v13055_v32 = vmul.f32 %v24480_v48, %v26062_v0 }
 0x55e   :  { %19890 = vmatmul.mubr.msk.f32.vlgmr.msra.gmra.mrb[14].mxu0 %vm118_vm1, %v12734_v12  ;;  %13015 = vmatprep.mubr.f32.mxu1 %v25716_v18 }
 0x55f   :  { %v13035_v56 = vpop.permute.xlu0 %13034  ;;  %13066 = vmatprep.subr.mxu0 %v13055_v32  ;;  %v13045_v20 = vpop.permute.xlu1 %13044  ;;  %19891 = vmatmul.mubr.msk.f32.vlgmr.msra.gmra.mrb[14].mxu1 %vm118_vm1, %v12734_v12  ;;  %v13062_v12 = vld [vmem:[%s25405_s5 + $0x38] sm:$0xff] }
 0x560   :  { %v24493_v1 = vsel %vm2953_vm8, %v13045_v20, %v13031_v40  ;;  %13130 = vmatprep.mubr.f32.mxu0 %v25716_v18  ;;  %13201 = vmatprep.mubr.f32.mxu1 %v25716_v18  ;;  %v24508_v61 = vsel %vm2953_vm8, %v13033_v36, %v13035_v56  ;;  %v26068_v36 = vld [vmem:[#allocation91_spill] sm:$0xff] }
 0x561   :  { %26063 = vst [vmem:[#allocation43_spill] sm:$0xff] %v24493_v1  ;;  %15332 = vrot.lane.b32.xlu0 %v23827_v34, %s21257_s12  ;;  %15326 = vrot.lane.b32.xlu1 %v23811_v17, %s21257_s12  ;;  %v13054_v46 = vmul.f32 %v24493_v1, %v26064_v22  ;;  %26065 = vst [vmem:[#allocation46_spill] sm:$0xff] %v24508_v61  ;;  %v26067_v22 = vld [vmem:[#allocation90_spill] sm:$0xff]  ;;  %v13056_v48 = vmul.f32 %v24508_v61, %v26068_v36 }
 0x562   :  { %v26076_v61 = vld [vmem:[#allocation94_spill] sm:$0xff] }
 0x563   :  { %v13039_v40 = vpop.permute.xlu0 %13038  ;;  %13067 = vmatpush1.msra.mxu0 %v13054_v46  ;;  %v13037_v0 = vpop.permute.xlu1 %13036 }
 0x564   :  { %v24512_v32 = vsel %vm2953_vm8, %v13035_v56, %v13037_v0  ;;  %19892 = vmatmul.mubr.msk.f32.vlgmr.msra.gmra.mrb[12].mxu0 %vm118_vm1, %v13062_v12  ;;  %v24526_v56 = vsel %vm2953_vm8, %v13037_v0, %v13039_v40 }
 0x565   :  { %26066 = vst [vmem:[#allocation47_spill] sm:$0xff] %v24512_v32  ;;  %15336 = vrot.lane.b32.xlu0 %v23835_v35, %s21257_s12  ;;  %15334 = vrot.lane.b32.xlu1 %v23829_v37, %s21257_s12  ;;  %v13057_v1 = vmul.f32 %v24512_v32, %v26067_v22  ;;  %26069 = vst [vmem:[#allocation48_spill] sm:$0xff] %v24526_v56  ;;  %v26075_v32 = vld [vmem:[#allocation97_spill] sm:$0xff] }
 0x566   :  { %13272 = vmatprep.mubr.f32.mxu0 %v25716_v18 }
 0x567   :  { %v13043_v46 = vpop.permute.xlu0 %13042  ;;  %13137 = vmatprep.subr.mxu1 %v13057_v1  ;;  %v13041_v39 = vpop.permute.xlu1 %13040  ;;  %v26073_v1 = vld [vmem:[#allocation96_spill] sm:$0xff] }
 0x568   :  { %v24530_v50 = vsel %vm2953_vm8, %v13043_v46, %v13045_v20  ;;  %v24534_v16 = vsel %vm2953_vm8, %v13041_v39, %v13043_v46  ;;  %v24538_v22 = vsel %vm2953_vm8, %v13039_v40, %v13041_v39  ;;  %13138 = vmatpush1.msra.mxu1 %v13056_v48  ;;  %v26074_v20 = vld [vmem:[#allocation95_spill] sm:$0xff]  ;;  %v13058_v46 = vmul.f32 %v24526_v56, %v26075_v32  ;;  %v26079_v32 = vld [vmem:[#allocation102_spill] sm:$0xff]  ;;  %vm26133_vm8 = vmmov %vm26122_vm0 }
 0x569   :  { %26070 = vst [vmem:[#allocation49_spill] sm:$0xff] %v24530_v50  ;;  %26071 = vst [vmem:[#allocation54_spill] sm:$0xff] %v24534_v16  ;;  %15340 = vrot.lane.b32.xlu0 %v23821_v25, %s21257_s12  ;;  %15338 = vrot.lane.b32.xlu1 %v23837_v44, %s21257_s12  ;;  %v13061_v0 = vmul.f32 %v24530_v50, %v26073_v1  ;;  %v13059_v36 = vmul.f32 %v24538_v22, %v26074_v20  ;;  %s26078_s12 = smov 120  }
 0x56a   :  { %26072 = vst [vmem:[#allocation56_spill] sm:$0xff] %v24538_v22  ;;  %v13060_v39 = vmul.f32 %v24534_v16, %v26076_v61  ;;  %19893 = vmatmul.mubr.msk.f32.vlgmr.msra.gmra.mrb[12].mxu1 %vm118_vm1, %v13062_v12  ;;  %v26088_v16 = vld [vmem:[#allocation109_spill] sm:$0xff] }
 0x56b   :  { %v13361_v48 = vpop.permute.xlu0 %13360  ;;  %13208 = vmatprep.subr.mxu0 %v13059_v36  ;;  %13279 = vmatprep.subr.mxu1 %v13061_v0  ;;  %v13359_v40 = vpop.permute.xlu1 %13358  ;;  %v26081_v36 = vld [vmem:[#allocation104_spill] sm:$0xff] }
 0x56c   :  { %v24555_v30 = vsel %vm3327_vm9, %v13359_v40, %v13361_v48  ;;  %13209 = vmatpush1.msra.mxu0 %v13058_v46  ;;  %13280 = vmatpush1.msra.mxu1 %v13060_v39 }
 0x56d   :  { %26077 = vst [vmem:[#allocation58_spill] sm:$0xff] %v24555_v30  ;;  %15658 = vrot.lane.b32.xlu0 %v23819_v2, %s26078_s12  ;;  %15656 = vrot.lane.b32.xlu1 %v23813_v58, %s26078_s12  ;;  %v13383_v61 = vmul.f32 %v24555_v30, %v26079_v32 }
 0x56e   :  { %19894 = vmatmul.mubr.msk.f32.vlgmr.msra.gmra.mrb[14].mxu0 %vm118_vm1, %v13062_v12  ;;  %13343 = vmatprep.mubr.f32.mxu1 %v25716_v18 }
 0x56f   :  { %13394 = vmatprep.subr.mxu0 %v13383_v61  ;;  %19895 = vmatmul.mubr.msk.f32.vlgmr.msra.gmra.mrb[14].mxu1 %vm118_vm1, %v13062_v12  ;;  %v13363_v1 = vpop.permute.xlu0 %13362  ;;  %v13390_v12 = vld [vmem:[%s25405_s5 + $0x40] sm:$0xff] }
 0x570   :  { %v13373_v0 = vpop.permute.xlu1 %13372  ;;  %13458 = vmatprep.mubr.f32.mxu0 %v25716_v18  ;;  %13529 = vmatprep.mubr.f32.mxu1 %v25716_v18  ;;  %v24587_v39 = vsel %vm3327_vm9, %v13361_v48, %v13363_v1 }
 0x571   :  { %15660 = vrot.lane.b32.xlu0 %v23827_v34, %s26078_s12  ;;  %15654 = vrot.lane.b32.xlu1 %v23811_v17, %s26078_s12  ;;  %v24574_v20 = vsel %vm3327_vm9, %v13373_v0, %v13359_v40  ;;  %26082 = vst [vmem:[#allocation64_spill] sm:$0xff] %v24587_v39 }
 0x572   :  { %26080 = vst [vmem:[#allocation59_spill] sm:$0xff] %v24574_v20  ;;  %v13382_v46 = vmul.f32 %v24574_v20, %v26081_v36  ;;  %v26084_v36 = vld [vmem:[#allocation106_spill] sm:$0xff]  ;;  %v26085_v20 = vld [vmem:[#allocation107_spill] sm:$0xff] }
 0x573   :  { %v13384_v30 = vmul.f32 %v24587_v39, %v26085_v20  ;;  %v26087_v39 = vld [vmem:[#allocation110_spill] sm:$0xff] }
 0x574   :  { %13395 = vmatpush1.msra.mxu0 %v13382_v46 }
 0x575   :  { %15664 = vrot.lane.b32.xlu0 %v23835_v35, %s26078_s12  ;;  %15662 = vrot.lane.b32.xlu1 %v23829_v37, %s26078_s12  ;;  %v13367_v40 = vpop.permute.xlu0 %13366 }
 0x576   :  { %v13365_v32 = vpop.permute.xlu1 %13364  ;;  %19896 = vmatmul.mubr.msk.f32.vlgmr.msra.gmra.mrb[12].mxu0 %vm118_vm1, %v13390_v12 }
 0x577   :  { %v24592_v61 = vsel %vm3327_vm9, %v13363_v1, %v13365_v32  ;;  %13600 = vmatprep.mubr.f32.mxu0 %v25716_v18  ;;  %v24605_v48 = vsel %vm3327_vm9, %v13365_v32, %v13367_v40 }
 0x578   :  { %26083 = vst [vmem:[#allocation63_spill] sm:$0xff] %v24592_v61  ;;  %v13385_v46 = vmul.f32 %v24592_v61, %v26084_v36  ;;  %v26086_v61 = vld [vmem:[#allocation111_spill] sm:$0xff] }
 0x579   :  { %15668 = vrot.lane.b32.xlu0 %v23821_v25, %s26078_s12  ;;  %15666 = vrot.lane.b32.xlu1 %v23837_v44, %s26078_s12  ;;  %v13371_v1 = vpop.permute.xlu0 %13370 }
 0x57a   :  { %13465 = vmatprep.subr.mxu1 %v13385_v46  ;;  %v13369_v22 = vpop.permute.xlu1 %13368  ;;  %v24609_v50 = vsel %vm3327_vm9, %v13371_v1, %v13373_v0  ;;  %v26089_v0 = vld [vmem:[#allocation112_spill] sm:$0xff] }
 0x57b   :  { %v24613_v20 = vsel %vm3327_vm9, %v13369_v22, %v13371_v1  ;;  %v24617_v36 = vsel %vm3327_vm9, %v13367_v40, %v13369_v22  ;;  %13466 = vmatpush1.msra.mxu1 %v13384_v30  ;;  %v13389_v32 = vmul.f32 %v24609_v50, %v26086_v61  ;;  %v13386_v1 = vmul.f32 %v24605_v48, %v26089_v0  ;;  %v26091_v61 = vld [vmem:[#allocation116_spill] sm:$0xff] }
 0x57c   :  { %v13387_v46 = vmul.f32 %v24617_v36, %v26087_v39  ;;  %v13388_v56 = vmul.f32 %v24613_v20, %v26088_v16  ;;  %19897 = vmatmul.mubr.msk.f32.vlgmr.msra.gmra.mrb[12].mxu1 %vm118_vm1, %v13390_v12  ;;  %v26090_v39 = vld [vmem:[#allocation115_spill] sm:$0xff]  ;;  %vm26138_vm9 = vcmp.lt.s32.totalorder %v21467_v13, 121  ;;  %v16311_v13 = vmul.f32 %v23968_v54, %v23108_v33  ;;  %v26171_v54 = vld [vmem:[#allocation113_spill] sm:$0xff] }
 0x57d   :  { %15986 = vrot.lane.b32.xlu0 %v23819_v2, %s21259_s28  ;;  %15984 = vrot.lane.b32.xlu1 %v23813_v58, %s21259_s28  ;;  %v16317_v33 = vmul.f32 %v23955_v21, %v23135_v29  ;;  %v16615_v29 = vmul.f32 %v24057_v43, %v23159_v62  ;;  %v16619_v62 = vmul.f32 %v24078_v9, %v23199_v5  ;;  %v26170_v21 = vld [vmem:[#allocation178_spill] sm:$0xff] }
 0x57e   :  { %v13689_v30 = vpop.permute.xlu0 %13688  ;;  %13536 = vmatprep.subr.mxu0 %v13387_v46  ;;  %13607 = vmatprep.subr.mxu1 %v13389_v32  ;;  %v13687_v22 = vpop.permute.xlu1 %13686  ;;  %v16921_v5 = vmul.f32 %v24163_v23, %v23223_v4  ;;  %v26173_v4 = vld [vmem:[#allocation2_spill] sm:$0xff] }
 0x57f   :  { %13537 = vmatpush1.msra.mxu0 %v13386_v1  ;;  %13608 = vmatpush1.msra.mxu1 %v13388_v56  ;;  %v13708_v16 = vsel %vm3701_vm10, %v13687_v22, %v13689_v30  ;;  %v26092_v1 = vld [vmem:[#allocation117_spill] sm:$0xff]  ;;  %v26181_v23 = vld [vmem:[#allocation6_spill] sm:$0xff] }
 0x580   :  { %19898 = vmatmul.mubr.msk.f32.vlgmr.msra.gmra.mrb[14].mxu0 %vm118_vm1, %v13390_v12  ;;  %13671 = vmatprep.mubr.f32.mxu1 %v25716_v18  ;;  %v13711_v40 = vmul.f32 %v13708_v16, %v26090_v39 }
 0x581   :  { %15988 = vrot.lane.b32.xlu0 %v23827_v34, %s21259_s28  ;;  %15982 = vrot.lane.b32.xlu1 %v23811_v17, %s21259_s28  ;;  %v13718_v17 = vld [vmem:[%s25405_s5 + $0x48] sm:$0xff] }
 0x582   :  { %19899 = vmatmul.mubr.msk.f32.vlgmr.msra.gmra.mrb[14].mxu1 %vm118_vm1, %v13390_v12  ;;  %13786 = vmatprep.mubr.f32.mxu0 %v25716_v18  ;;  %v13691_v58 = vpop.permute.xlu0 %13690 }
 0x583   :  { %13722 = vmatprep.subr.mxu0 %v13711_v40  ;;  %v13701_v2 = vpop.permute.xlu1 %13700  ;;  %13857 = vmatprep.mubr.f32.mxu1 %v25716_v18  ;;  %v13707_v34 = vsel %vm3701_vm10, %v13689_v30, %v13691_v58 }
 0x584   :  { %v13709_v56 = vsel %vm3701_vm10, %v13701_v2, %v13687_v22 }
 0x585   :  { %v13710_v32 = vmul.f32 %v13709_v56, %v26091_v61  ;;  %15992 = vrot.lane.b32.xlu0 %v23835_v35, %s21259_s28  ;;  %15990 = vrot.lane.b32.xlu1 %v23829_v37, %s21259_s28  ;;  %v26093_v37 = vld [vmem:[#allocation118_spill] sm:$0xff]  ;;  %v26095_v61 = vld [vmem:[#allocation120_spill] sm:$0xff] }
 0x586   :  { %v13695_v12 = vpop.permute.xlu0 %13694  ;;  %v13712_v22 = vmul.f32 %v13707_v34, %v26093_v37  ;;  %v26096_v34 = vld [vmem:[#allocation119_spill] sm:$0xff] }
 0x587   :  { %13723 = vmatpush1.msra.mxu0 %v13710_v32  ;;  %v13693_v46 = vpop.permute.xlu1 %13692  ;;  %v26098_v37 = vld [vmem:[#allocation123_spill] sm:$0xff] }
 0x588   :  { %v13706_v0 = vsel %vm3701_vm10, %v13691_v58, %v13693_v46  ;;  %19900 = vmatmul.mubr.msk.f32.vlgmr.msra.gmra.mrb[12].mxu0 %vm118_vm1, %v13718_v17  ;;  %v13705_v30 = vsel %vm3701_vm10, %v13693_v46, %v13695_v12  ;;  %v26097_v46 = vld [vmem:[#allocation122_spill] sm:$0xff] }
 0x589   :  { %v13713_v35 = vmul.f32 %v13706_v0, %v26092_v1  ;;  %15996 = vrot.lane.b32.xlu0 %v23821_v25, %s21259_s28  ;;  %15994 = vrot.lane.b32.xlu1 %v23837_v44, %s21259_s28  ;;  %v26094_v44 = vld [vmem:[#allocation121_spill] sm:$0xff]  ;;  %v13714_v1 = vmul.f32 %v13705_v30, %v26097_v46 }
 0x58a   :  { %13928 = vmatprep.mubr.f32.mxu0 %v25716_v18 }
 0x58b   :  { %v13699_v16 = vpop.permute.xlu0 %13698  ;;  %13793 = vmatprep.subr.mxu1 %v13713_v35  ;;  %v13697_v39 = vpop.permute.xlu1 %13696 }
 0x58c   :  { %v13702_v40 = vsel %vm3701_vm10, %v13699_v16, %v13701_v2  ;;  %v13703_v58 = vsel %vm3701_vm10, %v13697_v39, %v13699_v16  ;;  %v13704_v25 = vsel %vm3701_vm10, %v13695_v12, %v13697_v39  ;;  %13794 = vmatpush1.msra.mxu1 %v13712_v22  ;;  %vm26140_vm10 = vmmov %vm26138_vm9 }
 0x58d   :  { %v13717_v56 = vmul.f32 %v13702_v40, %v26094_v44  ;;  %v13715_v32 = vmul.f32 %v13704_v25, %v26095_v61  ;;  %v13716_v0 = vmul.f32 %v13703_v58, %v26096_v34  ;;  %19901 = vmatmul.mubr.msk.f32.vlgmr.msra.gmra.mrb[12].mxu1 %vm118_vm1, %v13718_v17  ;;  %v26099_v40 = vld [vmem:[#allocation124_spill] sm:$0xff] }
 0x58e   :  { %13999 = vmatprep.mubr.f32.mxu1 %v25716_v18  ;;  %v14046_v25 = vld [vmem:[%s25405_s5 + $0x50] sm:$0xff] }
 0x58f   :  { %v14017_v2 = vpop.permute.xlu0 %14016  ;;  %13864 = vmatprep.subr.mxu0 %v13715_v32  ;;  %13935 = vmatprep.subr.mxu1 %v13717_v56  ;;  %v14015_v35 = vpop.permute.xlu1 %14014  ;;  %v26100_v32 = vld [vmem:[#allocation125_spill] sm:$0xff] }
 0x590   :  { %v14036_v12 = vsel %vm4075_vm11, %v14015_v35, %v14017_v2  ;;  %13865 = vmatpush1.msra.mxu0 %v13714_v1  ;;  %13936 = vmatpush1.msra.mxu1 %v13716_v0  ;;  %v26101_v0 = vld [vmem:[#allocation126_spill] sm:$0xff] }
 0x591   :  { %v14039_v22 = vmul.f32 %v14036_v12, %v26098_v37  ;;  %19902 = vmatmul.mubr.msk.f32.vlgmr.msra.gmra.mrb[14].mxu0 %vm118_vm1, %v13718_v17  ;;  %19903 = vmatmul.mubr.msk.f32.vlgmr.msra.gmra.mrb[14].mxu1 %vm118_vm1, %v13718_v17 }
 0x592   :  { %14114 = vmatprep.mubr.f32.mxu0 %v25716_v18  ;;  %14185 = vmatprep.mubr.f32.mxu1 %v25716_v18 }
 0x593   :  { %v14019_v30 = vpop.permute.xlu0 %14018  ;;  %14050 = vmatprep.subr.mxu0 %v14039_v22  ;;  %v14029_v16 = vpop.permute.xlu1 %14028 }
 0x594   :  { %v14037_v39 = vsel %vm4075_vm11, %v14029_v16, %v14015_v35  ;;  %v14035_v44 = vsel %vm4075_vm11, %v14017_v2, %v14019_v30 }
 0x595   :  { %v14038_v58 = vmul.f32 %v14037_v39, %v26099_v40  ;;  %v14040_v46 = vmul.f32 %v14035_v44, %v26101_v0  ;;  %v26103_v40 = vld [vmem:[#allocation128_spill] sm:$0xff]  ;;  %v26104_v44 = vld [vmem:[#allocation127_spill] sm:$0xff] }
 0x596   :  { %v26106_v0 = vld [vmem:[#allocation131_spill] sm:$0xff] }
 0x597   :  { %v14023_v17 = vpop.permute.xlu0 %14022  ;;  %14051 = vmatpush1.msra.mxu0 %v14038_v58  ;;  %v14021_v56 = vpop.permute.xlu1 %14020 }
 0x598   :  { %v14034_v61 = vsel %vm4075_vm11, %v14019_v30, %v14021_v56  ;;  %19904 = vmatmul.mubr.msk.f32.vlgmr.msra.gmra.mrb[12].mxu0 %vm118_vm1, %v14046_v25  ;;  %v14033_v1 = vsel %vm4075_vm11, %v14021_v56, %v14023_v17  ;;  %v26102_v30 = vld [vmem:[#allocation129_spill] sm:$0xff]  ;;  %v26105_v56 = vld [vmem:[#allocation130_spill] sm:$0xff] }
 0x599   :  { %v14041_v34 = vmul.f32 %v14034_v61, %v26100_v32  ;;  %14256 = vmatprep.mubr.f32.mxu0 %v25716_v18  ;;  %v14042_v32 = vmul.f32 %v14033_v1, %v26105_v56 }
 0x59b   :  { %v14027_v35 = vpop.permute.xlu0 %14026  ;;  %14121 = vmatprep.subr.mxu1 %v14041_v34  ;;  %v14025_v2 = vpop.permute.xlu1 %14024 }
 0x59c   :  { %v14030_v12 = vsel %vm4075_vm11, %v14027_v35, %v14029_v16  ;;  %v14031_v37 = vsel %vm4075_vm11, %v14025_v2, %v14027_v35  ;;  %v14032_v22 = vsel %vm4075_vm11, %v14023_v17, %v14025_v2  ;;  %14122 = vmatpush1.msra.mxu1 %v14040_v46  ;;  %vm26142_vm11 = vmmov %vm26138_vm9 }
 0x59d   :  { %v14045_v39 = vmul.f32 %v14030_v12, %v26102_v30  ;;  %v14043_v58 = vmul.f32 %v14032_v22, %v26103_v40  ;;  %v14044_v61 = vmul.f32 %v14031_v37, %v26104_v44  ;;  %19905 = vmatmul.mubr.msk.f32.vlgmr.msra.gmra.mrb[12].mxu1 %vm118_vm1, %v14046_v25  ;;  %v26107_v12 = vld [vmem:[#allocation132_spill] sm:$0xff]  ;;  %v14374_v22 = vld [vmem:[%s25405_s5 + $0x58] sm:$0xff] }
 0x59e   :  { %14327 = vmatprep.mubr.f32.mxu1 %v25716_v18 }
 0x59f   :  { %v14345_v16 = vpop.permute.xlu0 %14344  ;;  %14192 = vmatprep.subr.mxu0 %v14043_v58  ;;  %14263 = vmatprep.subr.mxu1 %v14045_v39  ;;  %v14343_v34 = vpop.permute.xlu1 %14342  ;;  %v26108_v58 = vld [vmem:[#allocation133_spill] sm:$0xff] }
 0x5a0   :  { %v14364_v17 = vsel %vm4449_vm12, %v14343_v34, %v14345_v16  ;;  %14193 = vmatpush1.msra.mxu0 %v14042_v32  ;;  %14264 = vmatpush1.msra.mxu1 %v14044_v61  ;;  %v26109_v61 = vld [vmem:[#allocation134_spill] sm:$0xff] }
 0x5a1   :  { %v14367_v46 = vmul.f32 %v14364_v17, %v26106_v0  ;;  %19906 = vmatmul.mubr.msk.f32.vlgmr.msra.gmra.mrb[14].mxu0 %vm118_vm1, %v14046_v25  ;;  %19907 = vmatmul.mubr.msk.f32.vlgmr.msra.gmra.mrb[14].mxu1 %vm118_vm1, %v14046_v25 }
 0x5a2   :  { %14442 = vmatprep.mubr.f32.mxu0 %v25716_v18  ;;  %14513 = vmatprep.mubr.f32.mxu1 %v25716_v18 }
 0x5a3   :  { %v14347_v1 = vpop.permute.xlu0 %14346  ;;  %14378 = vmatprep.subr.mxu0 %v14367_v46  ;;  %v14357_v35 = vpop.permute.xlu1 %14356 }
 0x5a4   :  { %v14365_v2 = vsel %vm4449_vm12, %v14357_v35, %v14343_v34  ;;  %v14363_v30 = vsel %vm4449_vm12, %v14345_v16, %v14347_v1 }
 0x5a5   :  { %v14366_v37 = vmul.f32 %v14365_v2, %v26107_v12  ;;  %v14368_v56 = vmul.f32 %v14363_v30, %v26109_v61  ;;  %v26111_v12 = vld [vmem:[#allocation136_spill] sm:$0xff]  ;;  %v26112_v30 = vld [vmem:[#allocation135_spill] sm:$0xff] }
 0x5a6   :  { %v26114_v61 = vld [vmem:[#allocation139_spill] sm:$0xff] }
 0x5a7   :  { %v14351_v25 = vpop.permute.xlu0 %14350  ;;  %14379 = vmatpush1.msra.mxu0 %v14366_v37  ;;  %v14349_v39 = vpop.permute.xlu1 %14348 }
 0x5a8   :  { %v14362_v40 = vsel %vm4449_vm12, %v14347_v1, %v14349_v39  ;;  %19908 = vmatmul.mubr.msk.f32.vlgmr.msra.gmra.mrb[12].mxu0 %vm118_vm1, %v14374_v22  ;;  %v14361_v32 = vsel %vm4449_vm12, %v14349_v39, %v14351_v25  ;;  %v26110_v1 = vld [vmem:[#allocation137_spill] sm:$0xff]  ;;  %v26113_v39 = vld [vmem:[#allocation138_spill] sm:$0xff] }
 0x5a9   :  { %v14369_v44 = vmul.f32 %v14362_v40, %v26108_v58  ;;  %14584 = vmatprep.mubr.f32.mxu0 %v25716_v18  ;;  %v14370_v58 = vmul.f32 %v14361_v32, %v26113_v39 }
 0x5ab   :  { %v14355_v34 = vpop.permute.xlu0 %14354  ;;  %14449 = vmatprep.subr.mxu1 %v14369_v44  ;;  %v14353_v16 = vpop.permute.xlu1 %14352 }
 0x5ac   :  { %v14358_v17 = vsel %vm4449_vm12, %v14355_v34, %v14357_v35  ;;  %v14359_v0 = vsel %vm4449_vm12, %v14353_v16, %v14355_v34  ;;  %v14360_v46 = vsel %vm4449_vm12, %v14351_v25, %v14353_v16  ;;  %14450 = vmatpush1.msra.mxu1 %v14368_v56  ;;  %vm26143_vm12 = vmmov %vm26138_vm9 }
 0x5ad   :  { %v14373_v2 = vmul.f32 %v14358_v17, %v26110_v1  ;;  %v14371_v37 = vmul.f32 %v14360_v46, %v26111_v12  ;;  %v14372_v40 = vmul.f32 %v14359_v0, %v26112_v30  ;;  %19909 = vmatmul.mubr.msk.f32.vlgmr.msra.gmra.mrb[12].mxu1 %vm118_vm1, %v14374_v22  ;;  %v26115_v17 = vld [vmem:[#allocation140_spill] sm:$0xff]  ;;  %v14702_v46 = vld [vmem:[%s25405_s5 + $0x60] sm:$0xff] }
 0x5ae   :  { %14655 = vmatprep.mubr.f32.mxu1 %v25716_v18 }
 0x5af   :  { %v14673_v35 = vpop.permute.xlu0 %14672  ;;  %14520 = vmatprep.subr.mxu0 %v14371_v37  ;;  %14591 = vmatprep.subr.mxu1 %v14373_v2  ;;  %v14671_v44 = vpop.permute.xlu1 %14670  ;;  %v26116_v37 = vld [vmem:[#allocation141_spill] sm:$0xff] }
 0x5b0   :  { %v14692_v25 = vsel %vm4823_vm13, %v14671_v44, %v14673_v35  ;;  %14521 = vmatpush1.msra.mxu0 %v14370_v58  ;;  %14592 = vmatpush1.msra.mxu1 %v14372_v40  ;;  %v26117_v40 = vld [vmem:[#allocation142_spill] sm:$0xff] }
 0x5b1   :  { %v14695_v56 = vmul.f32 %v14692_v25, %v26114_v61  ;;  %19910 = vmatmul.mubr.msk.f32.vlgmr.msra.gmra.mrb[14].mxu0 %vm118_vm1, %v14374_v22  ;;  %19911 = vmatmul.mubr.msk.f32.vlgmr.msra.gmra.mrb[14].mxu1 %vm118_vm1, %v14374_v22 }
 0x5b2   :  { %14770 = vmatprep.mubr.f32.mxu0 %v25716_v18  ;;  %14841 = vmatprep.mubr.f32.mxu1 %v25716_v18 }
 0x5b3   :  { %v14675_v32 = vpop.permute.xlu0 %14674  ;;  %14706 = vmatprep.subr.mxu0 %v14695_v56  ;;  %v14685_v34 = vpop.permute.xlu1 %14684 }
 0x5b4   :  { %v14693_v16 = vsel %vm4823_vm13, %v14685_v34, %v14671_v44  ;;  %v14691_v1 = vsel %vm4823_vm13, %v14673_v35, %v14675_v32 }
 0x5b5   :  { %v14694_v0 = vmul.f32 %v14693_v16, %v26115_v17  ;;  %v14696_v39 = vmul.f32 %v14691_v1, %v26117_v40  ;;  %v26119_v17 = vld [vmem:[#allocation144_spill] sm:$0xff]  ;;  %v26120_v1 = vld [vmem:[#allocation143_spill] sm:$0xff] }
 0x5b6   :  { %v26123_v40 = vld [vmem:[#allocation147_spill] sm:$0xff] }
 0x5b7   :  { %v14679_v22 = vpop.permute.xlu0 %14678  ;;  %14707 = vmatpush1.msra.mxu0 %v14694_v0  ;;  %v14677_v2 = vpop.permute.xlu1 %14676 }
 0x5b8   :  { %v14690_v12 = vsel %vm4823_vm13, %v14675_v32, %v14677_v2  ;;  %19912 = vmatmul.mubr.msk.f32.vlgmr.msra.gmra.mrb[12].mxu0 %vm118_vm1, %v14702_v46  ;;  %v14689_v58 = vsel %vm4823_vm13, %v14677_v2, %v14679_v22  ;;  %v26118_v32 = vld [vmem:[#allocation145_spill] sm:$0xff]  ;;  %v26121_v2 = vld [vmem:[#allocation146_spill] sm:$0xff] }
 0x5b9   :  { %v14697_v30 = vmul.f32 %v14690_v12, %v26116_v37  ;;  %14912 = vmatprep.mubr.f32.mxu0 %v25716_v18  ;;  %v14698_v37 = vmul.f32 %v14689_v58, %v26121_v2 }
 0x5bb   :  { %v14683_v44 = vpop.permute.xlu0 %14682  ;;  %14777 = vmatprep.subr.mxu1 %v14697_v30  ;;  %v14681_v35 = vpop.permute.xlu1 %14680 }
 0x5bc   :  { %v14686_v25 = vsel %vm4823_vm13, %v14683_v44, %v14685_v34  ;;  %v14687_v61 = vsel %vm4823_vm13, %v14681_v35, %v14683_v44  ;;  %v14688_v56 = vsel %vm4823_vm13, %v14679_v22, %v14681_v35  ;;  %14778 = vmatpush1.msra.mxu1 %v14696_v39  ;;  %vm26146_vm13 = vmmov %vm26138_vm9 }
 0x5bd   :  { %v14701_v16 = vmul.f32 %v14686_v25, %v26118_v32  ;;  %v14699_v0 = vmul.f32 %v14688_v56, %v26119_v17  ;;  %v14700_v12 = vmul.f32 %v14687_v61, %v26120_v1  ;;  %19913 = vmatmul.mubr.msk.f32.vlgmr.msra.gmra.mrb[12].mxu1 %vm118_vm1, %v14702_v46  ;;  %v26125_v25 = vld [vmem:[#allocation148_spill] sm:$0xff] }
 0x5be   :  { %14983 = vmatprep.mubr.f32.mxu1 %v25716_v18  ;;  %v15030_v56 = vld [vmem:[%s25405_s5 + $0x70] sm:$0xff] }
 0x5bf   :  { %v15003_v34 = vpop.permute.xlu0 %15002  ;;  %14848 = vmatprep.subr.mxu0 %v14699_v0  ;;  %14919 = vmatprep.subr.mxu1 %v14701_v16  ;;  %v15001_v30 = vpop.permute.xlu1 %15000  ;;  %v26128_v0 = vld [vmem:[#allocation149_spill] sm:$0xff] }
 0x5c0   :  { %v15019_v22 = vsel %vm26122_vm0, %v15001_v30, %v15003_v34  ;;  %14849 = vmatpush1.msra.mxu0 %v14698_v37  ;;  %14920 = vmatpush1.msra.mxu1 %v14700_v12  ;;  %v26129_v12 = vld [vmem:[#allocation150_spill] sm:$0xff]  ;;  %vm26147_vm0 = vmmov %vm26138_vm9 }
 0x5c1   :  { %v15023_v39 = vmul.f32 %v15019_v22, %v26123_v40  ;;  %19914 = vmatmul.mubr.msk.f32.vlgmr.msra.gmra.mrb[14].mxu0 %vm118_vm1, %v14702_v46  ;;  %19915 = vmatmul.mubr.msk.f32.vlgmr.msra.gmra.mrb[14].mxu1 %vm118_vm1, %v14702_v46 }
 0x5c2   :  { %15098 = vmatprep.mubr.f32.mxu0 %v25716_v18  ;;  %15169 = vmatprep.mubr.f32.mxu1 %v25716_v18 }
 0x5c3   :  { %v15005_v58 = vpop.permute.xlu0 %15004  ;;  %15034 = vmatprep.subr.mxu0 %v15023_v39  ;;  %v14999_v44 = vpop.permute.xlu1 %14998 }
 0x5c4   :  { %v15020_v35 = vsel %vm26124_vm2, %v14999_v44, %v15001_v30  ;;  %v15018_v32 = vsel %vm26126_vm3, %v15003_v34, %v15005_v58  ;;  %vm26148_vm2 = vmmov %vm26147_vm0 }
 0x5c5   :  { %v15022_v61 = vmul.f32 %v15020_v35, %v26125_v25  ;;  %v15024_v2 = vmul.f32 %v15018_v32, %v26129_v12  ;;  %v26135_v25 = vld [vmem:[#allocation152_spill] sm:$0xff]  ;;  %v26136_v32 = vld [vmem:[#allocation151_spill] sm:$0xff]  ;;  %vm26149_vm3 = vmmov %vm26147_vm0 }
 0x5c6   :  { %v26139_v12 = vld [vmem:[#allocation155_spill] sm:$0xff] }
 0x5c7   :  { %v15009_v46 = vpop.permute.xlu0 %15008  ;;  %15035 = vmatpush1.msra.mxu0 %v15022_v61  ;;  %v15007_v16 = vpop.permute.xlu1 %15006 }
 0x5c8   :  { %v15017_v17 = vsel %vm26127_vm4, %v15005_v58, %v15007_v16  ;;  %19916 = vmatmul.mubr.msk.f32.vlgmr.msra.gmra.mrb[12].mxu0 %vm118_vm1, %v15030_v56  ;;  %v15016_v37 = vsel %vm26130_vm5, %v15007_v16, %v15009_v46  ;;  %v26134_v58 = vld [vmem:[#allocation153_spill] sm:$0xff]  ;;  %v26137_v16 = vld [vmem:[#allocation154_spill] sm:$0xff] }
 0x5c9   :  { %v15025_v1 = vmul.f32 %v15017_v17, %v26128_v0  ;;  %15240 = vmatprep.mubr.f32.mxu0 %v25716_v18  ;;  %v15026_v0 = vmul.f32 %v15016_v37, %v26137_v16 }
 0x5cb   :  { %v15013_v30 = vpop.permute.xlu0 %15012  ;;  %15105 = vmatprep.subr.mxu1 %v15025_v1  ;;  %v15011_v34 = vpop.permute.xlu1 %15010 }
 0x5cc   :  { %v15021_v22 = vsel %vm26131_vm6, %v15013_v30, %v14999_v44  ;;  %v15014_v40 = vsel %vm26132_vm7, %v15011_v34, %v15013_v30  ;;  %v15015_v39 = vsel %vm26133_vm8, %v15009_v46, %v15011_v34  ;;  %15106 = vmatpush1.msra.mxu1 %v15024_v2 }
 0x5cd   :  { %v15029_v35 = vmul.f32 %v15021_v22, %v26134_v58  ;;  %v15027_v61 = vmul.f32 %v15015_v39, %v26135_v25  ;;  %v15028_v17 = vmul.f32 %v15014_v40, %v26136_v32  ;;  %19917 = vmatmul.mubr.msk.f32.vlgmr.msra.gmra.mrb[12].mxu1 %vm118_vm1, %v15030_v56  ;;  %v26141_v22 = vld [vmem:[#allocation156_spill] sm:$0xff]  ;;  %v15358_v39 = vld [vmem:[%s25405_s5 + $0x78] sm:$0xff] }
 0x5ce   :  { %15311 = vmatprep.mubr.f32.mxu1 %v25716_v18 }
 0x5cf   :  { %v15331_v44 = vpop.permute.xlu0 %15330  ;;  %15176 = vmatprep.subr.mxu0 %v15027_v61  ;;  %15247 = vmatprep.subr.mxu1 %v15029_v35  ;;  %v15329_v1 = vpop.permute.xlu1 %15328  ;;  %v26144_v61 = vld [vmem:[#allocation157_spill] sm:$0xff] }
 0x5d0   :  { %v15347_v46 = vsel %vm26138_vm9, %v15329_v1, %v15331_v44  ;;  %15177 = vmatpush1.msra.mxu0 %v15026_v0  ;;  %15248 = vmatpush1.msra.mxu1 %v15028_v17  ;;  %v26145_v17 = vld [vmem:[#allocation158_spill] sm:$0xff] }
 0x5d1   :  { %v15351_v2 = vmul.f32 %v15347_v46, %v26139_v12  ;;  %19918 = vmatmul.mubr.msk.f32.vlgmr.msra.gmra.mrb[14].mxu0 %vm118_vm1, %v15030_v56  ;;  %19919 = vmatmul.mubr.msk.f32.vlgmr.msra.gmra.mrb[14].mxu1 %vm118_vm1, %v15030_v56 }
 0x5d2   :  { %15426 = vmatprep.mubr.f32.mxu0 %v25716_v18  ;;  %15497 = vmatprep.mubr.f32.mxu1 %v25716_v18 }
 0x5d3   :  { %v15333_v37 = vpop.permute.xlu0 %15332  ;;  %15362 = vmatprep.subr.mxu0 %v15351_v2  ;;  %v15327_v30 = vpop.permute.xlu1 %15326 }
 0x5d4   :  { %v15348_v34 = vsel %vm26140_vm10, %v15327_v30, %v15329_v1  ;;  %v15346_v58 = vsel %vm26142_vm11, %v15331_v44, %v15333_v37 }
 0x5d5   :  { %v15350_v40 = vmul.f32 %v15348_v34, %v26141_v22  ;;  %v15352_v16 = vmul.f32 %v15346_v58, %v26145_v17  ;;  %v26151_v22 = vld [vmem:[#allocation160_spill] sm:$0xff]  ;;  %v26152_v58 = vld [vmem:[#allocation159_spill] sm:$0xff] }
 0x5d6   :  { %v26154_v17 = vld [vmem:[#allocation163_spill] sm:$0xff] }
 0x5d7   :  { %v15337_v56 = vpop.permute.xlu0 %15336  ;;  %15363 = vmatpush1.msra.mxu0 %v15350_v40  ;;  %v15335_v35 = vpop.permute.xlu1 %15334 }
 0x5d8   :  { %v15345_v25 = vsel %vm26143_vm12, %v15333_v37, %v15335_v35  ;;  %19920 = vmatmul.mubr.msk.f32.vlgmr.msra.gmra.mrb[12].mxu0 %vm118_vm1, %v15358_v39  ;;  %v15344_v0 = vsel %vm26146_vm13, %v15335_v35, %v15337_v56  ;;  %v26150_v37 = vld [vmem:[#allocation161_spill] sm:$0xff]  ;;  %v26153_v35 = vld [vmem:[#allocation162_spill] sm:$0xff] }
 0x5d9   :  { %v15353_v32 = vmul.f32 %v15345_v25, %v26144_v61  ;;  %15568 = vmatprep.mubr.f32.mxu0 %v25716_v18  ;;  %v15354_v61 = vmul.f32 %v15344_v0, %v26153_v35 }
 0x5db   :  { %v15341_v1 = vpop.permute.xlu0 %15340  ;;  %15433 = vmatprep.subr.mxu1 %v15353_v32  ;;  %v15339_v44 = vpop.permute.xlu1 %15338 }
 0x5dc   :  { %v15349_v46 = vsel %vm26147_vm0, %v15341_v1, %v15327_v30  ;;  %v15342_v12 = vsel %vm26148_vm2, %v15339_v44, %v15341_v1  ;;  %v15343_v2 = vsel %vm26149_vm3, %v15337_v56, %v15339_v44  ;;  %15434 = vmatpush1.msra.mxu1 %v15352_v16 }
 0x5dd   :  { %v15357_v34 = vmul.f32 %v15349_v46, %v26150_v37  ;;  %v15355_v40 = vmul.f32 %v15343_v2, %v26151_v22  ;;  %v15356_v25 = vmul.f32 %v15342_v12, %v26152_v58  ;;  %19921 = vmatmul.mubr.msk.f32.vlgmr.msra.gmra.mrb[12].mxu1 %vm118_vm1, %v15358_v39  ;;  %v26155_v46 = vld [vmem:[#allocation164_spill] sm:$0xff]  ;;  %v15686_v2 = vld [vmem:[%s25405_s5 + $0x80] sm:$0xff] }
 0x5de   :  { %15639 = vmatprep.mubr.f32.mxu1 %v25716_v18 }
 0x5df   :  { %v15659_v30 = vpop.permute.xlu0 %15658  ;;  %15504 = vmatprep.subr.mxu0 %v15355_v40  ;;  %15575 = vmatprep.subr.mxu1 %v15357_v34  ;;  %v15657_v32 = vpop.permute.xlu1 %15656  ;;  %v26156_v40 = vld [vmem:[#allocation165_spill] sm:$0xff] }
 0x5e0   :  { %v15675_v56 = vsel %vm5945_vm14, %v15657_v32, %v15659_v30  ;;  %15505 = vmatpush1.msra.mxu0 %v15354_v61  ;;  %15576 = vmatpush1.msra.mxu1 %v15356_v25  ;;  %v26157_v25 = vld [vmem:[#allocation166_spill] sm:$0xff] }
 0x5e1   :  { %v15679_v16 = vmul.f32 %v15675_v56, %v26154_v17  ;;  %19922 = vmatmul.mubr.msk.f32.vlgmr.msra.gmra.mrb[14].mxu0 %vm118_vm1, %v15358_v39  ;;  %19923 = vmatmul.mubr.msk.f32.vlgmr.msra.gmra.mrb[14].mxu1 %vm118_vm1, %v15358_v39 }
 0x5e2   :  { %15754 = vmatprep.mubr.f32.mxu0 %v25716_v18  ;;  %15825 = vmatprep.mubr.f32.mxu1 %v25716_v18 }
 0x5e3   :  { %v15661_v0 = vpop.permute.xlu0 %15660  ;;  %15690 = vmatprep.subr.mxu0 %v15679_v16  ;;  %v15655_v1 = vpop.permute.xlu1 %15654 }
 0x5e4   :  { %v15676_v44 = vsel %vm5945_vm14, %v15655_v1, %v15657_v32  ;;  %v15674_v37 = vsel %vm5945_vm14, %v15659_v30, %v15661_v0 }
 0x5e5   :  { %v15678_v12 = vmul.f32 %v15676_v44, %v26155_v46  ;;  %v15680_v35 = vmul.f32 %v15674_v37, %v26157_v25  ;;  %v26159_v46 = vld [vmem:[#allocation168_spill] sm:$0xff]  ;;  %v26160_v37 = vld [vmem:[#allocation167_spill] sm:$0xff] }
 0x5e6   :  { %v26162_v25 = vld [vmem:[#allocation171_spill] sm:$0xff] }
 0x5e7   :  { %v15665_v39 = vpop.permute.xlu0 %15664  ;;  %15691 = vmatpush1.msra.mxu0 %v15678_v12  ;;  %v15663_v34 = vpop.permute.xlu1 %15662 }
 0x5e8   :  { %v15673_v22 = vsel %vm5945_vm14, %v15661_v0, %v15663_v34  ;;  %19924 = vmatmul.mubr.msk.f32.vlgmr.msra.gmra.mrb[12].mxu0 %vm118_vm1, %v15686_v2  ;;  %v15672_v61 = vsel %vm5945_vm14, %v15663_v34, %v15665_v39  ;;  %v26158_v0 = vld [vmem:[#allocation169_spill] sm:$0xff]  ;;  %v26161_v34 = vld [vmem:[#allocation170_spill] sm:$0xff] }
 0x5e9   :  { %v15681_v58 = vmul.f32 %v15673_v22, %v26156_v40  ;;  %15896 = vmatprep.mubr.f32.mxu0 %v25716_v18  ;;  %v15682_v40 = vmul.f32 %v15672_v61, %v26161_v34 }
 0x5eb   :  { %v15669_v32 = vpop.permute.xlu0 %15668  ;;  %15761 = vmatprep.subr.mxu1 %v15681_v58  ;;  %v15667_v30 = vpop.permute.xlu1 %15666 }
 0x5ec   :  { %v15677_v56 = vsel %vm5945_vm14, %v15669_v32, %v15655_v1  ;;  %v15670_v17 = vsel %vm5945_vm14, %v15667_v30, %v15669_v32  ;;  %v15671_v16 = vsel %vm5945_vm14, %v15665_v39, %v15667_v30  ;;  %15762 = vmatpush1.msra.mxu1 %v15680_v35 }
 0x5ed   :  { %v15685_v44 = vmul.f32 %v15677_v56, %v26158_v0  ;;  %v15683_v12 = vmul.f32 %v15671_v16, %v26159_v46  ;;  %v15684_v22 = vmul.f32 %v15670_v17, %v26160_v37  ;;  %19925 = vmatmul.mubr.msk.f32.vlgmr.msra.gmra.mrb[12].mxu1 %vm118_vm1, %v15686_v2  ;;  %v26163_v56 = vld [vmem:[#allocation172_spill] sm:$0xff]  ;;  %v16014_v16 = vld [vmem:[%s25405_s5 + $0x88] sm:$0xff] }
 0x5ee   :  { %15967 = vmatprep.mubr.f32.mxu1 %v25716_v18 }
 0x5ef   :  { %v15987_v1 = vpop.permute.xlu0 %15986  ;;  %15832 = vmatprep.subr.mxu0 %v15683_v12  ;;  %15903 = vmatprep.subr.mxu1 %v15685_v44  ;;  %v15985_v58 = vpop.permute.xlu1 %15984  ;;  %v26164_v12 = vld [vmem:[#allocation173_spill] sm:$0xff] }
 0x5f0   :  { %v16003_v39 = vsel %vm6319_vm15, %v15985_v58, %v15987_v1  ;;  %15833 = vmatpush1.msra.mxu0 %v15682_v40  ;;  %15904 = vmatpush1.msra.mxu1 %v15684_v22  ;;  %v26165_v22 = vld [vmem:[#allocation174_spill] sm:$0xff] }
 0x5f1   :  { %v16007_v35 = vmul.f32 %v16003_v39, %v26162_v25  ;;  %19926 = vmatmul.mubr.msk.f32.vlgmr.msra.gmra.mrb[14].mxu0 %vm118_vm1, %v15686_v2  ;;  %19927 = vmatmul.mubr.msk.f32.vlgmr.msra.gmra.mrb[14].mxu1 %vm118_vm1, %v15686_v2 }
 0x5f2   :  { %16082 = vmatprep.mubr.f32.mxu0 %v25716_v18  ;;  %16153 = vmatprep.mubr.f32.mxu1 %v25716_v18 }
 0x5f3   :  { %v15989_v61 = vpop.permute.xlu0 %15988  ;;  %16018 = vmatprep.subr.mxu0 %v16007_v35  ;;  %v15983_v32 = vpop.permute.xlu1 %15982 }
 0x5f4   :  { %v16004_v30 = vsel %vm6319_vm15, %v15983_v32, %v15985_v58  ;;  %v16002_v0 = vsel %vm6319_vm15, %v15987_v1, %v15989_v61 }
 0x5f5   :  { %v16006_v17 = vmul.f32 %v16004_v30, %v26163_v56  ;;  %v16008_v34 = vmul.f32 %v16002_v0, %v26165_v22  ;;  %v26166_v56 = vld [vmem:[#allocation175_spill] sm:$0xff]  ;;  %v26167_v0 = vld [vmem:[#allocation176_spill] sm:$0xff]  ;;  %v26184_v22 = vld [vmem:[#allocation185_spill] sm:$0xff] }
 0x5f7   :  { %v15993_v2 = vpop.permute.xlu0 %15992  ;;  %16019 = vmatpush1.msra.mxu0 %v16006_v17  ;;  %v15991_v44 = vpop.permute.xlu1 %15990 }
 0x5f8   :  { %v16001_v46 = vsel %vm6319_vm15, %v15989_v61, %v15991_v44  ;;  %19928 = vmatmul.mubr.msk.f32.vlgmr.msra.gmra.mrb[12].mxu0 %vm118_vm1, %v16014_v16  ;;  %v16000_v40 = vsel %vm6319_vm15, %v15991_v44, %v15993_v2 }
 0x5f9   :  { %v16009_v37 = vmul.f32 %v16001_v46, %v26164_v12  ;;  %16224 = vmatprep.mubr.f32.mxu0 %v25716_v18  ;;  %v16010_v44 = vmul.f32 %v16000_v40, %v26167_v0  ;;  %v26182_v46 = vld [vmem:[#allocation184_spill] sm:$0xff]  ;;  %v26183_v12 = vld [vmem:[#allocation11_spill] sm:$0xff] }
 0x5fa   :  { %v17230_v0 = vld [vmem:[%s25405_s5 + $0xa8] sm:$0xff] }
 0x5fb   :  { %v15997_v58 = vpop.permute.xlu0 %15996  ;;  %16089 = vmatprep.subr.mxu1 %v16009_v37  ;;  %v15995_v1 = vpop.permute.xlu1 %15994  ;;  %v17225_v37 = vmul.f32 %v26183_v12, %v26182_v46  ;;  %v26220_v46 = vld [vmem:[#allocation50_spill] sm:$0xff]  ;;  %v26221_v12 = vld [vmem:[#allocation21_spill] sm:$0xff] }
 0x5fc   :  { %v16005_v39 = vsel %vm6319_vm15, %v15997_v58, %v15983_v32  ;;  %v15998_v25 = vsel %vm6319_vm15, %v15995_v1, %v15997_v58  ;;  %v15999_v35 = vsel %vm6319_vm15, %v15993_v2, %v15995_v1  ;;  %16090 = vmatpush1.msra.mxu1 %v16008_v34  ;;  %v16312_v32 = vmul.f32 %v23972_v27, %v23128_v42  ;;  %v26185_v34 = vld [vmem:[#allocation4_spill] sm:$0xff]  ;;  %v26186_v58 = vld [vmem:[#allocation186_spill] sm:$0xff]  ;;  %v26187_v1 = vld [vmem:[#allocation7_spill] sm:$0xff] }
 0x5fd   :  { %v16013_v61 = vmul.f32 %v16005_v39, %v23097_v8  ;;  %v16011_v30 = vmul.f32 %v15999_v35, %v23094_v57  ;;  %v16012_v17 = vmul.f32 %v15998_v25, %v26166_v56  ;;  %19929 = vmatmul.mubr.msk.f32.vlgmr.msra.gmra.mrb[12].mxu1 %vm118_vm1, %v16014_v16  ;;  %v16313_v8 = vmul.f32 %v23986_v60, %v23125_v3  ;;  %v26188_v25 = vld [vmem:[#allocation188_spill] sm:$0xff]  ;;  %v26189_v35 = vld [vmem:[#allocation9_spill] sm:$0xff] }
 0x5fe   :  { %16295 = vmatprep.mubr.f32.mxu1 %v25716_v18  ;;  %v16310_v57 = vmul.f32 %v23945_v59, %v23105_v24  ;;  %v16315_v2 = vmul.f32 %v23994_v28, %v23140_v45  ;;  %v16318_v24 = vld [vmem:[%s25405_s5 + $0x90] sm:$0xff]  ;;  %v16316_v42 = vmul.f32 %v23990_v31, %v23143_v7  ;;  %v16314_v3 = vmul.f32 %v23998_v52, %v23146_v53  ;;  %v26174_v31 = vld [vmem:[#allocation179_spill] sm:$0xff]  ;;  %v26175_v28 = vld [vmem:[#allocation105_spill] sm:$0xff] }
 0x5ff   :  { %16160 = vmatprep.subr.mxu0 %v16011_v30  ;;  %16231 = vmatprep.subr.mxu1 %v16013_v61  ;;  %v16617_v45 = vmul.f32 %v24088_v49, %v23166_v26  ;;  %v16614_v7 = vmul.f32 %v24026_v51, %v23172_v15  ;;  %v16616_v53 = vmul.f32 %v24041_v11, %v23175_v41  ;;  %v16622_v15 = vld [vmem:[%s25405_s5 + $0x98] sm:$0xff]  ;;  %v16926_v51 = vld [vmem:[%s25405_s5 + $0xa0] sm:$0xff]  ;;  %v26190_v30 = vld [vmem:[#allocation187_spill] sm:$0xff] }
 0x600   :  { %16161 = vmatpush1.msra.mxu0 %v16010_v44  ;;  %16232 = vmatpush1.msra.mxu1 %v16012_v17  ;;  %v16621_v26 = vmul.f32 %v24045_v19, %v23190_v6  ;;  %v16620_v41 = vmul.f32 %v24068_v14, %v23202_v10  ;;  %v16618_v49 = vmul.f32 %v24072_v47, %v23205_v63  ;;  %v26168_v10 = vld [vmem:[#allocation177_spill] sm:$0xff]  ;;  %v26169_v63 = vld [vmem:[#allocation108_spill] sm:$0xff]  ;;  %v26177_v19 = vld [vmem:[#allocation114_spill] sm:$0xff] }
 0x601   :  { %19930 = vmatmul.mubr.msk.f32.vlgmr.msra.gmra.mrb[14].mxu0 %vm118_vm1, %v16014_v16  ;;  %19931 = vmatmul.mubr.msk.f32.vlgmr.msra.gmra.mrb[14].mxu1 %vm118_vm1, %v16014_v16  ;;  %v16919_v6 = vmul.f32 %v24125_v38, %v23214_v55  ;;  %v16918_v59 = vmul.f32 %v26169_v63, %v26168_v10  ;;  %v16920_v27 = vmul.f32 %v26171_v54, %v26170_v21  ;;  %v26172_v55 = vld [vmem:[#allocation180_spill] sm:$0xff]  ;;  %v26176_v11 = vld [vmem:[#allocation181_spill] sm:$0xff]  ;;  %v26178_v14 = vld [vmem:[#allocation182_spill] sm:$0xff] }
 0x602   :  { %16322 = vmatprep.subr.mxu0 %v16311_v13  ;;  %16393 = vmatprep.subr.mxu1 %v16313_v8  ;;  %v16923_v60 = vmul.f32 %v26173_v4, %v26172_v55  ;;  %v16925_v52 = vmul.f32 %v26175_v28, %v26174_v31  ;;  %v16924_v43 = vmul.f32 %v26177_v19, %v26176_v11  ;;  %v26179_v47 = vld [vmem:[#allocation3_spill] sm:$0xff]  ;;  %v26191_v56 = vld [vmem:[#allocation5_spill] sm:$0xff]  ;;  %v26193_v13 = vld [vmem:[#allocation8_spill] sm:$0xff] }
 0x603   :  { %16323 = vmatpush1.msra.mxu0 %v16310_v57  ;;  %16394 = vmatpush1.msra.mxu1 %v16312_v32  ;;  %v16922_v9 = vmul.f32 %v26179_v47, %v26178_v14  ;;  %v26180_v38 = vld [vmem:[#allocation183_spill] sm:$0xff]  ;;  %v17222_v40 = vmul.f32 %v26185_v34, %v26184_v22  ;;  %v17224_v39 = vmul.f32 %v26187_v1, %v26186_v58  ;;  %v26192_v44 = vld [vmem:[#allocation189_spill] sm:$0xff]  ;;  %v26194_v57 = vld [vmem:[#allocation190_spill] sm:$0xff] }
 0x604   :  { %16464 = vmatprep.subr.mxu0 %v16315_v2  ;;  %16535 = vmatprep.subr.mxu1 %v16317_v33  ;;  %v17223_v16 = vmul.f32 %v26181_v23, %v26180_v38  ;;  %v17227_v61 = vmul.f32 %v26189_v35, %v26188_v25  ;;  %v17229_v17 = vmul.f32 %v26191_v56, %v26190_v30  ;;  %v26195_v32 = vld [vmem:[#allocation10_spill] sm:$0xff]  ;;  %v26196_v33 = vld [vmem:[#allocation191_spill] sm:$0xff]  ;;  %v26207_v63 = vld [vmem:[#allocation13_spill] sm:$0xff] }
 0x605   :  { %16386 = vmatprep.mubr.f32.mxu0 %v25716_v18  ;;  %16457 = vmatprep.mubr.f32.mxu1 %v25716_v18  ;;  %v17228_v8 = vmul.f32 %v26193_v13, %v26192_v44  ;;  %v17226_v2 = vmul.f32 %v26195_v32, %v26194_v57  ;;  %v26206_v10 = vld [vmem:[#allocation35_spill] sm:$0xff]  ;;  %v17534_v21 = vld [vmem:[%s25405_s5 + $0xb0] sm:$0xff]  ;;  %v26210_v4 = vld [vmem:[#allocation53_spill] sm:$0xff] }
 0x606   :  { %19932 = vmatmul.mubr.msk.f32.vlgmr.msra.gmra.mrb[12].mxu0 %vm118_vm1, %v16318_v24  ;;  %19933 = vmatmul.mubr.msk.f32.vlgmr.msra.gmra.mrb[12].mxu1 %vm118_vm1, %v16318_v24  ;;  %v26208_v54 = vld [vmem:[#allocation44_spill] sm:$0xff]  ;;  %v26212_v28 = vld [vmem:[#allocation39_spill] sm:$0xff]  ;;  %v26214_v11 = vld [vmem:[#allocation45_spill] sm:$0xff] }
 0x607   :  { %16465 = vmatpush1.msra.mxu0 %v16314_v3  ;;  %16536 = vmatpush1.msra.mxu1 %v16316_v42  ;;  %v26198_v3 = vld [vmem:[#allocation36_spill] sm:$0xff]  ;;  %v26216_v14 = vld [vmem:[#allocation51_spill] sm:$0xff]  ;;  %v26218_v38 = vld [vmem:[#allocation41_spill] sm:$0xff] }
 0x608   :  { %16626 = vmatprep.subr.mxu0 %v16615_v29  ;;  %16697 = vmatprep.subr.mxu1 %v16617_v45  ;;  %v26199_v29 = vld [vmem:[#allocation19_spill] sm:$0xff]  ;;  %v26215_v19 = vld [vmem:[#allocation24_spill] sm:$0xff]  ;;  %v26223_v34 = vld [vmem:[#allocation26_spill] sm:$0xff] }
 0x609   :  { %16528 = vmatprep.mubr.f32.mxu0 %v25716_v18  ;;  %16599 = vmatprep.mubr.f32.mxu1 %v25716_v18  ;;  %v17529_v45 = vmul.f32 %v26199_v29, %v26198_v3  ;;  %v26217_v47 = vld [vmem:[#allocation20_spill] sm:$0xff]  ;;  %v26219_v23 = vld [vmem:[#allocation23_spill] sm:$0xff]  ;;  %v17838_v58 = vld [vmem:[%s25405_s5 + $0xb8] sm:$0xff] }
 0x60a   :  { %19934 = vmatmul.mubr.msk.f32.vlgmr.msra.gmra.mrb[14].mxu0 %vm118_vm1, %v16318_v24  ;;  %19935 = vmatmul.mubr.msk.f32.vlgmr.msra.gmra.mrb[14].mxu1 %vm118_vm1, %v16318_v24  ;;  %v26197_v24 = vld [vmem:[#allocation14_spill] sm:$0xff]  ;;  %v26222_v22 = vld [vmem:[#allocation52_spill] sm:$0xff]  ;;  %v26226_v35 = vld [vmem:[#allocation69_spill] sm:$0xff] }
 0x60b   :  { %16627 = vmatpush1.msra.mxu0 %v16614_v7  ;;  %16698 = vmatpush1.msra.mxu1 %v16616_v53  ;;  %v17527_v42 = vmul.f32 %v26197_v24, %v26196_v33  ;;  %v26200_v7 = vld [vmem:[#allocation28_spill] sm:$0xff]  ;;  %v26228_v56 = vld [vmem:[#allocation55_spill] sm:$0xff]  ;;  %v26230_v44 = vld [vmem:[#allocation61_spill] sm:$0xff] }
 0x60c   :  { %16768 = vmatprep.subr.mxu0 %v16619_v62  ;;  %16839 = vmatprep.subr.mxu1 %v16621_v26  ;;  %v26201_v53 = vld [vmem:[#allocation12_spill] sm:$0xff]  ;;  %v26231_v13 = vld [vmem:[#allocation33_spill] sm:$0xff]  ;;  %v26232_v57 = vld [vmem:[#allocation67_spill] sm:$0xff] }
 0x60d   :  { %16690 = vmatprep.mubr.f32.mxu0 %v25716_v18  ;;  %16761 = vmatprep.mubr.f32.mxu1 %v25716_v18  ;;  %v17526_v62 = vmul.f32 %v26201_v53, %v26200_v7  ;;  %v26202_v26 = vld [vmem:[#allocation192_spill] sm:$0xff]  ;;  %v26233_v32 = vld [vmem:[#allocation29_spill] sm:$0xff]  ;;  %v26236_v3 = vld [vmem:[#allocation66_spill] sm:$0xff] }
 0x60e   :  { %19936 = vmatmul.mubr.msk.f32.vlgmr.msra.gmra.mrb[12].mxu0 %vm118_vm1, %v16622_v15  ;;  %19937 = vmatmul.mubr.msk.f32.vlgmr.msra.gmra.mrb[12].mxu1 %vm118_vm1, %v16622_v15  ;;  %v26224_v1 = vld [vmem:[#allocation60_spill] sm:$0xff]  ;;  %v26234_v33 = vld [vmem:[#allocation57_spill] sm:$0xff]  ;;  %v26237_v29 = vld [vmem:[#allocation30_spill] sm:$0xff] }
 0x60f   :  { %16769 = vmatpush1.msra.mxu0 %v16618_v49  ;;  %16840 = vmatpush1.msra.mxu1 %v16620_v41  ;;  %v26204_v49 = vld [vmem:[#allocation37_spill] sm:$0xff]  ;;  %v26235_v24 = vld [vmem:[#allocation32_spill] sm:$0xff]  ;;  %v26239_v53 = vld [vmem:[#allocation38_spill] sm:$0xff] }
 0x610   :  { %16930 = vmatprep.subr.mxu0 %v16919_v6  ;;  %17001 = vmatprep.subr.mxu1 %v16921_v5  ;;  %v26205_v6 = vld [vmem:[#allocation17_spill] sm:$0xff]  ;;  %v26238_v7 = vld [vmem:[#allocation68_spill] sm:$0xff] }
 0x611   :  { %16832 = vmatprep.mubr.f32.mxu0 %v25716_v18  ;;  %16903 = vmatprep.mubr.f32.mxu1 %v25716_v18  ;;  %v17531_v5 = vmul.f32 %v26205_v6, %v26204_v49  ;;  %v26242_v6 = vld [vmem:[#allocation85_spill] sm:$0xff] }
 0x612   :  { %19938 = vmatmul.mubr.msk.f32.vlgmr.msra.gmra.mrb[14].mxu0 %vm118_vm1, %v16622_v15  ;;  %19939 = vmatmul.mubr.msk.f32.vlgmr.msra.gmra.mrb[14].mxu1 %vm118_vm1, %v16622_v15  ;;  %v26203_v15 = vld [vmem:[#allocation15_spill] sm:$0xff] }
 0x613   :  { %16931 = vmatpush1.msra.mxu0 %v16918_v59  ;;  %17002 = vmatpush1.msra.mxu1 %v16920_v27  ;;  %v17528_v41 = vmul.f32 %v26203_v15, %v26202_v26  ;;  %v17533_v59 = vmul.f32 %v26207_v63, %v26206_v10  ;;  %v26209_v27 = vld [vmem:[#allocation16_spill] sm:$0xff]  ;;  %v18142_v26 = vld [vmem:[%s25405_s5 + $0xc0] sm:$0xff]  ;;  %v26244_v63 = vld [vmem:[#allocation71_spill] sm:$0xff] }
 0x614   :  { %17072 = vmatprep.subr.mxu0 %v16923_v60  ;;  %17143 = vmatprep.subr.mxu1 %v16925_v52  ;;  %v17532_v55 = vmul.f32 %v26209_v27, %v26208_v54  ;;  %v26211_v60 = vld [vmem:[#allocation18_spill] sm:$0xff]  ;;  %v26240_v15 = vld [vmem:[#allocation76_spill] sm:$0xff]  ;;  %v26246_v54 = vld [vmem:[#allocation77_spill] sm:$0xff] }
 0x615   :  { %16994 = vmatprep.mubr.f32.mxu0 %v25716_v18  ;;  %17065 = vmatprep.mubr.f32.mxu1 %v25716_v18  ;;  %v17530_v31 = vmul.f32 %v26211_v60, %v26210_v4  ;;  %v26213_v52 = vld [vmem:[#allocation22_spill] sm:$0xff]  ;;  %v26247_v27 = vld [vmem:[#allocation48_spill] sm:$0xff]  ;;  %v26248_v4 = vld [vmem:[#allocation83_spill] sm:$0xff] }
 0x616   :  { %19940 = vmatmul.mubr.msk.f32.vlgmr.msra.gmra.mrb[12].mxu0 %vm118_vm1, %v16926_v51  ;;  %19941 = vmatmul.mubr.msk.f32.vlgmr.msra.gmra.mrb[12].mxu1 %vm118_vm1, %v16926_v51  ;;  %v26249_v60 = vld [vmem:[#allocation42_spill] sm:$0xff] }
 0x617   :  { %17073 = vmatpush1.msra.mxu0 %v16922_v9  ;;  %17144 = vmatpush1.msra.mxu1 %v16924_v43  ;;  %v17833_v43 = vmul.f32 %v26215_v19, %v26214_v11  ;;  %v17830_v9 = vmul.f32 %v26217_v47, %v26216_v14  ;;  %v26252_v11 = vld [vmem:[#allocation82_spill] sm:$0xff]  ;;  %v26253_v19 = vld [vmem:[#allocation43_spill] sm:$0xff]  ;;  %v26254_v14 = vld [vmem:[#allocation84_spill] sm:$0xff] }
 0x618   :  { %17234 = vmatprep.subr.mxu0 %v17223_v16  ;;  %17305 = vmatprep.subr.mxu1 %v17225_v37  ;;  %v17832_v16 = vmul.f32 %v26219_v23, %v26218_v38  ;;  %v17837_v37 = vmul.f32 %v26221_v12, %v26220_v46  ;;  %v26255_v47 = vld [vmem:[#allocation54_spill] sm:$0xff]  ;;  %v18446_v38 = vld [vmem:[%s25405_s5 + $0xc8] sm:$0xff]  ;;  %v26256_v23 = vld [vmem:[#allocation92_spill] sm:$0xff] }
 0x619   :  { %17136 = vmatprep.mubr.f32.mxu0 %v25716_v18  ;;  %17207 = vmatprep.mubr.f32.mxu1 %v25716_v18  ;;  %v26258_v12 = vld [vmem:[#allocation101_spill] sm:$0xff] }
 0x61a   :  { %19942 = vmatmul.mubr.msk.f32.vlgmr.msra.gmra.mrb[14].mxu0 %vm118_vm1, %v16926_v51  ;;  %19943 = vmatmul.mubr.msk.f32.vlgmr.msra.gmra.mrb[14].mxu1 %vm118_vm1, %v16926_v51  ;;  %v17831_v51 = vmul.f32 %v26213_v52, %v26212_v28  ;;  %v26250_v28 = vld [vmem:[#allocation73_spill] sm:$0xff]  ;;  %v26251_v52 = vld [vmem:[#allocation47_spill] sm:$0xff] }
 0x61b   :  { %17235 = vmatpush1.msra.mxu0 %v17222_v40  ;;  %17306 = vmatpush1.msra.mxu1 %v17224_v39  ;;  %v17835_v40 = vmul.f32 %v26223_v34, %v26222_v22  ;;  %v26225_v39 = vld [vmem:[#allocation25_spill] sm:$0xff]  ;;  %v26260_v34 = vld [vmem:[#allocation87_spill] sm:$0xff] }
 0x61c   :  { %17376 = vmatprep.subr.mxu0 %v17227_v61  ;;  %17447 = vmatprep.subr.mxu1 %v17229_v17  ;;  %v17836_v25 = vmul.f32 %v26225_v39, %v26224_v1  ;;  %v26227_v61 = vld [vmem:[#allocation27_spill] sm:$0xff]  ;;  %v26262_v1 = vld [vmem:[#allocation93_spill] sm:$0xff] }
 0x61d   :  { %17298 = vmatprep.mubr.f32.mxu0 %v25716_v18  ;;  %17369 = vmatprep.mubr.f32.mxu1 %v25716_v18  ;;  %v17834_v30 = vmul.f32 %v26227_v61, %v26226_v35  ;;  %v26229_v17 = vld [vmem:[#allocation31_spill] sm:$0xff]  ;;  %v18745_v39 = vmul.f32 %v24605_v48, %v26262_v1  ;;  %v26264_v35 = vld [vmem:[#allocation58_spill] sm:$0xff] }
 0x61e   :  { %19944 = vmatmul.mubr.msk.f32.vlgmr.msra.gmra.mrb[12].mxu0 %vm118_vm1, %v17230_v0  ;;  %19945 = vmatmul.mubr.msk.f32.vlgmr.msra.gmra.mrb[12].mxu1 %vm118_vm1, %v17230_v0  ;;  %v26268_v48 = vld [vmem:[#allocation59_spill] sm:$0xff] }
 0x61f   :  { %17377 = vmatpush1.msra.mxu0 %v17226_v2  ;;  %17448 = vmatpush1.msra.mxu1 %v17228_v8  ;;  %v18137_v8 = vmul.f32 %v26231_v13, %v26230_v44  ;;  %v18134_v2 = vmul.f32 %v26233_v32, %v26232_v57  ;;  %v26269_v13 = vld [vmem:[#allocation100_spill] sm:$0xff]  ;;  %v26270_v32 = vld [vmem:[#allocation193_spill] sm:$0xff] }
 0x620   :  { %17538 = vmatprep.subr.mxu0 %v17527_v42  ;;  %17609 = vmatprep.subr.mxu1 %v17529_v45  ;;  %v18136_v42 = vmul.f32 %v26235_v24, %v26234_v33  ;;  %v18141_v45 = vmul.f32 %v26237_v29, %v26236_v3  ;;  %v18750_v57 = vld [vmem:[%s25405_s5 + $0xd0] sm:$0xff]  ;;  %v26271_v33 = vld [vmem:[#allocation103_spill] sm:$0xff] }
 0x621   :  { %17440 = vmatprep.mubr.f32.mxu0 %v25716_v18  ;;  %17511 = vmatprep.mubr.f32.mxu1 %v25716_v18  ;;  %v18746_v24 = vmul.f32 %v24617_v36, %v26271_v33 }
 0x622   :  { %19946 = vmatmul.mubr.msk.f32.vlgmr.msra.gmra.mrb[14].mxu0 %vm118_vm1, %v17230_v0  ;;  %19947 = vmatmul.mubr.msk.f32.vlgmr.msra.gmra.mrb[14].mxu1 %vm118_vm1, %v17230_v0  ;;  %v18135_v0 = vmul.f32 %v26229_v17, %v26228_v56  ;;  %v26266_v56 = vld [vmem:[#allocation63_spill] sm:$0xff] }
 0x623   :  { %17539 = vmatpush1.msra.mxu0 %v17526_v62  ;;  %17610 = vmatpush1.msra.mxu1 %v17528_v41  ;;  %v18139_v62 = vmul.f32 %v26239_v53, %v26238_v7  ;;  %v26241_v41 = vld [vmem:[#allocation34_spill] sm:$0xff] }
 0x624   :  { %17680 = vmatprep.subr.mxu0 %v17531_v5  ;;  %17751 = vmatprep.subr.mxu1 %v17533_v59  ;;  %v18140_v49 = vmul.f32 %v26241_v41, %v26240_v15  ;;  %v26243_v5 = vld [vmem:[#allocation40_spill] sm:$0xff]  ;;  %v26245_v59 = vld [vmem:[#allocation46_spill] sm:$0xff] }
 0x625   :  { %17602 = vmatprep.mubr.f32.mxu0 %v25716_v18  ;;  %17673 = vmatprep.mubr.f32.mxu1 %v25716_v18  ;;  %v18138_v10 = vmul.f32 %v26243_v5, %v26242_v6 }
 0x626   :  { %19948 = vmatmul.mubr.msk.f32.vlgmr.msra.gmra.mrb[12].mxu0 %vm118_vm1, %v17534_v21  ;;  %19949 = vmatmul.mubr.msk.f32.vlgmr.msra.gmra.mrb[12].mxu1 %vm118_vm1, %v17534_v21 }
 0x627   :  { %17681 = vmatpush1.msra.mxu0 %v17530_v31  ;;  %17752 = vmatpush1.msra.mxu1 %v17532_v55  ;;  %v18441_v55 = vmul.f32 %v26247_v27, %v26246_v54  ;;  %v18438_v31 = vmul.f32 %v26249_v60, %v26248_v4 }
 0x628   :  { %17842 = vmatprep.subr.mxu0 %v17831_v51  ;;  %17913 = vmatprep.subr.mxu1 %v17833_v43  ;;  %v18440_v51 = vmul.f32 %v26251_v52, %v26250_v28  ;;  %v18445_v43 = vmul.f32 %v26253_v19, %v26252_v11 }
 0x629   :  { %17744 = vmatprep.mubr.f32.mxu0 %v25716_v18  ;;  %17815 = vmatprep.mubr.f32.mxu1 %v25716_v18 }
 0x62a   :  { %19950 = vmatmul.mubr.msk.f32.vlgmr.msra.gmra.mrb[14].mxu0 %vm118_vm1, %v17534_v21  ;;  %19951 = vmatmul.mubr.msk.f32.vlgmr.msra.gmra.mrb[14].mxu1 %vm118_vm1, %v17534_v21  ;;  %v18439_v21 = vmul.f32 %v26245_v59, %v26244_v63 }
 0x62b   :  { %17843 = vmatpush1.msra.mxu0 %v17830_v9  ;;  %17914 = vmatpush1.msra.mxu1 %v17832_v16  ;;  %v18443_v9 = vmul.f32 %v26255_v47, %v26254_v14  ;;  %v26257_v16 = vld [vmem:[#allocation49_spill] sm:$0xff]  ;;  %v19646_v14 = vld [vmem:[%s25406_s6] sm:$0xff] }
 0x62c   :  { %17984 = vmatprep.subr.mxu0 %v17835_v40  ;;  %18055 = vmatprep.subr.mxu1 %v17837_v37  ;;  %v18444_v46 = vmul.f32 %v26257_v16, %v26256_v23  ;;  %v26259_v37 = vld [vmem:[#allocation56_spill] sm:$0xff] }
 0x62d   :  { %17906 = vmatprep.mubr.f32.mxu0 %v25716_v18  ;;  %17977 = vmatprep.mubr.f32.mxu1 %v25716_v18  ;;  %v18442_v22 = vmul.f32 %v26259_v37, %v26258_v12  ;;  %v26261_v40 = vld [vmem:[#allocation64_spill] sm:$0xff] }
 0x62e   :  { %19952 = vmatmul.mubr.msk.f32.vlgmr.msra.gmra.mrb[12].mxu0 %vm118_vm1, %v17838_v58  ;;  %19953 = vmatmul.mubr.msk.f32.vlgmr.msra.gmra.mrb[12].mxu1 %vm118_vm1, %v17838_v58 }
 0x62f   :  { %17985 = vmatpush1.msra.mxu0 %v17834_v30  ;;  %18056 = vmatpush1.msra.mxu1 %v17836_v25  ;;  %v26263_v25 = vld [vmem:[#allocation99_spill] sm:$0xff]  ;;  %v26265_v30 = vld [vmem:[#allocation89_spill] sm:$0xff] }
 0x630   :  { %18146 = vmatprep.subr.mxu0 %v18135_v0  ;;  %18217 = vmatprep.subr.mxu1 %v18137_v8  ;;  %v18742_v61 = vmul.f32 %v26264_v35, %v26263_v25  ;;  %v18744_v17 = vmul.f32 %v26266_v56, %v26265_v30  ;;  %v26267_v0 = vld [vmem:[#allocation98_spill] sm:$0xff]  ;;  %v18747_v8 = vmul.f32 %v24613_v20, %v26269_v13  ;;  %v26272_v20 = vmov 1.0|1.0  }
 0x631   :  { %18048 = vmatprep.mubr.f32.mxu0 %v25716_v18  ;;  %18119 = vmatprep.mubr.f32.mxu1 %v25716_v18  ;;  %v18749_v44 = vmul.f32 %v26268_v48, %v26267_v0  ;;  %v19660_v0 = vld [vmem:[%s25407_s7] sm:$0xff] }
 0x632   :  { %19954 = vmatmul.mubr.msk.f32.vlgmr.msra.gmra.mrb[14].mxu0 %vm118_vm1, %v17838_v58  ;;  %19955 = vmatmul.mubr.msk.f32.vlgmr.msra.gmra.mrb[14].mxu1 %vm118_vm1, %v17838_v58  ;;  %v18743_v58 = vmul.f32 %v26261_v40, %v26260_v34 }
 0x633   :  { %18147 = vmatpush1.msra.mxu0 %v18134_v2  ;;  %18218 = vmatpush1.msra.mxu1 %v18136_v42  ;;  %v18748_v2 = vmul.f32 %v24609_v50, %v26270_v32 }
 0x634   :  { %18288 = vmatprep.subr.mxu0 %v18139_v62  ;;  %18359 = vmatprep.subr.mxu1 %v18141_v45 }
 0x635   :  { %18210 = vmatprep.mubr.f32.mxu0 %v25716_v18  ;;  %18281 = vmatprep.mubr.f32.mxu1 %v25716_v18 }
 0x636   :  { %19956 = vmatmul.mubr.msk.f32.vlgmr.msra.gmra.mrb[12].mxu0 %vm118_vm1, %v18142_v26  ;;  %19957 = vmatmul.mubr.msk.f32.vlgmr.msra.gmra.mrb[12].mxu1 %vm118_vm1, %v18142_v26 }
 0x637   :  { %18289 = vmatpush1.msra.mxu0 %v18138_v10  ;;  %18360 = vmatpush1.msra.mxu1 %v18140_v49 }
 0x638   :  { %18450 = vmatprep.subr.mxu0 %v18439_v21  ;;  %18521 = vmatprep.subr.mxu1 %v18441_v55 }
 0x639   :  { %18352 = vmatprep.mubr.f32.mxu0 %v25716_v18  ;;  %18423 = vmatprep.mubr.f32.mxu1 %v25716_v18 }
 0x63a   :  { %19958 = vmatmul.mubr.msk.f32.vlgmr.msra.gmra.mrb[14].mxu0 %vm118_vm1, %v18142_v26  ;;  %19959 = vmatmul.mubr.msk.f32.vlgmr.msra.gmra.mrb[14].mxu1 %vm118_vm1, %v18142_v26 }
 0x63b   :  { %18451 = vmatpush1.msra.mxu0 %v18438_v31  ;;  %18522 = vmatpush1.msra.mxu1 %v18440_v51 }
 0x63c   :  { %18592 = vmatprep.subr.mxu0 %v18443_v9  ;;  %18663 = vmatprep.subr.mxu1 %v18445_v43 }
 0x63d   :  { %18514 = vmatprep.mubr.f32.mxu0 %v25716_v18  ;;  %18585 = vmatprep.mubr.f32.mxu1 %v25716_v18 }
 0x63e   :  { %19960 = vmatmul.mubr.msk.f32.vlgmr.msra.gmra.mrb[12].mxu0 %vm118_vm1, %v18446_v38  ;;  %19961 = vmatmul.mubr.msk.f32.vlgmr.msra.gmra.mrb[12].mxu1 %vm118_vm1, %v18446_v38 }
 0x63f   :  { %18593 = vmatpush1.msra.mxu0 %v18442_v22  ;;  %18664 = vmatpush1.msra.mxu1 %v18444_v46 }
 0x640   :  { %18754 = vmatprep.subr.mxu0 %v18743_v58  ;;  %18825 = vmatprep.subr.mxu1 %v18745_v39 }
 0x641   :  { %18656 = vmatprep.mubr.f32.mxu0 %v25716_v18  ;;  %18727 = vmatprep.mubr.f32.mxu1 %v25716_v18 }
 0x642   :  { %19962 = vmatmul.mubr.msk.f32.vlgmr.msra.gmra.mrb[14].mxu0 %vm118_vm1, %v18446_v38  ;;  %19963 = vmatmul.mubr.msk.f32.vlgmr.msra.gmra.mrb[14].mxu1 %vm118_vm1, %v18446_v38 }
 0x643   :  { %18755 = vmatpush1.msra.mxu0 %v18742_v61  ;;  %18826 = vmatpush1.msra.mxu1 %v18744_v17 }
 0x644   :  { %18896 = vmatprep.subr.mxu0 %v18747_v8  ;;  %18967 = vmatprep.subr.mxu1 %v18749_v44 }
 0x645   :  { %18818 = vmatprep.mubr.f32.mxu0 %v25716_v18  ;;  %18889 = vmatprep.mubr.f32.mxu1 %v25716_v18 }
 0x646   :  { %19964 = vmatmul.mubr.msk.f32.vlgmr.msra.gmra.mrb[12].mxu0 %vm118_vm1, %v18750_v57  ;;  %19965 = vmatmul.mubr.msk.f32.vlgmr.msra.gmra.mrb[12].mxu1 %vm118_vm1, %v18750_v57 }
 0x647   :  { %18897 = vmatpush1.msra.mxu0 %v18746_v24  ;;  %18968 = vmatpush1.msra.mxu1 %v18748_v2 }
 0x648   :  { %18960 = vmatprep.mubr.f32.mxu0 %v25716_v18  ;;  %19031 = vmatprep.mubr.f32.mxu1 %v25716_v18 }
 0x649   :  { %20656 = vmatprep.subr.bf16.mxu0 %v26272_v20  ;;  %20672 = vmatprep.subr.bf16.mxu1 %v26272_v20 }
 0x64a   :  { %19966 = vmatmul.mubr.msk.f32.vlgmr.msra.gmra.mrb[14].mxu0 %vm118_vm1, %v18750_v57  ;;  %19967 = vmatmul.mubr.msk.f32.vlgmr.msra.gmra.mrb[14].mxu1 %vm118_vm1, %v18750_v57 }
 0x64b   :  { %20657 = vmatpush3.bf16.msra.mxu0 %v26272_v20  ;;  %20673 = vmatpush3.bf16.msra.mxu1 %v26272_v20 }
 0x64c   :  { %20658 = vmatprep.subr.bf16.mxu0 %v26272_v20  ;;  %20674 = vmatprep.subr.bf16.mxu1 %v26272_v20 }
 0x64f   :  { %20659 = vmatpush3.bf16.msra.mxu0 %v26272_v20  ;;  %20675 = vmatpush3.bf16.msra.mxu1 %v26272_v20 }
 0x650   :  { %20660 = vmatprep.subr.bf16.mxu0 %v26272_v20  ;;  %20676 = vmatprep.subr.bf16.mxu1 %v26272_v20 }
 0x653   :  { %20661 = vmatpush3.bf16.msra.mxu0 %v26272_v20  ;;  %20677 = vmatpush3.bf16.msra.mxu1 %v26272_v20 }
 0x654   :  { %20662 = vmatprep.subr.bf16.mxu0 %v26272_v20  ;;  %20678 = vmatprep.subr.bf16.mxu1 %v26272_v20 }
 0x657   :  { %20663 = vmatpush3.bf16.msra.mxu0 %v26272_v20  ;;  %20679 = vmatpush3.bf16.msra.mxu1 %v26272_v20 }
 0x658   :  { %20664 = vmatprep.subr.bf16.mxu0 %v26272_v20  ;;  %20680 = vmatprep.subr.bf16.mxu1 %v26272_v20 }
 0x65b   :  { %20665 = vmatpush3.bf16.msra.mxu0 %v26272_v20  ;;  %20681 = vmatpush3.bf16.msra.mxu1 %v26272_v20 }
 0x65c   :  { %20666 = vmatprep.subr.bf16.mxu0 %v26272_v20  ;;  %20682 = vmatprep.subr.bf16.mxu1 %v26272_v20 }
 0x65f   :  { %20667 = vmatpush3.bf16.msra.mxu0 %v26272_v20  ;;  %20683 = vmatpush3.bf16.msra.mxu1 %v26272_v20 }
 0x660   :  { %20668 = vmatprep.subr.bf16.mxu0 %v26272_v20  ;;  %20684 = vmatprep.subr.bf16.mxu1 %v26272_v20 }
 0x663   :  { %20669 = vmatpush3.bf16.msra.mxu0 %v26272_v20  ;;  %20685 = vmatpush3.bf16.msra.mxu1 %v26272_v20 }
 0x664   :  { %20670 = vmatprep.subr.bf16.mxu0 %v26272_v20  ;;  %20686 = vmatprep.subr.bf16.mxu1 %v26272_v20 }
 0x667   :  { %20671 = vmatpush3.bf16.msra.mxu0 %v26272_v20  ;;  %20687 = vmatpush3.bf16.msra.mxu1 %v26272_v20 }
 0x668   :  { %20688 = vmatprep.subr.bf16.mxu0 %v26272_v20  ;;  %20704 = vmatprep.subr.bf16.mxu1 %v26272_v20 }
 0x719   :  { %v25204_v18 = vpop.f32.mrb[12].mxu0  ;;  %v25206_v50 = vpop.f32.mrb[12].mxu1 }
 0x71a   :  { %v25208_v36 = vpop.f32.mrb[13].mxu0  ;;  %v25210_v42 = vpop.f32.mrb[13].mxu1  ;;  %v19326_v26 = vmul.f32 %v25204_v18, %v25204_v18  ;;  %v19328_v15 = vmul.f32 %v25206_v50, %v25206_v50 }
 0x71b   :  { %19110 = vmatprep.mubr.f32.mxu0 %v25208_v36  ;;  %19180 = vmatprep.mubr.f32.mxu1 %v25210_v42  ;;  %v19327_v53 = vmul.f32 %v25208_v36, %v25208_v36  ;;  %v19329_v62 = vmul.f32 %v25210_v42, %v25210_v42 }
 0x71c   :  { %19111 = vmatmul.mubr.f32.vlgmr.msra.gmra.mrb[16].mxu0 %v25204_v18  ;;  %19181 = vmatmul.mubr.f32.vlgmr.msra.gmra.mrb[16].mxu1 %v25206_v50 }
 0x71d   :  { %20689 = vmatpush3.bf16.msra.mxu0 %v26272_v20  ;;  %20705 = vmatpush3.bf16.msra.mxu1 %v26272_v20  ;;  %v25218_v3 = vpop.f32.mrb[14].mxu0  ;;  %v25220_v29 = vpop.f32.mrb[14].mxu1 }
 0x71e   :  { %v25222_v45 = vpop.f32.mrb[15].mxu0  ;;  %v25224_v7 = vpop.f32.mrb[15].mxu1  ;;  %20690 = vmatprep.subr.bf16.mxu0 %v26272_v20  ;;  %20706 = vmatprep.subr.bf16.mxu1 %v26272_v20  ;;  %v19330_v6 = vmul.f32 %v25218_v3, %v25218_v3  ;;  %v19332_v5 = vmul.f32 %v25220_v29, %v25220_v29 }
 0x71f   :  { %19250 = vmatprep.mubr.f32.mxu0 %v25222_v45  ;;  %19320 = vmatprep.mubr.f32.mxu1 %v25224_v7  ;;  %v19331_v41 = vmul.f32 %v25222_v45, %v25222_v45  ;;  %v19333_v49 = vmul.f32 %v25224_v7, %v25224_v7 }
 0x721   :  { %20691 = vmatpush3.bf16.msra.mxu0 %v26272_v20  ;;  %20707 = vmatpush3.bf16.msra.mxu1 %v26272_v20 }
 0x722   :  { %20692 = vmatprep.subr.bf16.mxu0 %v26272_v20  ;;  %20708 = vmatprep.subr.bf16.mxu1 %v26272_v20 }
 0x725   :  { %20693 = vmatpush3.bf16.msra.mxu0 %v26272_v20  ;;  %20709 = vmatpush3.bf16.msra.mxu1 %v26272_v20 }
 0x726   :  { %20694 = vmatprep.subr.bf16.mxu0 %v26272_v20  ;;  %20710 = vmatprep.subr.bf16.mxu1 %v26272_v20 }
 0x729   :  { %20695 = vmatpush3.bf16.msra.mxu0 %v26272_v20  ;;  %20711 = vmatpush3.bf16.msra.mxu1 %v26272_v20 }
 0x72a   :  { %20696 = vmatprep.subr.bf16.mxu0 %v26272_v20  ;;  %20712 = vmatprep.subr.bf16.mxu1 %v26272_v20 }
 0x72d   :  { %20697 = vmatpush3.bf16.msra.mxu0 %v26272_v20  ;;  %20713 = vmatpush3.bf16.msra.mxu1 %v26272_v20 }
 0x72e   :  { %20698 = vmatprep.subr.bf16.mxu0 %v26272_v20  ;;  %20714 = vmatprep.subr.bf16.mxu1 %v26272_v20 }
 0x731   :  { %20699 = vmatpush3.bf16.msra.mxu0 %v26272_v20  ;;  %20715 = vmatpush3.bf16.msra.mxu1 %v26272_v20 }
 0x732   :  { %20700 = vmatprep.subr.bf16.mxu0 %v26272_v20  ;;  %20716 = vmatprep.subr.bf16.mxu1 %v26272_v20 }
 0x735   :  { %20701 = vmatpush3.bf16.msra.mxu0 %v26272_v20  ;;  %20717 = vmatpush3.bf16.msra.mxu1 %v26272_v20 }
 0x736   :  { %20702 = vmatprep.subr.bf16.mxu0 %v26272_v20  ;;  %20718 = vmatprep.subr.bf16.mxu1 %v26272_v20 }
 0x739   :  { %20703 = vmatpush3.bf16.msra.mxu0 %v26272_v20  ;;  %20719 = vmatpush3.bf16.msra.mxu1 %v26272_v20 }
 0x73a   :  { %20720 = vmatprep.subr.bf16.mxu0 %v26272_v20  ;;  %20736 = vmatprep.subr.bf16.mxu1 %v26272_v20 }
 0x73c   :  { %19251 = vmatmul.mubr.f32.vlgmr.msra.gmra.mrb[18].mxu0 %v25218_v3  ;;  %19321 = vmatmul.mubr.f32.vlgmr.msra.gmra.mrb[18].mxu1 %v25220_v29 }
 0x73d   :  { %20721 = vmatpush3.bf16.msra.mxu0 %v26272_v20  ;;  %19398 = vmatprep.mubr.f32.mxu0 %v19327_v53 }
 0x73e   :  { %20737 = vmatpush3.bf16.msra.mxu1 %v26272_v20  ;;  %19468 = vmatprep.mubr.f32.mxu1 %v19329_v62 }
 0x73f   :  { %20722 = vmatprep.subr.bf16.mxu0 %v26272_v20  ;;  %20738 = vmatprep.subr.bf16.mxu1 %v26272_v20 }
 0x741   :  { %20723 = vmatpush3.bf16.msra.mxu0 %v26272_v20 }
 0x742   :  { %20739 = vmatpush3.bf16.msra.mxu1 %v26272_v20  ;;  %20724 = vmatprep.subr.bf16.mxu0 %v26272_v20 }
 0x743   :  { %20740 = vmatprep.subr.bf16.mxu1 %v26272_v20 }
 0x745   :  { %20725 = vmatpush3.bf16.msra.mxu0 %v26272_v20 }
 0x746   :  { %20741 = vmatpush3.bf16.msra.mxu1 %v26272_v20  ;;  %20726 = vmatprep.subr.bf16.mxu0 %v26272_v20 }
 0x747   :  { %20742 = vmatprep.subr.bf16.mxu1 %v26272_v20 }
 0x749   :  { %20727 = vmatpush3.bf16.msra.mxu0 %v26272_v20 }
 0x74a   :  { %20743 = vmatpush3.bf16.msra.mxu1 %v26272_v20  ;;  %20728 = vmatprep.subr.bf16.mxu0 %v26272_v20 }
 0x74b   :  { %20744 = vmatprep.subr.bf16.mxu1 %v26272_v20 }
 0x74d   :  { %20729 = vmatpush3.bf16.msra.mxu0 %v26272_v20 }
 0x74e   :  { %20745 = vmatpush3.bf16.msra.mxu1 %v26272_v20  ;;  %20730 = vmatprep.subr.bf16.mxu0 %v26272_v20 }
 0x74f   :  { %20746 = vmatprep.subr.bf16.mxu1 %v26272_v20 }
 0x751   :  { %20731 = vmatpush3.bf16.msra.mxu0 %v26272_v20 }
 0x752   :  { %20747 = vmatpush3.bf16.msra.mxu1 %v26272_v20  ;;  %20732 = vmatprep.subr.bf16.mxu0 %v26272_v20 }
 0x753   :  { %20748 = vmatprep.subr.bf16.mxu1 %v26272_v20 }
 0x755   :  { %20733 = vmatpush3.bf16.msra.mxu0 %v26272_v20 }
 0x756   :  { %20749 = vmatpush3.bf16.msra.mxu1 %v26272_v20  ;;  %20734 = vmatprep.subr.bf16.mxu0 %v26272_v20 }
 0x757   :  { %20750 = vmatprep.subr.bf16.mxu1 %v26272_v20 }
 0x759   :  { %20735 = vmatpush3.bf16.msra.mxu0 %v26272_v20 }
 0x75a   :  { %20751 = vmatpush3.bf16.msra.mxu1 %v26272_v20  ;;  %20752 = vmatprep.subr.bf16.mxu0 %v26272_v20 }
 0x75b   :  { %20768 = vmatprep.subr.bf16.mxu1 %v26272_v20 }
 0x75c   :  { %19399 = vmatmul.mubr.f32.vlgmr.msra.gmra.mrb[20].mxu0 %v19326_v26 }
 0x75d   :  { %19469 = vmatmul.mubr.f32.vlgmr.msra.gmra.mrb[20].mxu1 %v19328_v15  ;;  %20753 = vmatpush3.bf16.msra.mxu0 %v26272_v20 }
 0x75e   :  { %19538 = vmatprep.mubr.f32.mxu0 %v19331_v41  ;;  %20769 = vmatpush3.bf16.msra.mxu1 %v26272_v20 }
 0x75f   :  { %19608 = vmatprep.mubr.f32.mxu1 %v19333_v49  ;;  %20754 = vmatprep.subr.bf16.mxu0 %v26272_v20 }
 0x760   :  { %20770 = vmatprep.subr.bf16.mxu1 %v26272_v20 }
 0x761   :  { %20755 = vmatpush3.bf16.msra.mxu0 %v26272_v20 }
 0x762   :  { %20771 = vmatpush3.bf16.msra.mxu1 %v26272_v20  ;;  %20756 = vmatprep.subr.bf16.mxu0 %v26272_v20 }
 0x763   :  { %20772 = vmatprep.subr.bf16.mxu1 %v26272_v20 }
 0x765   :  { %20757 = vmatpush3.bf16.msra.mxu0 %v26272_v20 }
 0x766   :  { %20773 = vmatpush3.bf16.msra.mxu1 %v26272_v20  ;;  %20758 = vmatprep.subr.bf16.mxu0 %v26272_v20 }
 0x767   :  { %20774 = vmatprep.subr.bf16.mxu1 %v26272_v20 }
 0x769   :  { %20759 = vmatpush3.bf16.msra.mxu0 %v26272_v20 }
 0x76a   :  { %20775 = vmatpush3.bf16.msra.mxu1 %v26272_v20  ;;  %20760 = vmatprep.subr.bf16.mxu0 %v26272_v20 }
 0x76b   :  { %20776 = vmatprep.subr.bf16.mxu1 %v26272_v20 }
 0x76d   :  { %20761 = vmatpush3.bf16.msra.mxu0 %v26272_v20 }
 0x76e   :  { %20777 = vmatpush3.bf16.msra.mxu1 %v26272_v20  ;;  %20762 = vmatprep.subr.bf16.mxu0 %v26272_v20 }
 0x76f   :  { %20778 = vmatprep.subr.bf16.mxu1 %v26272_v20 }
 0x771   :  { %20763 = vmatpush3.bf16.msra.mxu0 %v26272_v20 }
 0x772   :  { %20779 = vmatpush3.bf16.msra.mxu1 %v26272_v20  ;;  %20764 = vmatprep.subr.bf16.mxu0 %v26272_v20 }
 0x773   :  { %20780 = vmatprep.subr.bf16.mxu1 %v26272_v20 }
 0x775   :  { %20765 = vmatpush3.bf16.msra.mxu0 %v26272_v20 }
 0x776   :  { %20781 = vmatpush3.bf16.msra.mxu1 %v26272_v20  ;;  %20766 = vmatprep.subr.bf16.mxu0 %v26272_v20 }
 0x777   :  { %20782 = vmatprep.subr.bf16.mxu1 %v26272_v20 }
 0x779   :  { %20767 = vmatpush3.bf16.msra.mxu0 %v26272_v20 }
 0x77a   :  { %20783 = vmatpush3.bf16.msra.mxu1 %v26272_v20 }
 0x77c   :  { %19539 = vmatmul.mubr.f32.vlgmr.msra.gmra.mrb[22].mxu0 %v19330_v6 }
 0x77d   :  { %19609 = vmatmul.mubr.f32.vlgmr.msra.gmra.mrb[22].mxu1 %v19332_v5 }
 0x7ef   :  { %v20280_v10 = vpop.f32.mrb[16].mxu0  ;;  %v20315_v63 = vpop.f32.mrb[16].mxu1 }
 0x7f0   :  { %v20281_v59 = vpop.f32.mrb[17].mxu0  ;;  %v20316_v21 = vpop.f32.mrb[17].mxu1 }
 0x7f1   :  { %v20282_v54 = vadd.f32 %v20281_v59, %v20280_v10  ;;  %v20317_v27 = vadd.f32 %v20316_v21, %v20315_v63 }
 0x7f3   :  { %v19183_v55 = vadd.f32 %v20317_v27, %v20282_v54 }
 0x80f   :  { %v20350_v4 = vpop.f32.mrb[18].mxu0  ;;  %v20385_v60 = vpop.f32.mrb[18].mxu1 }
 0x810   :  { %v20351_v31 = vpop.f32.mrb[19].mxu0  ;;  %v20386_v28 = vpop.f32.mrb[19].mxu1 }
 0x811   :  { %v20352_v52 = vadd.f32 %v20351_v31, %v20350_v4  ;;  %v20387_v51 = vadd.f32 %v20386_v28, %v20385_v60 }
 0x813   :  { %v19253_v11 = vadd.f32 %v20352_v52, %v19183_v55 }
 0x815   :  { %v19323_v19 = vadd.f32 %v20387_v51, %v19253_v11 }
 0x817   :  { %v19614_v43 = vmul.f32 0.0009765625, %v19323_v19 }
 0x819   :  { %19620 = vperm.xlu1 %21220, %v19614_v43   ;;  %v19616_v35 = vmul.f32 %v19614_v43, %v19614_v43 }
 0x81d   :  { %19649 = vperm.xlu1 %21220, %v19646_v14  }
 0x82f   :  { %v20420_v47 = vpop.f32.mrb[20].mxu0 }
 0x830   :  { %v20455_v9 = vpop.f32.mrb[20].mxu1  ;;  %v20421_v38 = vpop.f32.mrb[21].mxu0 }
 0x831   :  { %v20422_v23 = vadd.f32 %v20421_v38, %v20420_v47  ;;  %v20456_v16 = vpop.f32.mrb[21].mxu1 }
 0x832   :  { %v20457_v46 = vadd.f32 %v20456_v16, %v20455_v9  ;;  %v21234_v9 = vld [vmem:[%s25400_s0] sm:$0xff] }
 0x834   :  { %v19471_v12 = vadd.f32 %v20457_v46, %v20422_v23  ;;  %v21235_v23 = vld [vmem:[%s25400_s0 + $0x8] sm:$0xff]  ;;  %v21236_v46 = vld [vmem:[%s25400_s0 + $0x10] sm:$0xff] }
 0x84f   :  { %v20490_v37 = vpop.f32.mrb[22].mxu0 }
 0x850   :  { %v20525_v22 = vpop.f32.mrb[22].mxu1  ;;  %v20491_v34 = vpop.f32.mrb[23].mxu0 }
 0x851   :  { %v20492_v40 = vadd.f32 %v20491_v34, %v20490_v37  ;;  %v20526_v58 = vpop.f32.mrb[23].mxu1  ;;  %v21237_v37 = vld [vmem:[%s25400_s0 + $0x18] sm:$0xff]  ;;  %v21238_v34 = vld [vmem:[%s25400_s0 + $0x20] sm:$0xff] }
 0x852   :  { %v20527_v1 = vadd.f32 %v20526_v58, %v20525_v22  ;;  %v21239_v58 = vld [vmem:[%s25400_s0 + $0x28] sm:$0xff] }
 0x853   :  { %v19541_v39 = vadd.f32 %v20492_v40, %v19471_v12 }
 0x855   :  { %v19611_v25 = vadd.f32 %v20527_v1, %v19541_v39  ;;  %v21240_v39 = vld [vmem:[%s25400_s0 + $0x30] sm:$0xff] }
 0x857   :  { %v19615_v61 = vmul.f32 0.0009765625, %v19611_v25 }
 0x859   :  { %v19617_v30 = vsub.f32 %v19615_v61, %v19616_v35  ;;  %v21241_v35 = vld [vmem:[%s25400_s0 + $0x38] sm:$0xff] }
 0x85b   :  { %v19631_v56 = vadd.f32 1e-05, %v19617_v30 }
 0x85d   :  { %21224 = vrsqrt.f32 %v19631_v56 }
 0x867   :  { %v21225_v17 = vpop.eup %21224 }
 0x868   :  { %19635 = vperm.xlu0 %21221, %v21225_v17  }
 0x86c   :  { %19663 = vperm.xlu0 %21221, %v19660_v0  }
 0x898   :  { %v19621_v48 = vpop.permute.xlu1 %19620 }
 0x899   :  { %v19623_v44 = vsub.f32 %v25204_v18, %v19621_v48  ;;  %v19624_v13 = vsub.f32 %v25208_v36, %v19621_v48  ;;  %v19625_v8 = vsub.f32 %v25206_v50, %v19621_v48  ;;  %v19626_v57 = vsub.f32 %v25210_v42, %v19621_v48 }
 0x89a   :  { %v19627_v32 = vsub.f32 %v25218_v3, %v19621_v48  ;;  %v19628_v2 = vsub.f32 %v25222_v45, %v19621_v48  ;;  %v19629_v33 = vsub.f32 %v25220_v29, %v19621_v48  ;;  %v19630_v24 = vsub.f32 %v25224_v7, %v19621_v48 }
 0x89c   :  { %v19650_v18 = vpop.permute.xlu1 %19649 }
 0x8e7   :  { %v19636_v20 = vpop.permute.xlu0 %19635 }
 0x8e8   :  { %v19638_v53 = vmul.f32 %v19636_v20, %v19623_v44  ;;  %v19639_v62 = vmul.f32 %v19636_v20, %v19624_v13  ;;  %v19640_v26 = vmul.f32 %v19636_v20, %v19625_v8  ;;  %v19641_v15 = vmul.f32 %v19636_v20, %v19626_v57 }
 0x8e9   :  { %v19642_v41 = vmul.f32 %v19636_v20, %v19627_v32  ;;  %v19643_v36 = vmul.f32 %v19636_v20, %v19628_v2  ;;  %v19644_v49 = vmul.f32 %v19636_v20, %v19629_v33  ;;  %v19645_v50 = vmul.f32 %v19636_v20, %v19630_v24 }
 0x8ea   :  { %v19652_v6 = vmul.f32 %v19650_v18, %v19638_v53  ;;  %v19653_v42 = vmul.f32 %v19650_v18, %v19639_v62  ;;  %v19654_v5 = vmul.f32 %v19650_v18, %v19640_v26  ;;  %v19655_v3 = vmul.f32 %v19650_v18, %v19641_v15 }
 0x8eb   :  { %v19656_v10 = vmul.f32 %v19650_v18, %v19642_v41  ;;  %v19657_v45 = vmul.f32 %v19650_v18, %v19643_v36  ;;  %v19658_v63 = vmul.f32 %v19650_v18, %v19644_v49  ;;  %v19659_v29 = vmul.f32 %v19650_v18, %v19645_v50  ;;  %v19664_v59 = vpop.permute.xlu0 %19663 }
 0x8ec   :  { %v19666_v7 = vadd.f32 %v19664_v59, %v19652_v6  ;;  %v19667_v21 = vadd.f32 %v19664_v59, %v19653_v42  ;;  %v19668_v54 = vadd.f32 %v19664_v59, %v19654_v5  ;;  %v19669_v27 = vadd.f32 %v19664_v59, %v19655_v3 }
 0x8ed   :  { %v19670_v55 = vadd.f32 %v19664_v59, %v19656_v10  ;;  %v19671_v4 = vadd.f32 %v19664_v59, %v19657_v45  ;;  %v19672_v60 = vadd.f32 %v19664_v59, %v19658_v63  ;;  %v19673_v31 = vadd.f32 %v19664_v59, %v19659_v29 }
 0x8ee   :  { %v19674_v28 = vmax.f32 %v19666_v7, 0.0  ;;  %v19675_v52 = vmax.f32 %v19667_v21, 0.0  ;;  %v19676_v51 = vmax.f32 %v19668_v54, 0.0  ;;  %v19677_v11 = vmax.f32 %v19669_v27, 0.0 }
 0x8ef   :  { %v19678_v19 = vmax.f32 %v19670_v55, 0.0  ;;  %v19679_v43 = vmax.f32 %v19671_v4, 0.0  ;;  %v19680_v14 = vmax.f32 %v19672_v60, 0.0  ;;  %v19681_v47 = vmax.f32 %v19673_v31, 0.0 }
 0x8f0   :  { %v19682_v38 = vadd.f32 %v21234_v9, %v19674_v28  ;;  %v19683_v16 = vadd.f32 %v21235_v23, %v19675_v52  ;;  %v19684_v12 = vadd.f32 %v21236_v46, %v19676_v51  ;;  %v19685_v22 = vadd.f32 %v21237_v37, %v19677_v11 }
 0x8f1   :  { %v19686_v40 = vadd.f32 %v21238_v34, %v19678_v19  ;;  %v19687_v1 = vadd.f32 %v21239_v58, %v19679_v43  ;;  %v19688_v25 = vadd.f32 %v21240_v39, %v19680_v14  ;;  %v19689_v61 = vadd.f32 %v21241_v35, %v19681_v47 }
 0x8f2   :  { %19690 = vst [vmem:[%s25408_s8] sm:$0xff] %v19682_v38  ;;  %19691 = vst [vmem:[%s25408_s8 + $0x8] sm:$0xff] %v19683_v16 }
 0x8f3   :  { %19692 = vst [vmem:[%s25408_s8 + $0x10] sm:$0xff] %v19684_v12  ;;  %19693 = vst [vmem:[%s25408_s8 + $0x18] sm:$0xff] %v19685_v22 }
 0x8f4   :  { %19694 = vst [vmem:[%s25408_s8 + $0x20] sm:$0xff] %v19686_v40  ;;  %19695 = vst [vmem:[%s25408_s8 + $0x28] sm:$0xff] %v19687_v1 }
 0x8f5   :  { %19696 = vst [vmem:[%s25408_s8 + $0x30] sm:$0xff] %v19688_v25  ;;  %19697 = vst [vmem:[%s25408_s8 + $0x38] sm:$0xff] %v19689_v61 }

</bundles_post_ra>
